<compile_context>
chip_gen: v6e
topology: v6e:2x2x1
jax: 0.10.0
libtpu: 0.0.40
codegen_flags: <defaults>
</compile_context>

<pallas_src>
import functools
import math

import jax
import jax.numpy as jnp
from jax import lax
from jax.experimental import pallas as pl
from jax.experimental.pallas import tpu as pltpu

_BN_EPS = 1e-5


# ---------------------------------------------------------------------------
# Kernel bodies
# ---------------------------------------------------------------------------
def _accum_conv(x_ref, w_ref, k, stride, Ho, Wo, acc):
    """Accumulate a KxK conv (padding already applied) into acc (Ho*Wo, Cout).

    x_ref: stride==1 -> (1, Hp, Wp, Cin) block
           stride==2 -> (1, Hp//2, 2, Wp//2, 2, Cin) parity-reshaped block
    w_ref: (k*k, Cin, Cout)
    """
    for kh in range(k):
        for kw in range(k):
            if stride == 1:
                patch = x_ref[0, kh:kh + Ho, kw:kw + Wo, :]
            else:  # stride == 2: tap (kh, kw) lives on parity plane (rh, rw)
                qh, rh = kh // 2, kh % 2
                qw, rw = kw // 2, kw % 2
                patch = x_ref[0, qh:qh + Ho, rh, qw:qw + Wo, rw, :]
            cin = patch.shape[-1]
            acc = acc + jnp.dot(patch.reshape(Ho * Wo, cin),
                                w_ref[kh * k + kw],
                                preferred_element_type=jnp.float32)
    return acc


def _conv_bn_relu_kernel(x_ref, w_ref, s_ref, b_ref, o_ref, *,
                         k, stride, Ho, Wo, off):
    """Generic fused conv + folded-BN + ReLU; writes zero borders (fused pad)."""
    cout = o_ref.shape[-1]
    acc = jnp.zeros((Ho * Wo, cout), jnp.float32)
    acc = _accum_conv(x_ref, w_ref, k, stride, Ho, Wo, acc)
    y = jnp.maximum(acc * s_ref[...] + b_ref[...], 0.0).astype(o_ref.dtype)
    ot, ol = off
    if tuple(o_ref.shape) != (1, Ho, Wo, cout):
        o_ref[...] = jnp.zeros(o_ref.shape, o_ref.dtype)  # fused F.pad borders
    o_ref[0, ot:ot + Ho, ol:ol + Wo, :] = y.reshape(Ho, Wo, cout)


def _stem2a_pool_kernel(x_ref, w_ref, s_ref, b_ref, x2a_ref, x1_ref, *, Ho, Wo):
    """stem2a (2x2 s1 conv+BN+ReLU, right/bottom zero pad) fused with the
    2x2 s1 maxpool (all-around zero pad for stem3), sharing one input tile."""
    cout = x2a_ref.shape[-1]
    acc = jnp.zeros((Ho * Wo, cout), jnp.float32)
    acc = _accum_conv(x_ref, w_ref, 2, 1, Ho, Wo, acc)
    y = jnp.maximum(acc * s_ref[...] + b_ref[...], 0.0).astype(x2a_ref.dtype)
    x2a_ref[...] = jnp.zeros(x2a_ref.shape, x2a_ref.dtype)
    x2a_ref[0, :Ho, :Wo, :] = y.reshape(Ho, Wo, cout)

    m = jnp.maximum(
        jnp.maximum(x_ref[0, :Ho, :Wo, :], x_ref[0, 1:Ho + 1, :Wo, :]),
        jnp.maximum(x_ref[0, :Ho, 1:Wo + 1, :], x_ref[0, 1:Ho + 1, 1:Wo + 1, :]))
    x1_ref[...] = jnp.zeros(x1_ref.shape, x1_ref.dtype)
    x1_ref[0, 1:Ho + 1, 1:Wo + 1, :] = m.astype(x1_ref.dtype)


def _stem34_kernel(x1_ref, x2_ref, w3a_ref, w3b_ref, s3_ref, b3_ref,
                   w4_ref, s4_ref, b4_ref, o_ref, *, Ho, Wo):
    """stem3 (3x3 s2 conv on cat[x1,x2] via split weights) + BN + ReLU,
    fused with stem4 (1x1 conv) + BN + ReLU."""
    cm = w3a_ref.shape[-1]
    acc = jnp.zeros((Ho * Wo, cm), jnp.float32)
    acc = _accum_conv(x1_ref, w3a_ref, 3, 2, Ho, Wo, acc)   # concat fused:
    acc = _accum_conv(x2_ref, w3b_ref, 3, 2, Ho, Wo, acc)   # sum of split convs
    h = jnp.maximum(acc * s3_ref[...] + b3_ref[...], 0.0)
    out = jnp.dot(h, w4_ref[...], preferred_element_type=jnp.float32)
    out = jnp.maximum(out * s4_ref[...] + b4_ref[...], 0.0)
    c2 = o_ref.shape[-1]
    o_ref[0] = out.reshape(Ho, Wo, c2).astype(o_ref.dtype)


# ---------------------------------------------------------------------------
# BlockSpec / cost helpers
# ---------------------------------------------------------------------------
def _batched_spec(shape):
    nd = len(shape)

    def imap(n):
        return (n,) + (0,) * (nd - 1)

    return pl.BlockSpec((1,) + tuple(shape[1:]), imap)


def _const_spec(shape):
    nd = len(shape)

    def imap(n):
        return (0,) * nd

    return pl.BlockSpec(tuple(shape), imap)


def _cost(flops, in_arrays, out_shapes, dtype_bytes=4):
    nbytes = sum(int(math.prod(a.shape)) * a.dtype.itemsize for a in in_arrays)
    nbytes += sum(int(math.prod(s)) * dtype_bytes for s in out_shapes)
    return pl.CostEstimate(flops=int(flops), transcendentals=0,
                           bytes_accessed=int(nbytes))


_CPARAMS = pltpu.CompilerParams(dimension_semantics=("parallel",))


# ---------------------------------------------------------------------------
# Parameter construction / folding
# ---------------------------------------------------------------------------
def init_params(key, c1, cm, c2):
    keys = jax.random.split(key, 5)

    def layer(k, cin, cout, ksize):
        kw, kg, kb, km, kv = jax.random.split(k, 5)
        fan_in = cin * ksize * ksize
        return dict(
            w=jax.random.normal(kw, (cout, cin, ksize, ksize), jnp.float32)
              / (fan_in ** 0.5),
            gamma=1.0 + 0.1 * jax.random.normal(kg, (cout,), jnp.float32),
            beta=0.1 * jax.random.normal(kb, (cout,), jnp.float32),
            mean=0.1 * jax.random.normal(km, (cout,), jnp.float32),
            var=jax.random.uniform(kv, (cout,), jnp.float32, 0.5, 1.5),
        )

    return dict(
        stem1=layer(keys[0], c1, cm, 3),
        stem2a=layer(keys[1], cm, cm // 2, 2),
        stem2b=layer(keys[2], cm // 2, cm, 2),
        stem3=layer(keys[3], 2 * cm, cm, 3),
        stem4=layer(keys[4], cm, c2, 1),
    )


def _fold(layer):
    """Fold eval-mode BN into (scale, bias); weights -> (k*k, Cin, Cout)."""
    w = layer["w"]                                   # (Cout, Cin, k, k)
    co, ci, k, _ = w.shape
    wk = jnp.transpose(w, (2, 3, 1, 0)).reshape(k * k, ci, co)
    inv = 1.0 / jnp.sqrt(layer["var"] + _BN_EPS)
    scale = (layer["gamma"] * inv).reshape(1, co)
    bias = (layer["beta"] - layer["mean"] * layer["gamma"] * inv).reshape(1, co)
    return wk, scale, bias


# ---------------------------------------------------------------------------
# Pallas forward
# ---------------------------------------------------------------------------
@jax.jit
def hgstem_pallas(x_nchw, params):
    N, c1, H, W = x_nchw.shape
    assert H % 4 == 0 and W % 4 == 0, "HGStem Pallas path expects H, W % 4 == 0"
    cm = params["stem1"]["w"].shape[0]
    c2 = params["stem4"]["w"].shape[0]
    dt = x_nchw.dtype

    w1, s1, b1 = _fold(params["stem1"])
    w2a, s2a, b2a = _fold(params["stem2a"])
    w2b, s2b, b2b = _fold(params["stem2b"])
    w3, s3, b3 = _fold(params["stem3"])
    w4, s4, b4 = _fold(params["stem4"])
    w3a, w3b = w3[:, :cm, :], w3[:, cm:, :]          # split stem3 (fused concat)
    w4m = w4[0]                                       # (cm, c2) for the 1x1 conv

    # Single layout change for the whole stem + stem1's p=1 halo pad.
    x_nhwc = jnp.transpose(x_nchw, (0, 2, 3, 1))
    xp = jnp.pad(x_nhwc, ((0, 0), (1, 1), (1, 1), (0, 0)))
    Hp, Wp = H + 2, W + 2
    x6 = xp.reshape(N, Hp // 2, 2, Wp // 2, 2, c1)    # free (contiguous) reshape
    H1, W1 = H // 2, W // 2

    # ---- stem1: 3x3 s2 conv + BN + ReLU, output already right/bottom padded --
    x_pad_shape = (N, H1 + 1, W1 + 1, cm)
    x_pad = pl.pallas_call(
        functools.partial(_conv_bn_relu_kernel, k=3, stride=2,
                          Ho=H1, Wo=W1, off=(0, 0)),
        out_shape=jax.ShapeDtypeStruct(x_pad_shape, dt),
        grid=(N,),
        in_specs=[_batched_spec(x6.shape), _const_spec(w1.shape),
                  _const_spec(s1.shape), _const_spec(b1.shape)],
        out_specs=_batched_spec(x_pad_shape),
        compiler_params=_CPARAMS,
        cost_estimate=_cost(2 * N * H1 * W1 * 9 * c1 * cm,
                            [x6, w1, s1, b1], [x_pad_shape]),
    )(x6, w1, s1, b1)

    # ---- stem2a (2x2 s1 conv, rb-padded out) fused with 2x2 s1 maxpool -------
    x2a_shape = (N, H1 + 1, W1 + 1, cm // 2)
    x1_shape = (N, H1 + 2, W1 + 2, cm)               # all-around pad for stem3
    x2a_pad, x1_pad = pl.pallas_call(
        functools.partial(_stem2a_pool_kernel, Ho=H1, Wo=W1),
        out_shape=(jax.ShapeDtypeStruct(x2a_shape, dt),
                   jax.ShapeDtypeStruct(x1_shape, dt)),
        grid=(N,),
        in_specs=[_batched_spec(x_pad.shape), _const_spec(w2a.shape),
                  _const_spec(s2a.shape), _const_spec(b2a.shape)],
        out_specs=(_batched_spec(x2a_shape), _batched_spec(x1_shape)),
        compiler_params=_CPARAMS,
        cost_estimate=_cost(2 * N * H1 * W1 * 4 * cm * (cm // 2),
                            [x_pad, w2a, s2a, b2a], [x2a_shape, x1_shape]),
    )(x_pad, w2a, s2a, b2a)

    # ---- stem2b: 2x2 s1 conv + BN + ReLU, all-around padded output -----------
    x2_shape = (N, H1 + 2, W1 + 2, cm)
    x2_pad = pl.pallas_call(
        functools.partial(_conv_bn_relu_kernel, k=2, stride=1,
                          Ho=H1, Wo=W1, off=(1, 1)),
        out_shape=jax.ShapeDtypeStruct(x2_shape, dt),
        grid=(N,),
        in_specs=[_batched_spec(x2a_pad.shape), _const_spec(w2b.shape),
                  _const_spec(s2b.shape), _const_spec(b2b.shape)],
        out_specs=_batched_spec(x2_shape),
        compiler_params=_CPARAMS,
        cost_estimate=_cost(2 * N * H1 * W1 * 4 * (cm // 2) * cm,
                            [x2a_pad, w2b, s2b, b2b], [x2_shape]),
    )(x2a_pad, w2b, s2b, b2b)

    # ---- stem3 (3x3 s2 on cat[x1,x2], split weights) fused with stem4 (1x1) --
    H3, W3 = H1 // 2, W1 // 2
    Hq, Wq = (H1 + 2) // 2, (W1 + 2) // 2
    x1_6 = x1_pad.reshape(N, Hq, 2, Wq, 2, cm)        # free reshapes
    x2_6 = x2_pad.reshape(N, Hq, 2, Wq, 2, cm)
    out_shape = (N, H3, W3, c2)
    out_nhwc = pl.pallas_call(
        functools.partial(_stem34_kernel, Ho=H3, Wo=W3),
        out_shape=jax.ShapeDtypeStruct(out_shape, dt),
        grid=(N,),
        in_specs=[_batched_spec(x1_6.shape), _batched_spec(x2_6.shape),
                  _const_spec(w3a.shape), _const_spec(w3b.shape),
                  _const_spec(s3.shape), _const_spec(b3.shape),
                  _const_spec(w4m.shape), _const_spec(s4.shape),
                  _const_spec(b4.shape)],
        out_specs=_batched_spec(out_shape),
        compiler_params=_CPARAMS,
        cost_estimate=_cost(2 * N * H3 * W3 * (9 * 2 * cm * cm + cm * c2),
                            [x1_6, x2_6, w3a, w3b, s3, b3, w4m, s4, b4],
                            [out_shape]),
    )(x1_6, x2_6, w3a, w3b, s3, b3, w4m, s4, b4)

    # Single layout change back to the module's NCHW output.
    return jnp.transpose(out_nhwc, (0, 3, 1, 2))


# ---------------------------------------------------------------------------
# Pure-JAX reference (mirrors the PyTorch forward exactly, NCHW, eval-mode BN)
# ---------------------------------------------------------------------------
def hgstem_reference(x, p):
    def cbr(x, layer, stride, pad):
        y = lax.conv_general_dilated(
            x, layer["w"], (stride, stride), ((pad, pad), (pad, pad)),
            dimension_numbers=("NCHW", "OIHW", "NCHW"))
        inv = 1.0 / jnp.sqrt(layer["var"] + _BN_EPS)
        y = ((y - layer["mean"][None, :, None, None])
             * (layer["gamma"] * inv)[None, :, None, None]
             + layer["beta"][None, :, None, None])
        return jnp.maximum(y, 0.0)

    x = cbr(x, p["stem1"], 2, 1)
    x = jnp.pad(x, ((0, 0), (0, 0), (0, 1), (0, 1)))
    x2 = cbr(x, p["stem2a"], 1, 0)
    x2 = jnp.pad(x2, ((0, 0), (0, 0), (0, 1), (0, 1)))
    x2 = cbr(x2, p["stem2b"], 1, 0)
    H1, W1 = x.shape[2] - 1, x.shape[3] - 1
    x1 = jnp.maximum(                                   # 2x2 s1 maxpool (ceil)
        jnp.maximum(x[:, :, :H1, :W1], x[:, :, 1:, :W1]),
        jnp.maximum(x[:, :, :H1, 1:], x[:, :, 1:, 1:]))
    xc = jnp.concatenate([x1, x2], axis=1)
    xc = cbr(xc, p["stem3"], 2, 1)
    return cbr(xc, p["stem4"], 1, 0)


if __name__ == "__main__":
    key = jax.random.PRNGKey(0)
    N, c1, cm, c2, H, W = 2, 3, 16, 32, 16, 16
    kx, kp = jax.random.split(key)
    x = jax.random.normal(kx, (N, c1, H, W), jnp.float32)       # NCHW input
    params = init_params(kp, c1, cm, c2)

    out = hgstem_pallas(x, params)
    out = jax.block_until_ready(out)

    ref = hgstem_reference(x, params)
    assert out.shape == ref.shape == (N, c2, H // 4, W // 4), (out.shape, ref.shape)
    max_err = float(jnp.max(jnp.abs(out - ref)))
    assert jnp.allclose(out, ref, atol=1e-4, rtol=1e-4), f"max abs err {max_err}"

    print("KERNEL_OK")
</pallas_src>

<mosaic_0001>
module attributes {stable_mosaic.version = 11 : i64} {
  func.func @_stem2a_pool_kernel(%arg0: i32, %arg1: memref<1x9x9x16xf32, #tpu.memory_space<vmem>>, %arg2: memref<4x16x8xf32, #tpu.memory_space<vmem>>, %arg3: memref<1x8xf32, #tpu.memory_space<vmem>>, %arg4: memref<1x8xf32, #tpu.memory_space<vmem>>, %arg5: memref<1x9x9x8xf32, #tpu.memory_space<vmem>>, %arg6: memref<1x10x10x16xf32, #tpu.memory_space<vmem>>) attributes {dimension_semantics = [#tpu.dimension_semantics<parallel>], iteration_bounds = array<i64: 2>, scalar_prefetch = 0 : i64, scratch_operands = 0 : i64, tpu.core_type = #tpu.core_type<tc>, window_params = [{transform_indices = @transform_0, window_bounds = array<i64: 1, 9, 9, 16>}, {pipeline_mode = #tpu.pipeline_mode<synchronous>, transform_indices = @transform_1, window_bounds = array<i64: 4, 16, 8>}, {pipeline_mode = #tpu.pipeline_mode<synchronous>, transform_indices = @transform_2, window_bounds = array<i64: 1, 8>}, {pipeline_mode = #tpu.pipeline_mode<synchronous>, transform_indices = @transform_3, window_bounds = array<i64: 1, 8>}, {transform_indices = @transform_4, window_bounds = array<i64: 1, 9, 9, 8>}, {transform_indices = @transform_5, window_bounds = array<i64: 1, 10, 10, 16>}]} {
    %cst = arith.constant 0.000000e+00 : f32
    %0 = vector.broadcast %cst : f32 to vector<64x8xf32>
    %c0 = arith.constant 0 : index
    %c0_0 = arith.constant 0 : index
    %c0_1 = arith.constant 0 : index
    %c0_2 = arith.constant 0 : index
    %1 = vector.load %arg1[%c0, %c0_0, %c0_1, %c0_2] : memref<1x9x9x16xf32, #tpu.memory_space<vmem>>, vector<1x8x8x16xf32>
    %2 = vector.shape_cast %1 : vector<1x8x8x16xf32> to vector<8x8x16xf32>
    %3 = vector.shape_cast %2 : vector<8x8x16xf32> to vector<64x16xf32>
    %c0_3 = arith.constant 0 : index
    %c0_4 = arith.constant 0 : index
    %c0_5 = arith.constant 0 : index
    %4 = vector.load %arg2[%c0_3, %c0_4, %c0_5] : memref<4x16x8xf32, #tpu.memory_space<vmem>>, vector<1x16x8xf32>
    %5 = vector.shape_cast %4 : vector<1x16x8xf32> to vector<16x8xf32>
    %cst_6 = arith.constant dense<0.000000e+00> : vector<64x8xf32>
    %6 = tpu.matmul %3, %5, %cst_6 {dimension_numbers = #tpu.dot_dimension_numbers<[1], [0], [0], [1], [0, 0, 1, 1], [], []>} : vector<64x16xf32>, vector<16x8xf32>, vector<64x8xf32> -> vector<64x8xf32>
    %7 = arith.addf %0, %6 : vector<64x8xf32>
    %c0_7 = arith.constant 0 : index
    %c0_8 = arith.constant 0 : index
    %c1 = arith.constant 1 : index
    %c0_9 = arith.constant 0 : index
    %8 = vector.load %arg1[%c0_7, %c0_8, %c1, %c0_9] : memref<1x9x9x16xf32, #tpu.memory_space<vmem>>, vector<1x8x8x16xf32>
    %9 = vector.shape_cast %8 : vector<1x8x8x16xf32> to vector<8x8x16xf32>
    %10 = vector.shape_cast %9 : vector<8x8x16xf32> to vector<64x16xf32>
    %c1_10 = arith.constant 1 : index
    %c0_11 = arith.constant 0 : index
    %c0_12 = arith.constant 0 : index
    %11 = vector.load %arg2[%c1_10, %c0_11, %c0_12] : memref<4x16x8xf32, #tpu.memory_space<vmem>>, vector<1x16x8xf32>
    %12 = vector.shape_cast %11 : vector<1x16x8xf32> to vector<16x8xf32>
    %cst_13 = arith.constant dense<0.000000e+00> : vector<64x8xf32>
    %13 = tpu.matmul %10, %12, %cst_13 {dimension_numbers = #tpu.dot_dimension_numbers<[1], [0], [0], [1], [0, 0, 1, 1], [], []>} : vector<64x16xf32>, vector<16x8xf32>, vector<64x8xf32> -> vector<64x8xf32>
    %14 = arith.addf %7, %13 : vector<64x8xf32>
    %c0_14 = arith.constant 0 : index
    %c1_15 = arith.constant 1 : index
    %c0_16 = arith.constant 0 : index
    %c0_17 = arith.constant 0 : index
    %15 = vector.load %arg1[%c0_14, %c1_15, %c0_16, %c0_17] : memref<1x9x9x16xf32, #tpu.memory_space<vmem>>, vector<1x8x8x16xf32>
    %16 = vector.shape_cast %15 : vector<1x8x8x16xf32> to vector<8x8x16xf32>
    %17 = vector.shape_cast %16 : vector<8x8x16xf32> to vector<64x16xf32>
    %c2 = arith.constant 2 : index
    %c0_18 = arith.constant 0 : index
    %c0_19 = arith.constant 0 : index
    %18 = vector.load %arg2[%c2, %c0_18, %c0_19] : memref<4x16x8xf32, #tpu.memory_space<vmem>>, vector<1x16x8xf32>
    %19 = vector.shape_cast %18 : vector<1x16x8xf32> to vector<16x8xf32>
    %cst_20 = arith.constant dense<0.000000e+00> : vector<64x8xf32>
    %20 = tpu.matmul %17, %19, %cst_20 {dimension_numbers = #tpu.dot_dimension_numbers<[1], [0], [0], [1], [0, 0, 1, 1], [], []>} : vector<64x16xf32>, vector<16x8xf32>, vector<64x8xf32> -> vector<64x8xf32>
    %21 = arith.addf %14, %20 : vector<64x8xf32>
    %c0_21 = arith.constant 0 : index
    %c1_22 = arith.constant 1 : index
    %c1_23 = arith.constant 1 : index
    %c0_24 = arith.constant 0 : index
    %22 = vector.load %arg1[%c0_21, %c1_22, %c1_23, %c0_24] : memref<1x9x9x16xf32, #tpu.memory_space<vmem>>, vector<1x8x8x16xf32>
    %23 = vector.shape_cast %22 : vector<1x8x8x16xf32> to vector<8x8x16xf32>
    %24 = vector.shape_cast %23 : vector<8x8x16xf32> to vector<64x16xf32>
    %c3 = arith.constant 3 : index
    %c0_25 = arith.constant 0 : index
    %c0_26 = arith.constant 0 : index
    %25 = vector.load %arg2[%c3, %c0_25, %c0_26] : memref<4x16x8xf32, #tpu.memory_space<vmem>>, vector<1x16x8xf32>
    %26 = vector.shape_cast %25 : vector<1x16x8xf32> to vector<16x8xf32>
    %cst_27 = arith.constant dense<0.000000e+00> : vector<64x8xf32>
    %27 = tpu.matmul %24, %26, %cst_27 {dimension_numbers = #tpu.dot_dimension_numbers<[1], [0], [0], [1], [0, 0, 1, 1], [], []>} : vector<64x16xf32>, vector<16x8xf32>, vector<64x8xf32> -> vector<64x8xf32>
    %28 = arith.addf %21, %27 : vector<64x8xf32>
    %c0_28 = arith.constant 0 : index
    %c0_29 = arith.constant 0 : index
    %29 = vector.load %arg3[%c0_28, %c0_29] : memref<1x8xf32, #tpu.memory_space<vmem>>, vector<1x8xf32>
    %30 = vector.broadcast %29 : vector<1x8xf32> to vector<64x8xf32>
    %31 = arith.mulf %28, %30 : vector<64x8xf32>
    %c0_30 = arith.constant 0 : index
    %c0_31 = arith.constant 0 : index
    %32 = vector.load %arg4[%c0_30, %c0_31] : memref<1x8xf32, #tpu.memory_space<vmem>>, vector<1x8xf32>
    %33 = vector.broadcast %32 : vector<1x8xf32> to vector<64x8xf32>
    %34 = arith.addf %31, %33 : vector<64x8xf32>
    %cst_32 = arith.constant 0.000000e+00 : f32
    %35 = vector.broadcast %cst_32 : f32 to vector<64x8xf32>
    %36 = arith.maximumf %34, %35 : vector<64x8xf32>
    %cst_33 = arith.constant 0.000000e+00 : f32
    %37 = vector.broadcast %cst_33 : f32 to vector<1x9x9x8xf32>
    %c0_34 = arith.constant 0 : index
    %c0_35 = arith.constant 0 : index
    %c0_36 = arith.constant 0 : index
    %c0_37 = arith.constant 0 : index
    %38 = vector.load %arg5[%c0_34, %c0_35, %c0_36, %c0_37] : memref<1x9x9x8xf32, #tpu.memory_space<vmem>>, vector<1x9x9x8xf32>
    tpu.vector_store %arg5[%c0_34, %c0_35, %c0_36, %c0_37], %37 {strides = array<i32>} : memref<1x9x9x8xf32, #tpu.memory_space<vmem>>, vector<1x9x9x8xf32>,
    %39 = vector.shape_cast %36 : vector<64x8xf32> to vector<8x8x8xf32>
    %c0_38 = arith.constant 0 : index
    %c0_39 = arith.constant 0 : index
    %c0_40 = arith.constant 0 : index
    %c0_41 = arith.constant 0 : index
    %40 = vector.load %arg5[%c0_38, %c0_39, %c0_40, %c0_41] : memref<1x9x9x8xf32, #tpu.memory_space<vmem>>, vector<1x8x8x8xf32>
    %41 = vector.shape_cast %40 : vector<1x8x8x8xf32> to vector<8x8x8xf32>
    %42 = vector.shape_cast %39 : vector<8x8x8xf32> to vector<1x8x8x8xf32>
    tpu.vector_store %arg5[%c0_38, %c0_39, %c0_40, %c0_41], %42 {strides = array<i32>} : memref<1x9x9x8xf32, #tpu.memory_space<vmem>>, vector<1x8x8x8xf32>,
    %c0_42 = arith.constant 0 : index
    %c0_43 = arith.constant 0 : index
    %c0_44 = arith.constant 0 : index
    %c0_45 = arith.constant 0 : index
    %43 = vector.load %arg1[%c0_42, %c0_43, %c0_44, %c0_45] : memref<1x9x9x16xf32, #tpu.memory_space<vmem>>, vector<1x8x8x16xf32>
    %44 = vector.shape_cast %43 : vector<1x8x8x16xf32> to vector<8x8x16xf32>
    %c0_46 = arith.constant 0 : index
    %c1_47 = arith.constant 1 : index
    %c0_48 = arith.constant 0 : index
    %c0_49 = arith.constant 0 : index
    %45 = vector.load %arg1[%c0_46, %c1_47, %c0_48, %c0_49] : memref<1x9x9x16xf32, #tpu.memory_space<vmem>>, vector<1x8x8x16xf32>
    %46 = vector.shape_cast %45 : vector<1x8x8x16xf32> to vector<8x8x16xf32>
    %47 = arith.maximumf %44, %46 : vector<8x8x16xf32>
    %c0_50 = arith.constant 0 : index
    %c0_51 = arith.constant 0 : index
    %c1_52 = arith.constant 1 : index
    %c0_53 = arith.constant 0 : index
    %48 = vector.load %arg1[%c0_50, %c0_51, %c1_52, %c0_53] : memref<1x9x9x16xf32, #tpu.memory_space<vmem>>, vector<1x8x8x16xf32>
    %49 = vector.shape_cast %48 : vector<1x8x8x16xf32> to vector<8x8x16xf32>
    %c0_54 = arith.constant 0 : index
    %c1_55 = arith.constant 1 : index
    %c1_56 = arith.constant 1 : index
    %c0_57 = arith.constant 0 : index
    %50 = vector.load %arg1[%c0_54, %c1_55, %c1_56, %c0_57] : memref<1x9x9x16xf32, #tpu.memory_space<vmem>>, vector<1x8x8x16xf32>
    %51 = vector.shape_cast %50 : vector<1x8x8x16xf32> to vector<8x8x16xf32>
    %52 = arith.maximumf %49, %51 : vector<8x8x16xf32>
    %53 = arith.maximumf %47, %52 : vector<8x8x16xf32>
    %cst_58 = arith.constant 0.000000e+00 : f32
    %54 = vector.broadcast %cst_58 : f32 to vector<1x10x10x16xf32>
    %c0_59 = arith.constant 0 : index
    %c0_60 = arith.constant 0 : index
    %c0_61 = arith.constant 0 : index
    %c0_62 = arith.constant 0 : index
    %55 = vector.load %arg6[%c0_59, %c0_60, %c0_61, %c0_62] : memref<1x10x10x16xf32, #tpu.memory_space<vmem>>, vector<1x10x10x16xf32>
    tpu.vector_store %arg6[%c0_59, %c0_60, %c0_61, %c0_62], %54 {strides = array<i32>} : memref<1x10x10x16xf32, #tpu.memory_space<vmem>>, vector<1x10x10x16xf32>,
    %c0_63 = arith.constant 0 : index
    %c1_64 = arith.constant 1 : index
    %c1_65 = arith.constant 1 : index
    %c0_66 = arith.constant 0 : index
    %56 = vector.load %arg6[%c0_63, %c1_64, %c1_65, %c0_66] : memref<1x10x10x16xf32, #tpu.memory_space<vmem>>, vector<1x8x8x16xf32>
    %57 = vector.shape_cast %56 : vector<1x8x8x16xf32> to vector<8x8x16xf32>
    %58 = vector.shape_cast %53 : vector<8x8x16xf32> to vector<1x8x8x16xf32>
    tpu.vector_store %arg6[%c0_63, %c1_64, %c1_65, %c0_66], %58 {strides = array<i32>} : memref<1x10x10x16xf32, #tpu.memory_space<vmem>>, vector<1x8x8x16xf32>,
    return
  }
  func.func @transform_0(%arg0: i32) -> (i32, i32, i32, i32) {
    %c0_i32 = arith.constant 0 : i32
    %c0_i32_0 = arith.constant 0 : i32
    %c0_i32_1 = arith.constant 0 : i32
    %c0_i32_2 = arith.constant 0 : i32
    return %arg0, %c0_i32, %c0_i32_0, %c0_i32_1 : i32, i32, i32, i32
  }
  func.func @transform_1(%arg0: i32) -> (i32, i32, i32) {
    %c0_i32 = arith.constant 0 : i32
    %c0_i32_0 = arith.constant 0 : i32
    %c0_i32_1 = arith.constant 0 : i32
    %c0_i32_2 = arith.constant 0 : i32
    return %c0_i32, %c0_i32_0, %c0_i32_1 : i32, i32, i32
  }
  func.func @transform_2(%arg0: i32) -> (i32, i32) {
    %c0_i32 = arith.constant 0 : i32
    %c0_i32_0 = arith.constant 0 : i32
    %c0_i32_1 = arith.constant 0 : i32
    return %c0_i32, %c0_i32_0 : i32, i32
  }
  func.func @transform_3(%arg0: i32) -> (i32, i32) {
    %c0_i32 = arith.constant 0 : i32
    %c0_i32_0 = arith.constant 0 : i32
    %c0_i32_1 = arith.constant 0 : i32
    return %c0_i32, %c0_i32_0 : i32, i32
  }
  func.func @transform_4(%arg0: i32) -> (i32, i32, i32, i32) {
    %c0_i32 = arith.constant 0 : i32
    %c0_i32_0 = arith.constant 0 : i32
    %c0_i32_1 = arith.constant 0 : i32
    %c0_i32_2 = arith.constant 0 : i32
    return %arg0, %c0_i32, %c0_i32_0, %c0_i32_1 : i32, i32, i32, i32
  }
  func.func @transform_5(%arg0: i32) -> (i32, i32, i32, i32) {
    %c0_i32 = arith.constant 0 : i32
    %c0_i32_0 = arith.constant 0 : i32
    %c0_i32_1 = arith.constant 0 : i32
    %c0_i32_2 = arith.constant 0 : i32
    return %arg0, %c0_i32, %c0_i32_0, %c0_i32_1 : i32, i32, i32, i32
  }
}

module attributes {stable_mosaic.version = 11 : i64} {
  func.func @_conv_bn_relu_kernel(%arg0: i32, %arg1: memref<1x9x2x9x2x3xf32, #tpu.memory_space<vmem>>, %arg2: memref<9x3x16xf32, #tpu.memory_space<vmem>>, %arg3: memref<1x16xf32, #tpu.memory_space<vmem>>, %arg4: memref<1x16xf32, #tpu.memory_space<vmem>>, %arg5: memref<1x9x9x16xf32, #tpu.memory_space<vmem>>) attributes {dimension_semantics = [#tpu.dimension_semantics<parallel>], iteration_bounds = array<i64: 2>, scalar_prefetch = 0 : i64, scratch_operands = 0 : i64, tpu.core_type = #tpu.core_type<tc>, window_params = [{transform_indices = @transform_0, window_bounds = array<i64: 1, 9, 2, 9, 2, 3>}, {pipeline_mode = #tpu.pipeline_mode<synchronous>, transform_indices = @transform_1, window_bounds = array<i64: 9, 3, 16>}, {pipeline_mode = #tpu.pipeline_mode<synchronous>, transform_indices = @transform_2, window_bounds = array<i64: 1, 16>}, {pipeline_mode = #tpu.pipeline_mode<synchronous>, transform_indices = @transform_3, window_bounds = array<i64: 1, 16>}, {transform_indices = @transform_4, window_bounds = array<i64: 1, 9, 9, 16>}]} {
    %cst = arith.constant 0.000000e+00 : f32
    %0 = vector.broadcast %cst : f32 to vector<64x16xf32>
    %c0 = arith.constant 0 : index
    %c0_0 = arith.constant 0 : index
    %c0_1 = arith.constant 0 : index
    %c0_2 = arith.constant 0 : index
    %c0_3 = arith.constant 0 : index
    %c0_4 = arith.constant 0 : index
    %1 = vector.load %arg1[%c0, %c0_0, %c0_1, %c0_2, %c0_3, %c0_4] : memref<1x9x2x9x2x3xf32, #tpu.memory_space<vmem>>, vector<1x8x1x8x1x3xf32>
    %2 = vector.shape_cast %1 : vector<1x8x1x8x1x3xf32> to vector<8x8x3xf32>
    %3 = vector.shape_cast %2 : vector<8x8x3xf32> to vector<64x3xf32>
    %c0_5 = arith.constant 0 : index
    %c0_6 = arith.constant 0 : index
    %c0_7 = arith.constant 0 : index
    %4 = vector.load %arg2[%c0_5, %c0_6, %c0_7] : memref<9x3x16xf32, #tpu.memory_space<vmem>>, vector<1x3x16xf32>
    %5 = vector.shape_cast %4 : vector<1x3x16xf32> to vector<3x16xf32>
    %cst_8 = arith.constant dense<0.000000e+00> : vector<64x16xf32>
    %6 = tpu.matmul %3, %5, %cst_8 {dimension_numbers = #tpu.dot_dimension_numbers<[1], [0], [0], [1], [0, 0, 1, 1], [], []>} : vector<64x3xf32>, vector<3x16xf32>, vector<64x16xf32> -> vector<64x16xf32>
    %7 = arith.addf %0, %6 : vector<64x16xf32>
    %c0_9 = arith.constant 0 : index
    %c0_10 = arith.constant 0 : index
    %c0_11 = arith.constant 0 : index
    %c0_12 = arith.constant 0 : index
    %c1 = arith.constant 1 : index
    %c0_13 = arith.constant 0 : index
    %8 = vector.load %arg1[%c0_9, %c0_10, %c0_11, %c0_12, %c1, %c0_13] : memref<1x9x2x9x2x3xf32, #tpu.memory_space<vmem>>, vector<1x8x1x8x1x3xf32>
    %9 = vector.shape_cast %8 : vector<1x8x1x8x1x3xf32> to vector<8x8x3xf32>
    %10 = vector.shape_cast %9 : vector<8x8x3xf32> to vector<64x3xf32>
    %c1_14 = arith.constant 1 : index
    %c0_15 = arith.constant 0 : index
    %c0_16 = arith.constant 0 : index
    %11 = vector.load %arg2[%c1_14, %c0_15, %c0_16] : memref<9x3x16xf32, #tpu.memory_space<vmem>>, vector<1x3x16xf32>
    %12 = vector.shape_cast %11 : vector<1x3x16xf32> to vector<3x16xf32>
    %cst_17 = arith.constant dense<0.000000e+00> : vector<64x16xf32>
    %13 = tpu.matmul %10, %12, %cst_17 {dimension_numbers = #tpu.dot_dimension_numbers<[1], [0], [0], [1], [0, 0, 1, 1], [], []>} : vector<64x3xf32>, vector<3x16xf32>, vector<64x16xf32> -> vector<64x16xf32>
    %14 = arith.addf %7, %13 : vector<64x16xf32>
    %c0_18 = arith.constant 0 : index
    %c0_19 = arith.constant 0 : index
    %c0_20 = arith.constant 0 : index
    %c1_21 = arith.constant 1 : index
    %c0_22 = arith.constant 0 : index
    %c0_23 = arith.constant 0 : index
    %15 = vector.load %arg1[%c0_18, %c0_19, %c0_20, %c1_21, %c0_22, %c0_23] : memref<1x9x2x9x2x3xf32, #tpu.memory_space<vmem>>, vector<1x8x1x8x1x3xf32>
    %16 = vector.shape_cast %15 : vector<1x8x1x8x1x3xf32> to vector<8x8x3xf32>
    %17 = vector.shape_cast %16 : vector<8x8x3xf32> to vector<64x3xf32>
    %c2 = arith.constant 2 : index
    %c0_24 = arith.constant 0 : index
    %c0_25 = arith.constant 0 : index
    %18 = vector.load %arg2[%c2, %c0_24, %c0_25] : memref<9x3x16xf32, #tpu.memory_space<vmem>>, vector<1x3x16xf32>
    %19 = vector.shape_cast %18 : vector<1x3x16xf32> to vector<3x16xf32>
    %cst_26 = arith.constant dense<0.000000e+00> : vector<64x16xf32>
    %20 = tpu.matmul %17, %19, %cst_26 {dimension_numbers = #tpu.dot_dimension_numbers<[1], [0], [0], [1], [0, 0, 1, 1], [], []>} : vector<64x3xf32>, vector<3x16xf32>, vector<64x16xf32> -> vector<64x16xf32>
    %21 = arith.addf %14, %20 : vector<64x16xf32>
    %c0_27 = arith.constant 0 : index
    %c0_28 = arith.constant 0 : index
    %c1_29 = arith.constant 1 : index
    %c0_30 = arith.constant 0 : index
    %c0_31 = arith.constant 0 : index
    %c0_32 = arith.constant 0 : index
    %22 = vector.load %arg1[%c0_27, %c0_28, %c1_29, %c0_30, %c0_31, %c0_32] : memref<1x9x2x9x2x3xf32, #tpu.memory_space<vmem>>, vector<1x8x1x8x1x3xf32>
    %23 = vector.shape_cast %22 : vector<1x8x1x8x1x3xf32> to vector<8x8x3xf32>
    %24 = vector.shape_cast %23 : vector<8x8x3xf32> to vector<64x3xf32>
    %c3 = arith.constant 3 : index
    %c0_33 = arith.constant 0 : index
    %c0_34 = arith.constant 0 : index
    %25 = vector.load %arg2[%c3, %c0_33, %c0_34] : memref<9x3x16xf32, #tpu.memory_space<vmem>>, vector<1x3x16xf32>
    %26 = vector.shape_cast %25 : vector<1x3x16xf32> to vector<3x16xf32>
    %cst_35 = arith.constant dense<0.000000e+00> : vector<64x16xf32>
    %27 = tpu.matmul %24, %26, %cst_35 {dimension_numbers = #tpu.dot_dimension_numbers<[1], [0], [0], [1], [0, 0, 1, 1], [], []>} : vector<64x3xf32>, vector<3x16xf32>, vector<64x16xf32> -> vector<64x16xf32>
    %28 = arith.addf %21, %27 : vector<64x16xf32>
    %c0_36 = arith.constant 0 : index
    %c0_37 = arith.constant 0 : index
    %c1_38 = arith.constant 1 : index
    %c0_39 = arith.constant 0 : index
    %c1_40 = arith.constant 1 : index
    %c0_41 = arith.constant 0 : index
    %29 = vector.load %arg1[%c0_36, %c0_37, %c1_38, %c0_39, %c1_40, %c0_41] : memref<1x9x2x9x2x3xf32, #tpu.memory_space<vmem>>, vector<1x8x1x8x1x3xf32>
    %30 = vector.shape_cast %29 : vector<1x8x1x8x1x3xf32> to vector<8x8x3xf32>
    %31 = vector.shape_cast %30 : vector<8x8x3xf32> to vector<64x3xf32>
    %c4 = arith.constant 4 : index
    %c0_42 = arith.constant 0 : index
    %c0_43 = arith.constant 0 : index
    %32 = vector.load %arg2[%c4, %c0_42, %c0_43] : memref<9x3x16xf32, #tpu.memory_space<vmem>>, vector<1x3x16xf32>
    %33 = vector.shape_cast %32 : vector<1x3x16xf32> to vector<3x16xf32>
    %cst_44 = arith.constant dense<0.000000e+00> : vector<64x16xf32>
    %34 = tpu.matmul %31, %33, %cst_44 {dimension_numbers = #tpu.dot_dimension_numbers<[1], [0], [0], [1], [0, 0, 1, 1], [], []>} : vector<64x3xf32>, vector<3x16xf32>, vector<64x16xf32> -> vector<64x16xf32>
    %35 = arith.addf %28, %34 : vector<64x16xf32>
    %c0_45 = arith.constant 0 : index
    %c0_46 = arith.constant 0 : index
    %c1_47 = arith.constant 1 : index
    %c1_48 = arith.constant 1 : index
    %c0_49 = arith.constant 0 : index
    %c0_50 = arith.constant 0 : index
    %36 = vector.load %arg1[%c0_45, %c0_46, %c1_47, %c1_48, %c0_49, %c0_50] : memref<1x9x2x9x2x3xf32, #tpu.memory_space<vmem>>, vector<1x8x1x8x1x3xf32>
    %37 = vector.shape_cast %36 : vector<1x8x1x8x1x3xf32> to vector<8x8x3xf32>
    %38 = vector.shape_cast %37 : vector<8x8x3xf32> to vector<64x3xf32>
    %c5 = arith.constant 5 : index
    %c0_51 = arith.constant 0 : index
    %c0_52 = arith.constant 0 : index
    %39 = vector.load %arg2[%c5, %c0_51, %c0_52] : memref<9x3x16xf32, #tpu.memory_space<vmem>>, vector<1x3x16xf32>
    %40 = vector.shape_cast %39 : vector<1x3x16xf32> to vector<3x16xf32>
    %cst_53 = arith.constant dense<0.000000e+00> : vector<64x16xf32>
    %41 = tpu.matmul %38, %40, %cst_53 {dimension_numbers = #tpu.dot_dimension_numbers<[1], [0], [0], [1], [0, 0, 1, 1], [], []>} : vector<64x3xf32>, vector<3x16xf32>, vector<64x16xf32> -> vector<64x16xf32>
    %42 = arith.addf %35, %41 : vector<64x16xf32>
    %c0_54 = arith.constant 0 : index
    %c1_55 = arith.constant 1 : index
    %c0_56 = arith.constant 0 : index
    %c0_57 = arith.constant 0 : index
    %c0_58 = arith.constant 0 : index
    %c0_59 = arith.constant 0 : index
    %43 = vector.load %arg1[%c0_54, %c1_55, %c0_56, %c0_57, %c0_58, %c0_59] : memref<1x9x2x9x2x3xf32, #tpu.memory_space<vmem>>, vector<1x8x1x8x1x3xf32>
    %44 = vector.shape_cast %43 : vector<1x8x1x8x1x3xf32> to vector<8x8x3xf32>
    %45 = vector.shape_cast %44 : vector<8x8x3xf32> to vector<64x3xf32>
    %c6 = arith.constant 6 : index
    %c0_60 = arith.constant 0 : index
    %c0_61 = arith.constant 0 : index
    %46 = vector.load %arg2[%c6, %c0_60, %c0_61] : memref<9x3x16xf32, #tpu.memory_space<vmem>>, vector<1x3x16xf32>
    %47 = vector.shape_cast %46 : vector<1x3x16xf32> to vector<3x16xf32>
    %cst_62 = arith.constant dense<0.000000e+00> : vector<64x16xf32>
    %48 = tpu.matmul %45, %47, %cst_62 {dimension_numbers = #tpu.dot_dimension_numbers<[1], [0], [0], [1], [0, 0, 1, 1], [], []>} : vector<64x3xf32>, vector<3x16xf32>, vector<64x16xf32> -> vector<64x16xf32>
    %49 = arith.addf %42, %48 : vector<64x16xf32>
    %c0_63 = arith.constant 0 : index
    %c1_64 = arith.constant 1 : index
    %c0_65 = arith.constant 0 : index
    %c0_66 = arith.constant 0 : index
    %c1_67 = arith.constant 1 : index
    %c0_68 = arith.constant 0 : index
    %50 = vector.load %arg1[%c0_63, %c1_64, %c0_65, %c0_66, %c1_67, %c0_68] : memref<1x9x2x9x2x3xf32, #tpu.memory_space<vmem>>, vector<1x8x1x8x1x3xf32>
    %51 = vector.shape_cast %50 : vector<1x8x1x8x1x3xf32> to vector<8x8x3xf32>
    %52 = vector.shape_cast %51 : vector<8x8x3xf32> to vector<64x3xf32>
    %c7 = arith.constant 7 : index
    %c0_69 = arith.constant 0 : index
    %c0_70 = arith.constant 0 : index
    %53 = vector.load %arg2[%c7, %c0_69, %c0_70] : memref<9x3x16xf32, #tpu.memory_space<vmem>>, vector<1x3x16xf32>
    %54 = vector.shape_cast %53 : vector<1x3x16xf32> to vector<3x16xf32>
    %cst_71 = arith.constant dense<0.000000e+00> : vector<64x16xf32>
    %55 = tpu.matmul %52, %54, %cst_71 {dimension_numbers = #tpu.dot_dimension_numbers<[1], [0], [0], [1], [0, 0, 1, 1], [], []>} : vector<64x3xf32>, vector<3x16xf32>, vector<64x16xf32> -> vector<64x16xf32>
    %56 = arith.addf %49, %55 : vector<64x16xf32>
    %c0_72 = arith.constant 0 : index
    %c1_73 = arith.constant 1 : index
    %c0_74 = arith.constant 0 : index
    %c1_75 = arith.constant 1 : index
    %c0_76 = arith.constant 0 : index
    %c0_77 = arith.constant 0 : index
    %57 = vector.load %arg1[%c0_72, %c1_73, %c0_74, %c1_75, %c0_76, %c0_77] : memref<1x9x2x9x2x3xf32, #tpu.memory_space<vmem>>, vector<1x8x1x8x1x3xf32>
    %58 = vector.shape_cast %57 : vector<1x8x1x8x1x3xf32> to vector<8x8x3xf32>
    %59 = vector.shape_cast %58 : vector<8x8x3xf32> to vector<64x3xf32>
    %c8 = arith.constant 8 : index
    %c0_78 = arith.constant 0 : index
    %c0_79 = arith.constant 0 : index
    %60 = vector.load %arg2[%c8, %c0_78, %c0_79] : memref<9x3x16xf32, #tpu.memory_space<vmem>>, vector<1x3x16xf32>
    %61 = vector.shape_cast %60 : vector<1x3x16xf32> to vector<3x16xf32>
    %cst_80 = arith.constant dense<0.000000e+00> : vector<64x16xf32>
    %62 = tpu.matmul %59, %61, %cst_80 {dimension_numbers = #tpu.dot_dimension_numbers<[1], [0], [0], [1], [0, 0, 1, 1], [], []>} : vector<64x3xf32>, vector<3x16xf32>, vector<64x16xf32> -> vector<64x16xf32>
    %63 = arith.addf %56, %62 : vector<64x16xf32>
    %c0_81 = arith.constant 0 : index
    %c0_82 = arith.constant 0 : index
    %64 = vector.load %arg3[%c0_81, %c0_82] : memref<1x16xf32, #tpu.memory_space<vmem>>, vector<1x16xf32>
    %65 = vector.broadcast %64 : vector<1x16xf32> to vector<64x16xf32>
    %66 = arith.mulf %63, %65 : vector<64x16xf32>
    %c0_83 = arith.constant 0 : index
    %c0_84 = arith.constant 0 : index
    %67 = vector.load %arg4[%c0_83, %c0_84] : memref<1x16xf32, #tpu.memory_space<vmem>>, vector<1x16xf32>
    %68 = vector.broadcast %67 : vector<1x16xf32> to vector<64x16xf32>
    %69 = arith.addf %66, %68 : vector<64x16xf32>
    %cst_85 = arith.constant 0.000000e+00 : f32
    %70 = vector.broadcast %cst_85 : f32 to vector<64x16xf32>
    %71 = arith.maximumf %69, %70 : vector<64x16xf32>
    %cst_86 = arith.constant 0.000000e+00 : f32
    %72 = vector.broadcast %cst_86 : f32 to vector<1x9x9x16xf32>
    %c0_87 = arith.constant 0 : index
    %c0_88 = arith.constant 0 : index
    %c0_89 = arith.constant 0 : index
    %c0_90 = arith.constant 0 : index
    %73 = vector.load %arg5[%c0_87, %c0_88, %c0_89, %c0_90] : memref<1x9x9x16xf32, #tpu.memory_space<vmem>>, vector<1x9x9x16xf32>
    tpu.vector_store %arg5[%c0_87, %c0_88, %c0_89, %c0_90], %72 {strides = array<i32>} : memref<1x9x9x16xf32, #tpu.memory_space<vmem>>, vector<1x9x9x16xf32>,
    %74 = vector.shape_cast %71 : vector<64x16xf32> to vector<8x8x16xf32>
    %c0_91 = arith.constant 0 : index
    %c0_92 = arith.constant 0 : index
    %c0_93 = arith.constant 0 : index
    %c0_94 = arith.constant 0 : index
    %75 = vector.load %arg5[%c0_91, %c0_92, %c0_93, %c0_94] : memref<1x9x9x16xf32, #tpu.memory_space<vmem>>, vector<1x8x8x16xf32>
    %76 = vector.shape_cast %75 : vector<1x8x8x16xf32> to vector<8x8x16xf32>
    %77 = vector.shape_cast %74 : vector<8x8x16xf32> to vector<1x8x8x16xf32>
    tpu.vector_store %arg5[%c0_91, %c0_92, %c0_93, %c0_94], %77 {strides = array<i32>} : memref<1x9x9x16xf32, #tpu.memory_space<vmem>>, vector<1x8x8x16xf32>,
    return
  }
  func.func @transform_0(%arg0: i32) -> (i32, i32, i32, i32, i32, i32) {
    %c0_i32 = arith.constant 0 : i32
    %c0_i32_0 = arith.constant 0 : i32
    %c0_i32_1 = arith.constant 0 : i32
    %c0_i32_2 = arith.constant 0 : i32
    %c0_i32_3 = arith.constant 0 : i32
    %c0_i32_4 = arith.constant 0 : i32
    return %arg0, %c0_i32, %c0_i32_0, %c0_i32_1, %c0_i32_2, %c0_i32_3 : i32, i32, i32, i32, i32, i32
  }
  func.func @transform_1(%arg0: i32) -> (i32, i32, i32) {
    %c0_i32 = arith.constant 0 : i32
    %c0_i32_0 = arith.constant 0 : i32
    %c0_i32_1 = arith.constant 0 : i32
    %c0_i32_2 = arith.constant 0 : i32
    return %c0_i32, %c0_i32_0, %c0_i32_1 : i32, i32, i32
  }
  func.func @transform_2(%arg0: i32) -> (i32, i32) {
    %c0_i32 = arith.constant 0 : i32
    %c0_i32_0 = arith.constant 0 : i32
    %c0_i32_1 = arith.constant 0 : i32
    return %c0_i32, %c0_i32_0 : i32, i32
  }
  func.func @transform_3(%arg0: i32) -> (i32, i32) {
    %c0_i32 = arith.constant 0 : i32
    %c0_i32_0 = arith.constant 0 : i32
    %c0_i32_1 = arith.constant 0 : i32
    return %c0_i32, %c0_i32_0 : i32, i32
  }
  func.func @transform_4(%arg0: i32) -> (i32, i32, i32, i32) {
    %c0_i32 = arith.constant 0 : i32
    %c0_i32_0 = arith.constant 0 : i32
    %c0_i32_1 = arith.constant 0 : i32
    %c0_i32_2 = arith.constant 0 : i32
    return %arg0, %c0_i32, %c0_i32_0, %c0_i32_1 : i32, i32, i32, i32
  }
}

module attributes {stable_mosaic.version = 11 : i64} {
  func.func @_conv_bn_relu_kernel(%arg0: i32, %arg1: memref<1x9x9x8xf32, #tpu.memory_space<vmem>>, %arg2: memref<4x8x16xf32, #tpu.memory_space<vmem>>, %arg3: memref<1x16xf32, #tpu.memory_space<vmem>>, %arg4: memref<1x16xf32, #tpu.memory_space<vmem>>, %arg5: memref<1x10x10x16xf32, #tpu.memory_space<vmem>>) attributes {dimension_semantics = [#tpu.dimension_semantics<parallel>], iteration_bounds = array<i64: 2>, scalar_prefetch = 0 : i64, scratch_operands = 0 : i64, tpu.core_type = #tpu.core_type<tc>, window_params = [{transform_indices = @transform_0, window_bounds = array<i64: 1, 9, 9, 8>}, {pipeline_mode = #tpu.pipeline_mode<synchronous>, transform_indices = @transform_1, window_bounds = array<i64: 4, 8, 16>}, {pipeline_mode = #tpu.pipeline_mode<synchronous>, transform_indices = @transform_2, window_bounds = array<i64: 1, 16>}, {pipeline_mode = #tpu.pipeline_mode<synchronous>, transform_indices = @transform_3, window_bounds = array<i64: 1, 16>}, {transform_indices = @transform_4, window_bounds = array<i64: 1, 10, 10, 16>}]} {
    %cst = arith.constant 0.000000e+00 : f32
    %0 = vector.broadcast %cst : f32 to vector<64x16xf32>
    %c0 = arith.constant 0 : index
    %c0_0 = arith.constant 0 : index
    %c0_1 = arith.constant 0 : index
    %c0_2 = arith.constant 0 : index
    %1 = vector.load %arg1[%c0, %c0_0, %c0_1, %c0_2] : memref<1x9x9x8xf32, #tpu.memory_space<vmem>>, vector<1x8x8x8xf32>
    %2 = vector.shape_cast %1 : vector<1x8x8x8xf32> to vector<8x8x8xf32>
    %3 = vector.shape_cast %2 : vector<8x8x8xf32> to vector<64x8xf32>
    %c0_3 = arith.constant 0 : index
    %c0_4 = arith.constant 0 : index
    %c0_5 = arith.constant 0 : index
    %4 = vector.load %arg2[%c0_3, %c0_4, %c0_5] : memref<4x8x16xf32, #tpu.memory_space<vmem>>, vector<1x8x16xf32>
    %5 = vector.shape_cast %4 : vector<1x8x16xf32> to vector<8x16xf32>
    %cst_6 = arith.constant dense<0.000000e+00> : vector<64x16xf32>
    %6 = tpu.matmul %3, %5, %cst_6 {dimension_numbers = #tpu.dot_dimension_numbers<[1], [0], [0], [1], [0, 0, 1, 1], [], []>} : vector<64x8xf32>, vector<8x16xf32>, vector<64x16xf32> -> vector<64x16xf32>
    %7 = arith.addf %0, %6 : vector<64x16xf32>
    %c0_7 = arith.constant 0 : index
    %c0_8 = arith.constant 0 : index
    %c1 = arith.constant 1 : index
    %c0_9 = arith.constant 0 : index
    %8 = vector.load %arg1[%c0_7, %c0_8, %c1, %c0_9] : memref<1x9x9x8xf32, #tpu.memory_space<vmem>>, vector<1x8x8x8xf32>
    %9 = vector.shape_cast %8 : vector<1x8x8x8xf32> to vector<8x8x8xf32>
    %10 = vector.shape_cast %9 : vector<8x8x8xf32> to vector<64x8xf32>
    %c1_10 = arith.constant 1 : index
    %c0_11 = arith.constant 0 : index
    %c0_12 = arith.constant 0 : index
    %11 = vector.load %arg2[%c1_10, %c0_11, %c0_12] : memref<4x8x16xf32, #tpu.memory_space<vmem>>, vector<1x8x16xf32>
    %12 = vector.shape_cast %11 : vector<1x8x16xf32> to vector<8x16xf32>
    %cst_13 = arith.constant dense<0.000000e+00> : vector<64x16xf32>
    %13 = tpu.matmul %10, %12, %cst_13 {dimension_numbers = #tpu.dot_dimension_numbers<[1], [0], [0], [1], [0, 0, 1, 1], [], []>} : vector<64x8xf32>, vector<8x16xf32>, vector<64x16xf32> -> vector<64x16xf32>
    %14 = arith.addf %7, %13 : vector<64x16xf32>
    %c0_14 = arith.constant 0 : index
    %c1_15 = arith.constant 1 : index
    %c0_16 = arith.constant 0 : index
    %c0_17 = arith.constant 0 : index
    %15 = vector.load %arg1[%c0_14, %c1_15, %c0_16, %c0_17] : memref<1x9x9x8xf32, #tpu.memory_space<vmem>>, vector<1x8x8x8xf32>
    %16 = vector.shape_cast %15 : vector<1x8x8x8xf32> to vector<8x8x8xf32>
    %17 = vector.shape_cast %16 : vector<8x8x8xf32> to vector<64x8xf32>
    %c2 = arith.constant 2 : index
    %c0_18 = arith.constant 0 : index
    %c0_19 = arith.constant 0 : index
    %18 = vector.load %arg2[%c2, %c0_18, %c0_19] : memref<4x8x16xf32, #tpu.memory_space<vmem>>, vector<1x8x16xf32>
    %19 = vector.shape_cast %18 : vector<1x8x16xf32> to vector<8x16xf32>
    %cst_20 = arith.constant dense<0.000000e+00> : vector<64x16xf32>
    %20 = tpu.matmul %17, %19, %cst_20 {dimension_numbers = #tpu.dot_dimension_numbers<[1], [0], [0], [1], [0, 0, 1, 1], [], []>} : vector<64x8xf32>, vector<8x16xf32>, vector<64x16xf32> -> vector<64x16xf32>
    %21 = arith.addf %14, %20 : vector<64x16xf32>
    %c0_21 = arith.constant 0 : index
    %c1_22 = arith.constant 1 : index
    %c1_23 = arith.constant 1 : index
    %c0_24 = arith.constant 0 : index
    %22 = vector.load %arg1[%c0_21, %c1_22, %c1_23, %c0_24] : memref<1x9x9x8xf32, #tpu.memory_space<vmem>>, vector<1x8x8x8xf32>
    %23 = vector.shape_cast %22 : vector<1x8x8x8xf32> to vector<8x8x8xf32>
    %24 = vector.shape_cast %23 : vector<8x8x8xf32> to vector<64x8xf32>
    %c3 = arith.constant 3 : index
    %c0_25 = arith.constant 0 : index
    %c0_26 = arith.constant 0 : index
    %25 = vector.load %arg2[%c3, %c0_25, %c0_26] : memref<4x8x16xf32, #tpu.memory_space<vmem>>, vector<1x8x16xf32>
    %26 = vector.shape_cast %25 : vector<1x8x16xf32> to vector<8x16xf32>
    %cst_27 = arith.constant dense<0.000000e+00> : vector<64x16xf32>
    %27 = tpu.matmul %24, %26, %cst_27 {dimension_numbers = #tpu.dot_dimension_numbers<[1], [0], [0], [1], [0, 0, 1, 1], [], []>} : vector<64x8xf32>, vector<8x16xf32>, vector<64x16xf32> -> vector<64x16xf32>
    %28 = arith.addf %21, %27 : vector<64x16xf32>
    %c0_28 = arith.constant 0 : index
    %c0_29 = arith.constant 0 : index
    %29 = vector.load %arg3[%c0_28, %c0_29] : memref<1x16xf32, #tpu.memory_space<vmem>>, vector<1x16xf32>
    %30 = vector.broadcast %29 : vector<1x16xf32> to vector<64x16xf32>
    %31 = arith.mulf %28, %30 : vector<64x16xf32>
    %c0_30 = arith.constant 0 : index
    %c0_31 = arith.constant 0 : index
    %32 = vector.load %arg4[%c0_30, %c0_31] : memref<1x16xf32, #tpu.memory_space<vmem>>, vector<1x16xf32>
    %33 = vector.broadcast %32 : vector<1x16xf32> to vector<64x16xf32>
    %34 = arith.addf %31, %33 : vector<64x16xf32>
    %cst_32 = arith.constant 0.000000e+00 : f32
    %35 = vector.broadcast %cst_32 : f32 to vector<64x16xf32>
    %36 = arith.maximumf %34, %35 : vector<64x16xf32>
    %cst_33 = arith.constant 0.000000e+00 : f32
    %37 = vector.broadcast %cst_33 : f32 to vector<1x10x10x16xf32>
    %c0_34 = arith.constant 0 : index
    %c0_35 = arith.constant 0 : index
    %c0_36 = arith.constant 0 : index
    %c0_37 = arith.constant 0 : index
    %38 = vector.load %arg5[%c0_34, %c0_35, %c0_36, %c0_37] : memref<1x10x10x16xf32, #tpu.memory_space<vmem>>, vector<1x10x10x16xf32>
    tpu.vector_store %arg5[%c0_34, %c0_35, %c0_36, %c0_37], %37 {strides = array<i32>} : memref<1x10x10x16xf32, #tpu.memory_space<vmem>>, vector<1x10x10x16xf32>,
    %39 = vector.shape_cast %36 : vector<64x16xf32> to vector<8x8x16xf32>
    %c0_38 = arith.constant 0 : index
    %c1_39 = arith.constant 1 : index
    %c1_40 = arith.constant 1 : index
    %c0_41 = arith.constant 0 : index
    %40 = vector.load %arg5[%c0_38, %c1_39, %c1_40, %c0_41] : memref<1x10x10x16xf32, #tpu.memory_space<vmem>>, vector<1x8x8x16xf32>
    %41 = vector.shape_cast %40 : vector<1x8x8x16xf32> to vector<8x8x16xf32>
    %42 = vector.shape_cast %39 : vector<8x8x16xf32> to vector<1x8x8x16xf32>
    tpu.vector_store %arg5[%c0_38, %c1_39, %c1_40, %c0_41], %42 {strides = array<i32>} : memref<1x10x10x16xf32, #tpu.memory_space<vmem>>, vector<1x8x8x16xf32>,
    return
  }
  func.func @transform_0(%arg0: i32) -> (i32, i32, i32, i32) {
    %c0_i32 = arith.constant 0 : i32
    %c0_i32_0 = arith.constant 0 : i32
    %c0_i32_1 = arith.constant 0 : i32
    %c0_i32_2 = arith.constant 0 : i32
    return %arg0, %c0_i32, %c0_i32_0, %c0_i32_1 : i32, i32, i32, i32
  }
  func.func @transform_1(%arg0: i32) -> (i32, i32, i32) {
    %c0_i32 = arith.constant 0 : i32
    %c0_i32_0 = arith.constant 0 : i32
    %c0_i32_1 = arith.constant 0 : i32
    %c0_i32_2 = arith.constant 0 : i32
    return %c0_i32, %c0_i32_0, %c0_i32_1 : i32, i32, i32
  }
  func.func @transform_2(%arg0: i32) -> (i32, i32) {
    %c0_i32 = arith.constant 0 : i32
    %c0_i32_0 = arith.constant 0 : i32
    %c0_i32_1 = arith.constant 0 : i32
    return %c0_i32, %c0_i32_0 : i32, i32
  }
  func.func @transform_3(%arg0: i32) -> (i32, i32) {
    %c0_i32 = arith.constant 0 : i32
    %c0_i32_0 = arith.constant 0 : i32
    %c0_i32_1 = arith.constant 0 : i32
    return %c0_i32, %c0_i32_0 : i32, i32
  }
  func.func @transform_4(%arg0: i32) -> (i32, i32, i32, i32) {
    %c0_i32 = arith.constant 0 : i32
    %c0_i32_0 = arith.constant 0 : i32
    %c0_i32_1 = arith.constant 0 : i32
    %c0_i32_2 = arith.constant 0 : i32
    return %arg0, %c0_i32, %c0_i32_0, %c0_i32_1 : i32, i32, i32, i32
  }
}

module attributes {stable_mosaic.version = 11 : i64} {
  func.func @_stem34_kernel(%arg0: i32, %arg1: memref<1x5x2x5x2x16xf32, #tpu.memory_space<vmem>>, %arg2: memref<1x5x2x5x2x16xf32, #tpu.memory_space<vmem>>, %arg3: memref<9x16x16xf32, #tpu.memory_space<vmem>>, %arg4: memref<9x16x16xf32, #tpu.memory_space<vmem>>, %arg5: memref<1x16xf32, #tpu.memory_space<vmem>>, %arg6: memref<1x16xf32, #tpu.memory_space<vmem>>, %arg7: memref<16x32xf32, #tpu.memory_space<vmem>>, %arg8: memref<1x32xf32, #tpu.memory_space<vmem>>, %arg9: memref<1x32xf32, #tpu.memory_space<vmem>>, %arg10: memref<1x4x4x32xf32, #tpu.memory_space<vmem>>) attributes {dimension_semantics = [#tpu.dimension_semantics<parallel>], iteration_bounds = array<i64: 2>, scalar_prefetch = 0 : i64, scratch_operands = 0 : i64, tpu.core_type = #tpu.core_type<tc>, window_params = [{transform_indices = @transform_0, window_bounds = array<i64: 1, 5, 2, 5, 2, 16>}, {transform_indices = @transform_1, window_bounds = array<i64: 1, 5, 2, 5, 2, 16>}, {pipeline_mode = #tpu.pipeline_mode<synchronous>, transform_indices = @transform_2, window_bounds = array<i64: 9, 16, 16>}, {pipeline_mode = #tpu.pipeline_mode<synchronous>, transform_indices = @transform_3, window_bounds = array<i64: 9, 16, 16>}, {pipeline_mode = #tpu.pipeline_mode<synchronous>, transform_indices = @transform_4, window_bounds = array<i64: 1, 16>}, {pipeline_mode = #tpu.pipeline_mode<synchronous>, transform_indices = @transform_5, window_bounds = array<i64: 1, 16>}, {pipeline_mode = #tpu.pipeline_mode<synchronous>, transform_indices = @transform_6, window_bounds = array<i64: 16, 32>}, {pipeline_mode = #tpu.pipeline_mode<synchronous>, transform_indices = @transform_7, window_bounds = array<i64: 1, 32>}, {pipeline_mode = #tpu.pipeline_mode<synchronous>, transform_indices = @transform_8, window_bounds = array<i64: 1, 32>}, {transform_indices = @transform_9, window_bounds = array<i64: 1, 4, 4, 32>}]} {
    %cst = arith.constant 0.000000e+00 : f32
    %0 = vector.broadcast %cst : f32 to vector<16x16xf32>
    %c0 = arith.constant 0 : index
    %c0_0 = arith.constant 0 : index
    %c0_1 = arith.constant 0 : index
    %c0_2 = arith.constant 0 : index
    %c0_3 = arith.constant 0 : index
    %c0_4 = arith.constant 0 : index
    %1 = vector.load %arg1[%c0, %c0_0, %c0_1, %c0_2, %c0_3, %c0_4] : memref<1x5x2x5x2x16xf32, #tpu.memory_space<vmem>>, vector<1x4x1x4x1x16xf32>
    %2 = vector.shape_cast %1 : vector<1x4x1x4x1x16xf32> to vector<4x4x16xf32>
    %3 = vector.shape_cast %2 : vector<4x4x16xf32> to vector<16x16xf32>
    %c0_5 = arith.constant 0 : index
    %c0_6 = arith.constant 0 : index
    %c0_7 = arith.constant 0 : index
    %4 = vector.load %arg3[%c0_5, %c0_6, %c0_7] : memref<9x16x16xf32, #tpu.memory_space<vmem>>, vector<1x16x16xf32>
    %5 = vector.shape_cast %4 : vector<1x16x16xf32> to vector<16x16xf32>
    %cst_8 = arith.constant dense<0.000000e+00> : vector<16x16xf32>
    %6 = tpu.matmul %3, %5, %cst_8 {dimension_numbers = #tpu.dot_dimension_numbers<[1], [0], [0], [1], [0, 0, 1, 1], [], []>} : vector<16x16xf32>, vector<16x16xf32>, vector<16x16xf32> -> vector<16x16xf32>
    %7 = arith.addf %0, %6 : vector<16x16xf32>
    %c0_9 = arith.constant 0 : index
    %c0_10 = arith.constant 0 : index
    %c0_11 = arith.constant 0 : index
    %c0_12 = arith.constant 0 : index
    %c1 = arith.constant 1 : index
    %c0_13 = arith.constant 0 : index
    %8 = vector.load %arg1[%c0_9, %c0_10, %c0_11, %c0_12, %c1, %c0_13] : memref<1x5x2x5x2x16xf32, #tpu.memory_space<vmem>>, vector<1x4x1x4x1x16xf32>
    %9 = vector.shape_cast %8 : vector<1x4x1x4x1x16xf32> to vector<4x4x16xf32>
    %10 = vector.shape_cast %9 : vector<4x4x16xf32> to vector<16x16xf32>
    %c1_14 = arith.constant 1 : index
    %c0_15 = arith.constant 0 : index
    %c0_16 = arith.constant 0 : index
    %11 = vector.load %arg3[%c1_14, %c0_15, %c0_16] : memref<9x16x16xf32, #tpu.memory_space<vmem>>, vector<1x16x16xf32>
    %12 = vector.shape_cast %11 : vector<1x16x16xf32> to vector<16x16xf32>
    %cst_17 = arith.constant dense<0.000000e+00> : vector<16x16xf32>
    %13 = tpu.matmul %10, %12, %cst_17 {dimension_numbers = #tpu.dot_dimension_numbers<[1], [0], [0], [1], [0, 0, 1, 1], [], []>} : vector<16x16xf32>, vector<16x16xf32>, vector<16x16xf32> -> vector<16x16xf32>
    %14 = arith.addf %7, %13 : vector<16x16xf32>
    %c0_18 = arith.constant 0 : index
    %c0_19 = arith.constant 0 : index
    %c0_20 = arith.constant 0 : index
    %c1_21 = arith.constant 1 : index
    %c0_22 = arith.constant 0 : index
    %c0_23 = arith.constant 0 : index
    %15 = vector.load %arg1[%c0_18, %c0_19, %c0_20, %c1_21, %c0_22, %c0_23] : memref<1x5x2x5x2x16xf32, #tpu.memory_space<vmem>>, vector<1x4x1x4x1x16xf32>
    %16 = vector.shape_cast %15 : vector<1x4x1x4x1x16xf32> to vector<4x4x16xf32>
    %17 = vector.shape_cast %16 : vector<4x4x16xf32> to vector<16x16xf32>
    %c2 = arith.constant 2 : index
    %c0_24 = arith.constant 0 : index
    %c0_25 = arith.constant 0 : index
    %18 = vector.load %arg3[%c2, %c0_24, %c0_25] : memref<9x16x16xf32, #tpu.memory_space<vmem>>, vector<1x16x16xf32>
    %19 = vector.shape_cast %18 : vector<1x16x16xf32> to vector<16x16xf32>
    %cst_26 = arith.constant dense<0.000000e+00> : vector<16x16xf32>
    %20 = tpu.matmul %17, %19, %cst_26 {dimension_numbers = #tpu.dot_dimension_numbers<[1], [0], [0], [1], [0, 0, 1, 1], [], []>} : vector<16x16xf32>, vector<16x16xf32>, vector<16x16xf32> -> vector<16x16xf32>
    %21 = arith.addf %14, %20 : vector<16x16xf32>
    %c0_27 = arith.constant 0 : index
    %c0_28 = arith.constant 0 : index
    %c1_29 = arith.constant 1 : index
    %c0_30 = arith.constant 0 : index
    %c0_31 = arith.constant 0 : index
    %c0_32 = arith.constant 0 : index
    %22 = vector.load %arg1[%c0_27, %c0_28, %c1_29, %c0_30, %c0_31, %c0_32] : memref<1x5x2x5x2x16xf32, #tpu.memory_space<vmem>>, vector<1x4x1x4x1x16xf32>
    %23 = vector.shape_cast %22 : vector<1x4x1x4x1x16xf32> to vector<4x4x16xf32>
    %24 = vector.shape_cast %23 : vector<4x4x16xf32> to vector<16x16xf32>
    %c3 = arith.constant 3 : index
    %c0_33 = arith.constant 0 : index
    %c0_34 = arith.constant 0 : index
    %25 = vector.load %arg3[%c3, %c0_33, %c0_34] : memref<9x16x16xf32, #tpu.memory_space<vmem>>, vector<1x16x16xf32>
    %26 = vector.shape_cast %25 : vector<1x16x16xf32> to vector<16x16xf32>
    %cst_35 = arith.constant dense<0.000000e+00> : vector<16x16xf32>
    %27 = tpu.matmul %24, %26, %cst_35 {dimension_numbers = #tpu.dot_dimension_numbers<[1], [0], [0], [1], [0, 0, 1, 1], [], []>} : vector<16x16xf32>, vector<16x16xf32>, vector<16x16xf32> -> vector<16x16xf32>
    %28 = arith.addf %21, %27 : vector<16x16xf32>
    %c0_36 = arith.constant 0 : index
    %c0_37 = arith.constant 0 : index
    %c1_38 = arith.constant 1 : index
    %c0_39 = arith.constant 0 : index
    %c1_40 = arith.constant 1 : index
    %c0_41 = arith.constant 0 : index
    %29 = vector.load %arg1[%c0_36, %c0_37, %c1_38, %c0_39, %c1_40, %c0_41] : memref<1x5x2x5x2x16xf32, #tpu.memory_space<vmem>>, vector<1x4x1x4x1x16xf32>
    %30 = vector.shape_cast %29 : vector<1x4x1x4x1x16xf32> to vector<4x4x16xf32>
    %31 = vector.shape_cast %30 : vector<4x4x16xf32> to vector<16x16xf32>
    %c4 = arith.constant 4 : index
    %c0_42 = arith.constant 0 : index
    %c0_43 = arith.constant 0 : index
    %32 = vector.load %arg3[%c4, %c0_42, %c0_43] : memref<9x16x16xf32, #tpu.memory_space<vmem>>, vector<1x16x16xf32>
    %33 = vector.shape_cast %32 : vector<1x16x16xf32> to vector<16x16xf32>
    %cst_44 = arith.constant dense<0.000000e+00> : vector<16x16xf32>
    %34 = tpu.matmul %31, %33, %cst_44 {dimension_numbers = #tpu.dot_dimension_numbers<[1], [0], [0], [1], [0, 0, 1, 1], [], []>} : vector<16x16xf32>, vector<16x16xf32>, vector<16x16xf32> -> vector<16x16xf32>
    %35 = arith.addf %28, %34 : vector<16x16xf32>
    %c0_45 = arith.constant 0 : index
    %c0_46 = arith.constant 0 : index
    %c1_47 = arith.constant 1 : index
    %c1_48 = arith.constant 1 : index
    %c0_49 = arith.constant 0 : index
    %c0_50 = arith.constant 0 : index
    %36 = vector.load %arg1[%c0_45, %c0_46, %c1_47, %c1_48, %c0_49, %c0_50] : memref<1x5x2x5x2x16xf32, #tpu.memory_space<vmem>>, vector<1x4x1x4x1x16xf32>
    %37 = vector.shape_cast %36 : vector<1x4x1x4x1x16xf32> to vector<4x4x16xf32>
    %38 = vector.shape_cast %37 : vector<4x4x16xf32> to vector<16x16xf32>
    %c5 = arith.constant 5 : index
    %c0_51 = arith.constant 0 : index
    %c0_52 = arith.constant 0 : index
    %39 = vector.load %arg3[%c5, %c0_51, %c0_52] : memref<9x16x16xf32, #tpu.memory_space<vmem>>, vector<1x16x16xf32>
    %40 = vector.shape_cast %39 : vector<1x16x16xf32> to vector<16x16xf32>
    %cst_53 = arith.constant dense<0.000000e+00> : vector<16x16xf32>
    %41 = tpu.matmul %38, %40, %cst_53 {dimension_numbers = #tpu.dot_dimension_numbers<[1], [0], [0], [1], [0, 0, 1, 1], [], []>} : vector<16x16xf32>, vector<16x16xf32>, vector<16x16xf32> -> vector<16x16xf32>
    %42 = arith.addf %35, %41 : vector<16x16xf32>
    %c0_54 = arith.constant 0 : index
    %c1_55 = arith.constant 1 : index
    %c0_56 = arith.constant 0 : index
    %c0_57 = arith.constant 0 : index
    %c0_58 = arith.constant 0 : index
    %c0_59 = arith.constant 0 : index
    %43 = vector.load %arg1[%c0_54, %c1_55, %c0_56, %c0_57, %c0_58, %c0_59] : memref<1x5x2x5x2x16xf32, #tpu.memory_space<vmem>>, vector<1x4x1x4x1x16xf32>
    %44 = vector.shape_cast %43 : vector<1x4x1x4x1x16xf32> to vector<4x4x16xf32>
    %45 = vector.shape_cast %44 : vector<4x4x16xf32> to vector<16x16xf32>
    %c6 = arith.constant 6 : index
    %c0_60 = arith.constant 0 : index
    %c0_61 = arith.constant 0 : index
    %46 = vector.load %arg3[%c6, %c0_60, %c0_61] : memref<9x16x16xf32, #tpu.memory_space<vmem>>, vector<1x16x16xf32>
    %47 = vector.shape_cast %46 : vector<1x16x16xf32> to vector<16x16xf32>
    %cst_62 = arith.constant dense<0.000000e+00> : vector<16x16xf32>
    %48 = tpu.matmul %45, %47, %cst_62 {dimension_numbers = #tpu.dot_dimension_numbers<[1], [0], [0], [1], [0, 0, 1, 1], [], []>} : vector<16x16xf32>, vector<16x16xf32>, vector<16x16xf32> -> vector<16x16xf32>
    %49 = arith.addf %42, %48 : vector<16x16xf32>
    %c0_63 = arith.constant 0 : index
    %c1_64 = arith.constant 1 : index
    %c0_65 = arith.constant 0 : index
    %c0_66 = arith.constant 0 : index
    %c1_67 = arith.constant 1 : index
    %c0_68 = arith.constant 0 : index
    %50 = vector.load %arg1[%c0_63, %c1_64, %c0_65, %c0_66, %c1_67, %c0_68] : memref<1x5x2x5x2x16xf32, #tpu.memory_space<vmem>>, vector<1x4x1x4x1x16xf32>
    %51 = vector.shape_cast %50 : vector<1x4x1x4x1x16xf32> to vector<4x4x16xf32>
    %52 = vector.shape_cast %51 : vector<4x4x16xf32> to vector<16x16xf32>
    %c7 = arith.constant 7 : index
    %c0_69 = arith.constant 0 : index
    %c0_70 = arith.constant 0 : index
    %53 = vector.load %arg3[%c7, %c0_69, %c0_70] : memref<9x16x16xf32, #tpu.memory_space<vmem>>, vector<1x16x16xf32>
    %54 = vector.shape_cast %53 : vector<1x16x16xf32> to vector<16x16xf32>
    %cst_71 = arith.constant dense<0.000000e+00> : vector<16x16xf32>
    %55 = tpu.matmul %52, %54, %cst_71 {dimension_numbers = #tpu.dot_dimension_numbers<[1], [0], [0], [1], [0, 0, 1, 1], [], []>} : vector<16x16xf32>, vector<16x16xf32>, vector<16x16xf32> -> vector<16x16xf32>
    %56 = arith.addf %49, %55 : vector<16x16xf32>
    %c0_72 = arith.constant 0 : index
    %c1_73 = arith.constant 1 : index
    %c0_74 = arith.constant 0 : index
    %c1_75 = arith.constant 1 : index
    %c0_76 = arith.constant 0 : index
    %c0_77 = arith.constant 0 : index
    %57 = vector.load %arg1[%c0_72, %c1_73, %c0_74, %c1_75, %c0_76, %c0_77] : memref<1x5x2x5x2x16xf32, #tpu.memory_space<vmem>>, vector<1x4x1x4x1x16xf32>
    %58 = vector.shape_cast %57 : vector<1x4x1x4x1x16xf32> to vector<4x4x16xf32>
    %59 = vector.shape_cast %58 : vector<4x4x16xf32> to vector<16x16xf32>
    %c8 = arith.constant 8 : index
    %c0_78 = arith.constant 0 : index
    %c0_79 = arith.constant 0 : index
    %60 = vector.load %arg3[%c8, %c0_78, %c0_79] : memref<9x16x16xf32, #tpu.memory_space<vmem>>, vector<1x16x16xf32>
    %61 = vector.shape_cast %60 : vector<1x16x16xf32> to vector<16x16xf32>
    %cst_80 = arith.constant dense<0.000000e+00> : vector<16x16xf32>
    %62 = tpu.matmul %59, %61, %cst_80 {dimension_numbers = #tpu.dot_dimension_numbers<[1], [0], [0], [1], [0, 0, 1, 1], [], []>} : vector<16x16xf32>, vector<16x16xf32>, vector<16x16xf32> -> vector<16x16xf32>
    %63 = arith.addf %56, %62 : vector<16x16xf32>
    %c0_81 = arith.constant 0 : index
    %c0_82 = arith.constant 0 : index
    %c0_83 = arith.constant 0 : index
    %c0_84 = arith.constant 0 : index
    %c0_85 = arith.constant 0 : index
    %c0_86 = arith.constant 0 : index
    %64 = vector.load %arg2[%c0_81, %c0_82, %c0_83, %c0_84, %c0_85, %c0_86] : memref<1x5x2x5x2x16xf32, #tpu.memory_space<vmem>>, vector<1x4x1x4x1x16xf32>
    %65 = vector.shape_cast %64 : vector<1x4x1x4x1x16xf32> to vector<4x4x16xf32>
    %66 = vector.shape_cast %65 : vector<4x4x16xf32> to vector<16x16xf32>
    %c0_87 = arith.constant 0 : index
    %c0_88 = arith.constant 0 : index
    %c0_89 = arith.constant 0 : index
    %67 = vector.load %arg4[%c0_87, %c0_88, %c0_89] : memref<9x16x16xf32, #tpu.memory_space<vmem>>, vector<1x16x16xf32>
    %68 = vector.shape_cast %67 : vector<1x16x16xf32> to vector<16x16xf32>
    %cst_90 = arith.constant dense<0.000000e+00> : vector<16x16xf32>
    %69 = tpu.matmul %66, %68, %cst_90 {dimension_numbers = #tpu.dot_dimension_numbers<[1], [0], [0], [1], [0, 0, 1, 1], [], []>} : vector<16x16xf32>, vector<16x16xf32>, vector<16x16xf32> -> vector<16x16xf32>
    %70 = arith.addf %63, %69 : vector<16x16xf32>
    %c0_91 = arith.constant 0 : index
    %c0_92 = arith.constant 0 : index
    %c0_93 = arith.constant 0 : index
    %c0_94 = arith.constant 0 : index
    %c1_95 = arith.constant 1 : index
    %c0_96 = arith.constant 0 : index
    %71 = vector.load %arg2[%c0_91, %c0_92, %c0_93, %c0_94, %c1_95, %c0_96] : memref<1x5x2x5x2x16xf32, #tpu.memory_space<vmem>>, vector<1x4x1x4x1x16xf32>
    %72 = vector.shape_cast %71 : vector<1x4x1x4x1x16xf32> to vector<4x4x16xf32>
    %73 = vector.shape_cast %72 : vector<4x4x16xf32> to vector<16x16xf32>
    %c1_97 = arith.constant 1 : index
    %c0_98 = arith.constant 0 : index
    %c0_99 = arith.constant 0 : index
    %74 = vector.load %arg4[%c1_97, %c0_98, %c0_99] : memref<9x16x16xf32, #tpu.memory_space<vmem>>, vector<1x16x16xf32>
    %75 = vector.shape_cast %74 : vector<1x16x16xf32> to vector<16x16xf32>
    %cst_100 = arith.constant dense<0.000000e+00> : vector<16x16xf32>
    %76 = tpu.matmul %73, %75, %cst_100 {dimension_numbers = #tpu.dot_dimension_numbers<[1], [0], [0], [1], [0, 0, 1, 1], [], []>} : vector<16x16xf32>, vector<16x16xf32>, vector<16x16xf32> -> vector<16x16xf32>
    %77 = arith.addf %70, %76 : vector<16x16xf32>
    %c0_101 = arith.constant 0 : index
    %c0_102 = arith.constant 0 : index
    %c0_103 = arith.constant 0 : index
    %c1_104 = arith.constant 1 : index
    %c0_105 = arith.constant 0 : index
    %c0_106 = arith.constant 0 : index
    %78 = vector.load %arg2[%c0_101, %c0_102, %c0_103, %c1_104, %c0_105, %c0_106] : memref<1x5x2x5x2x16xf32, #tpu.memory_space<vmem>>, vector<1x4x1x4x1x16xf32>
    %79 = vector.shape_cast %78 : vector<1x4x1x4x1x16xf32> to vector<4x4x16xf32>
    %80 = vector.shape_cast %79 : vector<4x4x16xf32> to vector<16x16xf32>
    %c2_107 = arith.constant 2 : index
    %c0_108 = arith.constant 0 : index
    %c0_109 = arith.constant 0 : index
    %81 = vector.load %arg4[%c2_107, %c0_108, %c0_109] : memref<9x16x16xf32, #tpu.memory_space<vmem>>, vector<1x16x16xf32>
    %82 = vector.shape_cast %81 : vector<1x16x16xf32> to vector<16x16xf32>
    %cst_110 = arith.constant dense<0.000000e+00> : vector<16x16xf32>
    %83 = tpu.matmul %80, %82, %cst_110 {dimension_numbers = #tpu.dot_dimension_numbers<[1], [0], [0], [1], [0, 0, 1, 1], [], []>} : vector<16x16xf32>, vector<16x16xf32>, vector<16x16xf32> -> vector<16x16xf32>
    %84 = arith.addf %77, %83 : vector<16x16xf32>
    %c0_111 = arith.constant 0 : index
    %c0_112 = arith.constant 0 : index
    %c1_113 = arith.constant 1 : index
    %c0_114 = arith.constant 0 : index
    %c0_115 = arith.constant 0 : index
    %c0_116 = arith.constant 0 : index
    %85 = vector.load %arg2[%c0_111, %c0_112, %c1_113, %c0_114, %c0_115, %c0_116] : memref<1x5x2x5x2x16xf32, #tpu.memory_space<vmem>>, vector<1x4x1x4x1x16xf32>
    %86 = vector.shape_cast %85 : vector<1x4x1x4x1x16xf32> to vector<4x4x16xf32>
    %87 = vector.shape_cast %86 : vector<4x4x16xf32> to vector<16x16xf32>
    %c3_117 = arith.constant 3 : index
    %c0_118 = arith.constant 0 : index
    %c0_119 = arith.constant 0 : index
    %88 = vector.load %arg4[%c3_117, %c0_118, %c0_119] : memref<9x16x16xf32, #tpu.memory_space<vmem>>, vector<1x16x16xf32>
    %89 = vector.shape_cast %88 : vector<1x16x16xf32> to vector<16x16xf32>
    %cst_120 = arith.constant dense<0.000000e+00> : vector<16x16xf32>
    %90 = tpu.matmul %87, %89, %cst_120 {dimension_numbers = #tpu.dot_dimension_numbers<[1], [0], [0], [1], [0, 0, 1, 1], [], []>} : vector<16x16xf32>, vector<16x16xf32>, vector<16x16xf32> -> vector<16x16xf32>
    %91 = arith.addf %84, %90 : vector<16x16xf32>
    %c0_121 = arith.constant 0 : index
    %c0_122 = arith.constant 0 : index
    %c1_123 = arith.constant 1 : index
    %c0_124 = arith.constant 0 : index
    %c1_125 = arith.constant 1 : index
    %c0_126 = arith.constant 0 : index
    %92 = vector.load %arg2[%c0_121, %c0_122, %c1_123, %c0_124, %c1_125, %c0_126] : memref<1x5x2x5x2x16xf32, #tpu.memory_space<vmem>>, vector<1x4x1x4x1x16xf32>
    %93 = vector.shape_cast %92 : vector<1x4x1x4x1x16xf32> to vector<4x4x16xf32>
    %94 = vector.shape_cast %93 : vector<4x4x16xf32> to vector<16x16xf32>
    %c4_127 = arith.constant 4 : index
    %c0_128 = arith.constant 0 : index
    %c0_129 = arith.constant 0 : index
    %95 = vector.load %arg4[%c4_127, %c0_128, %c0_129] : memref<9x16x16xf32, #tpu.memory_space<vmem>>, vector<1x16x16xf32>
    %96 = vector.shape_cast %95 : vector<1x16x16xf32> to vector<16x16xf32>
    %cst_130 = arith.constant dense<0.000000e+00> : vector<16x16xf32>
    %97 = tpu.matmul %94, %96, %cst_130 {dimension_numbers = #tpu.dot_dimension_numbers<[1], [0], [0], [1], [0, 0, 1, 1], [], []>} : vector<16x16xf32>, vector<16x16xf32>, vector<16x16xf32> -> vector<16x16xf32>
    %98 = arith.addf %91, %97 : vector<16x16xf32>
    %c0_131 = arith.constant 0 : index
    %c0_132 = arith.constant 0 : index
    %c1_133 = arith.constant 1 : index
    %c1_134 = arith.constant 1 : index
    %c0_135 = arith.constant 0 : index
    %c0_136 = arith.constant 0 : index
    %99 = vector.load %arg2[%c0_131, %c0_132, %c1_133, %c1_134, %c0_135, %c0_136] : memref<1x5x2x5x2x16xf32, #tpu.memory_space<vmem>>, vector<1x4x1x4x1x16xf32>
    %100 = vector.shape_cast %99 : vector<1x4x1x4x1x16xf32> to vector<4x4x16xf32>
    %101 = vector.shape_cast %100 : vector<4x4x16xf32> to vector<16x16xf32>
    %c5_137 = arith.constant 5 : index
    %c0_138 = arith.constant 0 : index
    %c0_139 = arith.constant 0 : index
    %102 = vector.load %arg4[%c5_137, %c0_138, %c0_139] : memref<9x16x16xf32, #tpu.memory_space<vmem>>, vector<1x16x16xf32>
    %103 = vector.shape_cast %102 : vector<1x16x16xf32> to vector<16x16xf32>
    %cst_140 = arith.constant dense<0.000000e+00> : vector<16x16xf32>
    %104 = tpu.matmul %101, %103, %cst_140 {dimension_numbers = #tpu.dot_dimension_numbers<[1], [0], [0], [1], [0, 0, 1, 1], [], []>} : vector<16x16xf32>, vector<16x16xf32>, vector<16x16xf32> -> vector<16x16xf32>
    %105 = arith.addf %98, %104 : vector<16x16xf32>
    %c0_141 = arith.constant 0 : index
    %c1_142 = arith.constant 1 : index
    %c0_143 = arith.constant 0 : index
    %c0_144 = arith.constant 0 : index
    %c0_145 = arith.constant 0 : index
    %c0_146 = arith.constant 0 : index
    %106 = vector.load %arg2[%c0_141, %c1_142, %c0_143, %c0_144, %c0_145, %c0_146] : memref<1x5x2x5x2x16xf32, #tpu.memory_space<vmem>>, vector<1x4x1x4x1x16xf32>
    %107 = vector.shape_cast %106 : vector<1x4x1x4x1x16xf32> to vector<4x4x16xf32>
    %108 = vector.shape_cast %107 : vector<4x4x16xf32> to vector<16x16xf32>
    %c6_147 = arith.constant 6 : index
    %c0_148 = arith.constant 0 : index
    %c0_149 = arith.constant 0 : index
    %109 = vector.load %arg4[%c6_147, %c0_148, %c0_149] : memref<9x16x16xf32, #tpu.memory_space<vmem>>, vector<1x16x16xf32>
    %110 = vector.shape_cast %109 : vector<1x16x16xf32> to vector<16x16xf32>
    %cst_150 = arith.constant dense<0.000000e+00> : vector<16x16xf32>
    %111 = tpu.matmul %108, %110, %cst_150 {dimension_numbers = #tpu.dot_dimension_numbers<[1], [0], [0], [1], [0, 0, 1, 1], [], []>} : vector<16x16xf32>, vector<16x16xf32>, vector<16x16xf32> -> vector<16x16xf32>
    %112 = arith.addf %105, %111 : vector<16x16xf32>
    %c0_151 = arith.constant 0 : index
    %c1_152 = arith.constant 1 : index
    %c0_153 = arith.constant 0 : index
    %c0_154 = arith.constant 0 : index
    %c1_155 = arith.constant 1 : index
    %c0_156 = arith.constant 0 : index
    %113 = vector.load %arg2[%c0_151, %c1_152, %c0_153, %c0_154, %c1_155, %c0_156] : memref<1x5x2x5x2x16xf32, #tpu.memory_space<vmem>>, vector<1x4x1x4x1x16xf32>
    %114 = vector.shape_cast %113 : vector<1x4x1x4x1x16xf32> to vector<4x4x16xf32>
    %115 = vector.shape_cast %114 : vector<4x4x16xf32> to vector<16x16xf32>
    %c7_157 = arith.constant 7 : index
    %c0_158 = arith.constant 0 : index
    %c0_159 = arith.constant 0 : index
    %116 = vector.load %arg4[%c7_157, %c0_158, %c0_159] : memref<9x16x16xf32, #tpu.memory_space<vmem>>, vector<1x16x16xf32>
    %117 = vector.shape_cast %116 : vector<1x16x16xf32> to vector<16x16xf32>
    %cst_160 = arith.constant dense<0.000000e+00> : vector<16x16xf32>
    %118 = tpu.matmul %115, %117, %cst_160 {dimension_numbers = #tpu.dot_dimension_numbers<[1], [0], [0], [1], [0, 0, 1, 1], [], []>} : vector<16x16xf32>, vector<16x16xf32>, vector<16x16xf32> -> vector<16x16xf32>
    %119 = arith.addf %112, %118 : vector<16x16xf32>
    %c0_161 = arith.constant 0 : index
    %c1_162 = arith.constant 1 : index
    %c0_163 = arith.constant 0 : index
    %c1_164 = arith.constant 1 : index
    %c0_165 = arith.constant 0 : index
    %c0_166 = arith.constant 0 : index
    %120 = vector.load %arg2[%c0_161, %c1_162, %c0_163, %c1_164, %c0_165, %c0_166] : memref<1x5x2x5x2x16xf32, #tpu.memory_space<vmem>>, vector<1x4x1x4x1x16xf32>
    %121 = vector.shape_cast %120 : vector<1x4x1x4x1x16xf32> to vector<4x4x16xf32>
    %122 = vector.shape_cast %121 : vector<4x4x16xf32> to vector<16x16xf32>
    %c8_167 = arith.constant 8 : index
    %c0_168 = arith.constant 0 : index
    %c0_169 = arith.constant 0 : index
    %123 = vector.load %arg4[%c8_167, %c0_168, %c0_169] : memref<9x16x16xf32, #tpu.memory_space<vmem>>, vector<1x16x16xf32>
    %124 = vector.shape_cast %123 : vector<1x16x16xf32> to vector<16x16xf32>
    %cst_170 = arith.constant dense<0.000000e+00> : vector<16x16xf32>
    %125 = tpu.matmul %122, %124, %cst_170 {dimension_numbers = #tpu.dot_dimension_numbers<[1], [0], [0], [1], [0, 0, 1, 1], [], []>} : vector<16x16xf32>, vector<16x16xf32>, vector<16x16xf32> -> vector<16x16xf32>
    %126 = arith.addf %119, %125 : vector<16x16xf32>
    %c0_171 = arith.constant 0 : index
    %c0_172 = arith.constant 0 : index
    %127 = vector.load %arg5[%c0_171, %c0_172] : memref<1x16xf32, #tpu.memory_space<vmem>>, vector<1x16xf32>
    %128 = vector.broadcast %127 : vector<1x16xf32> to vector<16x16xf32>
    %129 = arith.mulf %126, %128 : vector<16x16xf32>
    %c0_173 = arith.constant 0 : index
    %c0_174 = arith.constant 0 : index
    %130 = vector.load %arg6[%c0_173, %c0_174] : memref<1x16xf32, #tpu.memory_space<vmem>>, vector<1x16xf32>
    %131 = vector.broadcast %130 : vector<1x16xf32> to vector<16x16xf32>
    %132 = arith.addf %129, %131 : vector<16x16xf32>
    %cst_175 = arith.constant 0.000000e+00 : f32
    %133 = vector.broadcast %cst_175 : f32 to vector<16x16xf32>
    %134 = arith.maximumf %132, %133 : vector<16x16xf32>
    %c0_176 = arith.constant 0 : index
    %c0_177 = arith.constant 0 : index
    %135 = vector.load %arg7[%c0_176, %c0_177] : memref<16x32xf32, #tpu.memory_space<vmem>>, vector<16x32xf32>
    %cst_178 = arith.constant dense<0.000000e+00> : vector<16x32xf32>
    %136 = tpu.matmul %134, %135, %cst_178 {dimension_numbers = #tpu.dot_dimension_numbers<[1], [0], [0], [1], [0, 0, 1, 1], [], []>} : vector<16x16xf32>, vector<16x32xf32>, vector<16x32xf32> -> vector<16x32xf32>
    %c0_179 = arith.constant 0 : index
    %c0_180 = arith.constant 0 : index
    %137 = vector.load %arg8[%c0_179, %c0_180] : memref<1x32xf32, #tpu.memory_space<vmem>>, vector<1x32xf32>
    %138 = vector.broadcast %137 : vector<1x32xf32> to vector<16x32xf32>
    %139 = arith.mulf %136, %138 : vector<16x32xf32>
    %c0_181 = arith.constant 0 : index
    %c0_182 = arith.constant 0 : index
    %140 = vector.load %arg9[%c0_181, %c0_182] : memref<1x32xf32, #tpu.memory_space<vmem>>, vector<1x32xf32>
    %141 = vector.broadcast %140 : vector<1x32xf32> to vector<16x32xf32>
    %142 = arith.addf %139, %141 : vector<16x32xf32>
    %cst_183 = arith.constant 0.000000e+00 : f32
    %143 = vector.broadcast %cst_183 : f32 to vector<16x32xf32>
    %144 = arith.maximumf %142, %143 : vector<16x32xf32>
    %145 = vector.shape_cast %144 : vector<16x32xf32> to vector<4x4x32xf32>
    %c0_184 = arith.constant 0 : index
    %c0_185 = arith.constant 0 : index
    %c0_186 = arith.constant 0 : index
    %c0_187 = arith.constant 0 : index
    %146 = vector.load %arg10[%c0_184, %c0_185, %c0_186, %c0_187] : memref<1x4x4x32xf32, #tpu.memory_space<vmem>>, vector<1x4x4x32xf32>
    %147 = vector.shape_cast %146 : vector<1x4x4x32xf32> to vector<4x4x32xf32>
    %148 = vector.shape_cast %145 : vector<4x4x32xf32> to vector<1x4x4x32xf32>
    tpu.vector_store %arg10[%c0_184, %c0_185, %c0_186, %c0_187], %148 {strides = array<i32>} : memref<1x4x4x32xf32, #tpu.memory_space<vmem>>, vector<1x4x4x32xf32>,
    return
  }
  func.func @transform_0(%arg0: i32) -> (i32, i32, i32, i32, i32, i32) {
    %c0_i32 = arith.constant 0 : i32
    %c0_i32_0 = arith.constant 0 : i32
    %c0_i32_1 = arith.constant 0 : i32
    %c0_i32_2 = arith.constant 0 : i32
    %c0_i32_3 = arith.constant 0 : i32
    %c0_i32_4 = arith.constant 0 : i32
    return %arg0, %c0_i32, %c0_i32_0, %c0_i32_1, %c0_i32_2, %c0_i32_3 : i32, i32, i32, i32, i32, i32
  }
  func.func @transform_1(%arg0: i32) -> (i32, i32, i32, i32, i32, i32) {
    %c0_i32 = arith.constant 0 : i32
    %c0_i32_0 = arith.constant 0 : i32
    %c0_i32_1 = arith.constant 0 : i32
    %c0_i32_2 = arith.constant 0 : i32
    %c0_i32_3 = arith.constant 0 : i32
    %c0_i32_4 = arith.constant 0 : i32
    return %arg0, %c0_i32, %c0_i32_0, %c0_i32_1, %c0_i32_2, %c0_i32_3 : i32, i32, i32, i32, i32, i32
  }
  func.func @transform_2(%arg0: i32) -> (i32, i32, i32) {
    %c0_i32 = arith.constant 0 : i32
    %c0_i32_0 = arith.constant 0 : i32
    %c0_i32_1 = arith.constant 0 : i32
    %c0_i32_2 = arith.constant 0 : i32
    return %c0_i32, %c0_i32_0, %c0_i32_1 : i32, i32, i32
  }
  func.func @transform_3(%arg0: i32) -> (i32, i32, i32) {
    %c0_i32 = arith.constant 0 : i32
    %c0_i32_0 = arith.constant 0 : i32
    %c0_i32_1 = arith.constant 0 : i32
    %c0_i32_2 = arith.constant 0 : i32
    return %c0_i32, %c0_i32_0, %c0_i32_1 : i32, i32, i32
  }
  func.func @transform_4(%arg0: i32) -> (i32, i32) {
    %c0_i32 = arith.constant 0 : i32
    %c0_i32_0 = arith.constant 0 : i32
    %c0_i32_1 = arith.constant 0 : i32
    return %c0_i32, %c0_i32_0 : i32, i32
  }
  func.func @transform_5(%arg0: i32) -> (i32, i32) {
    %c0_i32 = arith.constant 0 : i32
    %c0_i32_0 = arith.constant 0 : i32
    %c0_i32_1 = arith.constant 0 : i32
    return %c0_i32, %c0_i32_0 : i32, i32
  }
  func.func @transform_6(%arg0: i32) -> (i32, i32) {
    %c0_i32 = arith.constant 0 : i32
    %c0_i32_0 = arith.constant 0 : i32
    %c0_i32_1 = arith.constant 0 : i32
    return %c0_i32, %c0_i32_0 : i32, i32
  }
  func.func @transform_7(%arg0: i32) -> (i32, i32) {
    %c0_i32 = arith.constant 0 : i32
    %c0_i32_0 = arith.constant 0 : i32
    %c0_i32_1 = arith.constant 0 : i32
    return %c0_i32, %c0_i32_0 : i32, i32
  }
  func.func @transform_8(%arg0: i32) -> (i32, i32) {
    %c0_i32 = arith.constant 0 : i32
    %c0_i32_0 = arith.constant 0 : i32
    %c0_i32_1 = arith.constant 0 : i32
    return %c0_i32, %c0_i32_0 : i32, i32
  }
  func.func @transform_9(%arg0: i32) -> (i32, i32, i32, i32) {
    %c0_i32 = arith.constant 0 : i32
    %c0_i32_0 = arith.constant 0 : i32
    %c0_i32_1 = arith.constant 0 : i32
    %c0_i32_2 = arith.constant 0 : i32
    return %arg0, %c0_i32, %c0_i32_0, %c0_i32_1 : i32, i32, i32, i32
  }
}

</mosaic_0001>

<bundles_post_ra>
// kernel: hgstem_pallas.5
= control target key start
LH: loop header
LB: loop body
LE: loop exit
PB: predicated region body
PF: predicated region fallthrough
CT: control target
= control target key end

     0   :  { %s1299_s18 = smov 0   ;;  %s1632_s0 = inlined_call_operand.vmem [shape: f32[2,9,9,16], index: 0, kind: input, shape index: {}]   ;;  %s1633_s1 = inlined_call_operand.vmem [shape: f32[4,16,8], index: 1, kind: input, shape index: {}]   ;;  %s1634_s2 = inlined_call_operand.vmem [shape: f32[1,8], index: 2, kind: input, shape index: {}]   ;;  %s1635_s3 = inlined_call_operand.vmem [shape: f32[1,8], index: 3, kind: input, shape index: {}]   ;;  %s1636_s4 = inlined_call_operand.vmem [shape: f32[2,9,9,8], index: 4, kind: output, shape index: {0}]   ;;  %s1637_s5 = inlined_call_operand.vmem [shape: f32[2,10,10,16], index: 5, kind: output, shape index: {1}]  }
   0x1 LB: > { %s1055_s19 = sadd.s32 4294967295, %s1266_s18   ;;  %p1059_p0 = scmp.ge.s32.totalorder %s1266_s18, 1  ;;  %s1266_s18 = sphi %s1299_s18, %s16_s18  }
   0x2   : > { %p190_p1 = scmp.lt.s32.totalorder %s1266_s18, 3 }
   0x4   : > { %p191_p2 = pnand %p1059_p0, %p190_p1 }
   0x5   : > { %p223_p3 = scmp.lt.s32.totalorder (!%p191_p2), %s1055_s19, 1 }
   0x6   : > { %194 = sbr.rel (%p191_p2) target bundleno = 252 (0xfc), region = 36 }
   0xb   : > { %v1064_v0 = vld [vmem:[%s1633_s1 + $0x18] sm:$0xff]  ;;  %v247_v1 = vld [vmem:[%s1633_s1 + $0x8] sm:$0xff]  ;;  %v1063_v2 = vld [vmem:[%s1633_s1 + $0x10] sm:$0xff]  ;;  %s1639_s19 = smov (!%p223_p3, %s1055_s19), 1  ;;  %vm259_vm0 = vcmask 130048   ;;  %vm853_vm1 = vcmask 64512  }
   0xc   : > { %1185 = vmatprep.subr.mxu0 %v1064_v0  ;;  %1201 = vmatprep.subr.mxu1 %v247_v1  ;;  %v246_v3 = vld [vmem:[%s1633_s1] sm:$0xff]  ;;  %v1090_v4 = vld [vmem:[%s1633_s1 + $0x28] sm:$0xff]  ;;  %v1108_v5 = vld [vmem:[%s1633_s1 + $0x38] sm:$0xff]  ;;  %s1249_s7 = smul.u32 144, %s1639_s19  ;;  %vm855_vm2 = vcmask 57344   ;;  %v1268_v26 = vmov 0.0  }
   0xd   : > { %1186 = vmatpush3.msra.mxu0 %v1064_v0  ;;  %1202 = vmatpush3.msra.mxu1 %v247_v1  ;;  %v1089_v12 = vld [vmem:[%s1633_s1 + $0x20] sm:$0xff]  ;;  %v1107_v13 = vld [vmem:[%s1633_s1 + $0x30] sm:$0xff]  ;;  %s1250_s15 = smul.u32 160, %s1639_s19  ;;  %vm938_vm3 = vcmask 123904  }
   0xe   : > { %1187 = vmatprep.subr.mxu0 %v1063_v2  ;;  %1203 = vmatprep.subr.mxu1 %v246_v3  ;;  %s1333_s10 = scalar_lea.vmem %s1632_s0, %s1249_s7  ;;  %s1459_s20 = scalar_lea.vmem %s1636_s4, %s1249_s7 }
   0xf   : > { %1188 = vmatpush3.msra.mxu0 %v1063_v2  ;;  %1204 = vmatpush3.msra.mxu1 %v246_v3  ;;  %v1336_v6 = vld [vmem:[%s1333_s10 + $0x1] sm:$0xff]  ;;  %v1342_v8 = vld [vmem:[%s1333_s10 + $0x11] sm:$0xff]  ;;  %s1464_s19 = scalar_lea.vmem %s1637_s5, %s1250_s15  ;;  %856 = vst.msk [vmem:[%s1459_s20 + $0x8] sm:$0x1] %vm855_vm2, %v1268_v26  ;;  %858 = vst.msk [vmem:[%s1459_s20 + $0x18] sm:$0x1] %vm855_vm2, %v1268_v26 }
  0x10   : > { %1217 = vmatprep.subr.mxu0 %v1090_v4  ;;  %1233 = vmatprep.subr.mxu1 %v1108_v5  ;;  %v1339_v7 = vld [vmem:[%s1333_s10] sm:$0xff]  ;;  %v1349_v9 = vld [vmem:[%s1333_s10 + $0x10] sm:$0xff]  ;;  %857 = vst.msk [vmem:[%s1459_s20 + $0x10] sm:$0xff] %vm853_vm1, %v1268_v26  ;;  %871 = vst.msk [vmem:[%s1459_s20 + $0x80] sm:$0xff] %vm853_vm1, %v1268_v26  ;;  %v921_v35 = vmax.f32 %v1336_v6, %v1342_v8 }
  0x11   : > { %1189 = vmatprep.mubr.msk.f32.mxu0 %vm259_vm0, %v1336_v6  ;;  %1205 = vmatprep.mubr.msk.f32.mxu1 %vm259_vm0, %v1339_v7  ;;  %v1352_v10 = vld [vmem:[%s1333_s10 + $0x21] sm:$0xff]  ;;  %v1368_v14 = vld [vmem:[%s1333_s10 + $0x31] sm:$0xff]  ;;  %860 = vst.msk [vmem:[%s1459_s20 + $0x28] sm:$0x1] %vm855_vm2, %v1268_v26  ;;  %862 = vst.msk [vmem:[%s1459_s20 + $0x38] sm:$0x1] %vm855_vm2, %v1268_v26  ;;  %v897_v27 = vmax.f32 %v1339_v7, %v1349_v9 }
  0x12   : > { %v1355_v11 = vld [vmem:[%s1333_s10 + $0x20] sm:$0xff]  ;;  %1190 = vmatmul.mubr.msk.f32.vlgmr.msra.gmra.mxu0 %vm259_vm0, %v1342_v8  ;;  %1206 = vmatmul.mubr.msk.f32.vlgmr.msra.gmra.mxu1 %vm259_vm0, %v1349_v9  ;;  %v1371_v15 = vld [vmem:[%s1333_s10 + $0x30] sm:$0xff]  ;;  %864 = vst.msk [vmem:[%s1459_s20 + $0x48] sm:$0x1] %vm855_vm2, %v1268_v26  ;;  %866 = vst.msk [vmem:[%s1459_s20 + $0x58] sm:$0x1] %vm855_vm2, %v1268_v26  ;;  %v922_v36 = vmax.f32 %v1342_v8, %v1352_v10  ;;  %v923_v37 = vmax.f32 %v1352_v10, %v1368_v14 }
  0x13   : > { %1218 = vmatpush3.msra.mxu0 %v1090_v4  ;;  %1234 = vmatpush3.msra.mxu1 %v1108_v5  ;;  %v1378_v16 = vld [vmem:[%s1333_s10 + $0x41] sm:$0xff]  ;;  %v1392_v18 = vld [vmem:[%s1333_s10 + $0x51] sm:$0xff]  ;;  %868 = vst.msk [vmem:[%s1459_s20 + $0x68] sm:$0x1] %vm855_vm2, %v1268_v26  ;;  %870 = vst.msk [vmem:[%s1459_s20 + $0x78] sm:$0x1] %vm855_vm2, %v1268_v26  ;;  %v898_v28 = vmax.f32 %v1349_v9, %v1355_v11  ;;  %v899_v29 = vmax.f32 %v1355_v11, %v1371_v15 }
  0x14   : > { %1192 = vmatprep.mubr.msk.f32.mxu0 %vm259_vm0, %v1352_v10  ;;  %1208 = vmatprep.mubr.msk.f32.mxu1 %vm259_vm0, %v1355_v11  ;;  %v1381_v17 = vld [vmem:[%s1333_s10 + $0x40] sm:$0xff]  ;;  %v1395_v19 = vld [vmem:[%s1333_s10 + $0x50] sm:$0xff]  ;;  %872 = vst.msk [vmem:[%s1459_s20 + $0x88] sm:$0x1] %vm855_vm2, %v1268_v26  ;;  %v924_v38 = vmax.f32 %v1368_v14, %v1378_v16  ;;  %v925_v39 = vmax.f32 %v1378_v16, %v1392_v18 }
  0x15   : > { %1219 = vmatprep.subr.mxu0 %v1089_v12  ;;  %1235 = vmatprep.subr.mxu1 %v1107_v13  ;;  %v1398_v20 = vld [vmem:[%s1333_s10 + $0x61] sm:$0xff]  ;;  %v1412_v22 = vld [vmem:[%s1333_s10 + $0x71] sm:$0xff]  ;;  %937 = vst.msk [vmem:[%s1464_s19] sm:$0xff] %vm259_vm0, %v1268_v26  ;;  %940 = vst.msk [vmem:[%s1464_s19 + $0x10] sm:$0xff] %vm259_vm0, %v1268_v26  ;;  %v900_v30 = vmax.f32 %v1371_v15, %v1381_v17  ;;  %v901_v31 = vmax.f32 %v1381_v17, %v1395_v19 }
  0x16   : > { %1193 = vmatmul.mubr.msk.f32.gmra.mxu0 %vm259_vm0, %v1368_v14  ;;  %1209 = vmatmul.mubr.msk.f32.gmra.mxu1 %vm259_vm0, %v1371_v15  ;;  %v1401_v21 = vld [vmem:[%s1333_s10 + $0x60] sm:$0xff]  ;;  %v1415_v23 = vld [vmem:[%s1333_s10 + $0x70] sm:$0xff]  ;;  %942 = vst.msk [vmem:[%s1464_s19 + $0x20] sm:$0xff] %vm259_vm0, %v1268_v26  ;;  %944 = vst.msk [vmem:[%s1464_s19 + $0x30] sm:$0xff] %vm259_vm0, %v1268_v26  ;;  %v926_v40 = vmax.f32 %v1392_v18, %v1398_v20  ;;  %v927_v41 = vmax.f32 %v1398_v20, %v1412_v22 }
  0x17   : > { %1195 = vmatprep.mubr.msk.f32.mxu0 %vm259_vm0, %v1378_v16  ;;  %1211 = vmatprep.mubr.msk.f32.mxu1 %vm259_vm0, %v1381_v17  ;;  %v1088_v24 = vld [vmem:[%s1333_s10 + $0x80] sm:$0xff]  ;;  %946 = vst.msk [vmem:[%s1464_s19 + $0x40] sm:$0xff] %vm259_vm0, %v1268_v26  ;;  %948 = vst.msk [vmem:[%s1464_s19 + $0x50] sm:$0xff] %vm259_vm0, %v1268_v26  ;;  %v902_v32 = vmax.f32 %v1395_v19, %v1401_v21  ;;  %v903_v33 = vmax.f32 %v1401_v21, %v1415_v23 }
  0x18   : > { %1220 = vmatpush3.msra.mxu0 %v1089_v12  ;;  %1236 = vmatpush3.msra.mxu1 %v1107_v13  ;;  %v1106_v25 = vld [vmem:[%s1333_s10 + $0x81] sm:$0xff]  ;;  %950 = vst.msk [vmem:[%s1464_s19 + $0x60] sm:$0xff] %vm259_vm0, %v1268_v26  ;;  %952 = vst.msk [vmem:[%s1464_s19 + $0x70] sm:$0xff] %vm259_vm0, %v1268_v26  ;;  %v904_v34 = vmax.f32 %v1415_v23, %v1088_v24  ;;  %v929_v43 = vmax.f32 %v897_v27, %v921_v35 }
  0x19   : > { %954 = vst.msk [vmem:[%s1464_s19 + $0x80] sm:$0xff] %vm259_vm0, %v1268_v26  ;;  %956 = vst.msk [vmem:[%s1464_s19 + $0x90] sm:$0xff] %vm259_vm0, %v1268_v26  ;;  %v928_v42 = vmax.f32 %v1412_v22, %v1106_v25  ;;  %v930_v44 = vmax.f32 %v898_v28, %v922_v36  ;;  %v931_v45 = vmax.f32 %v899_v29, %v923_v37 }
  0x1a   : > { %1196 = vmatmul.mubr.msk.f32.gmra.mxu0 %vm259_vm0, %v1392_v18  ;;  %1212 = vmatmul.mubr.msk.f32.gmra.mxu1 %vm259_vm0, %v1395_v19  ;;  %854 = vst.msk [vmem:[%s1459_s20] sm:$0xff] %vm853_vm1, %v1268_v26  ;;  %859 = vst.msk [vmem:[%s1459_s20 + $0x20] sm:$0xff] %vm853_vm1, %v1268_v26  ;;  %v932_v46 = vmax.f32 %v900_v30, %v924_v38  ;;  %v933_v47 = vmax.f32 %v901_v31, %v925_v39 }
  0x1b   : > { %1198 = vmatprep.mubr.msk.f32.mxu0 %vm259_vm0, %v1398_v20  ;;  %1214 = vmatprep.mubr.msk.f32.mxu1 %vm259_vm0, %v1401_v21  ;;  %861 = vst.msk [vmem:[%s1459_s20 + $0x30] sm:$0xff] %vm853_vm1, %v1268_v26  ;;  %863 = vst.msk [vmem:[%s1459_s20 + $0x40] sm:$0xff] %vm853_vm1, %v1268_v26  ;;  %v934_v48 = vmax.f32 %v902_v32, %v926_v40  ;;  %v935_v49 = vmax.f32 %v903_v33, %v927_v41 }
  0x1c   : > { %865 = vst.msk [vmem:[%s1459_s20 + $0x50] sm:$0xff] %vm853_vm1, %v1268_v26  ;;  %867 = vst.msk [vmem:[%s1459_s20 + $0x60] sm:$0xff] %vm853_vm1, %v1268_v26  ;;  %v936_v50 = vmax.f32 %v904_v34, %v928_v42 }
  0x1d   : > { %869 = vst.msk [vmem:[%s1459_s20 + $0x70] sm:$0xff] %vm853_vm1, %v1268_v26 }
  0x1e   : > { %1199 = vmatmul.mubr.msk.f32.gmra.mxu0 %vm259_vm0, %v1412_v22  ;;  %1215 = vmatmul.mubr.msk.f32.gmra.mxu1 %vm259_vm0, %v1415_v23  ;;  %939 = vst.msk [vmem:[%s1464_s19 + $0x8] sm:$0x3] %vm938_vm3, %v1268_v26  ;;  %941 = vst.msk [vmem:[%s1464_s19 + $0x18] sm:$0x3] %vm938_vm3, %v1268_v26 }
  0x1f   : > { %1221 = vmatprep.mubr.msk.f32.mxu0 %vm259_vm0, %v1349_v9  ;;  %1237 = vmatprep.mubr.msk.f32.mxu1 %vm259_vm0, %v1342_v8  ;;  %943 = vst.msk [vmem:[%s1464_s19 + $0x28] sm:$0x3] %vm938_vm3, %v1268_v26  ;;  %945 = vst.msk [vmem:[%s1464_s19 + $0x38] sm:$0x3] %vm938_vm3, %v1268_v26  ;;  %v1117_v8 = vld [vmem:[%s1634_s2] ss:$0 sm:$0xff] }
  0x20   : > { %947 = vst.msk [vmem:[%s1464_s19 + $0x48] sm:$0x3] %vm938_vm3, %v1268_v26  ;;  %949 = vst.msk [vmem:[%s1464_s19 + $0x58] sm:$0x3] %vm938_vm3, %v1268_v26 }
  0x21   : > { %951 = vst.msk [vmem:[%s1464_s19 + $0x68] sm:$0x3] %vm938_vm3, %v1268_v26  ;;  %953 = vst.msk [vmem:[%s1464_s19 + $0x78] sm:$0x3] %vm938_vm3, %v1268_v26 }
  0x22   : > { %1222 = vmatmul.mubr.msk.f32.vlgmr.msra.gmra.mxu0 %vm259_vm0, %v1355_v11  ;;  %1238 = vmatmul.mubr.msk.f32.vlgmr.msra.gmra.mxu1 %vm259_vm0, %v1352_v10  ;;  %955 = vst.msk [vmem:[%s1464_s19 + $0x88] sm:$0x3] %vm938_vm3, %v1268_v26  ;;  %957 = vst.msk [vmem:[%s1464_s19 + $0x98] sm:$0x3] %vm938_vm3, %v1268_v26 }
  0x23   : > { %1224 = vmatprep.mubr.msk.f32.mxu0 %vm259_vm0, %v1371_v15  ;;  %1240 = vmatprep.mubr.msk.f32.mxu1 %vm259_vm0, %v1368_v14  ;;  %1135 = vst.msk [vmem:[%s1464_s19 + $0x11] sm:$0xff] %vm259_vm0, %v929_v43  ;;  %1136 = vst.msk [vmem:[%s1464_s19 + $0x21] sm:$0xff] %vm259_vm0, %v930_v44  ;;  %v1118_v14 = vld [vmem:[%s1635_s3] ss:$0 sm:$0xff] }
  0x24   : > { %1137 = vst.msk [vmem:[%s1464_s19 + $0x31] sm:$0xff] %vm259_vm0, %v931_v45  ;;  %1138 = vst.msk [vmem:[%s1464_s19 + $0x41] sm:$0xff] %vm259_vm0, %v932_v46 }
  0x25   : > { %1139 = vst.msk [vmem:[%s1464_s19 + $0x51] sm:$0xff] %vm259_vm0, %v933_v47  ;;  %1140 = vst.msk [vmem:[%s1464_s19 + $0x61] sm:$0xff] %vm259_vm0, %v934_v48 }
  0x26   : > { %1225 = vmatmul.mubr.msk.f32.gmra.mxu0 %vm259_vm0, %v1381_v17  ;;  %1241 = vmatmul.mubr.msk.f32.gmra.mxu1 %vm259_vm0, %v1378_v16  ;;  %1141 = vst.msk [vmem:[%s1464_s19 + $0x71] sm:$0xff] %vm259_vm0, %v935_v49  ;;  %1142 = vst.msk [vmem:[%s1464_s19 + $0x81] sm:$0xff] %vm259_vm0, %v936_v50 }
  0x27   : > { %1227 = vmatprep.mubr.msk.f32.mxu0 %vm259_vm0, %v1395_v19  ;;  %1243 = vmatprep.mubr.msk.f32.mxu1 %vm259_vm0, %v1392_v18 }
  0x2a   : > { %1228 = vmatmul.mubr.msk.f32.gmra.mxu0 %vm259_vm0, %v1401_v21  ;;  %1244 = vmatmul.mubr.msk.f32.gmra.mxu1 %vm259_vm0, %v1398_v20 }
  0x2b   : > { %1230 = vmatprep.mubr.msk.f32.mxu0 %vm259_vm0, %v1415_v23  ;;  %1246 = vmatprep.mubr.msk.f32.mxu1 %vm259_vm0, %v1412_v22 }
  0x2e   : > { %1231 = vmatmul.mubr.msk.f32.gmra.mxu0 %vm259_vm0, %v1088_v24  ;;  %1247 = vmatmul.mubr.msk.f32.gmra.mxu1 %vm259_vm0, %v1106_v25 }
  0xd2   : > { %v1191_v51 = vpop.f32.mrf.mxu0  ;;  %v1207_v52 = vpop.f32.mrf.mxu1 }
  0xd3   : > { %v485_v3 = vadd.f32 %v1207_v52, %v1191_v51 }
  0xd4   : > { %v350_v53 = vpop.f32.mrf.mxu0  ;;  %v479_v54 = vpop.f32.mrf.mxu1 }
  0xd5   : > { %v480_v6 = vadd.f32 %v479_v54, %v350_v53 }
  0xd6   : > { %v1194_v55 = vpop.f32.mrf.mxu0  ;;  %v1210_v56 = vpop.f32.mrf.mxu1 }
  0xd7   : > { %v495_v11 = vadd.f32 %v1210_v56, %v1194_v55 }
  0xd8   : > { %v360_v57 = vpop.f32.mrf.mxu0  ;;  %v489_v58 = vpop.f32.mrf.mxu1 }
  0xd9   : > { %v490_v17 = vadd.f32 %v489_v58, %v360_v57 }
  0xda   : > { %v1197_v59 = vpop.f32.mrf.mxu0  ;;  %v1213_v60 = vpop.f32.mrf.mxu1 }
  0xdb   : > { %v505_v27 = vadd.f32 %v1213_v60, %v1197_v59 }
  0xdc   : > { %v370_v61 = vpop.f32.mrf.mxu0  ;;  %v499_v62 = vpop.f32.mrf.mxu1 }
  0xdd   : > { %v500_v28 = vadd.f32 %v499_v62, %v370_v61 }
  0xde   : > { %v1200_v63 = vpop.f32.mrf.mxu0  ;;  %v1216_v0 = vpop.f32.mrf.mxu1 }
  0xdf   : > { %v515_v35 = vadd.f32 %v1216_v0, %v1200_v63 }
  0xe0   : > { %v380_v1 = vpop.f32.mrf.mxu0  ;;  %v509_v2 = vpop.f32.mrf.mxu1 }
  0xe1   : > { %v510_v43 = vadd.f32 %v509_v2, %v380_v1 }
  0xe2   : > { %v1223_v4 = vpop.f32.mrf.mxu0  ;;  %v1239_v5 = vpop.f32.mrf.mxu1 }
  0xe3   : > { %v660_v7 = vadd.f32 %v1223_v4, %v485_v3 }
  0xe4   : > { %v620_v9 = vpop.f32.mrf.mxu0  ;;  %v768_v10 = vpop.f32.mrf.mxu1 }
  0xe5   : > { %v808_v12 = vadd.f32 %v1239_v5, %v660_v7  ;;  %v659_v13 = vadd.f32 %v620_v9, %v480_v6 }
  0xe6   : > { %v1226_v15 = vpop.f32.mrf.mxu0  ;;  %v1242_v16 = vpop.f32.mrf.mxu1 }
  0xe7   : > { %v823_v18 = vmul.f32 %v1117_v8, %v808_v12  ;;  %v807_v19 = vadd.f32 %v768_v10, %v659_v13  ;;  %v662_v20 = vadd.f32 %v1226_v15, %v495_v11 }
  0xe8   : > { %v630_v21 = vpop.f32.mrf.mxu0  ;;  %v778_v22 = vpop.f32.mrf.mxu1 }
  0xe9   : > { %v838_v23 = vadd.f32 %v1118_v14, %v823_v18  ;;  %v822_v24 = vmul.f32 %v1117_v8, %v807_v19  ;;  %v810_v25 = vadd.f32 %v1242_v16, %v662_v20  ;;  %v661_v26 = vadd.f32 %v630_v21, %v490_v17 }
  0xea   : > { %v1229_v29 = vpop.f32.mrf.mxu0  ;;  %v1245_v30 = vpop.f32.mrf.mxu1 }
  0xeb   : > { %v846_v31 = vmax.f32 %v838_v23, 0.0  ;;  %v837_v32 = vadd.f32 %v1118_v14, %v822_v24  ;;  %v825_v33 = vmul.f32 %v1117_v8, %v810_v25  ;;  %v809_v34 = vadd.f32 %v778_v22, %v661_v26 }
  0xec   : > { %v664_v36 = vadd.f32 %v1229_v29, %v505_v27  ;;  %v640_v37 = vpop.f32.mrf.mxu0  ;;  %v788_v38 = vpop.f32.mrf.mxu1 }
  0xed   : > { %874 = vst.msk [vmem:[%s1459_s20 + $0x10] sm:$0xff] %vm853_vm1, %v846_v31  ;;  %v845_v39 = vmax.f32 %v837_v32, 0.0  ;;  %v840_v40 = vadd.f32 %v1118_v14, %v825_v33  ;;  %v824_v41 = vmul.f32 %v1117_v8, %v809_v34  ;;  %v663_v42 = vadd.f32 %v640_v37, %v500_v28 }
  0xee   : > { %v812_v44 = vadd.f32 %v1245_v30, %v664_v36  ;;  %v1232_v45 = vpop.f32.mrf.mxu0  ;;  %v1248_v46 = vpop.f32.mrf.mxu1 }
  0xef   : > { %873 = vst.msk [vmem:[%s1459_s20] sm:$0xff] %vm853_vm1, %v845_v39  ;;  %v848_v47 = vmax.f32 %v840_v40, 0.0  ;;  %v839_v48 = vadd.f32 %v1118_v14, %v824_v41  ;;  %v811_v49 = vadd.f32 %v788_v38, %v663_v42  ;;  %v666_v50 = vadd.f32 %v1232_v45, %v515_v35 }
  0xf0   : > { %v827_v51 = vmul.f32 %v1117_v8, %v812_v44  ;;  %v650_v52 = vpop.f32.mrf.mxu0  ;;  %v798_v58 = vpop.f32.mrf.mxu1 }
  0xf1   : > { %876 = vst.msk [vmem:[%s1459_s20 + $0x30] sm:$0xff] %vm853_vm1, %v848_v47  ;;  %v847_v53 = vmax.f32 %v839_v48, 0.0  ;;  %v826_v54 = vmul.f32 %v1117_v8, %v811_v49  ;;  %v814_v55 = vadd.f32 %v1248_v46, %v666_v50  ;;  %v665_v56 = vadd.f32 %v650_v52, %v510_v43 }
  0xf2   : > { %v842_v57 = vadd.f32 %v1118_v14, %v827_v51 }
  0xf3   : > { %875 = vst.msk [vmem:[%s1459_s20 + $0x20] sm:$0xff] %vm853_vm1, %v847_v53  ;;  %v841_v59 = vadd.f32 %v1118_v14, %v826_v54  ;;  %v829_v60 = vmul.f32 %v1117_v8, %v814_v55  ;;  %v813_v61 = vadd.f32 %v798_v58, %v665_v56 }
  0xf4   : > { %v850_v62 = vmax.f32 %v842_v57, 0.0 }
  0xf5   : > { %v849_v63 = vmax.f32 %v841_v59, 0.0  ;;  %v844_v0 = vadd.f32 %v1118_v14, %v829_v60  ;;  %v828_v1 = vmul.f32 %v1117_v8, %v813_v61 }
  0xf6   : > { %878 = vst.msk [vmem:[%s1459_s20 + $0x50] sm:$0xff] %vm853_vm1, %v850_v62 }
  0xf7   : > { %877 = vst.msk [vmem:[%s1459_s20 + $0x40] sm:$0xff] %vm853_vm1, %v849_v63  ;;  %v852_v2 = vmax.f32 %v844_v0, 0.0  ;;  %v843_v3 = vadd.f32 %v1118_v14, %v828_v1 }
  0xf9   : > { %880 = vst.msk [vmem:[%s1459_s20 + $0x70] sm:$0xff] %vm853_vm1, %v852_v2  ;;  %v851_v4 = vmax.f32 %v843_v3, 0.0 }
  0xfb   : > { %879 = vst.msk [vmem:[%s1459_s20 + $0x60] sm:$0xff] %vm853_vm1, %v851_v4 }
  0xfc PF: > { %s16_s18 = sadd.s32 1, %s1266_s18  }
  0xfd   : > { %p13_p4 = scmp.ge.s32.totalorder %s16_s18, 4  }
  0xff   :  { %15 = sbr.rel (!%p13_p4) target bundleno = 1 (0x1), region = 83 }

// kernel: hgstem_pallas.6
= control target key start
LH: loop header
LB: loop body
LE: loop exit
PB: predicated region body
PF: predicated region fallthrough
CT: control target
= control target key end

     0   :  { %s1102_s15 = smov 0   ;;  %s1251_s0 = inlined_call_operand.vmem [shape: f32[2,9,9,8], index: 0, kind: input, shape index: {}]   ;;  %s1252_s1 = inlined_call_operand.vmem [shape: f32[4,8,16], index: 1, kind: input, shape index: {}]   ;;  %s1253_s2 = inlined_call_operand.vmem [shape: f32[1,16], index: 2, kind: input, shape index: {}]   ;;  %s1254_s3 = inlined_call_operand.vmem [shape: f32[1,16], index: 3, kind: input, shape index: {}]   ;;  %s1255_s4 = inlined_call_operand.vmem [shape: f32[2,10,10,16], index: 4, kind: output, shape index: {}]  }
   0x1 LB: > { %s895_s16 = sadd.s32 4294967295, %s1074_s15   ;;  %p899_p0 = scmp.ge.s32.totalorder %s1074_s15, 1  ;;  %s1074_s15 = sphi %s1102_s15, %s14_s15  }
   0x2   : > { %p162_p1 = scmp.lt.s32.totalorder %s1074_s15, 3 }
   0x4   : > { %p163_p2 = pnand %p899_p0, %p162_p1 }
   0x5   : > { %p188_p3 = scmp.lt.s32.totalorder (!%p163_p2), %s895_s16, 1 }
   0x6   : > { %166 = sbr.rel (%p163_p2) target bundleno = 251 (0xfb), region = 36 }
   0xb   : > { %v902_v0 = vld [vmem:[%s1252_s1 + $0x8] sm:$0xff]  ;;  %v206_v1 = vld [vmem:[%s1252_s1] sm:$0xff]  ;;  %v927_v2 = vld [vmem:[%s1252_s1 + $0x10] sm:$0xff]  ;;  %s1257_s16 = smov (!%p188_p3, %s895_s16), 1  ;;  %vm217_vm0 = vcmask 64512   ;;  %vm809_vm1 = vcmask 130048  }
   0xc   : > { %1001 = vmatprep.subr.mxu0 %v902_v0  ;;  %1015 = vmatprep.subr.mxu1 %v206_v1  ;;  %v944_v3 = vld [vmem:[%s1252_s1 + $0x18] sm:$0xff]  ;;  %s1057_s25 = smul.u32 144, %s1257_s16  ;;  %vm811_vm2 = vcmask 123904   ;;  %v1076_v22 = vmov 0.0   ;;  %v953_v44 = vld [vmem:[%s1253_s2] ss:$0 sm:$0xff] }
   0xd   : > { %1002 = vmatpush3.msra.mxu0 %v902_v0  ;;  %1016 = vmatpush3.msra.mxu1 %v206_v1  ;;  %s1058_s29 = smul.u32 160, %s1257_s16  ;;  %v954_v50 = vld [vmem:[%s1254_s3] ss:$0 sm:$0xff] }
   0xe   : > { %1029 = vmatprep.subr.mxu0 %v927_v2  ;;  %1043 = vmatprep.subr.mxu1 %v944_v3  ;;  %s1128_s28 = scalar_lea.vmem %s1251_s0, %s1057_s25 }
   0xf   : > { %v207_v4 = vld [vmem:[%s1128_s28 + $0x1] sm:$0xff]  ;;  %v208_v6 = vld [vmem:[%s1128_s28 + $0x11] sm:$0xff]  ;;  %s1184_s6 = scalar_lea.vmem %s1255_s4, %s1058_s29 }
  0x10   : > { %v198_v5 = vld [vmem:[%s1128_s28] sm:$0xff]  ;;  %1003 = vmatprep.mubr.msk.f32.mxu0 %vm217_vm0, %v207_v4  ;;  %v199_v7 = vld [vmem:[%s1128_s28 + $0x10] sm:$0xff]  ;;  %810 = vst.msk [vmem:[%s1184_s6] sm:$0xff] %vm809_vm1, %v1076_v22  ;;  %815 = vst.msk [vmem:[%s1184_s6 + $0x20] sm:$0xff] %vm809_vm1, %v1076_v22 }
  0x11   : > { %1017 = vmatprep.mubr.msk.f32.mxu1 %vm217_vm0, %v198_v5  ;;  %v209_v8 = vld [vmem:[%s1128_s28 + $0x21] sm:$0xff]  ;;  %1004 = vmatmul.mubr.msk.f32.vlgmr.msra.gmra.mxu0 %vm217_vm0, %v208_v6  ;;  %v210_v10 = vld [vmem:[%s1128_s28 + $0x31] sm:$0xff]  ;;  %812 = vst.msk [vmem:[%s1184_s6 + $0x8] sm:$0x3] %vm811_vm2, %v1076_v22  ;;  %816 = vst.msk [vmem:[%s1184_s6 + $0x28] sm:$0x3] %vm811_vm2, %v1076_v22 }
  0x12   : > { %v200_v9 = vld [vmem:[%s1128_s28 + $0x20] sm:$0xff]  ;;  %1018 = vmatmul.mubr.msk.f32.vlgmr.msra.gmra.mxu1 %vm217_vm0, %v199_v7  ;;  %1030 = vmatpush3.msra.mxu0 %v927_v2  ;;  %v201_v11 = vld [vmem:[%s1128_s28 + $0x30] sm:$0xff]  ;;  %829 = vst.msk [vmem:[%s1184_s6 + $0x90] sm:$0xff] %vm809_vm1, %v1076_v22  ;;  %813 = vst.msk [vmem:[%s1184_s6 + $0x10] sm:$0xff] %vm809_vm1, %v1076_v22 }
  0x13   : > { %1044 = vmatpush3.msra.mxu1 %v944_v3  ;;  %1006 = vmatprep.mubr.msk.f32.mxu0 %vm217_vm0, %v209_v8  ;;  %v211_v12 = vld [vmem:[%s1128_s28 + $0x41] sm:$0xff]  ;;  %v212_v14 = vld [vmem:[%s1128_s28 + $0x51] sm:$0xff]  ;;  %830 = vst.msk [vmem:[%s1184_s6 + $0x98] sm:$0x3] %vm811_vm2, %v1076_v22  ;;  %814 = vst.msk [vmem:[%s1184_s6 + $0x18] sm:$0x3] %vm811_vm2, %v1076_v22 }
  0x14   : > { %1020 = vmatprep.mubr.msk.f32.mxu1 %vm217_vm0, %v200_v9  ;;  %v202_v13 = vld [vmem:[%s1128_s28 + $0x40] sm:$0xff]  ;;  %v203_v15 = vld [vmem:[%s1128_s28 + $0x50] sm:$0xff]  ;;  %817 = vst.msk [vmem:[%s1184_s6 + $0x30] sm:$0xff] %vm809_vm1, %v1076_v22  ;;  %819 = vst.msk [vmem:[%s1184_s6 + $0x40] sm:$0xff] %vm809_vm1, %v1076_v22 }
  0x15   : > { %1007 = vmatmul.mubr.msk.f32.gmra.mxu0 %vm217_vm0, %v210_v10  ;;  %v213_v16 = vld [vmem:[%s1128_s28 + $0x61] sm:$0xff]  ;;  %v214_v18 = vld [vmem:[%s1128_s28 + $0x71] sm:$0xff]  ;;  %818 = vst.msk [vmem:[%s1184_s6 + $0x38] sm:$0x3] %vm811_vm2, %v1076_v22  ;;  %820 = vst.msk [vmem:[%s1184_s6 + $0x48] sm:$0x3] %vm811_vm2, %v1076_v22 }
  0x16   : > { %1021 = vmatmul.mubr.msk.f32.gmra.mxu1 %vm217_vm0, %v201_v11  ;;  %1009 = vmatprep.mubr.msk.f32.mxu0 %vm217_vm0, %v211_v12  ;;  %v204_v17 = vld [vmem:[%s1128_s28 + $0x60] sm:$0xff]  ;;  %v205_v19 = vld [vmem:[%s1128_s28 + $0x70] sm:$0xff]  ;;  %821 = vst.msk [vmem:[%s1184_s6 + $0x50] sm:$0xff] %vm809_vm1, %v1076_v22  ;;  %823 = vst.msk [vmem:[%s1184_s6 + $0x60] sm:$0xff] %vm809_vm1, %v1076_v22 }
  0x17   : > { %1023 = vmatprep.mubr.msk.f32.mxu1 %vm217_vm0, %v202_v13  ;;  %v926_v20 = vld [vmem:[%s1128_s28 + $0x80] sm:$0xff]  ;;  %822 = vst.msk [vmem:[%s1184_s6 + $0x58] sm:$0x3] %vm811_vm2, %v1076_v22  ;;  %824 = vst.msk [vmem:[%s1184_s6 + $0x68] sm:$0x3] %vm811_vm2, %v1076_v22 }
  0x18   : > { %v943_v21 = vld [vmem:[%s1128_s28 + $0x81] sm:$0xff]  ;;  %825 = vst.msk [vmem:[%s1184_s6 + $0x70] sm:$0xff] %vm809_vm1, %v1076_v22  ;;  %827 = vst.msk [vmem:[%s1184_s6 + $0x80] sm:$0xff] %vm809_vm1, %v1076_v22 }
  0x19   : > { %1010 = vmatmul.mubr.msk.f32.gmra.mxu0 %vm217_vm0, %v212_v14  ;;  %826 = vst.msk [vmem:[%s1184_s6 + $0x78] sm:$0x3] %vm811_vm2, %v1076_v22  ;;  %828 = vst.msk [vmem:[%s1184_s6 + $0x88] sm:$0x3] %vm811_vm2, %v1076_v22 }
  0x1a   : > { %1024 = vmatmul.mubr.msk.f32.gmra.mxu1 %vm217_vm0, %v203_v15  ;;  %1012 = vmatprep.mubr.msk.f32.mxu0 %vm217_vm0, %v213_v16 }
  0x1b   : > { %1026 = vmatprep.mubr.msk.f32.mxu1 %vm217_vm0, %v204_v17 }
  0x1d   : > { %1013 = vmatmul.mubr.msk.f32.gmra.mxu0 %vm217_vm0, %v214_v18 }
  0x1e   : > { %1027 = vmatmul.mubr.msk.f32.gmra.mxu1 %vm217_vm0, %v205_v19  ;;  %1031 = vmatprep.mubr.msk.f32.mxu0 %vm217_vm0, %v199_v7 }
  0x1f   : > { %1045 = vmatprep.mubr.msk.f32.mxu1 %vm217_vm0, %v208_v6 }
  0x21   : > { %1032 = vmatmul.mubr.msk.f32.vlgmr.msra.gmra.mxu0 %vm217_vm0, %v200_v9 }
  0x22   : > { %1046 = vmatmul.mubr.msk.f32.vlgmr.msra.gmra.mxu1 %vm217_vm0, %v209_v8  ;;  %1034 = vmatprep.mubr.msk.f32.mxu0 %vm217_vm0, %v201_v11 }
  0x23   : > { %1048 = vmatprep.mubr.msk.f32.mxu1 %vm217_vm0, %v210_v10 }
  0x25   : > { %1035 = vmatmul.mubr.msk.f32.gmra.mxu0 %vm217_vm0, %v202_v13 }
  0x26   : > { %1049 = vmatmul.mubr.msk.f32.gmra.mxu1 %vm217_vm0, %v211_v12  ;;  %1037 = vmatprep.mubr.msk.f32.mxu0 %vm217_vm0, %v203_v15 }
  0x27   : > { %1051 = vmatprep.mubr.msk.f32.mxu1 %vm217_vm0, %v212_v14 }
  0x29   : > { %1038 = vmatmul.mubr.msk.f32.gmra.mxu0 %vm217_vm0, %v204_v17 }
  0x2a   : > { %1052 = vmatmul.mubr.msk.f32.gmra.mxu1 %vm217_vm0, %v213_v16  ;;  %1040 = vmatprep.mubr.msk.f32.mxu0 %vm217_vm0, %v205_v19 }
  0x2b   : > { %1054 = vmatprep.mubr.msk.f32.mxu1 %vm217_vm0, %v214_v18 }
  0x2d   : > { %1041 = vmatmul.mubr.msk.f32.gmra.mxu0 %vm217_vm0, %v926_v20 }
  0x2e   : > { %1055 = vmatmul.mubr.msk.f32.gmra.mxu1 %vm217_vm0, %v943_v21 }
  0xd1   : > { %v1005_v23 = vpop.f32.mrf.mxu0 }
  0xd2   : > { %v1019_v24 = vpop.f32.mrf.mxu1 }
  0xd3   : > { %v308_v25 = vpop.f32.mrf.mxu0  ;;  %v443_v39 = vadd.f32 %v1019_v24, %v1005_v23 }
  0xd4   : > { %v437_v26 = vpop.f32.mrf.mxu1 }
  0xd5   : > { %v1008_v27 = vpop.f32.mrf.mxu0  ;;  %v438_v42 = vadd.f32 %v437_v26, %v308_v25 }
  0xd6   : > { %v1022_v28 = vpop.f32.mrf.mxu1 }
  0xd7   : > { %v318_v29 = vpop.f32.mrf.mxu0  ;;  %v453_v47 = vadd.f32 %v1022_v28, %v1008_v27 }
  0xd8   : > { %v447_v30 = vpop.f32.mrf.mxu1 }
  0xd9   : > { %v1011_v31 = vpop.f32.mrf.mxu0  ;;  %v448_v53 = vadd.f32 %v447_v30, %v318_v29 }
  0xda   : > { %v1025_v32 = vpop.f32.mrf.mxu1 }
  0xdb   : > { %v328_v33 = vpop.f32.mrf.mxu0  ;;  %v463_v63 = vadd.f32 %v1025_v32, %v1011_v31 }
  0xdc   : > { %v457_v34 = vpop.f32.mrf.mxu1 }
  0xdd   : > { %v1014_v35 = vpop.f32.mrf.mxu0  ;;  %v458_v0 = vadd.f32 %v457_v34, %v328_v33 }
  0xde   : > { %v1028_v36 = vpop.f32.mrf.mxu1 }
  0xdf   : > { %v338_v37 = vpop.f32.mrf.mxu0  ;;  %v473_v7 = vadd.f32 %v1028_v36, %v1014_v35 }
  0xe0   : > { %v467_v38 = vpop.f32.mrf.mxu1 }
  0xe1   : > { %v1033_v40 = vpop.f32.mrf.mxu0  ;;  %v468_v15 = vadd.f32 %v467_v38, %v338_v37 }
  0xe2   : > { %v1047_v41 = vpop.f32.mrf.mxu1  ;;  %v617_v43 = vadd.f32 %v1033_v40, %v443_v39 }
  0xe3   : > { %v577_v45 = vpop.f32.mrf.mxu0 }
  0xe4   : > { %v724_v46 = vpop.f32.mrf.mxu1  ;;  %v764_v48 = vadd.f32 %v1047_v41, %v617_v43  ;;  %v616_v49 = vadd.f32 %v577_v45, %v438_v42 }
  0xe5   : > { %v1036_v51 = vpop.f32.mrf.mxu0 }
  0xe6   : > { %v1050_v52 = vpop.f32.mrf.mxu1  ;;  %v779_v54 = vmul.f32 %v953_v44, %v764_v48  ;;  %v763_v55 = vadd.f32 %v724_v46, %v616_v49  ;;  %v619_v56 = vadd.f32 %v1036_v51, %v453_v47 }
  0xe7   : > { %v587_v57 = vpop.f32.mrf.mxu0 }
  0xe8   : > { %v734_v58 = vpop.f32.mrf.mxu1  ;;  %v794_v59 = vadd.f32 %v954_v50, %v779_v54  ;;  %v778_v60 = vmul.f32 %v953_v44, %v763_v55  ;;  %v766_v61 = vadd.f32 %v1050_v52, %v619_v56  ;;  %v618_v62 = vadd.f32 %v587_v57, %v448_v53 }
  0xe9   : > { %v1039_v1 = vpop.f32.mrf.mxu0 }
  0xea   : > { %v1053_v2 = vpop.f32.mrf.mxu1  ;;  %v802_v3 = vmax.f32 %v794_v59, 0.0  ;;  %v793_v4 = vadd.f32 %v954_v50, %v778_v60  ;;  %v781_v5 = vmul.f32 %v953_v44, %v766_v61  ;;  %v765_v6 = vadd.f32 %v734_v58, %v618_v62 }
  0xeb   : > { %v621_v8 = vadd.f32 %v1039_v1, %v463_v63  ;;  %v597_v9 = vpop.f32.mrf.mxu0 }
  0xec   : > { %v744_v10 = vpop.f32.mrf.mxu1  ;;  %956 = vst.msk [vmem:[%s1184_s6 + $0x21] sm:$0xff] %vm809_vm1, %v802_v3  ;;  %v801_v11 = vmax.f32 %v793_v4, 0.0  ;;  %v796_v12 = vadd.f32 %v954_v50, %v781_v5  ;;  %v780_v13 = vmul.f32 %v953_v44, %v765_v6  ;;  %v620_v14 = vadd.f32 %v597_v9, %v458_v0 }
  0xed   : > { %v768_v16 = vadd.f32 %v1053_v2, %v621_v8  ;;  %v1042_v17 = vpop.f32.mrf.mxu0 }
  0xee   : > { %v1056_v18 = vpop.f32.mrf.mxu1  ;;  %955 = vst.msk [vmem:[%s1184_s6 + $0x11] sm:$0xff] %vm809_vm1, %v801_v11  ;;  %v804_v19 = vmax.f32 %v796_v12, 0.0  ;;  %v795_v20 = vadd.f32 %v954_v50, %v780_v13  ;;  %v767_v21 = vadd.f32 %v744_v10, %v620_v14  ;;  %v623_v22 = vadd.f32 %v1042_v17, %v473_v7 }
  0xef   : > { %v783_v23 = vmul.f32 %v953_v44, %v768_v16  ;;  %v607_v24 = vpop.f32.mrf.mxu0 }
  0xf0   : > { %958 = vst.msk [vmem:[%s1184_s6 + $0x41] sm:$0xff] %vm809_vm1, %v804_v19  ;;  %v803_v25 = vmax.f32 %v795_v20, 0.0  ;;  %v782_v26 = vmul.f32 %v953_v44, %v767_v21  ;;  %v770_v27 = vadd.f32 %v1056_v18, %v623_v22  ;;  %v622_v28 = vadd.f32 %v607_v24, %v468_v15  ;;  %v754_v30 = vpop.f32.mrf.mxu1 }
  0xf1   : > { %v798_v29 = vadd.f32 %v954_v50, %v783_v23 }
  0xf2   : > { %957 = vst.msk [vmem:[%s1184_s6 + $0x31] sm:$0xff] %vm809_vm1, %v803_v25  ;;  %v797_v31 = vadd.f32 %v954_v50, %v782_v26  ;;  %v785_v32 = vmul.f32 %v953_v44, %v770_v27  ;;  %v769_v33 = vadd.f32 %v754_v30, %v622_v28 }
  0xf3   : > { %v806_v34 = vmax.f32 %v798_v29, 0.0 }
  0xf4   : > { %v805_v35 = vmax.f32 %v797_v31, 0.0  ;;  %v800_v36 = vadd.f32 %v954_v50, %v785_v32  ;;  %v784_v37 = vmul.f32 %v953_v44, %v769_v33 }
  0xf5   : > { %960 = vst.msk [vmem:[%s1184_s6 + $0x61] sm:$0xff] %vm809_vm1, %v806_v34 }
  0xf6   : > { %959 = vst.msk [vmem:[%s1184_s6 + $0x51] sm:$0xff] %vm809_vm1, %v805_v35  ;;  %v808_v38 = vmax.f32 %v800_v36, 0.0  ;;  %v799_v39 = vadd.f32 %v954_v50, %v784_v37 }
  0xf8   : > { %962 = vst.msk [vmem:[%s1184_s6 + $0x81] sm:$0xff] %vm809_vm1, %v808_v38  ;;  %v807_v40 = vmax.f32 %v799_v39, 0.0 }
  0xfa   : > { %961 = vst.msk [vmem:[%s1184_s6 + $0x71] sm:$0xff] %vm809_vm1, %v807_v40 }
  0xfb PF: > { %s14_s15 = sadd.s32 1, %s1074_s15  }
  0xfc   : > { %p11_p4 = scmp.ge.s32.totalorder %s14_s15, 4  }
  0xfe   :  { %13 = sbr.rel (!%p11_p4) target bundleno = 1 (0x1), region = 71 }

// kernel: hgstem_pallas.4
= control target key start
LH: loop header
LB: loop body
LE: loop exit
PB: predicated region body
PF: predicated region fallthrough
CT: control target
= control target key end

     0   :  { %s4484_s15 = smov 0   ;;  %s5919_s0 = inlined_call_operand.vmem [shape: f32[2,9,2,9,2,3], index: 0, kind: input, shape index: {}]   ;;  %s5920_s1 = inlined_call_operand.vmem [shape: f32[9,3,16], index: 1, kind: input, shape index: {}]   ;;  %s5921_s2 = inlined_call_operand.vmem [shape: f32[1,16], index: 2, kind: input, shape index: {}]   ;;  %s5922_s3 = inlined_call_operand.vmem [shape: f32[1,16], index: 3, kind: input, shape index: {}]   ;;  %s5923_s4 = inlined_call_operand.vmem [shape: f32[2,9,9,16], index: 4, kind: output, shape index: {}]  }
   0x1 LB: > { %s3682_s16 = sadd.s32 4294967295, %s4456_s15   ;;  %p3686_p0 = scmp.ge.s32.totalorder %s4456_s15, 1  ;;  %s4456_s15 = sphi %s4484_s15, %s14_s15  }
   0x2   : > { %p162_p1 = scmp.lt.s32.totalorder %s4456_s15, 3 }
   0x4   : > { %p163_p2 = pnand %p3686_p0, %p162_p1 }
   0x5   : > { %p188_p3 = scmp.lt.s32.totalorder (!%p163_p2), %s3682_s16, 1 }
   0x6   : > { %166 = sbr.rel (%p163_p2) target bundleno = 517 (0x205), region = 36 }
   0xb   : > { %v3689_v0 = vld [vmem:[%s5920_s1 + $0x4] sm:$0x7]  ;;  %vm529_vm0 = vcmask 1042432   ;;  %v4500_v1 = vld [vmem:[%s5920_s1] sm:$0x7]  ;;  %s5925_s16 = smov (!%p188_p3, %s3682_s16), 1 }
   0xc   : > { %4437 = vmatprep.subr.msk.mxu1 %vm529_vm0, %v3689_v0  ;;  %4311 = vmatprep.subr.msk.mxu0 %vm529_vm0, %v3689_v0  ;;  %v4509_v2 = vld [vmem:[%s5920_s1 + $0x8] sm:$0x7]  ;;  %s4439_s23 = smul.u32 324, %s5925_s16  ;;  %vm394_vm1 = vcmask 1041409   ;;  %vm397_vm2 = vcmask 1042434   ;;  %vm400_vm3 = vcmask 1043459  }
   0xd   : > { %4438 = vmatpush3.msk.msra.mxu1 %vm529_vm0, %v3689_v0  ;;  %4312 = vmatpush3.msk.msra.mxu0 %vm529_vm0, %v3689_v0  ;;  %vm403_vm4 = vcmask 1044484   ;;  %vm406_vm5 = vcmask 1045509   ;;  %vm409_vm6 = vcmask 1046534   ;;  %vm412_vm7 = vcmask 1047559   ;;  %s4440_s13 = smul.u32 144, %s5925_s16 }
   0xe   : > { %4325 = vmatprep.subr.msk.mxu1 %vm529_vm0, %v4500_v1  ;;  %4339 = vmatprep.subr.msk.mxu0 %vm529_vm0, %v4509_v2  ;;  %s4519_s26 = scalar_lea.vmem %s5919_s0, %s4439_s23  ;;  %vm512_vm8 = vcmask 23552   ;;  %vm3599_vm9 = vcmask 130048   ;;  %vm3601_vm10 = vcmask 122880  }
   0xf   : > { %v263_v3 = vld [vmem:[%s4519_s26 + $0x1] sm:$0x1]  ;;  %v264_v4 = vld [vmem:[%s4519_s26 + $0x3] sm:$0x1]  ;;  %v265_v5 = vld [vmem:[%s4519_s26 + $0x5] sm:$0x1]  ;;  %s5777_s18 = scalar_lea.vmem %s5923_s4, %s4440_s13 }
  0x10   : > { %v266_v6 = vld [vmem:[%s4519_s26 + $0x7] sm:$0x1]  ;;  %v267_v7 = vld [vmem:[%s4519_s26 + $0x9] sm:$0x1]  ;;  %v268_v8 = vld [vmem:[%s4519_s26 + $0xb] sm:$0x1] }
  0x11   : > { %v269_v9 = vld [vmem:[%s4519_s26 + $0xd] sm:$0x1]  ;;  %v270_v10 = vld [vmem:[%s4519_s26 + $0xf] sm:$0x1]  ;;  %v393_v11 = vrot.slane %v264_v4, 7  ;;  %v396_v12 = vrot.slane %v265_v5, 6 }
  0x12   : > { %v399_v13 = vrot.slane %v266_v6, 5  ;;  %v402_v14 = vrot.slane %v267_v7, 4  ;;  %v405_v15 = vrot.slane %v268_v8, 3  ;;  %v295_v16 = vld [vmem:[%s4519_s26 + $0x91] sm:$0x1]  ;;  %v408_v18 = vrot.slane %v269_v9, 2 }
  0x13   : > { %v395_v17 = vsel %vm394_vm1, %v393_v11, %v263_v3  ;;  %v411_v19 = vrot.slane %v270_v10, 1  ;;  %v296_v20 = vld [vmem:[%s4519_s26 + $0x93] sm:$0x1]  ;;  %v297_v21 = vld [vmem:[%s4519_s26 + $0x95] sm:$0x1] }
  0x14   : > { %v398_v22 = vsel %vm397_vm2, %v396_v12, %v395_v17  ;;  %v298_v23 = vld [vmem:[%s4519_s26 + $0x97] sm:$0x1]  ;;  %v299_v24 = vld [vmem:[%s4519_s26 + $0x99] sm:$0x1]  ;;  %v300_v25 = vld [vmem:[%s4519_s26 + $0x9b] sm:$0x1] }
  0x15   : > { %v401_v26 = vsel %vm400_vm3, %v399_v13, %v398_v22  ;;  %v301_v27 = vld [vmem:[%s4519_s26 + $0x9d] sm:$0x1]  ;;  %v302_v28 = vld [vmem:[%s4519_s26 + $0x9f] sm:$0x1]  ;;  %v456_v29 = vrot.slane %v296_v20, 7  ;;  %v458_v30 = vrot.slane %v297_v21, 6 }
  0x16   : > { %v404_v31 = vsel %vm403_vm4, %v402_v14, %v401_v26  ;;  %v460_v32 = vrot.slane %v298_v23, 5  ;;  %v462_v33 = vrot.slane %v299_v24, 4  ;;  %v464_v34 = vrot.slane %v300_v25, 3  ;;  %v271_v35 = vld [vmem:[%s4519_s26 + $0x25] sm:$0x1] }
  0x17   : > { %v407_v36 = vsel %vm406_vm5, %v405_v15, %v404_v31  ;;  %v457_v37 = vsel %vm394_vm1, %v456_v29, %v295_v16  ;;  %v466_v38 = vrot.slane %v301_v27, 2  ;;  %v468_v39 = vrot.slane %v302_v28, 1  ;;  %v272_v40 = vld [vmem:[%s4519_s26 + $0x27] sm:$0x1]  ;;  %v273_v41 = vld [vmem:[%s4519_s26 + $0x29] sm:$0x1] }
  0x18   : > { %v410_v42 = vsel %vm409_vm6, %v408_v18, %v407_v36  ;;  %v459_v43 = vsel %vm397_vm2, %v458_v30, %v457_v37  ;;  %v274_v44 = vld [vmem:[%s4519_s26 + $0x2b] sm:$0x1]  ;;  %v275_v45 = vld [vmem:[%s4519_s26 + $0x2d] sm:$0x1]  ;;  %v276_v46 = vld [vmem:[%s4519_s26 + $0x2f] sm:$0x1] }
  0x19   : > { %v413_v47 = vsel %vm412_vm7, %v411_v19, %v410_v42  ;;  %v461_v48 = vsel %vm400_vm3, %v460_v32, %v459_v43  ;;  %v277_v49 = vld [vmem:[%s4519_s26 + $0x31] sm:$0x1]  ;;  %v278_v50 = vld [vmem:[%s4519_s26 + $0x33] sm:$0x1]  ;;  %v414_v51 = vrot.slane %v272_v40, 7  ;;  %v416_v52 = vrot.slane %v273_v41, 6 }
  0x1a   : > { %4313 = vmatprep.mubr.msk.f32.mxu0 %vm512_vm8, %v413_v47  ;;  %v463_v53 = vsel %vm403_vm4, %v462_v33, %v461_v48  ;;  %v418_v54 = vrot.slane %v274_v44, 5  ;;  %v420_v55 = vrot.slane %v275_v45, 4  ;;  %v422_v56 = vrot.slane %v276_v46, 3  ;;  %v303_v57 = vld [vmem:[%s4519_s26 + $0xb5] sm:$0x1] }
  0x1b   : > { %v465_v58 = vsel %vm406_vm5, %v464_v34, %v463_v53  ;;  %v415_v59 = vsel %vm394_vm1, %v414_v51, %v271_v35  ;;  %v424_v60 = vrot.slane %v277_v49, 2  ;;  %v426_v61 = vrot.slane %v278_v50, 1  ;;  %v304_v62 = vld [vmem:[%s4519_s26 + $0xb7] sm:$0x1]  ;;  %v305_v63 = vld [vmem:[%s4519_s26 + $0xb9] sm:$0x1] }
  0x1c   : > { %v467_v0 = vsel %vm409_vm6, %v466_v38, %v465_v58  ;;  %v417_v3 = vsel %vm397_vm2, %v416_v52, %v415_v59  ;;  %v306_v4 = vld [vmem:[%s4519_s26 + $0xbb] sm:$0x1]  ;;  %v307_v5 = vld [vmem:[%s4519_s26 + $0xbd] sm:$0x1]  ;;  %v308_v6 = vld [vmem:[%s4519_s26 + $0xbf] sm:$0x1] }
  0x1d   : > { %v469_v7 = vsel %vm412_vm7, %v468_v39, %v467_v0  ;;  %v419_v8 = vsel %vm400_vm3, %v418_v54, %v417_v3  ;;  %v309_v9 = vld [vmem:[%s4519_s26 + $0xc1] sm:$0x1]  ;;  %v310_v10 = vld [vmem:[%s4519_s26 + $0xc3] sm:$0x1]  ;;  %v470_v11 = vrot.slane %v304_v62, 7  ;;  %v472_v12 = vrot.slane %v305_v63, 6 }
  0x1e   : > { %4319 = vmatprep.mubr.msk.f32.mxu1 %vm512_vm8, %v469_v7  ;;  %v421_v13 = vsel %vm403_vm4, %v420_v55, %v419_v8  ;;  %v474_v14 = vrot.slane %v306_v4, 5  ;;  %v476_v15 = vrot.slane %v307_v5, 4  ;;  %v478_v16 = vrot.slane %v308_v6, 3  ;;  %v279_v17 = vld [vmem:[%s4519_s26 + $0x49] sm:$0x1] }
  0x1f   : > { %v423_v18 = vsel %vm406_vm5, %v422_v56, %v421_v13  ;;  %v471_v19 = vsel %vm394_vm1, %v470_v11, %v303_v57  ;;  %v480_v20 = vrot.slane %v309_v9, 2  ;;  %v482_v21 = vrot.slane %v310_v10, 1  ;;  %v280_v22 = vld [vmem:[%s4519_s26 + $0x4b] sm:$0x1]  ;;  %v281_v23 = vld [vmem:[%s4519_s26 + $0x4d] sm:$0x1] }
  0x20   : > { %v4581_v24 = vld [vmem:[%s5920_s1 + $0x10] sm:$0x7]  ;;  %v425_v25 = vsel %vm409_vm6, %v424_v60, %v423_v18  ;;  %v473_v26 = vsel %vm397_vm2, %v472_v12, %v471_v19  ;;  %v282_v27 = vld [vmem:[%s4519_s26 + $0x4f] sm:$0x1]  ;;  %v284_v29 = vld [vmem:[%s4519_s26 + $0x53] sm:$0x1] }
  0x21   : > { %v283_v28 = vld [vmem:[%s4519_s26 + $0x51] sm:$0x1]  ;;  %v427_v30 = vsel %vm412_vm7, %v426_v61, %v425_v25  ;;  %v475_v31 = vsel %vm400_vm3, %v474_v14, %v473_v26  ;;  %v285_v32 = vld [vmem:[%s4519_s26 + $0x55] sm:$0x1]  ;;  %v286_v33 = vld [vmem:[%s4519_s26 + $0x57] sm:$0x1] }
  0x22   : > { %v428_v34 = vrot.slane %v280_v22, 7  ;;  %v430_v35 = vrot.slane %v281_v23, 6  ;;  %4314 = vmatmul.mubr.msk.f32.vlgmr.msra.gmra.mxu0 %vm512_vm8, %v427_v30  ;;  %v477_v36 = vsel %vm403_vm4, %v476_v15, %v475_v31  ;;  %v432_v37 = vrot.slane %v282_v27, 5  ;;  %v311_v40 = vld [vmem:[%s4519_s26 + $0xd9] sm:$0x1] }
  0x23   : > { %v434_v38 = vrot.slane %v283_v28, 4  ;;  %v436_v39 = vrot.slane %v284_v29, 3  ;;  %v479_v41 = vsel %vm406_vm5, %v478_v16, %v477_v36  ;;  %4340 = vmatpush3.msk.msra.mxu0 %vm529_vm0, %v4509_v2  ;;  %v438_v43 = vrot.slane %v285_v32, 2  ;;  %v312_v45 = vld [vmem:[%s4519_s26 + $0xdb] sm:$0x1] }
  0x24   : > { %v429_v42 = vsel %vm394_vm1, %v428_v34, %v279_v17  ;;  %v440_v44 = vrot.slane %v286_v33, 1  ;;  %v313_v46 = vld [vmem:[%s4519_s26 + $0xdd] sm:$0x1]  ;;  %v4604_v47 = vld [vmem:[%s5920_s1 + $0xc] sm:$0x7]  ;;  %v481_v48 = vsel %vm409_vm6, %v480_v20, %v479_v41  ;;  %4367 = vmatprep.subr.msk.mxu0 %vm529_vm0, %v4581_v24  ;;  %v484_v56 = vrot.slane %v312_v45, 7 }
  0x25   : > { %v431_v49 = vsel %vm397_vm2, %v430_v35, %v429_v42  ;;  %v314_v50 = vld [vmem:[%s4519_s26 + $0xdf] sm:$0x1]  ;;  %v315_v51 = vld [vmem:[%s4519_s26 + $0xe1] sm:$0x1]  ;;  %v316_v2 = vld [vmem:[%s4519_s26 + $0xe3] sm:$0x1]  ;;  %v483_v52 = vsel %vm412_vm7, %v482_v21, %v481_v48 }
  0x26   : > { %v433_v53 = vsel %vm400_vm3, %v432_v37, %v431_v49  ;;  %v317_v54 = vld [vmem:[%s4519_s26 + $0xe5] sm:$0x1]  ;;  %v318_v55 = vld [vmem:[%s4519_s26 + $0xe7] sm:$0x1]  ;;  %v486_v57 = vrot.slane %v313_v46, 6  ;;  %4320 = vmatmul.mubr.msk.f32.vlgmr.msra.gmra.mxu1 %vm512_vm8, %v483_v52  ;;  %v488_v59 = vrot.slane %v314_v50, 5  ;;  %v485_v0 = vsel %vm394_vm1, %v484_v56, %v311_v40 }
  0x27   : > { %v435_v58 = vsel %vm403_vm4, %v434_v38, %v433_v53  ;;  %v490_v60 = vrot.slane %v315_v51, 4  ;;  %v492_v61 = vrot.slane %v316_v2, 3  ;;  %v287_v62 = vld [vmem:[%s4519_s26 + $0x6d] sm:$0x1]  ;;  %4326 = vmatpush3.msk.msra.mxu1 %vm529_vm0, %v4500_v1  ;;  %v494_v3 = vrot.slane %v317_v54, 2 }
  0x28   : > { %v437_v63 = vsel %vm406_vm5, %v436_v39, %v435_v58  ;;  %v496_v4 = vrot.slane %v318_v55, 1  ;;  %v288_v5 = vld [vmem:[%s4519_s26 + $0x6f] sm:$0x1]  ;;  %v289_v6 = vld [vmem:[%s4519_s26 + $0x71] sm:$0x1]  ;;  %v487_v8 = vsel %vm397_vm2, %v486_v57, %v485_v0  ;;  %4353 = vmatprep.subr.msk.mxu1 %vm529_vm0, %v4604_v47 }
  0x29   : > { %v439_v7 = vsel %vm409_vm6, %v438_v43, %v437_v63  ;;  %v290_v9 = vld [vmem:[%s4519_s26 + $0x73] sm:$0x1]  ;;  %v291_v10 = vld [vmem:[%s4519_s26 + $0x75] sm:$0x1]  ;;  %v292_v11 = vld [vmem:[%s4519_s26 + $0x77] sm:$0x1]  ;;  %v489_v12 = vsel %vm400_vm3, %v488_v59, %v487_v8 }
  0x2a   : > { %v441_v1 = vsel %vm412_vm7, %v440_v44, %v439_v7  ;;  %v293_v13 = vld [vmem:[%s4519_s26 + $0x79] sm:$0x1]  ;;  %v294_v14 = vld [vmem:[%s4519_s26 + $0x7b] sm:$0x1]  ;;  %v442_v15 = vrot.slane %v288_v5, 7  ;;  %v444_v16 = vrot.slane %v289_v6, 6  ;;  %v491_v17 = vsel %vm403_vm4, %v490_v60, %v489_v12 }
  0x2b   : > { %4316 = vmatprep.mubr.msk.f32.mxu0 %vm512_vm8, %v441_v1  ;;  %v446_v18 = vrot.slane %v290_v9, 5  ;;  %v448_v19 = vrot.slane %v291_v10, 4  ;;  %v450_v20 = vrot.slane %v292_v11, 3  ;;  %v319_v21 = vld [vmem:[%s4519_s26 + $0xfd] sm:$0x1]  ;;  %v493_v22 = vsel %vm406_vm5, %v492_v61, %v491_v17 }
  0x2c   : > { %v443_v23 = vsel %vm394_vm1, %v442_v15, %v287_v62  ;;  %v452_v25 = vrot.slane %v293_v13, 2  ;;  %v454_v26 = vrot.slane %v294_v14, 1  ;;  %v320_v27 = vld [vmem:[%s4519_s26 + $0xff] sm:$0x1]  ;;  %v321_v28 = vld [vmem:[%s4519_s26 + $0x101] sm:$0x1]  ;;  %v495_v29 = vsel %vm409_vm6, %v494_v3, %v493_v22 }
  0x2d   : > { %v445_v30 = vsel %vm397_vm2, %v444_v16, %v443_v23  ;;  %v322_v31 = vld [vmem:[%s4519_s26 + $0x103] sm:$0x1]  ;;  %v323_v32 = vld [vmem:[%s4519_s26 + $0x105] sm:$0x1]  ;;  %v324_v33 = vld [vmem:[%s4519_s26 + $0x107] sm:$0x1]  ;;  %v497_v34 = vsel %vm412_vm7, %v496_v4, %v495_v29 }
  0x2e   : > { %v447_v35 = vsel %vm400_vm3, %v446_v18, %v445_v30  ;;  %v325_v36 = vld [vmem:[%s4519_s26 + $0x109] sm:$0x1]  ;;  %v326_v37 = vld [vmem:[%s4519_s26 + $0x10b] sm:$0x1]  ;;  %v498_v38 = vrot.slane %v320_v27, 7  ;;  %v500_v39 = vrot.slane %v321_v28, 6  ;;  %4322 = vmatprep.mubr.msk.f32.mxu1 %vm512_vm8, %v497_v34 }
  0x2f   : > { %v449_v40 = vsel %vm403_vm4, %v448_v19, %v447_v35  ;;  %v502_v41 = vrot.slane %v322_v31, 5  ;;  %v504_v42 = vrot.slane %v323_v32, 4  ;;  %v506_v43 = vrot.slane %v324_v33, 3  ;;  %v198_v44 = vld [vmem:[%s4519_s26] sm:$0x1] }
  0x30   : > { %v451_v45 = vsel %vm406_vm5, %v450_v20, %v449_v40  ;;  %v499_v46 = vsel %vm394_vm1, %v498_v38, %v319_v21  ;;  %v508_v48 = vrot.slane %v325_v36, 2  ;;  %v510_v49 = vrot.slane %v326_v37, 1  ;;  %v199_v50 = vld [vmem:[%s4519_s26 + $0x2] sm:$0x1]  ;;  %v200_v51 = vld [vmem:[%s4519_s26 + $0x4] sm:$0x1] }
  0x31   : > { %v453_v2 = vsel %vm409_vm6, %v452_v25, %v451_v45  ;;  %v501_v52 = vsel %vm397_vm2, %v500_v39, %v499_v46  ;;  %v201_v53 = vld [vmem:[%s4519_s26 + $0x6] sm:$0x1]  ;;  %v202_v54 = vld [vmem:[%s4519_s26 + $0x8] sm:$0x1]  ;;  %v203_v55 = vld [vmem:[%s4519_s26 + $0xa] sm:$0x1] }
  0x32   : > { %v455_v56 = vsel %vm412_vm7, %v454_v26, %v453_v2  ;;  %v503_v57 = vsel %vm400_vm3, %v502_v41, %v501_v52  ;;  %v204_v58 = vld [vmem:[%s4519_s26 + $0xc] sm:$0x1]  ;;  %v205_v59 = vld [vmem:[%s4519_s26 + $0xe] sm:$0x1]  ;;  %v702_v60 = vrot.slane %v199_v50, 7  ;;  %v704_v61 = vrot.slane %v200_v51, 6 }
  0x33   : > { %4317 = vmatmul.mubr.msk.f32.gmra.mxu0 %vm512_vm8, %v455_v56  ;;  %v505_v62 = vsel %vm403_vm4, %v504_v42, %v503_v57  ;;  %v706_v63 = vrot.slane %v201_v53, 5  ;;  %v708_v0 = vrot.slane %v202_v54, 4  ;;  %v710_v3 = vrot.slane %v203_v55, 3  ;;  %v3708_v4 = vld [vmem:[%s4519_s26 + $0x2] sm:$0x1] }
  0x34   : > { %v507_v5 = vsel %vm406_vm5, %v506_v43, %v505_v62  ;;  %v703_v6 = vsel %vm394_vm1, %v702_v60, %v198_v44  ;;  %v712_v7 = vrot.slane %v204_v58, 2  ;;  %v714_v8 = vrot.slane %v205_v59, 1  ;;  %v3709_v9 = vld [vmem:[%s4519_s26 + $0x4] sm:$0x1]  ;;  %v3710_v10 = vld [vmem:[%s4519_s26 + $0x6] sm:$0x1] }
  0x35   : > { %v509_v11 = vsel %vm409_vm6, %v508_v48, %v507_v5  ;;  %v705_v1 = vsel %vm397_vm2, %v704_v61, %v703_v6  ;;  %v3711_v12 = vld [vmem:[%s4519_s26 + $0x8] sm:$0x1]  ;;  %v3712_v13 = vld [vmem:[%s4519_s26 + $0xa] sm:$0x1]  ;;  %v3713_v14 = vld [vmem:[%s4519_s26 + $0xc] sm:$0x1] }
  0x36   : > { %v511_v15 = vsel %vm412_vm7, %v510_v49, %v509_v11  ;;  %v707_v16 = vsel %vm400_vm3, %v706_v63, %v705_v1  ;;  %v3714_v17 = vld [vmem:[%s4519_s26 + $0xe] sm:$0x1]  ;;  %v3715_v18 = vld [vmem:[%s4519_s26 + $0x10] sm:$0x1]  ;;  %v1069_v19 = vrot.slane %v3709_v9, 7  ;;  %v1071_v20 = vrot.slane %v3710_v10, 6 }
  0x37   : > { %4323 = vmatmul.mubr.msk.f32.gmra.mxu1 %vm512_vm8, %v511_v15  ;;  %v709_v21 = vsel %vm403_vm4, %v708_v0, %v707_v16  ;;  %v1073_v22 = vrot.slane %v3711_v12, 5  ;;  %v1075_v23 = vrot.slane %v3712_v13, 4  ;;  %v1077_v25 = vrot.slane %v3713_v14, 3  ;;  %v206_v26 = vld [vmem:[%s4519_s26 + $0x24] sm:$0x1] }
  0x38   : > { %v711_v27 = vsel %vm406_vm5, %v710_v3, %v709_v21  ;;  %v1070_v28 = vsel %vm394_vm1, %v1069_v19, %v3708_v4  ;;  %v1079_v29 = vrot.slane %v3714_v17, 2  ;;  %v1081_v30 = vrot.slane %v3715_v18, 1  ;;  %v207_v31 = vld [vmem:[%s4519_s26 + $0x26] sm:$0x1]  ;;  %v208_v32 = vld [vmem:[%s4519_s26 + $0x28] sm:$0x1] }
  0x39   : > { %v713_v33 = vsel %vm409_vm6, %v712_v7, %v711_v27  ;;  %v1072_v34 = vsel %vm397_vm2, %v1071_v20, %v1070_v28  ;;  %v209_v35 = vld [vmem:[%s4519_s26 + $0x2a] sm:$0x1]  ;;  %v210_v36 = vld [vmem:[%s4519_s26 + $0x2c] sm:$0x1]  ;;  %v211_v37 = vld [vmem:[%s4519_s26 + $0x2e] sm:$0x1] }
  0x3a   : > { %v715_v38 = vsel %vm412_vm7, %v714_v8, %v713_v33  ;;  %v1074_v39 = vsel %vm400_vm3, %v1073_v22, %v1072_v34  ;;  %v212_v40 = vld [vmem:[%s4519_s26 + $0x30] sm:$0x1]  ;;  %v213_v41 = vld [vmem:[%s4519_s26 + $0x32] sm:$0x1]  ;;  %v716_v42 = vrot.slane %v207_v31, 7  ;;  %v718_v43 = vrot.slane %v208_v32, 6 }
  0x3b   : > { %4327 = vmatprep.mubr.msk.f32.mxu1 %vm512_vm8, %v715_v38  ;;  %v1076_v44 = vsel %vm403_vm4, %v1075_v23, %v1074_v39  ;;  %v720_v45 = vrot.slane %v209_v35, 5  ;;  %v722_v46 = vrot.slane %v210_v36, 4  ;;  %v724_v48 = vrot.slane %v211_v37, 3  ;;  %v3716_v49 = vld [vmem:[%s4519_s26 + $0x26] sm:$0x1] }
  0x3c   : > { %v1078_v50 = vsel %vm406_vm5, %v1077_v25, %v1076_v44  ;;  %v717_v51 = vsel %vm394_vm1, %v716_v42, %v206_v26  ;;  %v726_v2 = vrot.slane %v212_v40, 2  ;;  %v728_v52 = vrot.slane %v213_v41, 1  ;;  %v3717_v53 = vld [vmem:[%s4519_s26 + $0x28] sm:$0x1]  ;;  %v3718_v54 = vld [vmem:[%s4519_s26 + $0x2a] sm:$0x1] }
  0x3d   : > { %v1080_v55 = vsel %vm409_vm6, %v1079_v29, %v1078_v50  ;;  %v719_v56 = vsel %vm397_vm2, %v718_v43, %v717_v51  ;;  %v3719_v57 = vld [vmem:[%s4519_s26 + $0x2c] sm:$0x1]  ;;  %v3720_v58 = vld [vmem:[%s4519_s26 + $0x2e] sm:$0x1]  ;;  %v3721_v59 = vld [vmem:[%s4519_s26 + $0x30] sm:$0x1] }
  0x3e   : > { %v1082_v60 = vsel %vm412_vm7, %v1081_v30, %v1080_v55  ;;  %v721_v61 = vsel %vm400_vm3, %v720_v45, %v719_v56  ;;  %v3722_v62 = vld [vmem:[%s4519_s26 + $0x32] sm:$0x1]  ;;  %v3723_v63 = vld [vmem:[%s4519_s26 + $0x34] sm:$0x1]  ;;  %v1083_v0 = vrot.slane %v3717_v53, 7  ;;  %v1085_v3 = vrot.slane %v3718_v54, 6 }
  0x3f   : > { %4341 = vmatprep.mubr.msk.f32.mxu0 %vm512_vm8, %v1082_v60  ;;  %v723_v4 = vsel %vm403_vm4, %v722_v46, %v721_v61  ;;  %v1087_v5 = vrot.slane %v3719_v57, 5  ;;  %v1089_v6 = vrot.slane %v3720_v58, 4  ;;  %v1091_v7 = vrot.slane %v3721_v59, 3  ;;  %v214_v8 = vld [vmem:[%s4519_s26 + $0x48] sm:$0x1] }
  0x40   : > { %v725_v9 = vsel %vm406_vm5, %v724_v48, %v723_v4  ;;  %v1084_v10 = vsel %vm394_vm1, %v1083_v0, %v3716_v49  ;;  %v1093_v11 = vrot.slane %v3722_v62, 2  ;;  %v1095_v1 = vrot.slane %v3723_v63, 1  ;;  %v215_v12 = vld [vmem:[%s4519_s26 + $0x4a] sm:$0x1]  ;;  %v216_v13 = vld [vmem:[%s4519_s26 + $0x4c] sm:$0x1] }
  0x41   : > { %v4727_v14 = vld [vmem:[%s5920_s1 + $0x14] sm:$0x7]  ;;  %v727_v15 = vsel %vm409_vm6, %v726_v2, %v725_v9  ;;  %v1086_v16 = vsel %vm397_vm2, %v1085_v3, %v1084_v10  ;;  %v217_v17 = vld [vmem:[%s4519_s26 + $0x4e] sm:$0x1]  ;;  %v218_v18 = vld [vmem:[%s4519_s26 + $0x50] sm:$0x1] }
  0x42   : > { %v219_v19 = vld [vmem:[%s4519_s26 + $0x52] sm:$0x1]  ;;  %v729_v20 = vsel %vm412_vm7, %v728_v52, %v727_v15  ;;  %v1088_v21 = vsel %vm400_vm3, %v1087_v5, %v1086_v16  ;;  %v220_v22 = vld [vmem:[%s4519_s26 + $0x54] sm:$0x1]  ;;  %v221_v23 = vld [vmem:[%s4519_s26 + $0x56] sm:$0x1] }
  0x43   : > { %v730_v25 = vrot.slane %v215_v12, 7  ;;  %v732_v26 = vrot.slane %v216_v13, 6  ;;  %4328 = vmatmul.mubr.msk.f32.vlgmr.msra.gmra.mxu1 %vm512_vm8, %v729_v20  ;;  %v1090_v27 = vsel %vm403_vm4, %v1089_v6, %v1088_v21  ;;  %v734_v28 = vrot.slane %v217_v17, 5  ;;  %v3724_v31 = vld [vmem:[%s4519_s26 + $0x4a] sm:$0x1] }
  0x44   : > { %v736_v29 = vrot.slane %v218_v18, 4  ;;  %v738_v30 = vrot.slane %v219_v19, 3  ;;  %v1092_v32 = vsel %vm406_vm5, %v1091_v7, %v1090_v27  ;;  %4354 = vmatpush3.msk.msra.mxu1 %vm529_vm0, %v4604_v47  ;;  %v740_v34 = vrot.slane %v220_v22, 2  ;;  %v3725_v36 = vld [vmem:[%s4519_s26 + $0x4c] sm:$0x1] }
  0x45   : > { %v731_v33 = vsel %vm394_vm1, %v730_v25, %v214_v8  ;;  %v742_v35 = vrot.slane %v221_v23, 1  ;;  %v3726_v37 = vld [vmem:[%s4519_s26 + $0x4e] sm:$0x1]  ;;  %v4750_v38 = vld [vmem:[%s5920_s1 + $0x18] sm:$0x7]  ;;  %v1094_v39 = vsel %vm409_vm6, %v1093_v11, %v1092_v32  ;;  %4381 = vmatprep.subr.msk.mxu1 %vm529_vm0, %v4727_v14  ;;  %v1097_v48 = vrot.slane %v3725_v36, 7 }
  0x46   : > { %v733_v40 = vsel %vm397_vm2, %v732_v26, %v731_v33  ;;  %v3727_v41 = vld [vmem:[%s4519_s26 + $0x50] sm:$0x1]  ;;  %v3728_v42 = vld [vmem:[%s4519_s26 + $0x52] sm:$0x1]  ;;  %v3729_v47 = vld [vmem:[%s4519_s26 + $0x54] sm:$0x1]  ;;  %v1096_v43 = vsel %vm412_vm7, %v1095_v1, %v1094_v39 }
  0x47   : > { %v735_v44 = vsel %vm400_vm3, %v734_v28, %v733_v40  ;;  %v3730_v45 = vld [vmem:[%s4519_s26 + $0x56] sm:$0x1]  ;;  %v3731_v46 = vld [vmem:[%s4519_s26 + $0x58] sm:$0x1]  ;;  %v1099_v49 = vrot.slane %v3726_v37, 6  ;;  %4342 = vmatmul.mubr.msk.f32.vlgmr.msra.gmra.mxu0 %vm512_vm8, %v1096_v43  ;;  %v1101_v51 = vrot.slane %v3727_v41, 5  ;;  %v1098_v55 = vsel %vm394_vm1, %v1097_v48, %v3724_v31 }
  0x48   : > { %v737_v50 = vsel %vm403_vm4, %v736_v29, %v735_v44  ;;  %v1103_v2 = vrot.slane %v3728_v42, 4  ;;  %v1105_v52 = vrot.slane %v3729_v47, 3  ;;  %v222_v53 = vld [vmem:[%s4519_s26 + $0x6c] sm:$0x1]  ;;  %4368 = vmatpush3.msk.msra.mxu0 %vm529_vm0, %v4581_v24  ;;  %v1107_v56 = vrot.slane %v3730_v45, 2 }
  0x49   : > { %v739_v54 = vsel %vm406_vm5, %v738_v30, %v737_v50  ;;  %v1109_v57 = vrot.slane %v3731_v46, 1  ;;  %v223_v58 = vld [vmem:[%s4519_s26 + $0x6e] sm:$0x1]  ;;  %v224_v59 = vld [vmem:[%s4519_s26 + $0x70] sm:$0x1]  ;;  %v1100_v61 = vsel %vm397_vm2, %v1099_v49, %v1098_v55  ;;  %4395 = vmatprep.subr.msk.mxu0 %vm529_vm0, %v4750_v38 }
  0x4a   : > { %v741_v60 = vsel %vm409_vm6, %v740_v34, %v739_v54  ;;  %v225_v62 = vld [vmem:[%s4519_s26 + $0x72] sm:$0x1]  ;;  %v226_v63 = vld [vmem:[%s4519_s26 + $0x74] sm:$0x1]  ;;  %v227_v0 = vld [vmem:[%s4519_s26 + $0x76] sm:$0x1]  ;;  %v1102_v3 = vsel %vm400_vm3, %v1101_v51, %v1100_v61 }
  0x4b   : > { %v743_v24 = vsel %vm412_vm7, %v742_v35, %v741_v60  ;;  %v228_v4 = vld [vmem:[%s4519_s26 + $0x78] sm:$0x1]  ;;  %v229_v5 = vld [vmem:[%s4519_s26 + $0x7a] sm:$0x1]  ;;  %v744_v6 = vrot.slane %v223_v58, 7  ;;  %v746_v7 = vrot.slane %v224_v59, 6  ;;  %v1104_v8 = vsel %vm403_vm4, %v1103_v2, %v1102_v3 }
  0x4c   : > { %4330 = vmatprep.mubr.msk.f32.mxu1 %vm512_vm8, %v743_v24  ;;  %v748_v9 = vrot.slane %v225_v62, 5  ;;  %v750_v10 = vrot.slane %v226_v63, 4  ;;  %v752_v11 = vrot.slane %v227_v0, 3  ;;  %v3732_v1 = vld [vmem:[%s4519_s26 + $0x6e] sm:$0x1]  ;;  %v1106_v12 = vsel %vm406_vm5, %v1105_v52, %v1104_v8 }
  0x4d   : > { %v745_v13 = vsel %vm394_vm1, %v744_v6, %v222_v53  ;;  %v754_v15 = vrot.slane %v228_v4, 2  ;;  %v756_v16 = vrot.slane %v229_v5, 1  ;;  %v3733_v17 = vld [vmem:[%s4519_s26 + $0x70] sm:$0x1]  ;;  %v3734_v18 = vld [vmem:[%s4519_s26 + $0x72] sm:$0x1]  ;;  %v1108_v19 = vsel %vm409_vm6, %v1107_v56, %v1106_v12 }
  0x4e   : > { %v747_v20 = vsel %vm397_vm2, %v746_v7, %v745_v13  ;;  %v3735_v21 = vld [vmem:[%s4519_s26 + $0x74] sm:$0x1]  ;;  %v3736_v22 = vld [vmem:[%s4519_s26 + $0x76] sm:$0x1]  ;;  %v3737_v23 = vld [vmem:[%s4519_s26 + $0x78] sm:$0x1]  ;;  %v1110_v25 = vsel %vm412_vm7, %v1109_v57, %v1108_v19 }
  0x4f   : > { %v749_v26 = vsel %vm400_vm3, %v748_v9, %v747_v20  ;;  %v3738_v27 = vld [vmem:[%s4519_s26 + $0x7a] sm:$0x1]  ;;  %v3739_v28 = vld [vmem:[%s4519_s26 + $0x7c] sm:$0x1]  ;;  %v1111_v29 = vrot.slane %v3733_v17, 7  ;;  %v1113_v30 = vrot.slane %v3734_v18, 6  ;;  %4344 = vmatprep.mubr.msk.f32.mxu0 %vm512_vm8, %v1110_v25 }
  0x50   : > { %v751_v31 = vsel %vm403_vm4, %v750_v10, %v749_v26  ;;  %v1115_v32 = vrot.slane %v3735_v21, 5  ;;  %v1117_v33 = vrot.slane %v3736_v22, 4  ;;  %v1119_v34 = vrot.slane %v3737_v23, 3  ;;  %v230_v35 = vld [vmem:[%s4519_s26 + $0x90] sm:$0x1] }
  0x51   : > { %v753_v36 = vsel %vm406_vm5, %v752_v11, %v751_v31  ;;  %v1112_v37 = vsel %vm394_vm1, %v1111_v29, %v3732_v1  ;;  %v1121_v39 = vrot.slane %v3738_v27, 2  ;;  %v1123_v40 = vrot.slane %v3739_v28, 1  ;;  %v231_v41 = vld [vmem:[%s4519_s26 + $0x92] sm:$0x1]  ;;  %v232_v42 = vld [vmem:[%s4519_s26 + $0x94] sm:$0x1] }
  0x52   : > { %v755_v47 = vsel %vm409_vm6, %v754_v15, %v753_v36  ;;  %v1114_v43 = vsel %vm397_vm2, %v1113_v30, %v1112_v37  ;;  %v233_v44 = vld [vmem:[%s4519_s26 + $0x96] sm:$0x1]  ;;  %v234_v45 = vld [vmem:[%s4519_s26 + $0x98] sm:$0x1]  ;;  %v235_v46 = vld [vmem:[%s4519_s26 + $0x9a] sm:$0x1] }
  0x53   : > { %v757_v48 = vsel %vm412_vm7, %v756_v16, %v755_v47  ;;  %v1116_v49 = vsel %vm400_vm3, %v1115_v32, %v1114_v43  ;;  %v236_v50 = vld [vmem:[%s4519_s26 + $0x9c] sm:$0x1]  ;;  %v237_v51 = vld [vmem:[%s4519_s26 + $0x9e] sm:$0x1]  ;;  %v758_v2 = vrot.slane %v231_v41, 7  ;;  %v760_v52 = vrot.slane %v232_v42, 6 }
  0x54   : > { %4331 = vmatmul.mubr.msk.f32.gmra.mxu1 %vm512_vm8, %v757_v48  ;;  %v1118_v53 = vsel %vm403_vm4, %v1117_v33, %v1116_v49  ;;  %v762_v54 = vrot.slane %v233_v44, 5  ;;  %v764_v55 = vrot.slane %v234_v45, 4  ;;  %v766_v56 = vrot.slane %v235_v46, 3  ;;  %v3740_v57 = vld [vmem:[%s4519_s26 + $0x92] sm:$0x1] }
  0x55   : > { %v1120_v58 = vsel %vm406_vm5, %v1119_v34, %v1118_v53  ;;  %v759_v59 = vsel %vm394_vm1, %v758_v2, %v230_v35  ;;  %v768_v60 = vrot.slane %v236_v50, 2  ;;  %v770_v61 = vrot.slane %v237_v51, 1  ;;  %v3741_v62 = vld [vmem:[%s4519_s26 + $0x94] sm:$0x1]  ;;  %v3742_v63 = vld [vmem:[%s4519_s26 + $0x96] sm:$0x1] }
  0x56   : > { %v1122_v0 = vsel %vm409_vm6, %v1121_v39, %v1120_v58  ;;  %v761_v24 = vsel %vm397_vm2, %v760_v52, %v759_v59  ;;  %v3743_v3 = vld [vmem:[%s4519_s26 + $0x98] sm:$0x1]  ;;  %v3744_v4 = vld [vmem:[%s4519_s26 + $0x9a] sm:$0x1]  ;;  %v3745_v5 = vld [vmem:[%s4519_s26 + $0x9c] sm:$0x1] }
  0x57   : > { %v1124_v6 = vsel %vm412_vm7, %v1123_v40, %v1122_v0  ;;  %v763_v7 = vsel %vm400_vm3, %v762_v54, %v761_v24  ;;  %v3746_v8 = vld [vmem:[%s4519_s26 + $0x9e] sm:$0x1]  ;;  %v3747_v9 = vld [vmem:[%s4519_s26 + $0xa0] sm:$0x1]  ;;  %v1125_v10 = vrot.slane %v3741_v62, 7  ;;  %v1127_v11 = vrot.slane %v3742_v63, 6 }
  0x58   : > { %4345 = vmatmul.mubr.msk.f32.gmra.mxu0 %vm512_vm8, %v1124_v6  ;;  %v765_v1 = vsel %vm403_vm4, %v764_v55, %v763_v7  ;;  %v1129_v12 = vrot.slane %v3743_v3, 5  ;;  %v1131_v13 = vrot.slane %v3744_v4, 4  ;;  %v1133_v15 = vrot.slane %v3745_v5, 3  ;;  %v238_v16 = vld [vmem:[%s4519_s26 + $0xb4] sm:$0x1] }
  0x59   : > { %v767_v17 = vsel %vm406_vm5, %v766_v56, %v765_v1  ;;  %v1126_v18 = vsel %vm394_vm1, %v1125_v10, %v3740_v57  ;;  %v1135_v19 = vrot.slane %v3746_v8, 2  ;;  %v1137_v20 = vrot.slane %v3747_v9, 1  ;;  %v239_v21 = vld [vmem:[%s4519_s26 + $0xb6] sm:$0x1]  ;;  %v240_v22 = vld [vmem:[%s4519_s26 + $0xb8] sm:$0x1] }
  0x5a   : > { %v769_v23 = vsel %vm409_vm6, %v768_v60, %v767_v17  ;;  %v1128_v25 = vsel %vm397_vm2, %v1127_v11, %v1126_v18  ;;  %v241_v26 = vld [vmem:[%s4519_s26 + $0xba] sm:$0x1]  ;;  %v242_v27 = vld [vmem:[%s4519_s26 + $0xbc] sm:$0x1]  ;;  %v243_v28 = vld [vmem:[%s4519_s26 + $0xbe] sm:$0x1] }
  0x5b   : > { %v771_v29 = vsel %vm412_vm7, %v770_v61, %v769_v23  ;;  %v1130_v30 = vsel %vm400_vm3, %v1129_v12, %v1128_v25  ;;  %v244_v31 = vld [vmem:[%s4519_s26 + $0xc0] sm:$0x1]  ;;  %v245_v32 = vld [vmem:[%s4519_s26 + $0xc2] sm:$0x1]  ;;  %v772_v33 = vrot.slane %v239_v21, 7  ;;  %v774_v34 = vrot.slane %v240_v22, 6 }
  0x5c   : > { %4333 = vmatprep.mubr.msk.f32.mxu1 %vm512_vm8, %v771_v29  ;;  %v1132_v35 = vsel %vm403_vm4, %v1131_v13, %v1130_v30  ;;  %v776_v36 = vrot.slane %v241_v26, 5  ;;  %v778_v37 = vrot.slane %v242_v27, 4  ;;  %v780_v39 = vrot.slane %v243_v28, 3  ;;  %v3748_v40 = vld [vmem:[%s4519_s26 + $0xb6] sm:$0x1] }
  0x5d   : > { %v1134_v41 = vsel %vm406_vm5, %v1133_v15, %v1132_v35  ;;  %v773_v42 = vsel %vm394_vm1, %v772_v33, %v238_v16  ;;  %v782_v47 = vrot.slane %v244_v31, 2  ;;  %v784_v43 = vrot.slane %v245_v32, 1  ;;  %v3749_v44 = vld [vmem:[%s4519_s26 + $0xb8] sm:$0x1]  ;;  %v3750_v45 = vld [vmem:[%s4519_s26 + $0xba] sm:$0x1] }
  0x5e   : > { %v1136_v46 = vsel %vm409_vm6, %v1135_v19, %v1134_v41  ;;  %v775_v48 = vsel %vm397_vm2, %v774_v34, %v773_v42  ;;  %v3751_v49 = vld [vmem:[%s4519_s26 + $0xbc] sm:$0x1]  ;;  %v3752_v50 = vld [vmem:[%s4519_s26 + $0xbe] sm:$0x1]  ;;  %v3753_v51 = vld [vmem:[%s4519_s26 + $0xc0] sm:$0x1] }
  0x5f   : > { %v1138_v2 = vsel %vm412_vm7, %v1137_v20, %v1136_v46  ;;  %v777_v52 = vsel %vm400_vm3, %v776_v36, %v775_v48  ;;  %v3754_v53 = vld [vmem:[%s4519_s26 + $0xc2] sm:$0x1]  ;;  %v3755_v54 = vld [vmem:[%s4519_s26 + $0xc4] sm:$0x1]  ;;  %v1139_v55 = vrot.slane %v3749_v44, 7  ;;  %v1141_v56 = vrot.slane %v3750_v45, 6 }
  0x60   : > { %4347 = vmatprep.mubr.msk.f32.mxu0 %vm512_vm8, %v1138_v2  ;;  %v779_v57 = vsel %vm403_vm4, %v778_v37, %v777_v52  ;;  %v1143_v58 = vrot.slane %v3751_v49, 5  ;;  %v1145_v59 = vrot.slane %v3752_v50, 4  ;;  %v1147_v60 = vrot.slane %v3753_v51, 3  ;;  %v246_v61 = vld [vmem:[%s4519_s26 + $0xd8] sm:$0x1] }
  0x61   : > { %v781_v62 = vsel %vm406_vm5, %v780_v39, %v779_v57  ;;  %v1140_v63 = vsel %vm394_vm1, %v1139_v55, %v3748_v40  ;;  %v1149_v0 = vrot.slane %v3754_v53, 2  ;;  %v1151_v24 = vrot.slane %v3755_v54, 1  ;;  %v247_v3 = vld [vmem:[%s4519_s26 + $0xda] sm:$0x1]  ;;  %v248_v4 = vld [vmem:[%s4519_s26 + $0xdc] sm:$0x1] }
  0x62   : > { %v783_v5 = vsel %vm409_vm6, %v782_v47, %v781_v62  ;;  %v1142_v6 = vsel %vm397_vm2, %v1141_v56, %v1140_v63  ;;  %v249_v7 = vld [vmem:[%s4519_s26 + $0xde] sm:$0x1]  ;;  %v250_v8 = vld [vmem:[%s4519_s26 + $0xe0] sm:$0x1]  ;;  %v251_v9 = vld [vmem:[%s4519_s26 + $0xe2] sm:$0x1] }
  0x63   : > { %v785_v10 = vsel %vm412_vm7, %v784_v43, %v783_v5  ;;  %v1144_v11 = vsel %vm400_vm3, %v1143_v58, %v1142_v6  ;;  %v252_v1 = vld [vmem:[%s4519_s26 + $0xe4] sm:$0x1]  ;;  %v253_v12 = vld [vmem:[%s4519_s26 + $0xe6] sm:$0x1]  ;;  %v786_v13 = vrot.slane %v247_v3, 7  ;;  %v788_v15 = vrot.slane %v248_v4, 6 }
  0x64   : > { %4334 = vmatmul.mubr.msk.f32.gmra.mxu1 %vm512_vm8, %v785_v10  ;;  %v1146_v16 = vsel %vm403_vm4, %v1145_v59, %v1144_v11  ;;  %v790_v17 = vrot.slane %v249_v7, 5  ;;  %v792_v18 = vrot.slane %v250_v8, 4  ;;  %v794_v19 = vrot.slane %v251_v9, 3  ;;  %v3756_v20 = vld [vmem:[%s4519_s26 + $0xda] sm:$0x1] }
  0x65   : > { %v1148_v21 = vsel %vm406_vm5, %v1147_v60, %v1146_v16  ;;  %v787_v22 = vsel %vm394_vm1, %v786_v13, %v246_v61  ;;  %v796_v23 = vrot.slane %v252_v1, 2  ;;  %v798_v25 = vrot.slane %v253_v12, 1  ;;  %v3757_v26 = vld [vmem:[%s4519_s26 + $0xdc] sm:$0x1]  ;;  %v3758_v27 = vld [vmem:[%s4519_s26 + $0xde] sm:$0x1] }
  0x66   : > { %v1150_v28 = vsel %vm409_vm6, %v1149_v0, %v1148_v21  ;;  %v789_v29 = vsel %vm397_vm2, %v788_v15, %v787_v22  ;;  %v3759_v30 = vld [vmem:[%s4519_s26 + $0xe0] sm:$0x1]  ;;  %v3760_v31 = vld [vmem:[%s4519_s26 + $0xe2] sm:$0x1]  ;;  %v3761_v32 = vld [vmem:[%s4519_s26 + $0xe4] sm:$0x1] }
  0x67   : > { %v1152_v33 = vsel %vm412_vm7, %v1151_v24, %v1150_v28  ;;  %v791_v34 = vsel %vm400_vm3, %v790_v17, %v789_v29  ;;  %v3762_v35 = vld [vmem:[%s4519_s26 + $0xe6] sm:$0x1]  ;;  %v3763_v36 = vld [vmem:[%s4519_s26 + $0xe8] sm:$0x1]  ;;  %v1153_v37 = vrot.slane %v3757_v26, 7  ;;  %v1155_v39 = vrot.slane %v3758_v27, 6 }
  0x68   : > { %4348 = vmatmul.mubr.msk.f32.gmra.mxu0 %vm512_vm8, %v1152_v33  ;;  %v793_v40 = vsel %vm403_vm4, %v792_v18, %v791_v34  ;;  %v1157_v41 = vrot.slane %v3759_v30, 5  ;;  %v1159_v42 = vrot.slane %v3760_v31, 4  ;;  %v1161_v47 = vrot.slane %v3761_v32, 3  ;;  %v254_v43 = vld [vmem:[%s4519_s26 + $0xfc] sm:$0x1] }
  0x69   : > { %v795_v44 = vsel %vm406_vm5, %v794_v19, %v793_v40  ;;  %v1154_v45 = vsel %vm394_vm1, %v1153_v37, %v3756_v20  ;;  %v1163_v46 = vrot.slane %v3762_v35, 2  ;;  %v1165_v48 = vrot.slane %v3763_v36, 1  ;;  %v255_v49 = vld [vmem:[%s4519_s26 + $0xfe] sm:$0x1]  ;;  %v256_v50 = vld [vmem:[%s4519_s26 + $0x100] sm:$0x1] }
  0x6a   : > { %v797_v51 = vsel %vm409_vm6, %v796_v23, %v795_v44  ;;  %v1156_v2 = vsel %vm397_vm2, %v1155_v39, %v1154_v45  ;;  %v257_v52 = vld [vmem:[%s4519_s26 + $0x102] sm:$0x1]  ;;  %v258_v53 = vld [vmem:[%s4519_s26 + $0x104] sm:$0x1]  ;;  %v259_v54 = vld [vmem:[%s4519_s26 + $0x106] sm:$0x1] }
  0x6b   : > { %v799_v55 = vsel %vm412_vm7, %v798_v25, %v797_v51  ;;  %v1158_v56 = vsel %vm400_vm3, %v1157_v41, %v1156_v2  ;;  %v260_v57 = vld [vmem:[%s4519_s26 + $0x108] sm:$0x1]  ;;  %v261_v58 = vld [vmem:[%s4519_s26 + $0x10a] sm:$0x1]  ;;  %v800_v59 = vrot.slane %v255_v49, 7  ;;  %v802_v60 = vrot.slane %v256_v50, 6 }
  0x6c   : > { %4336 = vmatprep.mubr.msk.f32.mxu1 %vm512_vm8, %v799_v55  ;;  %v1160_v61 = vsel %vm403_vm4, %v1159_v42, %v1158_v56  ;;  %v804_v62 = vrot.slane %v257_v52, 5  ;;  %v806_v63 = vrot.slane %v258_v53, 4  ;;  %v808_v0 = vrot.slane %v259_v54, 3  ;;  %v3764_v24 = vld [vmem:[%s4519_s26 + $0xfe] sm:$0x1] }
  0x6d   : > { %v1162_v3 = vsel %vm406_vm5, %v1161_v47, %v1160_v61  ;;  %v801_v4 = vsel %vm394_vm1, %v800_v59, %v254_v43  ;;  %v810_v5 = vrot.slane %v260_v57, 2  ;;  %v812_v6 = vrot.slane %v261_v58, 1  ;;  %v3765_v7 = vld [vmem:[%s4519_s26 + $0x100] sm:$0x1]  ;;  %v3766_v8 = vld [vmem:[%s4519_s26 + $0x102] sm:$0x1] }
  0x6e   : > { %v1164_v9 = vsel %vm409_vm6, %v1163_v46, %v1162_v3  ;;  %v803_v10 = vsel %vm397_vm2, %v802_v60, %v801_v4  ;;  %v3767_v11 = vld [vmem:[%s4519_s26 + $0x104] sm:$0x1]  ;;  %v3768_v1 = vld [vmem:[%s4519_s26 + $0x106] sm:$0x1]  ;;  %v3769_v12 = vld [vmem:[%s4519_s26 + $0x108] sm:$0x1] }
  0x6f   : > { %v1166_v13 = vsel %vm412_vm7, %v1165_v48, %v1164_v9  ;;  %v805_v15 = vsel %vm400_vm3, %v804_v62, %v803_v10  ;;  %v3770_v16 = vld [vmem:[%s4519_s26 + $0x10a] sm:$0x1]  ;;  %v3771_v17 = vld [vmem:[%s4519_s26 + $0x10c] sm:$0x1]  ;;  %v1167_v18 = vrot.slane %v3765_v7, 7  ;;  %v1169_v19 = vrot.slane %v3766_v8, 6 }
  0x70   : > { %4350 = vmatprep.mubr.msk.f32.mxu0 %vm512_vm8, %v1166_v13  ;;  %v807_v20 = vsel %vm403_vm4, %v806_v63, %v805_v15  ;;  %v1171_v21 = vrot.slane %v3767_v11, 5  ;;  %v1173_v22 = vrot.slane %v3768_v1, 4  ;;  %v1175_v23 = vrot.slane %v3769_v12, 3  ;;  %v3782_v25 = vld [vmem:[%s4519_s26 + $0x12] sm:$0x1] }
  0x71   : > { %v809_v26 = vsel %vm406_vm5, %v808_v0, %v807_v20  ;;  %v1168_v27 = vsel %vm394_vm1, %v1167_v18, %v3764_v24  ;;  %v1177_v28 = vrot.slane %v3770_v16, 2  ;;  %v1179_v29 = vrot.slane %v3771_v17, 1  ;;  %v3783_v30 = vld [vmem:[%s4519_s26 + $0x14] sm:$0x1]  ;;  %v3784_v31 = vld [vmem:[%s4519_s26 + $0x16] sm:$0x1] }
  0x72   : > { %v811_v32 = vsel %vm409_vm6, %v810_v5, %v809_v26  ;;  %v1170_v33 = vsel %vm397_vm2, %v1169_v19, %v1168_v27  ;;  %v3785_v34 = vld [vmem:[%s4519_s26 + $0x18] sm:$0x1]  ;;  %v3786_v35 = vld [vmem:[%s4519_s26 + $0x1a] sm:$0x1]  ;;  %v3787_v36 = vld [vmem:[%s4519_s26 + $0x1c] sm:$0x1] }
  0x73   : > { %v813_v37 = vsel %vm412_vm7, %v812_v6, %v811_v32  ;;  %v1172_v39 = vsel %vm400_vm3, %v1171_v21, %v1170_v33  ;;  %v3788_v40 = vld [vmem:[%s4519_s26 + $0x1e] sm:$0x1]  ;;  %v3789_v41 = vld [vmem:[%s4519_s26 + $0x20] sm:$0x1]  ;;  %v1444_v42 = vrot.slane %v3783_v30, 7  ;;  %v1446_v47 = vrot.slane %v3784_v31, 6 }
  0x74   : > { %4337 = vmatmul.mubr.msk.f32.gmra.mxu1 %vm512_vm8, %v813_v37  ;;  %v1174_v43 = vsel %vm403_vm4, %v1173_v22, %v1172_v39  ;;  %v1448_v44 = vrot.slane %v3785_v34, 5  ;;  %v1450_v45 = vrot.slane %v3786_v35, 4  ;;  %v1452_v46 = vrot.slane %v3787_v36, 3  ;;  %v3856_v48 = vld [vmem:[%s4519_s26 + $0x13] sm:$0x1] }
  0x75   : > { %v1176_v49 = vsel %vm406_vm5, %v1175_v23, %v1174_v43  ;;  %v1445_v50 = vsel %vm394_vm1, %v1444_v42, %v3782_v25  ;;  %v1454_v51 = vrot.slane %v3788_v40, 2  ;;  %v1456_v2 = vrot.slane %v3789_v41, 1  ;;  %v3857_v52 = vld [vmem:[%s4519_s26 + $0x15] sm:$0x1]  ;;  %v3858_v53 = vld [vmem:[%s4519_s26 + $0x17] sm:$0x1] }
  0x76   : > { %v1178_v54 = vsel %vm409_vm6, %v1177_v28, %v1176_v49  ;;  %v1447_v55 = vsel %vm397_vm2, %v1446_v47, %v1445_v50  ;;  %v3859_v56 = vld [vmem:[%s4519_s26 + $0x19] sm:$0x1]  ;;  %v3860_v57 = vld [vmem:[%s4519_s26 + $0x1b] sm:$0x1]  ;;  %v3861_v58 = vld [vmem:[%s4519_s26 + $0x1d] sm:$0x1] }
  0x77   : > { %v1180_v59 = vsel %vm412_vm7, %v1179_v29, %v1178_v54  ;;  %v1449_v60 = vsel %vm400_vm3, %v1448_v44, %v1447_v55  ;;  %v3862_v61 = vld [vmem:[%s4519_s26 + $0x1f] sm:$0x1]  ;;  %v3863_v62 = vld [vmem:[%s4519_s26 + $0x21] sm:$0x1]  ;;  %v1818_v63 = vrot.slane %v3857_v52, 7  ;;  %v1820_v0 = vrot.slane %v3858_v53, 6 }
  0x78   : > { %4351 = vmatmul.mubr.msk.f32.gmra.mxu0 %vm512_vm8, %v1180_v59  ;;  %v1451_v24 = vsel %vm403_vm4, %v1450_v45, %v1449_v60  ;;  %v1822_v3 = vrot.slane %v3859_v56, 5  ;;  %v1824_v4 = vrot.slane %v3860_v57, 4  ;;  %v1826_v5 = vrot.slane %v3861_v58, 3  ;;  %v3790_v6 = vld [vmem:[%s4519_s26 + $0x36] sm:$0x1] }
  0x79   : > { %v1453_v7 = vsel %vm406_vm5, %v1452_v46, %v1451_v24  ;;  %v1819_v8 = vsel %vm394_vm1, %v1818_v63, %v3856_v48  ;;  %v1828_v9 = vrot.slane %v3862_v61, 2  ;;  %v1830_v10 = vrot.slane %v3863_v62, 1  ;;  %v3791_v11 = vld [vmem:[%s4519_s26 + $0x38] sm:$0x1]  ;;  %v3792_v1 = vld [vmem:[%s4519_s26 + $0x3a] sm:$0x1] }
  0x7a   : > { %v1455_v12 = vsel %vm409_vm6, %v1454_v51, %v1453_v7  ;;  %v1821_v13 = vsel %vm397_vm2, %v1820_v0, %v1819_v8  ;;  %v3793_v15 = vld [vmem:[%s4519_s26 + $0x3c] sm:$0x1]  ;;  %v3794_v16 = vld [vmem:[%s4519_s26 + $0x3e] sm:$0x1]  ;;  %v3795_v17 = vld [vmem:[%s4519_s26 + $0x40] sm:$0x1] }
  0x7b   : > { %v1457_v18 = vsel %vm412_vm7, %v1456_v2, %v1455_v12  ;;  %v1823_v19 = vsel %vm400_vm3, %v1822_v3, %v1821_v13  ;;  %v3796_v20 = vld [vmem:[%s4519_s26 + $0x42] sm:$0x1]  ;;  %v3797_v21 = vld [vmem:[%s4519_s26 + $0x44] sm:$0x1]  ;;  %v1458_v22 = vrot.slane %v3791_v11, 7  ;;  %v1460_v23 = vrot.slane %v3792_v1, 6 }
  0x7c   : > { %4355 = vmatprep.mubr.msk.f32.mxu1 %vm512_vm8, %v1457_v18  ;;  %v1825_v25 = vsel %vm403_vm4, %v1824_v4, %v1823_v19  ;;  %v1462_v26 = vrot.slane %v3793_v15, 5  ;;  %v1464_v27 = vrot.slane %v3794_v16, 4  ;;  %v1466_v28 = vrot.slane %v3795_v17, 3  ;;  %v3864_v29 = vld [vmem:[%s4519_s26 + $0x37] sm:$0x1] }
  0x7d   : > { %v1827_v30 = vsel %vm406_vm5, %v1826_v5, %v1825_v25  ;;  %v1459_v31 = vsel %vm394_vm1, %v1458_v22, %v3790_v6  ;;  %v1468_v32 = vrot.slane %v3796_v20, 2  ;;  %v1470_v33 = vrot.slane %v3797_v21, 1  ;;  %v3865_v34 = vld [vmem:[%s4519_s26 + $0x39] sm:$0x1]  ;;  %v3866_v35 = vld [vmem:[%s4519_s26 + $0x3b] sm:$0x1] }
  0x7e   : > { %v1829_v36 = vsel %vm409_vm6, %v1828_v9, %v1827_v30  ;;  %v1461_v37 = vsel %vm397_vm2, %v1460_v23, %v1459_v31  ;;  %v3867_v39 = vld [vmem:[%s4519_s26 + $0x3d] sm:$0x1]  ;;  %v3868_v40 = vld [vmem:[%s4519_s26 + $0x3f] sm:$0x1]  ;;  %v3869_v41 = vld [vmem:[%s4519_s26 + $0x41] sm:$0x1] }
  0x7f   : > { %v1831_v42 = vsel %vm412_vm7, %v1830_v10, %v1829_v36  ;;  %v1463_v47 = vsel %vm400_vm3, %v1462_v26, %v1461_v37  ;;  %v3870_v43 = vld [vmem:[%s4519_s26 + $0x43] sm:$0x1]  ;;  %v3871_v44 = vld [vmem:[%s4519_s26 + $0x45] sm:$0x1]  ;;  %v1832_v45 = vrot.slane %v3865_v34, 7  ;;  %v1834_v46 = vrot.slane %v3866_v35, 6 }
  0x80   : > { %4369 = vmatprep.mubr.msk.f32.mxu0 %vm512_vm8, %v1831_v42  ;;  %v1465_v48 = vsel %vm403_vm4, %v1464_v27, %v1463_v47  ;;  %v1836_v49 = vrot.slane %v3867_v39, 5  ;;  %v1838_v50 = vrot.slane %v3868_v40, 4  ;;  %v1840_v51 = vrot.slane %v3869_v41, 3  ;;  %v3798_v2 = vld [vmem:[%s4519_s26 + $0x5a] sm:$0x1] }
  0x81   : > { %v1467_v52 = vsel %vm406_vm5, %v1466_v28, %v1465_v48  ;;  %v1833_v53 = vsel %vm394_vm1, %v1832_v45, %v3864_v29  ;;  %v1842_v54 = vrot.slane %v3870_v43, 2  ;;  %v1844_v55 = vrot.slane %v3871_v44, 1  ;;  %v3799_v56 = vld [vmem:[%s4519_s26 + $0x5c] sm:$0x1]  ;;  %v3800_v57 = vld [vmem:[%s4519_s26 + $0x5e] sm:$0x1] }
  0x82   : > { %v1469_v58 = vsel %vm409_vm6, %v1468_v32, %v1467_v52  ;;  %v1835_v59 = vsel %vm397_vm2, %v1834_v46, %v1833_v53  ;;  %v3801_v60 = vld [vmem:[%s4519_s26 + $0x60] sm:$0x1]  ;;  %v3802_v61 = vld [vmem:[%s4519_s26 + $0x62] sm:$0x1]  ;;  %v3803_v62 = vld [vmem:[%s4519_s26 + $0x64] sm:$0x1] }
  0x83   : > { %v1471_v63 = vsel %vm412_vm7, %v1470_v33, %v1469_v58  ;;  %v1837_v0 = vsel %vm400_vm3, %v1836_v49, %v1835_v59  ;;  %v3804_v24 = vld [vmem:[%s4519_s26 + $0x66] sm:$0x1]  ;;  %v3805_v3 = vld [vmem:[%s4519_s26 + $0x68] sm:$0x1]  ;;  %v1472_v4 = vrot.slane %v3799_v56, 7  ;;  %v1474_v5 = vrot.slane %v3800_v57, 6 }
  0x84   : > { %4356 = vmatmul.mubr.msk.f32.vlgmr.msra.gmra.mxu1 %vm512_vm8, %v1471_v63  ;;  %v1839_v6 = vsel %vm403_vm4, %v1838_v50, %v1837_v0  ;;  %v1476_v7 = vrot.slane %v3801_v60, 5  ;;  %v1478_v8 = vrot.slane %v3802_v61, 4  ;;  %v1480_v9 = vrot.slane %v3803_v62, 3  ;;  %v3872_v10 = vld [vmem:[%s4519_s26 + $0x5b] sm:$0x1] }
  0x85   : > { %v1841_v11 = vsel %vm406_vm5, %v1840_v51, %v1839_v6  ;;  %4382 = vmatpush3.msk.msra.mxu1 %vm529_vm0, %v4727_v14  ;;  %v1473_v1 = vsel %vm394_vm1, %v1472_v4, %v3798_v2  ;;  %v1482_v12 = vrot.slane %v3804_v24, 2  ;;  %v1484_v13 = vrot.slane %v3805_v3, 1  ;;  %v3873_v15 = vld [vmem:[%s4519_s26 + $0x5d] sm:$0x1]  ;;  %v3874_v16 = vld [vmem:[%s4519_s26 + $0x5f] sm:$0x1] }
  0x86   : > { %v1843_v17 = vsel %vm409_vm6, %v1842_v54, %v1841_v11  ;;  %v1475_v18 = vsel %vm397_vm2, %v1474_v5, %v1473_v1  ;;  %v3875_v19 = vld [vmem:[%s4519_s26 + $0x61] sm:$0x1]  ;;  %v3876_v20 = vld [vmem:[%s4519_s26 + $0x63] sm:$0x1]  ;;  %v3877_v21 = vld [vmem:[%s4519_s26 + $0x65] sm:$0x1] }
  0x87   : > { %v1845_v22 = vsel %vm412_vm7, %v1844_v55, %v1843_v17  ;;  %v1477_v23 = vsel %vm400_vm3, %v1476_v7, %v1475_v18  ;;  %v3878_v14 = vld [vmem:[%s4519_s26 + $0x67] sm:$0x1]  ;;  %v3879_v25 = vld [vmem:[%s4519_s26 + $0x69] sm:$0x1]  ;;  %v1846_v26 = vrot.slane %v3873_v15, 7  ;;  %v1848_v27 = vrot.slane %v3874_v16, 6 }
  0x88   : > { %4370 = vmatmul.mubr.msk.f32.vlgmr.msra.gmra.mxu0 %vm512_vm8, %v1845_v22  ;;  %v1479_v28 = vsel %vm403_vm4, %v1478_v8, %v1477_v23  ;;  %v1850_v29 = vrot.slane %v3875_v19, 5  ;;  %v1852_v30 = vrot.slane %v3876_v20, 4  ;;  %v1854_v31 = vrot.slane %v3877_v21, 3  ;;  %v3806_v32 = vld [vmem:[%s4519_s26 + $0x7e] sm:$0x1] }
  0x89   : > { %4396 = vmatpush3.msk.msra.mxu0 %vm529_vm0, %v4750_v38  ;;  %v1481_v33 = vsel %vm406_vm5, %v1480_v9, %v1479_v28  ;;  %v1847_v34 = vsel %vm394_vm1, %v1846_v26, %v3872_v10  ;;  %v1856_v35 = vrot.slane %v3878_v14, 2  ;;  %v1858_v36 = vrot.slane %v3879_v25, 1  ;;  %v3807_v37 = vld [vmem:[%s4519_s26 + $0x80] sm:$0x1]  ;;  %v3808_v39 = vld [vmem:[%s4519_s26 + $0x82] sm:$0x1] }
  0x8a   : > { %v1483_v40 = vsel %vm409_vm6, %v1482_v12, %v1481_v33  ;;  %v1849_v41 = vsel %vm397_vm2, %v1848_v27, %v1847_v34  ;;  %v3809_v42 = vld [vmem:[%s4519_s26 + $0x84] sm:$0x1]  ;;  %v3810_v47 = vld [vmem:[%s4519_s26 + $0x86] sm:$0x1]  ;;  %v3811_v43 = vld [vmem:[%s4519_s26 + $0x88] sm:$0x1] }
  0x8b   : > { %v1485_v44 = vsel %vm412_vm7, %v1484_v13, %v1483_v40  ;;  %v1851_v38 = vsel %vm400_vm3, %v1850_v29, %v1849_v41  ;;  %v3812_v45 = vld [vmem:[%s4519_s26 + $0x8a] sm:$0x1]  ;;  %v3813_v46 = vld [vmem:[%s4519_s26 + $0x8c] sm:$0x1]  ;;  %v1486_v48 = vrot.slane %v3807_v37, 7  ;;  %v1488_v49 = vrot.slane %v3808_v39, 6 }
  0x8c   : > { %4358 = vmatprep.mubr.msk.f32.mxu1 %vm512_vm8, %v1485_v44  ;;  %v1853_v50 = vsel %vm403_vm4, %v1852_v30, %v1851_v38  ;;  %v1490_v51 = vrot.slane %v3809_v42, 5  ;;  %v1492_v2 = vrot.slane %v3810_v47, 4  ;;  %v1494_v52 = vrot.slane %v3811_v43, 3  ;;  %v3880_v53 = vld [vmem:[%s4519_s26 + $0x7f] sm:$0x1] }
  0x8d   : > { %v1855_v54 = vsel %vm406_vm5, %v1854_v31, %v1853_v50  ;;  %v1487_v55 = vsel %vm394_vm1, %v1486_v48, %v3806_v32  ;;  %v1496_v56 = vrot.slane %v3812_v45, 2  ;;  %v1498_v57 = vrot.slane %v3813_v46, 1  ;;  %v3881_v58 = vld [vmem:[%s4519_s26 + $0x81] sm:$0x1]  ;;  %v3882_v59 = vld [vmem:[%s4519_s26 + $0x83] sm:$0x1] }
  0x8e   : > { %v1857_v60 = vsel %vm409_vm6, %v1856_v35, %v1855_v54  ;;  %v1489_v61 = vsel %vm397_vm2, %v1488_v49, %v1487_v55  ;;  %v3883_v62 = vld [vmem:[%s4519_s26 + $0x85] sm:$0x1]  ;;  %v3884_v63 = vld [vmem:[%s4519_s26 + $0x87] sm:$0x1]  ;;  %v3885_v0 = vld [vmem:[%s4519_s26 + $0x89] sm:$0x1] }
  0x8f   : > { %v1859_v24 = vsel %vm412_vm7, %v1858_v36, %v1857_v60  ;;  %v1491_v3 = vsel %vm400_vm3, %v1490_v51, %v1489_v61  ;;  %v3886_v4 = vld [vmem:[%s4519_s26 + $0x8b] sm:$0x1]  ;;  %v3887_v5 = vld [vmem:[%s4519_s26 + $0x8d] sm:$0x1]  ;;  %v1860_v6 = vrot.slane %v3881_v58, 7  ;;  %v1862_v7 = vrot.slane %v3882_v59, 6 }
  0x90   : > { %4372 = vmatprep.mubr.msk.f32.mxu0 %vm512_vm8, %v1859_v24  ;;  %v1493_v8 = vsel %vm403_vm4, %v1492_v2, %v1491_v3  ;;  %v1864_v9 = vrot.slane %v3883_v62, 5  ;;  %v1866_v10 = vrot.slane %v3884_v63, 4  ;;  %v1868_v11 = vrot.slane %v3885_v0, 3  ;;  %v3814_v1 = vld [vmem:[%s4519_s26 + $0xa2] sm:$0x1] }
  0x91   : > { %v1495_v12 = vsel %vm406_vm5, %v1494_v52, %v1493_v8  ;;  %v1861_v13 = vsel %vm394_vm1, %v1860_v6, %v3880_v53  ;;  %v1870_v15 = vrot.slane %v3886_v4, 2  ;;  %v1872_v16 = vrot.slane %v3887_v5, 1  ;;  %v3815_v17 = vld [vmem:[%s4519_s26 + $0xa4] sm:$0x1]  ;;  %v3816_v18 = vld [vmem:[%s4519_s26 + $0xa6] sm:$0x1] }
  0x92   : > { %v1497_v19 = vsel %vm409_vm6, %v1496_v56, %v1495_v12  ;;  %v1863_v20 = vsel %vm397_vm2, %v1862_v7, %v1861_v13  ;;  %v3817_v21 = vld [vmem:[%s4519_s26 + $0xa8] sm:$0x1]  ;;  %v3818_v22 = vld [vmem:[%s4519_s26 + $0xaa] sm:$0x1]  ;;  %v3819_v23 = vld [vmem:[%s4519_s26 + $0xac] sm:$0x1] }
  0x93   : > { %v1499_v14 = vsel %vm412_vm7, %v1498_v57, %v1497_v19  ;;  %v1865_v25 = vsel %vm400_vm3, %v1864_v9, %v1863_v20  ;;  %v3820_v26 = vld [vmem:[%s4519_s26 + $0xae] sm:$0x1]  ;;  %v3821_v27 = vld [vmem:[%s4519_s26 + $0xb0] sm:$0x1]  ;;  %v1500_v28 = vrot.slane %v3815_v17, 7  ;;  %v1502_v29 = vrot.slane %v3816_v18, 6 }
  0x94   : > { %4359 = vmatmul.mubr.msk.f32.gmra.mxu1 %vm512_vm8, %v1499_v14  ;;  %v1867_v30 = vsel %vm403_vm4, %v1866_v10, %v1865_v25  ;;  %v1504_v31 = vrot.slane %v3817_v21, 5  ;;  %v1506_v32 = vrot.slane %v3818_v22, 4  ;;  %v1508_v33 = vrot.slane %v3819_v23, 3  ;;  %v3888_v34 = vld [vmem:[%s4519_s26 + $0xa3] sm:$0x1] }
  0x95   : > { %v1869_v35 = vsel %vm406_vm5, %v1868_v11, %v1867_v30  ;;  %v1501_v36 = vsel %vm394_vm1, %v1500_v28, %v3814_v1  ;;  %v1510_v37 = vrot.slane %v3820_v26, 2  ;;  %v1512_v39 = vrot.slane %v3821_v27, 1  ;;  %v3889_v40 = vld [vmem:[%s4519_s26 + $0xa5] sm:$0x1]  ;;  %v3890_v41 = vld [vmem:[%s4519_s26 + $0xa7] sm:$0x1] }
  0x96   : > { %v1871_v42 = vsel %vm409_vm6, %v1870_v15, %v1869_v35  ;;  %v1503_v47 = vsel %vm397_vm2, %v1502_v29, %v1501_v36  ;;  %v3891_v43 = vld [vmem:[%s4519_s26 + $0xa9] sm:$0x1]  ;;  %v3892_v44 = vld [vmem:[%s4519_s26 + $0xab] sm:$0x1]  ;;  %v3893_v38 = vld [vmem:[%s4519_s26 + $0xad] sm:$0x1] }
  0x97   : > { %v1873_v45 = vsel %vm412_vm7, %v1872_v16, %v1871_v42  ;;  %v1505_v46 = vsel %vm400_vm3, %v1504_v31, %v1503_v47  ;;  %v3894_v48 = vld [vmem:[%s4519_s26 + $0xaf] sm:$0x1]  ;;  %v3895_v49 = vld [vmem:[%s4519_s26 + $0xb1] sm:$0x1]  ;;  %v1874_v50 = vrot.slane %v3889_v40, 7  ;;  %v1876_v51 = vrot.slane %v3890_v41, 6 }
  0x98   : > { %4373 = vmatmul.mubr.msk.f32.gmra.mxu0 %vm512_vm8, %v1873_v45  ;;  %v1507_v2 = vsel %vm403_vm4, %v1506_v32, %v1505_v46  ;;  %v1878_v52 = vrot.slane %v3891_v43, 5  ;;  %v1880_v53 = vrot.slane %v3892_v44, 4  ;;  %v1882_v54 = vrot.slane %v3893_v38, 3  ;;  %v3822_v55 = vld [vmem:[%s4519_s26 + $0xc6] sm:$0x1] }
  0x99   : > { %v1509_v56 = vsel %vm406_vm5, %v1508_v33, %v1507_v2  ;;  %v1875_v57 = vsel %vm394_vm1, %v1874_v50, %v3888_v34  ;;  %v1884_v58 = vrot.slane %v3894_v48, 2  ;;  %v1886_v59 = vrot.slane %v3895_v49, 1  ;;  %v3823_v60 = vld [vmem:[%s4519_s26 + $0xc8] sm:$0x1]  ;;  %v3824_v61 = vld [vmem:[%s4519_s26 + $0xca] sm:$0x1] }
  0x9a   : > { %v1511_v62 = vsel %vm409_vm6, %v1510_v37, %v1509_v56  ;;  %v1877_v63 = vsel %vm397_vm2, %v1876_v51, %v1875_v57  ;;  %v3825_v0 = vld [vmem:[%s4519_s26 + $0xcc] sm:$0x1]  ;;  %v3826_v24 = vld [vmem:[%s4519_s26 + $0xce] sm:$0x1]  ;;  %v3827_v3 = vld [vmem:[%s4519_s26 + $0xd0] sm:$0x1] }
  0x9b   : > { %v1513_v4 = vsel %vm412_vm7, %v1512_v39, %v1511_v62  ;;  %v1879_v5 = vsel %vm400_vm3, %v1878_v52, %v1877_v63  ;;  %v3828_v6 = vld [vmem:[%s4519_s26 + $0xd2] sm:$0x1]  ;;  %v3829_v7 = vld [vmem:[%s4519_s26 + $0xd4] sm:$0x1]  ;;  %v1514_v8 = vrot.slane %v3823_v60, 7  ;;  %v1516_v9 = vrot.slane %v3824_v61, 6 }
  0x9c   : > { %4361 = vmatprep.mubr.msk.f32.mxu1 %vm512_vm8, %v1513_v4  ;;  %v1881_v10 = vsel %vm403_vm4, %v1880_v53, %v1879_v5  ;;  %v1518_v11 = vrot.slane %v3825_v0, 5  ;;  %v1520_v1 = vrot.slane %v3826_v24, 4  ;;  %v1522_v12 = vrot.slane %v3827_v3, 3  ;;  %v3896_v13 = vld [vmem:[%s4519_s26 + $0xc7] sm:$0x1] }
  0x9d   : > { %v1883_v15 = vsel %vm406_vm5, %v1882_v54, %v1881_v10  ;;  %v1515_v16 = vsel %vm394_vm1, %v1514_v8, %v3822_v55  ;;  %v1524_v17 = vrot.slane %v3828_v6, 2  ;;  %v1526_v18 = vrot.slane %v3829_v7, 1  ;;  %v3897_v19 = vld [vmem:[%s4519_s26 + $0xc9] sm:$0x1]  ;;  %v3898_v20 = vld [vmem:[%s4519_s26 + $0xcb] sm:$0x1] }
  0x9e   : > { %v1885_v21 = vsel %vm409_vm6, %v1884_v58, %v1883_v15  ;;  %v1517_v22 = vsel %vm397_vm2, %v1516_v9, %v1515_v16  ;;  %v3899_v23 = vld [vmem:[%s4519_s26 + $0xcd] sm:$0x1]  ;;  %v3900_v14 = vld [vmem:[%s4519_s26 + $0xcf] sm:$0x1]  ;;  %v3901_v25 = vld [vmem:[%s4519_s26 + $0xd1] sm:$0x1] }
  0x9f   : > { %v1887_v26 = vsel %vm412_vm7, %v1886_v59, %v1885_v21  ;;  %v1519_v27 = vsel %vm400_vm3, %v1518_v11, %v1517_v22  ;;  %v3902_v28 = vld [vmem:[%s4519_s26 + $0xd3] sm:$0x1]  ;;  %v3903_v29 = vld [vmem:[%s4519_s26 + $0xd5] sm:$0x1]  ;;  %v1888_v30 = vrot.slane %v3897_v19, 7  ;;  %v1890_v31 = vrot.slane %v3898_v20, 6 }
  0xa0   : > { %4375 = vmatprep.mubr.msk.f32.mxu0 %vm512_vm8, %v1887_v26  ;;  %v1521_v32 = vsel %vm403_vm4, %v1520_v1, %v1519_v27  ;;  %v1892_v33 = vrot.slane %v3899_v23, 5  ;;  %v1894_v34 = vrot.slane %v3900_v14, 4  ;;  %v1896_v35 = vrot.slane %v3901_v25, 3  ;;  %v3830_v36 = vld [vmem:[%s4519_s26 + $0xea] sm:$0x1] }
  0xa1   : > { %v1523_v37 = vsel %vm406_vm5, %v1522_v12, %v1521_v32  ;;  %v1889_v39 = vsel %vm394_vm1, %v1888_v30, %v3896_v13  ;;  %v1898_v40 = vrot.slane %v3902_v28, 2  ;;  %v1900_v41 = vrot.slane %v3903_v29, 1  ;;  %v3831_v42 = vld [vmem:[%s4519_s26 + $0xec] sm:$0x1]  ;;  %v3832_v47 = vld [vmem:[%s4519_s26 + $0xee] sm:$0x1] }
  0xa2   : > { %v1525_v43 = vsel %vm409_vm6, %v1524_v17, %v1523_v37  ;;  %v1891_v44 = vsel %vm397_vm2, %v1890_v31, %v1889_v39  ;;  %v3833_v38 = vld [vmem:[%s4519_s26 + $0xf0] sm:$0x1]  ;;  %v3834_v45 = vld [vmem:[%s4519_s26 + $0xf2] sm:$0x1]  ;;  %v3835_v46 = vld [vmem:[%s4519_s26 + $0xf4] sm:$0x1] }
  0xa3   : > { %v1527_v48 = vsel %vm412_vm7, %v1526_v18, %v1525_v43  ;;  %v1893_v49 = vsel %vm400_vm3, %v1892_v33, %v1891_v44  ;;  %v3836_v50 = vld [vmem:[%s4519_s26 + $0xf6] sm:$0x1]  ;;  %v3837_v51 = vld [vmem:[%s4519_s26 + $0xf8] sm:$0x1]  ;;  %v1528_v2 = vrot.slane %v3831_v42, 7  ;;  %v1530_v52 = vrot.slane %v3832_v47, 6 }
  0xa4   : > { %4362 = vmatmul.mubr.msk.f32.gmra.mxu1 %vm512_vm8, %v1527_v48  ;;  %v1895_v53 = vsel %vm403_vm4, %v1894_v34, %v1893_v49  ;;  %v1532_v54 = vrot.slane %v3833_v38, 5  ;;  %v1534_v55 = vrot.slane %v3834_v45, 4  ;;  %v1536_v56 = vrot.slane %v3835_v46, 3  ;;  %v3904_v57 = vld [vmem:[%s4519_s26 + $0xeb] sm:$0x1] }
  0xa5   : > { %v1897_v58 = vsel %vm406_vm5, %v1896_v35, %v1895_v53  ;;  %v1529_v59 = vsel %vm394_vm1, %v1528_v2, %v3830_v36  ;;  %v1538_v60 = vrot.slane %v3836_v50, 2  ;;  %v1540_v61 = vrot.slane %v3837_v51, 1  ;;  %v3905_v62 = vld [vmem:[%s4519_s26 + $0xed] sm:$0x1]  ;;  %v3906_v63 = vld [vmem:[%s4519_s26 + $0xef] sm:$0x1] }
  0xa6   : > { %v1899_v0 = vsel %vm409_vm6, %v1898_v40, %v1897_v58  ;;  %v1531_v24 = vsel %vm397_vm2, %v1530_v52, %v1529_v59  ;;  %v3907_v3 = vld [vmem:[%s4519_s26 + $0xf1] sm:$0x1]  ;;  %v3908_v4 = vld [vmem:[%s4519_s26 + $0xf3] sm:$0x1]  ;;  %v3909_v5 = vld [vmem:[%s4519_s26 + $0xf5] sm:$0x1] }
  0xa7   : > { %v1901_v6 = vsel %vm412_vm7, %v1900_v41, %v1899_v0  ;;  %v1533_v7 = vsel %vm400_vm3, %v1532_v54, %v1531_v24  ;;  %v3910_v8 = vld [vmem:[%s4519_s26 + $0xf7] sm:$0x1]  ;;  %v3911_v9 = vld [vmem:[%s4519_s26 + $0xf9] sm:$0x1]  ;;  %v1902_v10 = vrot.slane %v3905_v62, 7  ;;  %v1904_v11 = vrot.slane %v3906_v63, 6 }
  0xa8   : > { %4376 = vmatmul.mubr.msk.f32.gmra.mxu0 %vm512_vm8, %v1901_v6  ;;  %v1535_v1 = vsel %vm403_vm4, %v1534_v55, %v1533_v7  ;;  %v1906_v12 = vrot.slane %v3907_v3, 5  ;;  %v1908_v13 = vrot.slane %v3908_v4, 4  ;;  %v1910_v15 = vrot.slane %v3909_v5, 3  ;;  %v3838_v16 = vld [vmem:[%s4519_s26 + $0x10e] sm:$0x1] }
  0xa9   : > { %v1537_v17 = vsel %vm406_vm5, %v1536_v56, %v1535_v1  ;;  %v1903_v18 = vsel %vm394_vm1, %v1902_v10, %v3904_v57  ;;  %v1912_v19 = vrot.slane %v3910_v8, 2  ;;  %v1914_v20 = vrot.slane %v3911_v9, 1  ;;  %v3839_v21 = vld [vmem:[%s4519_s26 + $0x110] sm:$0x1]  ;;  %v3840_v22 = vld [vmem:[%s4519_s26 + $0x112] sm:$0x1] }
  0xaa   : > { %v1539_v23 = vsel %vm409_vm6, %v1538_v60, %v1537_v17  ;;  %v1905_v14 = vsel %vm397_vm2, %v1904_v11, %v1903_v18  ;;  %v3841_v25 = vld [vmem:[%s4519_s26 + $0x114] sm:$0x1]  ;;  %v3842_v26 = vld [vmem:[%s4519_s26 + $0x116] sm:$0x1]  ;;  %v3843_v27 = vld [vmem:[%s4519_s26 + $0x118] sm:$0x1] }
  0xab   : > { %v1541_v28 = vsel %vm412_vm7, %v1540_v61, %v1539_v23  ;;  %v1907_v29 = vsel %vm400_vm3, %v1906_v12, %v1905_v14  ;;  %v3844_v30 = vld [vmem:[%s4519_s26 + $0x11a] sm:$0x1]  ;;  %v3845_v31 = vld [vmem:[%s4519_s26 + $0x11c] sm:$0x1]  ;;  %v1542_v32 = vrot.slane %v3839_v21, 7  ;;  %v1544_v33 = vrot.slane %v3840_v22, 6 }
  0xac   : > { %4364 = vmatprep.mubr.msk.f32.mxu1 %vm512_vm8, %v1541_v28  ;;  %v1909_v34 = vsel %vm403_vm4, %v1908_v13, %v1907_v29  ;;  %v1546_v35 = vrot.slane %v3841_v25, 5  ;;  %v1548_v36 = vrot.slane %v3842_v26, 4  ;;  %v1550_v37 = vrot.slane %v3843_v27, 3  ;;  %v3912_v39 = vld [vmem:[%s4519_s26 + $0x10f] sm:$0x1] }
  0xad   : > { %v1911_v40 = vsel %vm406_vm5, %v1910_v15, %v1909_v34  ;;  %v1543_v41 = vsel %vm394_vm1, %v1542_v32, %v3838_v16  ;;  %v1552_v42 = vrot.slane %v3844_v30, 2  ;;  %v1554_v47 = vrot.slane %v3845_v31, 1  ;;  %v3913_v43 = vld [vmem:[%s4519_s26 + $0x111] sm:$0x1]  ;;  %v3914_v44 = vld [vmem:[%s4519_s26 + $0x113] sm:$0x1] }
  0xae   : > { %v1913_v38 = vsel %vm409_vm6, %v1912_v19, %v1911_v40  ;;  %v1545_v45 = vsel %vm397_vm2, %v1544_v33, %v1543_v41  ;;  %v3915_v46 = vld [vmem:[%s4519_s26 + $0x115] sm:$0x1]  ;;  %v3916_v48 = vld [vmem:[%s4519_s26 + $0x117] sm:$0x1]  ;;  %v3917_v49 = vld [vmem:[%s4519_s26 + $0x119] sm:$0x1] }
  0xaf   : > { %v1915_v50 = vsel %vm412_vm7, %v1914_v20, %v1913_v38  ;;  %v1547_v51 = vsel %vm400_vm3, %v1546_v35, %v1545_v45  ;;  %v3918_v2 = vld [vmem:[%s4519_s26 + $0x11b] sm:$0x1]  ;;  %v3919_v52 = vld [vmem:[%s4519_s26 + $0x11d] sm:$0x1]  ;;  %v1916_v53 = vrot.slane %v3913_v43, 7  ;;  %v1918_v54 = vrot.slane %v3914_v44, 6 }
  0xb0   : > { %4378 = vmatprep.mubr.msk.f32.mxu0 %vm512_vm8, %v1915_v50  ;;  %v1549_v55 = vsel %vm403_vm4, %v1548_v36, %v1547_v51  ;;  %v1920_v56 = vrot.slane %v3915_v46, 5  ;;  %v1922_v57 = vrot.slane %v3916_v48, 4  ;;  %v1924_v58 = vrot.slane %v3917_v49, 3  ;;  %v3930_v59 = vld [vmem:[%s4519_s26 + $0x14] sm:$0x1] }
  0xb1   : > { %v1551_v60 = vsel %vm406_vm5, %v1550_v37, %v1549_v55  ;;  %v1917_v61 = vsel %vm394_vm1, %v1916_v53, %v3912_v39  ;;  %v1926_v62 = vrot.slane %v3918_v2, 2  ;;  %v1928_v63 = vrot.slane %v3919_v52, 1  ;;  %v3931_v0 = vld [vmem:[%s4519_s26 + $0x16] sm:$0x1]  ;;  %v3932_v24 = vld [vmem:[%s4519_s26 + $0x18] sm:$0x1] }
  0xb2   : > { %v1553_v3 = vsel %vm409_vm6, %v1552_v42, %v1551_v60  ;;  %v1919_v4 = vsel %vm397_vm2, %v1918_v54, %v1917_v61  ;;  %v3933_v5 = vld [vmem:[%s4519_s26 + $0x1a] sm:$0x1]  ;;  %v3934_v6 = vld [vmem:[%s4519_s26 + $0x1c] sm:$0x1]  ;;  %v3935_v7 = vld [vmem:[%s4519_s26 + $0x1e] sm:$0x1] }
  0xb3   : > { %v1555_v8 = vsel %vm412_vm7, %v1554_v47, %v1553_v3  ;;  %v1921_v9 = vsel %vm400_vm3, %v1920_v56, %v1919_v4  ;;  %v3936_v10 = vld [vmem:[%s4519_s26 + $0x20] sm:$0x1]  ;;  %v3937_v11 = vld [vmem:[%s4519_s26 + $0x22] sm:$0x1]  ;;  %v2193_v1 = vrot.slane %v3931_v0, 7  ;;  %v2195_v12 = vrot.slane %v3932_v24, 6 }
  0xb4   : > { %4365 = vmatmul.mubr.msk.f32.gmra.mxu1 %vm512_vm8, %v1555_v8  ;;  %v1923_v13 = vsel %vm403_vm4, %v1922_v57, %v1921_v9  ;;  %v2197_v15 = vrot.slane %v3933_v5, 5  ;;  %v2199_v16 = vrot.slane %v3934_v6, 4  ;;  %v2201_v17 = vrot.slane %v3935_v7, 3  ;;  %v4004_v18 = vld [vmem:[%s4519_s26 + $0x24] sm:$0x1] }
  0xb5   : > { %v1925_v19 = vsel %vm406_vm5, %v1924_v58, %v1923_v13  ;;  %v2194_v20 = vsel %vm394_vm1, %v2193_v1, %v3930_v59  ;;  %v2203_v21 = vrot.slane %v3936_v10, 2  ;;  %v2205_v22 = vrot.slane %v3937_v11, 1  ;;  %v4005_v23 = vld [vmem:[%s4519_s26 + $0x26] sm:$0x1]  ;;  %v4006_v14 = vld [vmem:[%s4519_s26 + $0x28] sm:$0x1] }
  0xb6   : > { %v1927_v25 = vsel %vm409_vm6, %v1926_v62, %v1925_v19  ;;  %v2196_v26 = vsel %vm397_vm2, %v2195_v12, %v2194_v20  ;;  %v4007_v27 = vld [vmem:[%s4519_s26 + $0x2a] sm:$0x1]  ;;  %v4008_v28 = vld [vmem:[%s4519_s26 + $0x2c] sm:$0x1]  ;;  %v4009_v29 = vld [vmem:[%s4519_s26 + $0x2e] sm:$0x1] }
  0xb7   : > { %v1929_v30 = vsel %vm412_vm7, %v1928_v63, %v1927_v25  ;;  %v2198_v31 = vsel %vm400_vm3, %v2197_v15, %v2196_v26  ;;  %v4010_v32 = vld [vmem:[%s4519_s26 + $0x30] sm:$0x1]  ;;  %v4011_v33 = vld [vmem:[%s4519_s26 + $0x32] sm:$0x1]  ;;  %v2568_v34 = vrot.slane %v4005_v23, 7  ;;  %v2570_v35 = vrot.slane %v4006_v14, 6 }
  0xb8   : > { %4379 = vmatmul.mubr.msk.f32.gmra.mxu0 %vm512_vm8, %v1929_v30  ;;  %v2200_v36 = vsel %vm403_vm4, %v2199_v16, %v2198_v31  ;;  %v2572_v37 = vrot.slane %v4007_v27, 5  ;;  %v2574_v39 = vrot.slane %v4008_v28, 4  ;;  %v2576_v40 = vrot.slane %v4009_v29, 3  ;;  %v5224_v41 = vld [vmem:[%s5920_s1 + $0x1c] sm:$0x7] }
  0xb9   : > { %v2202_v42 = vsel %vm406_vm5, %v2201_v17, %v2200_v36  ;;  %v2569_v47 = vsel %vm394_vm1, %v2568_v34, %v4004_v18  ;;  %v2578_v43 = vrot.slane %v4010_v32, 2  ;;  %v2580_v44 = vrot.slane %v4011_v33, 1  ;;  %4409 = vmatprep.subr.msk.mxu1 %vm529_vm0, %v5224_v41  ;;  %v3938_v38 = vld [vmem:[%s4519_s26 + $0x38] sm:$0x1]  ;;  %v3939_v45 = vld [vmem:[%s4519_s26 + $0x3a] sm:$0x1] }
  0xba   : > { %v2204_v46 = vsel %vm409_vm6, %v2203_v21, %v2202_v42  ;;  %v2571_v48 = vsel %vm397_vm2, %v2570_v35, %v2569_v47  ;;  %v3940_v49 = vld [vmem:[%s4519_s26 + $0x3c] sm:$0x1]  ;;  %v3941_v50 = vld [vmem:[%s4519_s26 + $0x3e] sm:$0x1]  ;;  %v3942_v51 = vld [vmem:[%s4519_s26 + $0x40] sm:$0x1] }
  0xbb   : > { %v2206_v2 = vsel %vm412_vm7, %v2205_v22, %v2204_v46  ;;  %v2573_v52 = vsel %vm400_vm3, %v2572_v37, %v2571_v48  ;;  %v3943_v53 = vld [vmem:[%s4519_s26 + $0x42] sm:$0x1]  ;;  %v3944_v54 = vld [vmem:[%s4519_s26 + $0x44] sm:$0x1]  ;;  %v3945_v55 = vld [vmem:[%s4519_s26 + $0x46] sm:$0x1] }
  0xbc   : > { %4383 = vmatprep.mubr.msk.f32.mxu1 %vm512_vm8, %v2206_v2  ;;  %v2575_v56 = vsel %vm403_vm4, %v2574_v39, %v2573_v52  ;;  %v2207_v57 = vrot.slane %v3939_v45, 7  ;;  %v2209_v58 = vrot.slane %v3940_v49, 6  ;;  %v2211_v59 = vrot.slane %v3941_v50, 5  ;;  %v4012_v60 = vld [vmem:[%s4519_s26 + $0x48] sm:$0x1] }
  0xbd   : > { %v2577_v61 = vsel %vm406_vm5, %v2576_v40, %v2575_v56  ;;  %v2213_v62 = vrot.slane %v3942_v51, 4  ;;  %v2215_v63 = vrot.slane %v3943_v53, 3  ;;  %v2217_v0 = vrot.slane %v3944_v54, 2  ;;  %v4013_v24 = vld [vmem:[%s4519_s26 + $0x4a] sm:$0x1] }
  0xbe   : > { %v2579_v3 = vsel %vm409_vm6, %v2578_v43, %v2577_v61  ;;  %v2208_v4 = vsel %vm394_vm1, %v2207_v57, %v3938_v38  ;;  %v2219_v5 = vrot.slane %v3945_v55, 1  ;;  %v4014_v6 = vld [vmem:[%s4519_s26 + $0x4c] sm:$0x1]  ;;  %v4015_v7 = vld [vmem:[%s4519_s26 + $0x4e] sm:$0x1]  ;;  %v2582_v8 = vrot.slane %v4013_v24, 7 }
  0xbf   : > { %v2581_v9 = vsel %vm412_vm7, %v2580_v44, %v2579_v3  ;;  %v2210_v10 = vsel %vm397_vm2, %v2209_v58, %v2208_v4  ;;  %v4016_v11 = vld [vmem:[%s4519_s26 + $0x50] sm:$0x1]  ;;  %v4017_v1 = vld [vmem:[%s4519_s26 + $0x52] sm:$0x1]  ;;  %v4018_v12 = vld [vmem:[%s4519_s26 + $0x54] sm:$0x1] }
  0xc0   : > { %4397 = vmatprep.mubr.msk.f32.mxu0 %vm512_vm8, %v2581_v9  ;;  %v2212_v13 = vsel %vm400_vm3, %v2211_v59, %v2210_v10  ;;  %v4019_v15 = vld [vmem:[%s4519_s26 + $0x56] sm:$0x1]  ;;  %v2583_v16 = vsel %vm394_vm1, %v2582_v8, %v4012_v60  ;;  %v2584_v17 = vrot.slane %v4014_v6, 6  ;;  %v2586_v18 = vrot.slane %v4015_v7, 5  ;;  %v4216_v19 = vld [vmem:[%s5920_s1 + $0x20] sm:$0x7] }
  0xc1   : > { %v2214_v20 = vsel %vm403_vm4, %v2213_v62, %v2212_v13  ;;  %v2588_v21 = vrot.slane %v4016_v11, 4  ;;  %v2590_v22 = vrot.slane %v4017_v1, 3  ;;  %4423 = vmatprep.subr.msk.mxu0 %vm529_vm0, %v4216_v19  ;;  %v3946_v23 = vld [vmem:[%s4519_s26 + $0x5c] sm:$0x1]  ;;  %v2592_v26 = vrot.slane %v4018_v12, 2 }
  0xc2   : > { %v2216_v14 = vsel %vm406_vm5, %v2215_v63, %v2214_v20  ;;  %v2585_v25 = vsel %vm397_vm2, %v2584_v17, %v2583_v16  ;;  %v2594_v27 = vrot.slane %v4019_v15, 1  ;;  %v3947_v28 = vld [vmem:[%s4519_s26 + $0x5e] sm:$0x1]  ;;  %v3948_v29 = vld [vmem:[%s4519_s26 + $0x60] sm:$0x1] }
  0xc3   : > { %v2218_v30 = vsel %vm409_vm6, %v2217_v0, %v2216_v14  ;;  %v2587_v31 = vsel %vm400_vm3, %v2586_v18, %v2585_v25  ;;  %v3949_v32 = vld [vmem:[%s4519_s26 + $0x62] sm:$0x1]  ;;  %v3950_v33 = vld [vmem:[%s4519_s26 + $0x64] sm:$0x1]  ;;  %v3951_v34 = vld [vmem:[%s4519_s26 + $0x66] sm:$0x1] }
  0xc4   : > { %v2220_v35 = vsel %vm412_vm7, %v2219_v5, %v2218_v30  ;;  %v2589_v36 = vsel %vm403_vm4, %v2588_v21, %v2587_v31  ;;  %v3952_v37 = vld [vmem:[%s4519_s26 + $0x68] sm:$0x1]  ;;  %v3953_v39 = vld [vmem:[%s4519_s26 + $0x6a] sm:$0x1]  ;;  %v2221_v40 = vrot.slane %v3947_v28, 7  ;;  %v2223_v42 = vrot.slane %v3948_v29, 6 }
  0xc5   : > { %4384 = vmatmul.mubr.msk.f32.vlgmr.msra.gmra.mxu1 %vm512_vm8, %v2220_v35  ;;  %v2591_v47 = vsel %vm406_vm5, %v2590_v22, %v2589_v36  ;;  %v2225_v43 = vrot.slane %v3949_v32, 5  ;;  %v2227_v44 = vrot.slane %v3950_v33, 4  ;;  %v2229_v38 = vrot.slane %v3951_v34, 3  ;;  %v4020_v45 = vld [vmem:[%s4519_s26 + $0x6c] sm:$0x1] }
  0xc6   : > { %v2593_v46 = vsel %vm409_vm6, %v2592_v26, %v2591_v47  ;;  %4410 = vmatpush3.msk.msra.mxu1 %vm529_vm0, %v5224_v41  ;;  %v2222_v48 = vsel %vm394_vm1, %v2221_v40, %v3946_v23  ;;  %v2231_v49 = vrot.slane %v3952_v37, 2  ;;  %v2233_v50 = vrot.slane %v3953_v39, 1  ;;  %v4021_v51 = vld [vmem:[%s4519_s26 + $0x6e] sm:$0x1]  ;;  %v4022_v2 = vld [vmem:[%s4519_s26 + $0x70] sm:$0x1] }
  0xc7   : > { %v2595_v52 = vsel %vm412_vm7, %v2594_v27, %v2593_v46  ;;  %v2224_v53 = vsel %vm397_vm2, %v2223_v42, %v2222_v48  ;;  %v4023_v54 = vld [vmem:[%s4519_s26 + $0x72] sm:$0x1]  ;;  %v4024_v55 = vld [vmem:[%s4519_s26 + $0x74] sm:$0x1]  ;;  %v4025_v56 = vld [vmem:[%s4519_s26 + $0x76] sm:$0x1] }
  0xc8   : > { %4398 = vmatmul.mubr.msk.f32.vlgmr.msra.gmra.mxu0 %vm512_vm8, %v2595_v52  ;;  %v2226_v57 = vsel %vm400_vm3, %v2225_v43, %v2224_v53  ;;  %v4026_v41 = vld [vmem:[%s4519_s26 + $0x78] sm:$0x1]  ;;  %v4027_v58 = vld [vmem:[%s4519_s26 + $0x7a] sm:$0x1]  ;;  %v2596_v59 = vrot.slane %v4021_v51, 7  ;;  %v2598_v60 = vrot.slane %v4022_v2, 6 }
  0xc9   : > { %4424 = vmatpush3.msk.msra.mxu0 %vm529_vm0, %v4216_v19  ;;  %v2228_v61 = vsel %vm403_vm4, %v2227_v44, %v2226_v57  ;;  %v2600_v62 = vrot.slane %v4023_v54, 5  ;;  %v2602_v63 = vrot.slane %v4024_v55, 4  ;;  %v2604_v0 = vrot.slane %v4025_v56, 3  ;;  %v3954_v24 = vld [vmem:[%s4519_s26 + $0x80] sm:$0x1] }
  0xca   : > { %v2230_v3 = vsel %vm406_vm5, %v2229_v38, %v2228_v61  ;;  %v2597_v4 = vsel %vm394_vm1, %v2596_v59, %v4020_v45  ;;  %v2606_v5 = vrot.slane %v4026_v41, 2  ;;  %v2608_v6 = vrot.slane %v4027_v58, 1  ;;  %v3955_v7 = vld [vmem:[%s4519_s26 + $0x82] sm:$0x1]  ;;  %v3956_v8 = vld [vmem:[%s4519_s26 + $0x84] sm:$0x1] }
  0xcb   : > { %v2232_v9 = vsel %vm409_vm6, %v2231_v49, %v2230_v3  ;;  %v2599_v10 = vsel %vm397_vm2, %v2598_v60, %v2597_v4  ;;  %v3957_v11 = vld [vmem:[%s4519_s26 + $0x86] sm:$0x1]  ;;  %v3958_v1 = vld [vmem:[%s4519_s26 + $0x88] sm:$0x1]  ;;  %v3959_v12 = vld [vmem:[%s4519_s26 + $0x8a] sm:$0x1] }
  0xcc   : > { %v2234_v13 = vsel %vm412_vm7, %v2233_v50, %v2232_v9  ;;  %v2601_v15 = vsel %vm400_vm3, %v2600_v62, %v2599_v10  ;;  %v3960_v16 = vld [vmem:[%s4519_s26 + $0x8c] sm:$0x1]  ;;  %v3961_v17 = vld [vmem:[%s4519_s26 + $0x8e] sm:$0x1]  ;;  %v2235_v18 = vrot.slane %v3955_v7, 7  ;;  %v2237_v19 = vrot.slane %v3956_v8, 6 }
  0xcd   : > { %4386 = vmatprep.mubr.msk.f32.mxu1 %vm512_vm8, %v2234_v13  ;;  %v2603_v20 = vsel %vm403_vm4, %v2602_v63, %v2601_v15  ;;  %v2239_v21 = vrot.slane %v3957_v11, 5  ;;  %v2241_v22 = vrot.slane %v3958_v1, 4  ;;  %v2243_v23 = vrot.slane %v3959_v12, 3  ;;  %v4028_v14 = vld [vmem:[%s4519_s26 + $0x90] sm:$0x1] }
  0xce   : > { %v2605_v25 = vsel %vm406_vm5, %v2604_v0, %v2603_v20  ;;  %v2236_v26 = vsel %vm394_vm1, %v2235_v18, %v3954_v24  ;;  %v2245_v27 = vrot.slane %v3960_v16, 2  ;;  %v2247_v28 = vrot.slane %v3961_v17, 1  ;;  %v4029_v29 = vld [vmem:[%s4519_s26 + $0x92] sm:$0x1]  ;;  %v4030_v30 = vld [vmem:[%s4519_s26 + $0x94] sm:$0x1] }
  0xcf   : > { %v2607_v31 = vsel %vm409_vm6, %v2606_v5, %v2605_v25  ;;  %v2238_v32 = vsel %vm397_vm2, %v2237_v19, %v2236_v26  ;;  %v4031_v33 = vld [vmem:[%s4519_s26 + $0x96] sm:$0x1]  ;;  %v4032_v34 = vld [vmem:[%s4519_s26 + $0x98] sm:$0x1]  ;;  %v4033_v35 = vld [vmem:[%s4519_s26 + $0x9a] sm:$0x1] }
  0xd0   : > { %v2609_v36 = vsel %vm412_vm7, %v2608_v6, %v2607_v31  ;;  %v2240_v37 = vsel %vm400_vm3, %v2239_v21, %v2238_v32  ;;  %v4034_v39 = vld [vmem:[%s4519_s26 + $0x9c] sm:$0x1]  ;;  %v4035_v40 = vld [vmem:[%s4519_s26 + $0x9e] sm:$0x1]  ;;  %v2610_v42 = vrot.slane %v4029_v29, 7  ;;  %v2612_v47 = vrot.slane %v4030_v30, 6 }
  0xd1   : > { %4400 = vmatprep.mubr.msk.f32.mxu0 %vm512_vm8, %v2609_v36  ;;  %v2242_v43 = vsel %vm403_vm4, %v2241_v22, %v2240_v37  ;;  %v2614_v44 = vrot.slane %v4031_v33, 5  ;;  %v2616_v38 = vrot.slane %v4032_v34, 4  ;;  %v2618_v45 = vrot.slane %v4033_v35, 3  ;;  %v3962_v46 = vld [vmem:[%s4519_s26 + $0xa4] sm:$0x1] }
  0xd2   : > { %v2244_v48 = vsel %vm406_vm5, %v2243_v23, %v2242_v43  ;;  %v2611_v49 = vsel %vm394_vm1, %v2610_v42, %v4028_v14  ;;  %v2620_v50 = vrot.slane %v4034_v39, 2  ;;  %v2622_v51 = vrot.slane %v4035_v40, 1  ;;  %v3963_v2 = vld [vmem:[%s4519_s26 + $0xa6] sm:$0x1]  ;;  %v3964_v52 = vld [vmem:[%s4519_s26 + $0xa8] sm:$0x1] }
  0xd3   : > { %v2246_v53 = vsel %vm409_vm6, %v2245_v27, %v2244_v48  ;;  %v2613_v54 = vsel %vm397_vm2, %v2612_v47, %v2611_v49  ;;  %v3965_v55 = vld [vmem:[%s4519_s26 + $0xaa] sm:$0x1]  ;;  %v3966_v56 = vld [vmem:[%s4519_s26 + $0xac] sm:$0x1]  ;;  %v3967_v57 = vld [vmem:[%s4519_s26 + $0xae] sm:$0x1] }
  0xd4   : > { %v2248_v41 = vsel %vm412_vm7, %v2247_v28, %v2246_v53  ;;  %v2615_v58 = vsel %vm400_vm3, %v2614_v44, %v2613_v54  ;;  %v3968_v59 = vld [vmem:[%s4519_s26 + $0xb0] sm:$0x1]  ;;  %v3969_v60 = vld [vmem:[%s4519_s26 + $0xb2] sm:$0x1]  ;;  %v2249_v61 = vrot.slane %v3963_v2, 7  ;;  %v2251_v62 = vrot.slane %v3964_v52, 6 }
  0xd5   : > { %4387 = vmatmul.mubr.msk.f32.gmra.mxu1 %vm512_vm8, %v2248_v41  ;;  %v2617_v63 = vsel %vm403_vm4, %v2616_v38, %v2615_v58  ;;  %v2253_v0 = vrot.slane %v3965_v55, 5  ;;  %v2255_v24 = vrot.slane %v3966_v56, 4  ;;  %v2257_v3 = vrot.slane %v3967_v57, 3  ;;  %v4036_v4 = vld [vmem:[%s4519_s26 + $0xb4] sm:$0x1] }
  0xd6   : > { %v2619_v5 = vsel %vm406_vm5, %v2618_v45, %v2617_v63  ;;  %v2250_v6 = vsel %vm394_vm1, %v2249_v61, %v3962_v46  ;;  %v2259_v7 = vrot.slane %v3968_v59, 2  ;;  %v2261_v8 = vrot.slane %v3969_v60, 1  ;;  %v4037_v9 = vld [vmem:[%s4519_s26 + $0xb6] sm:$0x1]  ;;  %v4038_v10 = vld [vmem:[%s4519_s26 + $0xb8] sm:$0x1] }
  0xd7   : > { %v2621_v11 = vsel %vm409_vm6, %v2620_v50, %v2619_v5  ;;  %v2252_v1 = vsel %vm397_vm2, %v2251_v62, %v2250_v6  ;;  %v4039_v12 = vld [vmem:[%s4519_s26 + $0xba] sm:$0x1]  ;;  %v4040_v13 = vld [vmem:[%s4519_s26 + $0xbc] sm:$0x1]  ;;  %v4041_v15 = vld [vmem:[%s4519_s26 + $0xbe] sm:$0x1] }
  0xd8   : > { %v2623_v16 = vsel %vm412_vm7, %v2622_v51, %v2621_v11  ;;  %v2254_v17 = vsel %vm400_vm3, %v2253_v0, %v2252_v1  ;;  %v4042_v18 = vld [vmem:[%s4519_s26 + $0xc0] sm:$0x1]  ;;  %v4043_v19 = vld [vmem:[%s4519_s26 + $0xc2] sm:$0x1]  ;;  %v2624_v20 = vrot.slane %v4037_v9, 7  ;;  %v2626_v21 = vrot.slane %v4038_v10, 6 }
  0xd9   : > { %4401 = vmatmul.mubr.msk.f32.gmra.mxu0 %vm512_vm8, %v2623_v16  ;;  %v2256_v22 = vsel %vm403_vm4, %v2255_v24, %v2254_v17  ;;  %v2628_v23 = vrot.slane %v4039_v12, 5  ;;  %v2630_v14 = vrot.slane %v4040_v13, 4  ;;  %v2632_v25 = vrot.slane %v4041_v15, 3  ;;  %v3970_v26 = vld [vmem:[%s4519_s26 + $0xc8] sm:$0x1] }
  0xda   : > { %v2258_v27 = vsel %vm406_vm5, %v2257_v3, %v2256_v22  ;;  %v2625_v28 = vsel %vm394_vm1, %v2624_v20, %v4036_v4  ;;  %v2634_v29 = vrot.slane %v4042_v18, 2  ;;  %v2636_v30 = vrot.slane %v4043_v19, 1  ;;  %v3971_v31 = vld [vmem:[%s4519_s26 + $0xca] sm:$0x1]  ;;  %v3972_v32 = vld [vmem:[%s4519_s26 + $0xcc] sm:$0x1] }
  0xdb   : > { %v2260_v33 = vsel %vm409_vm6, %v2259_v7, %v2258_v27  ;;  %v2627_v34 = vsel %vm397_vm2, %v2626_v21, %v2625_v28  ;;  %v3973_v35 = vld [vmem:[%s4519_s26 + $0xce] sm:$0x1]  ;;  %v3974_v36 = vld [vmem:[%s4519_s26 + $0xd0] sm:$0x1]  ;;  %v3975_v37 = vld [vmem:[%s4519_s26 + $0xd2] sm:$0x1] }
  0xdc   : > { %v2262_v39 = vsel %vm412_vm7, %v2261_v8, %v2260_v33  ;;  %v2629_v40 = vsel %vm400_vm3, %v2628_v23, %v2627_v34  ;;  %v3976_v42 = vld [vmem:[%s4519_s26 + $0xd4] sm:$0x1]  ;;  %v3977_v47 = vld [vmem:[%s4519_s26 + $0xd6] sm:$0x1]  ;;  %v2263_v43 = vrot.slane %v3971_v31, 7  ;;  %v2265_v44 = vrot.slane %v3972_v32, 6 }
  0xdd   : > { %4389 = vmatprep.mubr.msk.f32.mxu1 %vm512_vm8, %v2262_v39  ;;  %v2631_v38 = vsel %vm403_vm4, %v2630_v14, %v2629_v40  ;;  %v2267_v45 = vrot.slane %v3973_v35, 5  ;;  %v2269_v46 = vrot.slane %v3974_v36, 4  ;;  %v2271_v48 = vrot.slane %v3975_v37, 3  ;;  %v4044_v49 = vld [vmem:[%s4519_s26 + $0xd8] sm:$0x1] }
  0xde   : > { %v2633_v50 = vsel %vm406_vm5, %v2632_v25, %v2631_v38  ;;  %v2264_v51 = vsel %vm394_vm1, %v2263_v43, %v3970_v26  ;;  %v2273_v2 = vrot.slane %v3976_v42, 2  ;;  %v2275_v52 = vrot.slane %v3977_v47, 1  ;;  %v4045_v53 = vld [vmem:[%s4519_s26 + $0xda] sm:$0x1]  ;;  %v4046_v54 = vld [vmem:[%s4519_s26 + $0xdc] sm:$0x1] }
  0xdf   : > { %v2635_v55 = vsel %vm409_vm6, %v2634_v29, %v2633_v50  ;;  %v2266_v56 = vsel %vm397_vm2, %v2265_v44, %v2264_v51  ;;  %v4047_v57 = vld [vmem:[%s4519_s26 + $0xde] sm:$0x1]  ;;  %v4048_v41 = vld [vmem:[%s4519_s26 + $0xe0] sm:$0x1]  ;;  %v4049_v58 = vld [vmem:[%s4519_s26 + $0xe2] sm:$0x1] }
  0xe0   : > { %v2637_v59 = vsel %vm412_vm7, %v2636_v30, %v2635_v55  ;;  %v2268_v60 = vsel %vm400_vm3, %v2267_v45, %v2266_v56  ;;  %v4050_v61 = vld [vmem:[%s4519_s26 + $0xe4] sm:$0x1]  ;;  %v4051_v62 = vld [vmem:[%s4519_s26 + $0xe6] sm:$0x1]  ;;  %v2638_v63 = vrot.slane %v4045_v53, 7  ;;  %v2640_v0 = vrot.slane %v4046_v54, 6 }
  0xe1   : > { %4403 = vmatprep.mubr.msk.f32.mxu0 %vm512_vm8, %v2637_v59  ;;  %v2270_v24 = vsel %vm403_vm4, %v2269_v46, %v2268_v60  ;;  %v2642_v3 = vrot.slane %v4047_v57, 5  ;;  %v2644_v4 = vrot.slane %v4048_v41, 4  ;;  %v2646_v5 = vrot.slane %v4049_v58, 3  ;;  %v3978_v6 = vld [vmem:[%s4519_s26 + $0xec] sm:$0x1] }
  0xe2   : > { %v2272_v7 = vsel %vm406_vm5, %v2271_v48, %v2270_v24  ;;  %v2639_v8 = vsel %vm394_vm1, %v2638_v63, %v4044_v49  ;;  %v2648_v9 = vrot.slane %v4050_v61, 2  ;;  %v2650_v10 = vrot.slane %v4051_v62, 1  ;;  %v3979_v11 = vld [vmem:[%s4519_s26 + $0xee] sm:$0x1]  ;;  %v3980_v1 = vld [vmem:[%s4519_s26 + $0xf0] sm:$0x1] }
  0xe3   : > { %v2274_v12 = vsel %vm409_vm6, %v2273_v2, %v2272_v7  ;;  %v2641_v13 = vsel %vm397_vm2, %v2640_v0, %v2639_v8  ;;  %v3981_v15 = vld [vmem:[%s4519_s26 + $0xf2] sm:$0x1]  ;;  %v3982_v16 = vld [vmem:[%s4519_s26 + $0xf4] sm:$0x1]  ;;  %v3983_v17 = vld [vmem:[%s4519_s26 + $0xf6] sm:$0x1] }
  0xe4   : > { %v2276_v18 = vsel %vm412_vm7, %v2275_v52, %v2274_v12  ;;  %v2643_v19 = vsel %vm400_vm3, %v2642_v3, %v2641_v13  ;;  %v3984_v20 = vld [vmem:[%s4519_s26 + $0xf8] sm:$0x1]  ;;  %v3985_v21 = vld [vmem:[%s4519_s26 + $0xfa] sm:$0x1]  ;;  %v2277_v22 = vrot.slane %v3979_v11, 7  ;;  %v2279_v23 = vrot.slane %v3980_v1, 6 }
  0xe5   : > { %4390 = vmatmul.mubr.msk.f32.gmra.mxu1 %vm512_vm8, %v2276_v18  ;;  %v2645_v14 = vsel %vm403_vm4, %v2644_v4, %v2643_v19  ;;  %v2281_v25 = vrot.slane %v3981_v15, 5  ;;  %v2283_v26 = vrot.slane %v3982_v16, 4  ;;  %v2285_v27 = vrot.slane %v3983_v17, 3  ;;  %v4052_v28 = vld [vmem:[%s4519_s26 + $0xfc] sm:$0x1] }
  0xe6   : > { %v2647_v29 = vsel %vm406_vm5, %v2646_v5, %v2645_v14  ;;  %v2278_v30 = vsel %vm394_vm1, %v2277_v22, %v3978_v6  ;;  %v2287_v31 = vrot.slane %v3984_v20, 2  ;;  %v2289_v32 = vrot.slane %v3985_v21, 1  ;;  %v4053_v33 = vld [vmem:[%s4519_s26 + $0xfe] sm:$0x1]  ;;  %v4054_v34 = vld [vmem:[%s4519_s26 + $0x100] sm:$0x1] }
  0xe7   : > { %v2649_v35 = vsel %vm409_vm6, %v2648_v9, %v2647_v29  ;;  %v2280_v36 = vsel %vm397_vm2, %v2279_v23, %v2278_v30  ;;  %v4055_v37 = vld [vmem:[%s4519_s26 + $0x102] sm:$0x1]  ;;  %v4056_v39 = vld [vmem:[%s4519_s26 + $0x104] sm:$0x1]  ;;  %v4057_v40 = vld [vmem:[%s4519_s26 + $0x106] sm:$0x1] }
  0xe8   : > { %v2651_v42 = vsel %vm412_vm7, %v2650_v10, %v2649_v35  ;;  %v2282_v47 = vsel %vm400_vm3, %v2281_v25, %v2280_v36  ;;  %v4058_v43 = vld [vmem:[%s4519_s26 + $0x108] sm:$0x1]  ;;  %v4059_v44 = vld [vmem:[%s4519_s26 + $0x10a] sm:$0x1]  ;;  %v2652_v38 = vrot.slane %v4053_v33, 7  ;;  %v2654_v45 = vrot.slane %v4054_v34, 6 }
  0xe9   : > { %4404 = vmatmul.mubr.msk.f32.gmra.mxu0 %vm512_vm8, %v2651_v42  ;;  %v2284_v46 = vsel %vm403_vm4, %v2283_v26, %v2282_v47  ;;  %v2656_v48 = vrot.slane %v4055_v37, 5  ;;  %v2658_v49 = vrot.slane %v4056_v39, 4  ;;  %v2660_v50 = vrot.slane %v4057_v40, 3  ;;  %v3986_v51 = vld [vmem:[%s4519_s26 + $0x110] sm:$0x1] }
  0xea   : > { %v2286_v2 = vsel %vm406_vm5, %v2285_v27, %v2284_v46  ;;  %v2653_v52 = vsel %vm394_vm1, %v2652_v38, %v4052_v28  ;;  %v2662_v53 = vrot.slane %v4058_v43, 2  ;;  %v2664_v54 = vrot.slane %v4059_v44, 1  ;;  %v3987_v55 = vld [vmem:[%s4519_s26 + $0x112] sm:$0x1]  ;;  %v3988_v56 = vld [vmem:[%s4519_s26 + $0x114] sm:$0x1] }
  0xeb   : > { %v2288_v57 = vsel %vm409_vm6, %v2287_v31, %v2286_v2  ;;  %v2655_v41 = vsel %vm397_vm2, %v2654_v45, %v2653_v52  ;;  %v3989_v58 = vld [vmem:[%s4519_s26 + $0x116] sm:$0x1]  ;;  %v3990_v59 = vld [vmem:[%s4519_s26 + $0x118] sm:$0x1]  ;;  %v3991_v60 = vld [vmem:[%s4519_s26 + $0x11a] sm:$0x1] }
  0xec   : > { %v2290_v61 = vsel %vm412_vm7, %v2289_v32, %v2288_v57  ;;  %v2657_v62 = vsel %vm400_vm3, %v2656_v48, %v2655_v41  ;;  %v3992_v63 = vld [vmem:[%s4519_s26 + $0x11c] sm:$0x1]  ;;  %v3993_v0 = vld [vmem:[%s4519_s26 + $0x11e] sm:$0x1]  ;;  %v2291_v24 = vrot.slane %v3987_v55, 7  ;;  %v2293_v3 = vrot.slane %v3988_v56, 6 }
  0xed   : > { %4392 = vmatprep.mubr.msk.f32.mxu1 %vm512_vm8, %v2290_v61  ;;  %v2659_v4 = vsel %vm403_vm4, %v2658_v49, %v2657_v62  ;;  %v2295_v5 = vrot.slane %v3989_v58, 5  ;;  %v2297_v6 = vrot.slane %v3990_v59, 4  ;;  %v2299_v7 = vrot.slane %v3991_v60, 3  ;;  %v4060_v8 = vld [vmem:[%s4519_s26 + $0x120] sm:$0x1] }
  0xee   : > { %v2661_v9 = vsel %vm406_vm5, %v2660_v50, %v2659_v4  ;;  %v2292_v10 = vsel %vm394_vm1, %v2291_v24, %v3986_v51  ;;  %v2301_v11 = vrot.slane %v3992_v63, 2  ;;  %v2303_v1 = vrot.slane %v3993_v0, 1  ;;  %v4061_v12 = vld [vmem:[%s4519_s26 + $0x122] sm:$0x1]  ;;  %v4062_v13 = vld [vmem:[%s4519_s26 + $0x124] sm:$0x1] }
  0xef   : > { %v2663_v15 = vsel %vm409_vm6, %v2662_v53, %v2661_v9  ;;  %v2294_v16 = vsel %vm397_vm2, %v2293_v3, %v2292_v10  ;;  %v4063_v17 = vld [vmem:[%s4519_s26 + $0x126] sm:$0x1]  ;;  %v4064_v18 = vld [vmem:[%s4519_s26 + $0x128] sm:$0x1]  ;;  %v4065_v19 = vld [vmem:[%s4519_s26 + $0x12a] sm:$0x1] }
  0xf0   : > { %v2665_v20 = vsel %vm412_vm7, %v2664_v54, %v2663_v15  ;;  %v2296_v21 = vsel %vm400_vm3, %v2295_v5, %v2294_v16  ;;  %v4066_v22 = vld [vmem:[%s4519_s26 + $0x12c] sm:$0x1]  ;;  %v4067_v23 = vld [vmem:[%s4519_s26 + $0x12e] sm:$0x1]  ;;  %v2666_v14 = vrot.slane %v4061_v12, 7  ;;  %v2668_v25 = vrot.slane %v4062_v13, 6 }
  0xf1   : > { %4406 = vmatprep.mubr.msk.f32.mxu0 %vm512_vm8, %v2665_v20  ;;  %v2298_v26 = vsel %vm403_vm4, %v2297_v6, %v2296_v21  ;;  %v2670_v27 = vrot.slane %v4063_v17, 5  ;;  %v2672_v28 = vrot.slane %v4064_v18, 4  ;;  %v2674_v29 = vrot.slane %v4065_v19, 3  ;;  %v4078_v30 = vld [vmem:[%s4519_s26 + $0x25] sm:$0x1] }
  0xf2   : > { %v2300_v31 = vsel %vm406_vm5, %v2299_v7, %v2298_v26  ;;  %v2667_v32 = vsel %vm394_vm1, %v2666_v14, %v4060_v8  ;;  %v2676_v33 = vrot.slane %v4066_v22, 2  ;;  %v2678_v34 = vrot.slane %v4067_v23, 1  ;;  %v4079_v35 = vld [vmem:[%s4519_s26 + $0x27] sm:$0x1]  ;;  %v4080_v36 = vld [vmem:[%s4519_s26 + $0x29] sm:$0x1] }
  0xf3   : > { %v2302_v37 = vsel %vm409_vm6, %v2301_v11, %v2300_v31  ;;  %v2669_v39 = vsel %vm397_vm2, %v2668_v25, %v2667_v32  ;;  %v4081_v40 = vld [vmem:[%s4519_s26 + $0x2b] sm:$0x1]  ;;  %v4082_v42 = vld [vmem:[%s4519_s26 + $0x2d] sm:$0x1]  ;;  %v4083_v47 = vld [vmem:[%s4519_s26 + $0x2f] sm:$0x1] }
  0xf4   : > { %v2304_v43 = vsel %vm412_vm7, %v2303_v1, %v2302_v37  ;;  %v2671_v44 = vsel %vm400_vm3, %v2670_v27, %v2669_v39  ;;  %v4084_v38 = vld [vmem:[%s4519_s26 + $0x31] sm:$0x1]  ;;  %v4085_v45 = vld [vmem:[%s4519_s26 + $0x33] sm:$0x1]  ;;  %v2942_v46 = vrot.slane %v4079_v35, 7  ;;  %v2944_v48 = vrot.slane %v4080_v36, 6 }
  0xf5   : > { %4393 = vmatmul.mubr.msk.f32.gmra.mxu1 %vm512_vm8, %v2304_v43  ;;  %v2673_v49 = vsel %vm403_vm4, %v2672_v28, %v2671_v44  ;;  %v2946_v50 = vrot.slane %v4081_v40, 5  ;;  %v2948_v51 = vrot.slane %v4082_v42, 4  ;;  %v2950_v2 = vrot.slane %v4083_v47, 3  ;;  %v4152_v52 = vld [vmem:[%s4519_s26 + $0x26] sm:$0x1] }
  0xf6   : > { %v2675_v53 = vsel %vm406_vm5, %v2674_v29, %v2673_v49  ;;  %v2943_v54 = vsel %vm394_vm1, %v2942_v46, %v4078_v30  ;;  %v2952_v55 = vrot.slane %v4084_v38, 2  ;;  %v2954_v56 = vrot.slane %v4085_v45, 1  ;;  %v4153_v57 = vld [vmem:[%s4519_s26 + $0x28] sm:$0x1]  ;;  %v4154_v41 = vld [vmem:[%s4519_s26 + $0x2a] sm:$0x1] }
  0xf7   : > { %v2677_v58 = vsel %vm409_vm6, %v2676_v33, %v2675_v53  ;;  %v2945_v59 = vsel %vm397_vm2, %v2944_v48, %v2943_v54  ;;  %v4155_v60 = vld [vmem:[%s4519_s26 + $0x2c] sm:$0x1]  ;;  %v4156_v61 = vld [vmem:[%s4519_s26 + $0x2e] sm:$0x1]  ;;  %v4157_v62 = vld [vmem:[%s4519_s26 + $0x30] sm:$0x1] }
  0xf8   : > { %v2679_v63 = vsel %vm412_vm7, %v2678_v34, %v2677_v58  ;;  %v2947_v0 = vsel %vm400_vm3, %v2946_v50, %v2945_v59  ;;  %v4158_v24 = vld [vmem:[%s4519_s26 + $0x32] sm:$0x1]  ;;  %v4159_v3 = vld [vmem:[%s4519_s26 + $0x34] sm:$0x1]  ;;  %v3317_v4 = vrot.slane %v4153_v57, 7  ;;  %v3319_v5 = vrot.slane %v4154_v41, 6 }
  0xf9   : > { %4407 = vmatmul.mubr.msk.f32.gmra.mxu0 %vm512_vm8, %v2679_v63  ;;  %v2949_v6 = vsel %vm403_vm4, %v2948_v51, %v2947_v0  ;;  %v3321_v7 = vrot.slane %v4155_v60, 5  ;;  %v3323_v8 = vrot.slane %v4156_v61, 4  ;;  %v3325_v9 = vrot.slane %v4157_v62, 3  ;;  %v4086_v10 = vld [vmem:[%s4519_s26 + $0x49] sm:$0x1] }
  0xfa   : > { %v2951_v11 = vsel %vm406_vm5, %v2950_v2, %v2949_v6  ;;  %v3318_v1 = vsel %vm394_vm1, %v3317_v4, %v4152_v52  ;;  %v3327_v12 = vrot.slane %v4158_v24, 2  ;;  %v3329_v13 = vrot.slane %v4159_v3, 1  ;;  %v4087_v15 = vld [vmem:[%s4519_s26 + $0x4b] sm:$0x1]  ;;  %v4088_v16 = vld [vmem:[%s4519_s26 + $0x4d] sm:$0x1] }
  0xfb   : > { %v2953_v17 = vsel %vm409_vm6, %v2952_v55, %v2951_v11  ;;  %v3320_v18 = vsel %vm397_vm2, %v3319_v5, %v3318_v1  ;;  %v4089_v19 = vld [vmem:[%s4519_s26 + $0x4f] sm:$0x1]  ;;  %v4090_v20 = vld [vmem:[%s4519_s26 + $0x51] sm:$0x1]  ;;  %v4091_v21 = vld [vmem:[%s4519_s26 + $0x53] sm:$0x1] }
  0xfc   : > { %v2955_v22 = vsel %vm412_vm7, %v2954_v56, %v2953_v17  ;;  %v3322_v23 = vsel %vm400_vm3, %v3321_v7, %v3320_v18  ;;  %v4092_v14 = vld [vmem:[%s4519_s26 + $0x55] sm:$0x1]  ;;  %v4093_v25 = vld [vmem:[%s4519_s26 + $0x57] sm:$0x1]  ;;  %v2956_v26 = vrot.slane %v4087_v15, 7  ;;  %v2958_v27 = vrot.slane %v4088_v16, 6 }
  0xfd   : > { %4411 = vmatprep.mubr.msk.f32.mxu1 %vm512_vm8, %v2955_v22  ;;  %v3324_v28 = vsel %vm403_vm4, %v3323_v8, %v3322_v23  ;;  %v2960_v29 = vrot.slane %v4089_v19, 5  ;;  %v2962_v30 = vrot.slane %v4090_v20, 4  ;;  %v2964_v31 = vrot.slane %v4091_v21, 3  ;;  %v4160_v32 = vld [vmem:[%s4519_s26 + $0x4a] sm:$0x1] }
  0xfe   : > { %v3326_v33 = vsel %vm406_vm5, %v3325_v9, %v3324_v28  ;;  %v2957_v34 = vsel %vm394_vm1, %v2956_v26, %v4086_v10  ;;  %v2966_v35 = vrot.slane %v4092_v14, 2  ;;  %v2968_v36 = vrot.slane %v4093_v25, 1  ;;  %v4161_v37 = vld [vmem:[%s4519_s26 + $0x4c] sm:$0x1]  ;;  %v4162_v39 = vld [vmem:[%s4519_s26 + $0x4e] sm:$0x1] }
  0xff   : > { %v3328_v40 = vsel %vm409_vm6, %v3327_v12, %v3326_v33  ;;  %v2959_v42 = vsel %vm397_vm2, %v2958_v27, %v2957_v34  ;;  %v4163_v47 = vld [vmem:[%s4519_s26 + $0x50] sm:$0x1]  ;;  %v4164_v43 = vld [vmem:[%s4519_s26 + $0x52] sm:$0x1]  ;;  %v4165_v44 = vld [vmem:[%s4519_s26 + $0x54] sm:$0x1] }
 0x100   : > { %v3330_v38 = vsel %vm412_vm7, %v3329_v13, %v3328_v40  ;;  %v2961_v45 = vsel %vm400_vm3, %v2960_v29, %v2959_v42  ;;  %v4166_v46 = vld [vmem:[%s4519_s26 + $0x56] sm:$0x1]  ;;  %v4167_v48 = vld [vmem:[%s4519_s26 + $0x58] sm:$0x1]  ;;  %v3331_v49 = vrot.slane %v4161_v37, 7  ;;  %v3333_v50 = vrot.slane %v4162_v39, 6 }
 0x101   : > { %4425 = vmatprep.mubr.msk.f32.mxu0 %vm512_vm8, %v3330_v38  ;;  %v2963_v51 = vsel %vm403_vm4, %v2962_v30, %v2961_v45  ;;  %v3335_v2 = vrot.slane %v4163_v47, 5  ;;  %v3337_v52 = vrot.slane %v4164_v43, 4  ;;  %v3339_v53 = vrot.slane %v4165_v44, 3  ;;  %v4094_v54 = vld [vmem:[%s4519_s26 + $0x6d] sm:$0x1] }
 0x102   : > { %v2965_v55 = vsel %vm406_vm5, %v2964_v31, %v2963_v51  ;;  %v3332_v56 = vsel %vm394_vm1, %v3331_v49, %v4160_v32  ;;  %v3341_v57 = vrot.slane %v4166_v46, 2  ;;  %v3343_v41 = vrot.slane %v4167_v48, 1  ;;  %v4095_v58 = vld [vmem:[%s4519_s26 + $0x6f] sm:$0x1]  ;;  %v4096_v59 = vld [vmem:[%s4519_s26 + $0x71] sm:$0x1] }
 0x103   : > { %v2967_v60 = vsel %vm409_vm6, %v2966_v35, %v2965_v55  ;;  %v3334_v61 = vsel %vm397_vm2, %v3333_v50, %v3332_v56  ;;  %v4097_v62 = vld [vmem:[%s4519_s26 + $0x73] sm:$0x1]  ;;  %v4098_v63 = vld [vmem:[%s4519_s26 + $0x75] sm:$0x1]  ;;  %v4099_v0 = vld [vmem:[%s4519_s26 + $0x77] sm:$0x1] }
 0x104   : > { %v2969_v24 = vsel %vm412_vm7, %v2968_v36, %v2967_v60  ;;  %v3336_v3 = vsel %vm400_vm3, %v3335_v2, %v3334_v61  ;;  %v4100_v4 = vld [vmem:[%s4519_s26 + $0x79] sm:$0x1]  ;;  %v4101_v5 = vld [vmem:[%s4519_s26 + $0x7b] sm:$0x1]  ;;  %v2970_v6 = vrot.slane %v4095_v58, 7  ;;  %v2972_v7 = vrot.slane %v4096_v59, 6 }
 0x105   : > { %4412 = vmatmul.mubr.msk.f32.vlgmr.msra.gmra.mxu1 %vm512_vm8, %v2969_v24  ;;  %v3338_v8 = vsel %vm403_vm4, %v3337_v52, %v3336_v3  ;;  %v2974_v9 = vrot.slane %v4097_v62, 5  ;;  %v2976_v10 = vrot.slane %v4098_v63, 4  ;;  %v2978_v11 = vrot.slane %v4099_v0, 3  ;;  %v4168_v1 = vld [vmem:[%s4519_s26 + $0x6e] sm:$0x1]  ;;  %v5569_v52 = vpop.f32.mrf.mxu1 }
 0x106   : > { %v3340_v12 = vsel %vm406_vm5, %v3339_v53, %v3338_v8  ;;  %v2971_v13 = vsel %vm394_vm1, %v2970_v6, %v4094_v54  ;;  %v2980_v15 = vrot.slane %v4100_v4, 2  ;;  %v2982_v16 = vrot.slane %v4101_v5, 1  ;;  %v4169_v17 = vld [vmem:[%s4519_s26 + $0x70] sm:$0x1]  ;;  %v4170_v18 = vld [vmem:[%s4519_s26 + $0x72] sm:$0x1] }
 0x107   : > { %v3342_v19 = vsel %vm409_vm6, %v3341_v57, %v3340_v12  ;;  %v2973_v20 = vsel %vm397_vm2, %v2972_v7, %v2971_v13  ;;  %v4171_v21 = vld [vmem:[%s4519_s26 + $0x74] sm:$0x1]  ;;  %v4172_v22 = vld [vmem:[%s4519_s26 + $0x76] sm:$0x1]  ;;  %v4173_v23 = vld [vmem:[%s4519_s26 + $0x78] sm:$0x1] }
 0x108   : > { %v3344_v14 = vsel %vm412_vm7, %v3343_v41, %v3342_v19  ;;  %v2975_v25 = vsel %vm400_vm3, %v2974_v9, %v2973_v20  ;;  %v4174_v26 = vld [vmem:[%s4519_s26 + $0x7a] sm:$0x1]  ;;  %v4175_v27 = vld [vmem:[%s4519_s26 + $0x7c] sm:$0x1]  ;;  %v3345_v28 = vrot.slane %v4169_v17, 7  ;;  %v3347_v29 = vrot.slane %v4170_v18, 6 }
 0x109   : > { %4426 = vmatmul.mubr.msk.f32.vlgmr.msra.gmra.mxu0 %vm512_vm8, %v3344_v14  ;;  %v2977_v30 = vsel %vm403_vm4, %v2976_v10, %v2975_v25  ;;  %v3349_v31 = vrot.slane %v4171_v21, 5  ;;  %v3351_v32 = vrot.slane %v4172_v22, 4  ;;  %v3353_v33 = vrot.slane %v4173_v23, 3  ;;  %v4102_v34 = vld [vmem:[%s4519_s26 + $0x91] sm:$0x1] }
 0x10a   : > { %v2979_v35 = vsel %vm406_vm5, %v2978_v11, %v2977_v30  ;;  %v3346_v36 = vsel %vm394_vm1, %v3345_v28, %v4168_v1  ;;  %v3355_v37 = vrot.slane %v4174_v26, 2  ;;  %v3357_v39 = vrot.slane %v4175_v27, 1  ;;  %v4103_v40 = vld [vmem:[%s4519_s26 + $0x93] sm:$0x1]  ;;  %v4104_v42 = vld [vmem:[%s4519_s26 + $0x95] sm:$0x1]  ;;  %v5587_v11 = vpop.f32.mrf.mxu0  ;;  %v5589_v1 = vpop.f32.mrf.mxu1 }
 0x10b   : > { %v2981_v47 = vsel %vm409_vm6, %v2980_v15, %v2979_v35  ;;  %v3348_v43 = vsel %vm397_vm2, %v3347_v29, %v3346_v36  ;;  %v4105_v44 = vld [vmem:[%s4519_s26 + $0x97] sm:$0x1]  ;;  %v4106_v38 = vld [vmem:[%s4519_s26 + $0x99] sm:$0x1]  ;;  %v4107_v45 = vld [vmem:[%s4519_s26 + $0x9b] sm:$0x1] }
 0x10c   : > { %v2983_v46 = vsel %vm412_vm7, %v2982_v16, %v2981_v47  ;;  %v3350_v48 = vsel %vm400_vm3, %v3349_v31, %v3348_v43  ;;  %v4108_v49 = vld [vmem:[%s4519_s26 + $0x9d] sm:$0x1]  ;;  %v4109_v50 = vld [vmem:[%s4519_s26 + $0x9f] sm:$0x1]  ;;  %v2984_v51 = vrot.slane %v4103_v40, 7  ;;  %v2986_v2 = vrot.slane %v4104_v42, 6  ;;  %v5607_v35 = vpop.f32.mrf.mxu0  ;;  %v5609_v36 = vpop.f32.mrf.mxu1 }
 0x10d   : > { %4414 = vmatprep.mubr.msk.f32.mxu1 %vm512_vm8, %v2983_v46  ;;  %v3352_v53 = vsel %vm403_vm4, %v3351_v32, %v3350_v48  ;;  %v2988_v54 = vrot.slane %v4105_v44, 5  ;;  %v2990_v55 = vrot.slane %v4106_v38, 4  ;;  %v2992_v56 = vrot.slane %v4107_v45, 3  ;;  %v4176_v57 = vld [vmem:[%s4519_s26 + $0x92] sm:$0x1] }
 0x10e   : > { %v3354_v41 = vsel %vm406_vm5, %v3353_v33, %v3352_v53  ;;  %v2985_v58 = vsel %vm394_vm1, %v2984_v51, %v4102_v34  ;;  %v2994_v59 = vrot.slane %v4108_v49, 2  ;;  %v2996_v60 = vrot.slane %v4109_v50, 1  ;;  %v4177_v61 = vld [vmem:[%s4519_s26 + $0x94] sm:$0x1]  ;;  %v4178_v62 = vld [vmem:[%s4519_s26 + $0x96] sm:$0x1] }
 0x10f   : > { %v3356_v63 = vsel %vm409_vm6, %v3355_v37, %v3354_v41  ;;  %v2987_v0 = vsel %vm397_vm2, %v2986_v2, %v2985_v58  ;;  %v4179_v24 = vld [vmem:[%s4519_s26 + $0x98] sm:$0x1]  ;;  %v4180_v3 = vld [vmem:[%s4519_s26 + $0x9a] sm:$0x1]  ;;  %v4181_v4 = vld [vmem:[%s4519_s26 + $0x9c] sm:$0x1] }
 0x110   : > { %v3358_v5 = vsel %vm412_vm7, %v3357_v39, %v3356_v63  ;;  %v2989_v6 = vsel %vm400_vm3, %v2988_v54, %v2987_v0  ;;  %v4182_v7 = vld [vmem:[%s4519_s26 + $0x9e] sm:$0x1]  ;;  %v4183_v8 = vld [vmem:[%s4519_s26 + $0xa0] sm:$0x1]  ;;  %v3359_v9 = vrot.slane %v4177_v61, 7  ;;  %v3361_v10 = vrot.slane %v4178_v62, 6 }
 0x111   : > { %4428 = vmatprep.mubr.msk.f32.mxu0 %vm512_vm8, %v3358_v5  ;;  %v2991_v12 = vsel %vm403_vm4, %v2990_v55, %v2989_v6  ;;  %v3363_v13 = vrot.slane %v4179_v24, 5  ;;  %v3365_v15 = vrot.slane %v4180_v3, 4  ;;  %v3367_v16 = vrot.slane %v4181_v4, 3  ;;  %v4110_v17 = vld [vmem:[%s4519_s26 + $0xb5] sm:$0x1] }
 0x112   : > { %v2993_v18 = vsel %vm406_vm5, %v2992_v56, %v2991_v12  ;;  %v3360_v19 = vsel %vm394_vm1, %v3359_v9, %v4176_v57  ;;  %v3369_v20 = vrot.slane %v4182_v7, 2  ;;  %v3371_v21 = vrot.slane %v4183_v8, 1  ;;  %v4111_v22 = vld [vmem:[%s4519_s26 + $0xb7] sm:$0x1]  ;;  %v4112_v23 = vld [vmem:[%s4519_s26 + $0xb9] sm:$0x1] }
 0x113   : > { %v2995_v14 = vsel %vm409_vm6, %v2994_v59, %v2993_v18  ;;  %v3362_v25 = vsel %vm397_vm2, %v3361_v10, %v3360_v19  ;;  %v4113_v26 = vld [vmem:[%s4519_s26 + $0xbb] sm:$0x1]  ;;  %v4114_v27 = vld [vmem:[%s4519_s26 + $0xbd] sm:$0x1]  ;;  %v4115_v28 = vld [vmem:[%s4519_s26 + $0xbf] sm:$0x1]  ;;  %v5627_v59 = vpop.f32.mrf.mxu0 }
 0x114   : > { %v2997_v29 = vsel %vm412_vm7, %v2996_v60, %v2995_v14  ;;  %v3364_v30 = vsel %vm400_vm3, %v3363_v13, %v3362_v25  ;;  %v4116_v31 = vld [vmem:[%s4519_s26 + $0xc1] sm:$0x1]  ;;  %v4117_v32 = vld [vmem:[%s4519_s26 + $0xc3] sm:$0x1]  ;;  %v2998_v33 = vrot.slane %v4111_v22, 7  ;;  %v3000_v34 = vrot.slane %v4112_v23, 6  ;;  %v5629_v60 = vpop.f32.mrf.mxu1 }
 0x115   : > { %4415 = vmatmul.mubr.msk.f32.gmra.mxu1 %vm512_vm8, %v2997_v29  ;;  %v3366_v37 = vsel %vm403_vm4, %v3365_v15, %v3364_v30  ;;  %v3002_v39 = vrot.slane %v4113_v26, 5  ;;  %v3004_v40 = vrot.slane %v4114_v27, 4  ;;  %v3006_v42 = vrot.slane %v4115_v28, 3  ;;  %v4184_v47 = vld [vmem:[%s4519_s26 + $0xb6] sm:$0x1]  ;;  %v5647_v22 = vpop.f32.mrf.mxu0 }
 0x116   : > { %v3368_v43 = vsel %vm406_vm5, %v3367_v16, %v3366_v37  ;;  %v2999_v44 = vsel %vm394_vm1, %v2998_v33, %v4110_v17  ;;  %v3008_v38 = vrot.slane %v4116_v31, 2  ;;  %v3010_v45 = vrot.slane %v4117_v32, 1  ;;  %v4185_v46 = vld [vmem:[%s4519_s26 + $0xb8] sm:$0x1]  ;;  %v4186_v48 = vld [vmem:[%s4519_s26 + $0xba] sm:$0x1]  ;;  %v5649_v23 = vpop.f32.mrf.mxu1 }
 0x117   : > { %v3370_v49 = vsel %vm409_vm6, %v3369_v20, %v3368_v43  ;;  %v3001_v50 = vsel %vm397_vm2, %v3000_v34, %v2999_v44  ;;  %v4187_v51 = vld [vmem:[%s4519_s26 + $0xbc] sm:$0x1]  ;;  %v4188_v2 = vld [vmem:[%s4519_s26 + $0xbe] sm:$0x1]  ;;  %v4189_v53 = vld [vmem:[%s4519_s26 + $0xc0] sm:$0x1] }
 0x118   : > { %v3372_v54 = vsel %vm412_vm7, %v3371_v21, %v3370_v49  ;;  %v3003_v55 = vsel %vm400_vm3, %v3002_v39, %v3001_v50  ;;  %v4190_v56 = vld [vmem:[%s4519_s26 + $0xc2] sm:$0x1]  ;;  %v4191_v57 = vld [vmem:[%s4519_s26 + $0xc4] sm:$0x1]  ;;  %v3373_v41 = vrot.slane %v4185_v46, 7  ;;  %v3375_v58 = vrot.slane %v4186_v48, 6  ;;  %v5667_v49 = vpop.f32.mrf.mxu0  ;;  %v5669_v50 = vpop.f32.mrf.mxu1 }
 0x119   : > { %4429 = vmatmul.mubr.msk.f32.gmra.mxu0 %vm512_vm8, %v3372_v54  ;;  %v3005_v61 = vsel %vm403_vm4, %v3004_v40, %v3003_v55  ;;  %v3377_v62 = vrot.slane %v4187_v51, 5  ;;  %v3379_v63 = vrot.slane %v4188_v2, 4  ;;  %v3381_v0 = vrot.slane %v4189_v53, 3  ;;  %v4118_v24 = vld [vmem:[%s4519_s26 + $0xd9] sm:$0x1] }
 0x11a   : > { %v3007_v3 = vsel %vm406_vm5, %v3006_v42, %v3005_v61  ;;  %v3374_v4 = vsel %vm394_vm1, %v3373_v41, %v4184_v47  ;;  %v3383_v5 = vrot.slane %v4190_v56, 2  ;;  %v3385_v6 = vrot.slane %v4191_v57, 1  ;;  %v4119_v7 = vld [vmem:[%s4519_s26 + $0xdb] sm:$0x1]  ;;  %v4120_v8 = vld [vmem:[%s4519_s26 + $0xdd] sm:$0x1] }
 0x11b   : > { %v3009_v9 = vsel %vm409_vm6, %v3008_v38, %v3007_v3  ;;  %v3376_v10 = vsel %vm397_vm2, %v3375_v58, %v3374_v4  ;;  %v4121_v12 = vld [vmem:[%s4519_s26 + $0xdf] sm:$0x1]  ;;  %v4122_v13 = vld [vmem:[%s4519_s26 + $0xe1] sm:$0x1]  ;;  %v4123_v15 = vld [vmem:[%s4519_s26 + $0xe3] sm:$0x1] }
 0x11c   : > { %v3011_v16 = vsel %vm412_vm7, %v3010_v45, %v3009_v9  ;;  %v3378_v17 = vsel %vm400_vm3, %v3377_v62, %v3376_v10  ;;  %v4124_v18 = vld [vmem:[%s4519_s26 + $0xe5] sm:$0x1]  ;;  %v4125_v19 = vld [vmem:[%s4519_s26 + $0xe7] sm:$0x1]  ;;  %v3012_v20 = vrot.slane %v4119_v7, 7  ;;  %v3014_v21 = vrot.slane %v4120_v8, 6 }
 0x11d   : > { %4417 = vmatprep.mubr.msk.f32.mxu1 %vm512_vm8, %v3011_v16  ;;  %v3380_v14 = vsel %vm403_vm4, %v3379_v63, %v3378_v17  ;;  %v3016_v25 = vrot.slane %v4121_v12, 5  ;;  %v3018_v26 = vrot.slane %v4122_v13, 4  ;;  %v3020_v27 = vrot.slane %v4123_v15, 3  ;;  %v4192_v28 = vld [vmem:[%s4519_s26 + $0xda] sm:$0x1]  ;;  %v5687_v12 = vpop.f32.mrf.mxu0  ;;  %v5689_v13 = vpop.f32.mrf.mxu1 }
 0x11e   : > { %v3382_v29 = vsel %vm406_vm5, %v3381_v0, %v3380_v14  ;;  %v3013_v30 = vsel %vm394_vm1, %v3012_v20, %v4118_v24  ;;  %v3022_v31 = vrot.slane %v4124_v18, 2  ;;  %v3024_v32 = vrot.slane %v4125_v19, 1  ;;  %v4193_v33 = vld [vmem:[%s4519_s26 + $0xdc] sm:$0x1]  ;;  %v4194_v34 = vld [vmem:[%s4519_s26 + $0xde] sm:$0x1] }
 0x11f   : > { %v3384_v37 = vsel %vm409_vm6, %v3383_v5, %v3382_v29  ;;  %v3015_v39 = vsel %vm397_vm2, %v3014_v21, %v3013_v30  ;;  %v4195_v40 = vld [vmem:[%s4519_s26 + $0xe0] sm:$0x1]  ;;  %v4196_v42 = vld [vmem:[%s4519_s26 + $0xe2] sm:$0x1]  ;;  %v4197_v47 = vld [vmem:[%s4519_s26 + $0xe4] sm:$0x1] }
 0x120   : > { %v3386_v43 = vsel %vm412_vm7, %v3385_v6, %v3384_v37  ;;  %v3017_v44 = vsel %vm400_vm3, %v3016_v25, %v3015_v39  ;;  %v4198_v38 = vld [vmem:[%s4519_s26 + $0xe6] sm:$0x1]  ;;  %v4199_v45 = vld [vmem:[%s4519_s26 + $0xe8] sm:$0x1]  ;;  %v3387_v46 = vrot.slane %v4193_v33, 7  ;;  %v3389_v48 = vrot.slane %v4194_v34, 6 }
 0x121   : > { %4431 = vmatprep.mubr.msk.f32.mxu0 %vm512_vm8, %v3386_v43  ;;  %v3019_v51 = vsel %vm403_vm4, %v3018_v26, %v3017_v44  ;;  %v3391_v2 = vrot.slane %v4195_v40, 5  ;;  %v3393_v53 = vrot.slane %v4196_v42, 4  ;;  %v3395_v54 = vrot.slane %v4197_v47, 3  ;;  %v4126_v55 = vld [vmem:[%s4519_s26 + $0xfd] sm:$0x1]  ;;  %v5707_v47 = vpop.f32.mrf.mxu0  ;;  %v5709_v43 = vpop.f32.mrf.mxu1 }
 0x122   : > { %v3021_v56 = vsel %vm406_vm5, %v3020_v27, %v3019_v51  ;;  %v3388_v57 = vsel %vm394_vm1, %v3387_v46, %v4192_v28  ;;  %v3397_v41 = vrot.slane %v4198_v38, 2  ;;  %v3399_v58 = vrot.slane %v4199_v45, 1  ;;  %v4127_v61 = vld [vmem:[%s4519_s26 + $0xff] sm:$0x1]  ;;  %v4128_v62 = vld [vmem:[%s4519_s26 + $0x101] sm:$0x1] }
 0x123   : > { %v3023_v63 = vsel %vm409_vm6, %v3022_v31, %v3021_v56  ;;  %v3390_v0 = vsel %vm397_vm2, %v3389_v48, %v3388_v57  ;;  %v4129_v24 = vld [vmem:[%s4519_s26 + $0x103] sm:$0x1]  ;;  %v4130_v3 = vld [vmem:[%s4519_s26 + $0x105] sm:$0x1]  ;;  %v4131_v4 = vld [vmem:[%s4519_s26 + $0x107] sm:$0x1] }
 0x124   : > { %v3025_v5 = vsel %vm412_vm7, %v3024_v32, %v3023_v63  ;;  %v3392_v6 = vsel %vm400_vm3, %v3391_v2, %v3390_v0  ;;  %v4132_v7 = vld [vmem:[%s4519_s26 + $0x109] sm:$0x1]  ;;  %v4133_v8 = vld [vmem:[%s4519_s26 + $0x10b] sm:$0x1]  ;;  %v3026_v9 = vrot.slane %v4127_v61, 7  ;;  %v3028_v10 = vrot.slane %v4128_v62, 6 }
 0x125   : > { %4418 = vmatmul.mubr.msk.f32.gmra.mxu1 %vm512_vm8, %v3025_v5  ;;  %v3394_v15 = vsel %vm403_vm4, %v3393_v53, %v3392_v6  ;;  %v3030_v16 = vrot.slane %v4129_v24, 5  ;;  %v3032_v17 = vrot.slane %v4130_v3, 4  ;;  %v3034_v18 = vrot.slane %v4131_v4, 3  ;;  %v4200_v19 = vld [vmem:[%s4519_s26 + $0xfe] sm:$0x1]  ;;  %v5727_v6 = vpop.f32.mrf.mxu0 }
 0x126   : > { %v3396_v20 = vsel %vm406_vm5, %v3395_v54, %v3394_v15  ;;  %v3027_v21 = vsel %vm394_vm1, %v3026_v9, %v4126_v55  ;;  %v3036_v14 = vrot.slane %v4132_v7, 2  ;;  %v3038_v25 = vrot.slane %v4133_v8, 1  ;;  %v4201_v26 = vld [vmem:[%s4519_s26 + $0x100] sm:$0x1]  ;;  %v4202_v27 = vld [vmem:[%s4519_s26 + $0x102] sm:$0x1]  ;;  %v5729_v7 = vpop.f32.mrf.mxu1 }
 0x127   : > { %v3398_v28 = vsel %vm409_vm6, %v3397_v41, %v3396_v20  ;;  %v3029_v29 = vsel %vm397_vm2, %v3028_v10, %v3027_v21  ;;  %v4203_v30 = vld [vmem:[%s4519_s26 + $0x104] sm:$0x1]  ;;  %v4204_v31 = vld [vmem:[%s4519_s26 + $0x106] sm:$0x1]  ;;  %v4205_v32 = vld [vmem:[%s4519_s26 + $0x108] sm:$0x1] }
 0x128   : > { %v3400_v33 = vsel %vm412_vm7, %v3399_v58, %v3398_v28  ;;  %v3031_v34 = vsel %vm400_vm3, %v3030_v16, %v3029_v29  ;;  %v4206_v37 = vld [vmem:[%s4519_s26 + $0x10a] sm:$0x1]  ;;  %v4207_v39 = vld [vmem:[%s4519_s26 + $0x10c] sm:$0x1]  ;;  %v3401_v40 = vrot.slane %v4201_v26, 7  ;;  %v3403_v42 = vrot.slane %v4202_v27, 6 }
 0x129   : > { %4432 = vmatmul.mubr.msk.f32.gmra.mxu0 %vm512_vm8, %v3400_v33  ;;  %v3033_v44 = vsel %vm403_vm4, %v3032_v17, %v3031_v34  ;;  %v3405_v38 = vrot.slane %v4203_v30, 5  ;;  %v3407_v45 = vrot.slane %v4204_v31, 4  ;;  %v3409_v46 = vrot.slane %v4205_v32, 3  ;;  %v4134_v48 = vld [vmem:[%s4519_s26 + $0x121] sm:$0x1] }
 0x12a   : > { %v3035_v51 = vsel %vm406_vm5, %v3034_v18, %v3033_v44  ;;  %v3402_v2 = vsel %vm394_vm1, %v3401_v40, %v4200_v19  ;;  %v3411_v53 = vrot.slane %v4206_v37, 2  ;;  %v3413_v54 = vrot.slane %v4207_v39, 1  ;;  %v4135_v55 = vld [vmem:[%s4519_s26 + $0x123] sm:$0x1]  ;;  %v4136_v56 = vld [vmem:[%s4519_s26 + $0x125] sm:$0x1]  ;;  %v5746_v37 = vpop.f32.mrf.mxu0  ;;  %v5748_v39 = vpop.f32.mrf.mxu1 }
 0x12b   : > { %v3037_v57 = vsel %vm409_vm6, %v3036_v14, %v3035_v51  ;;  %v3404_v41 = vsel %vm397_vm2, %v3403_v42, %v3402_v2  ;;  %v4137_v58 = vld [vmem:[%s4519_s26 + $0x127] sm:$0x1]  ;;  %v4138_v61 = vld [vmem:[%s4519_s26 + $0x129] sm:$0x1]  ;;  %v4139_v62 = vld [vmem:[%s4519_s26 + $0x12b] sm:$0x1] }
 0x12c   : > { %v3039_v63 = vsel %vm412_vm7, %v3038_v25, %v3037_v57  ;;  %v3406_v0 = vsel %vm400_vm3, %v3405_v38, %v3404_v41  ;;  %v4140_v24 = vld [vmem:[%s4519_s26 + $0x12d] sm:$0x1]  ;;  %v4141_v3 = vld [vmem:[%s4519_s26 + $0x12f] sm:$0x1]  ;;  %v3040_v4 = vrot.slane %v4135_v55, 7  ;;  %v3042_v5 = vrot.slane %v4136_v56, 6  ;;  %v5759_v57 = vpop.f32.mrf.mxu0 }
 0x12d   : > { %4420 = vmatprep.mubr.msk.f32.mxu1 %vm512_vm8, %v3039_v63  ;;  %v3408_v8 = vsel %vm403_vm4, %v3407_v45, %v3406_v0  ;;  %v3044_v9 = vrot.slane %v4137_v58, 5  ;;  %v3046_v10 = vrot.slane %v4138_v61, 4  ;;  %v3048_v15 = vrot.slane %v4139_v62, 3  ;;  %v4208_v16 = vld [vmem:[%s4519_s26 + $0x122] sm:$0x1] }
 0x12e   : > { %v3410_v17 = vsel %vm406_vm5, %v3409_v46, %v3408_v8  ;;  %v3041_v18 = vsel %vm394_vm1, %v3040_v4, %v4134_v48  ;;  %v3050_v19 = vrot.slane %v4140_v24, 2  ;;  %v3052_v20 = vrot.slane %v4141_v3, 1  ;;  %v4209_v21 = vld [vmem:[%s4519_s26 + $0x124] sm:$0x1]  ;;  %v4210_v14 = vld [vmem:[%s4519_s26 + $0x126] sm:$0x1] }
 0x12f   : > { %v3412_v25 = vsel %vm409_vm6, %v3411_v53, %v3410_v17  ;;  %v3043_v26 = vsel %vm397_vm2, %v3042_v5, %v3041_v18  ;;  %v4211_v27 = vld [vmem:[%s4519_s26 + $0x128] sm:$0x1]  ;;  %v4212_v28 = vld [vmem:[%s4519_s26 + $0x12a] sm:$0x1]  ;;  %v4213_v29 = vld [vmem:[%s4519_s26 + $0x12c] sm:$0x1] }
 0x130   : > { %v3414_v30 = vsel %vm412_vm7, %v3413_v54, %v3412_v25  ;;  %v3045_v31 = vsel %vm400_vm3, %v3044_v9, %v3043_v26  ;;  %v4214_v32 = vld [vmem:[%s4519_s26 + $0x12e] sm:$0x1]  ;;  %v3415_v33 = vrot.slane %v4209_v21, 7  ;;  %v3417_v34 = vrot.slane %v4210_v14, 6  ;;  %v4215_v42 = vld [vmem:[%s4519_s26 + $0x130] sm:$0x1] }
 0x131   : > { %4434 = vmatprep.mubr.msk.f32.mxu0 %vm512_vm8, %v3414_v30  ;;  %v3047_v40 = vsel %vm403_vm4, %v3046_v10, %v3045_v31  ;;  %v3419_v44 = vrot.slane %v4211_v27, 5  ;;  %v3421_v38 = vrot.slane %v4212_v28, 4  ;;  %v3423_v48 = vrot.slane %v4213_v29, 3 }
 0x132   : > { %v3049_v45 = vsel %vm406_vm5, %v3048_v15, %v3047_v40  ;;  %v3416_v46 = vsel %vm394_vm1, %v3415_v33, %v4208_v16  ;;  %v3425_v53 = vrot.slane %v4214_v32, 2  ;;  %v3427_v56 = vrot.slane %v4215_v42, 1 }
 0x133   : > { %v3051_v51 = vsel %vm409_vm6, %v3050_v19, %v3049_v45  ;;  %v3418_v2 = vsel %vm397_vm2, %v3417_v34, %v3416_v46 }
 0x134   : > { %v3053_v54 = vsel %vm412_vm7, %v3052_v20, %v3051_v51  ;;  %v3420_v55 = vsel %vm400_vm3, %v3419_v44, %v3418_v2  ;;  %v4338_v41 = vpop.f32.mrf.mxu1 }
 0x135   : > { %4421 = vmatmul.mubr.msk.f32.gmra.mxu1 %vm512_vm8, %v3053_v54  ;;  %v3422_v58 = vsel %vm403_vm4, %v3421_v38, %v3420_v55  ;;  %v935_v61 = vadd.f32 %v4338_v41, %v5609_v36  ;;  %v4458_v36 = vmov 0.0   ;;  %v905_v38 = vadd.f32 %v5649_v23, %v5587_v11 }
 0x136   : > { %v3424_v62 = vsel %vm406_vm5, %v3423_v48, %v3422_v58  ;;  %v929_v63 = vpop.f32.mrf.mxu1  ;;  %3602 = vst.msk [vmem:[%s5777_s18 + $0x8] sm:$0x1] %vm3601_vm10, %v4458_v36  ;;  %3604 = vst.msk [vmem:[%s5777_s18 + $0x18] sm:$0x1] %vm3601_vm10, %v4458_v36  ;;  %v900_v48 = vadd.f32 %v5669_v50, %v5607_v35  ;;  %v915_v50 = vadd.f32 %v5689_v13, %v5627_v59 }
 0x137   : > { %v3426_v0 = vsel %vm409_vm6, %v3425_v53, %v3424_v62  ;;  %v930_v24 = vadd.f32 %v929_v63, %v5629_v60  ;;  %3603 = vst.msk [vmem:[%s5777_s18 + $0x10] sm:$0xff] %vm3599_vm9, %v4458_v36  ;;  %3617 = vst.msk [vmem:[%s5777_s18 + $0x80] sm:$0xff] %vm3599_vm9, %v4458_v36  ;;  %v1306_v51 = vadd.f32 %v5667_v49, %v905_v38 }
 0x138   : > { %v3428_v3 = vsel %vm412_vm7, %v3427_v56, %v3426_v0  ;;  %v4352_v4 = vpop.f32.mrf.mxu0  ;;  %3606 = vst.msk [vmem:[%s5777_s18 + $0x28] sm:$0x1] %vm3601_vm10, %v4458_v36  ;;  %3608 = vst.msk [vmem:[%s5777_s18 + $0x38] sm:$0x1] %vm3601_vm10, %v4458_v36  ;;  %v1305_v54 = vadd.f32 %v5687_v12, %v900_v48 }
 0x139   : > { %4435 = vmatmul.mubr.msk.f32.gmra.mxu0 %vm512_vm8, %v3428_v3  ;;  %v5769_v5 = vadd.f32 %v4352_v4, %v935_v61  ;;  %3610 = vst.msk [vmem:[%s5777_s18 + $0x48] sm:$0x1] %vm3601_vm10, %v4458_v36  ;;  %3612 = vst.msk [vmem:[%s5777_s18 + $0x58] sm:$0x1] %vm3601_vm10, %v4458_v36 }
 0x13a   : > { %v1296_v8 = vpop.f32.mrf.mxu0  ;;  %3614 = vst.msk [vmem:[%s5777_s18 + $0x68] sm:$0x1] %vm3601_vm10, %v4458_v36  ;;  %3616 = vst.msk [vmem:[%s5777_s18 + $0x78] sm:$0x1] %vm3601_vm10, %v4458_v36 }
 0x13b   : > { %v5771_v9 = vadd.f32 %v1296_v8, %v930_v24  ;;  %3618 = vst.msk [vmem:[%s5777_s18 + $0x88] sm:$0x1] %vm3601_vm10, %v4458_v36  ;;  %v910_v24 = vadd.f32 %v5709_v43, %v5647_v22  ;;  %v5858_v22 = vld [vmem:[%s5922_s3] ss:$0 sm:$0xff] }
 0x13c   : > { %3600 = vst.msk [vmem:[%s5777_s18] sm:$0xff] %vm3599_vm9, %v4458_v36  ;;  %3605 = vst.msk [vmem:[%s5777_s18 + $0x20] sm:$0xff] %vm3599_vm9, %v4458_v36 }
 0x13d   : > { %3607 = vst.msk [vmem:[%s5777_s18 + $0x30] sm:$0xff] %vm3599_vm9, %v4458_v36  ;;  %3609 = vst.msk [vmem:[%s5777_s18 + $0x40] sm:$0xff] %vm3599_vm9, %v4458_v36  ;;  %v1307_v59 = vadd.f32 %v5727_v6, %v910_v24 }
 0x13e   : > { %3611 = vst.msk [vmem:[%s5777_s18 + $0x50] sm:$0xff] %vm3599_vm9, %v4458_v36  ;;  %3613 = vst.msk [vmem:[%s5777_s18 + $0x60] sm:$0xff] %vm3599_vm9, %v4458_v36 }
 0x13f   : > { %3615 = vst.msk [vmem:[%s5777_s18 + $0x70] sm:$0xff] %vm3599_vm9, %v4458_v36  ;;  %v1308_v36 = vadd.f32 %v5707_v47, %v915_v50 }
 0x144   : > { %v4357_v60 = vpop.f32.mrf.mxu1 }
 0x145   : > { %v1681_v55 = vadd.f32 %v4357_v60, %v1306_v51 }
 0x146   : > { %v1641_v15 = vpop.f32.mrf.mxu1 }
 0x147   : > { %v1680_v56 = vadd.f32 %v1641_v15, %v1305_v54  ;;  %v5852_v15 = vld [vmem:[%s5921_s2] ss:$0 sm:$0xff] }
 0x148   : > { %v4371_v10 = vpop.f32.mrf.mxu0 }
 0x149   : > { %v2055_v11 = vadd.f32 %v4371_v10, %v1681_v55 }
 0x14a   : > { %v2015_v16 = vpop.f32.mrf.mxu0 }
 0x14b   : > { %v2054_v23 = vadd.f32 %v2015_v16, %v1680_v56 }
 0x154   : > { %v4360_v17 = vpop.f32.mrf.mxu1 }
 0x155   : > { %v1683_v13 = vadd.f32 %v4360_v17, %v1308_v36 }
 0x156   : > { %v1651_v19 = vpop.f32.mrf.mxu1 }
 0x157   : > { %v1682_v47 = vadd.f32 %v1651_v19, %v1307_v59  ;;  %v925_v19 = vadd.f32 %v5729_v7, %v5569_v52 }
 0x158   : > { %v4374_v18 = vpop.f32.mrf.mxu0 }
 0x15a   : > { %v2025_v20 = vpop.f32.mrf.mxu0 }
 0x15b   : > { %v2056_v6 = vadd.f32 %v2025_v20, %v1682_v47 }
 0x164   : > { %v5806_v21 = vpop.f32.mrf.mxu1 }
 0x166   : > { %v5810_v25 = vpop.f32.mrf.mxu1 }
 0x168   : > { %v5808_v14 = vpop.f32.mrf.mxu0 }
 0x16a   : > { %v5812_v26 = vpop.f32.mrf.mxu0 }
 0x174   : > { %v5814_v27 = vpop.f32.mrf.mxu1 }
 0x175   : > { %v1687_v59 = vadd.f32 %v5814_v27, %v5769_v5 }
 0x176   : > { %v5818_v29 = vpop.f32.mrf.mxu1 }
 0x178   : > { %v5816_v28 = vpop.f32.mrf.mxu0 }
 0x179   : > { %v2061_v47 = vadd.f32 %v5816_v28, %v1687_v59 }
 0x17a   : > { %v5820_v30 = vpop.f32.mrf.mxu0 }
 0x185   : > { %v4385_v31 = vpop.f32.mrf.mxu1 }
 0x186   : > { %v2430_v61 = vadd.f32 %v4385_v31, %v2055_v11  ;;  %v920_v11 = vadd.f32 %v5748_v39, %v5589_v1 }
 0x187   : > { %v2390_v33 = vpop.f32.mrf.mxu1 }
 0x188   : > { %v4399_v32 = vpop.f32.mrf.mxu0  ;;  %v2429_v49 = vadd.f32 %v2390_v33, %v2054_v23  ;;  %v2057_v33 = vadd.f32 %v4374_v18, %v1683_v13  ;;  %v1309_v50 = vadd.f32 %v5759_v57, %v920_v11 }
 0x189   : > { %v2805_v63 = vadd.f32 %v4399_v32, %v2430_v61  ;;  %v1310_v61 = vadd.f32 %v5746_v37, %v925_v19 }
 0x18a   : > { %v2765_v34 = vpop.f32.mrf.mxu0 }
 0x18b   : > { %v2804_v3 = vadd.f32 %v2765_v34, %v2429_v49 }
 0x195   : > { %v4388_v40 = vpop.f32.mrf.mxu1 }
 0x196   : > { %v2432_v48 = vadd.f32 %v4388_v40, %v2057_v33 }
 0x197   : > { %v2400_v44 = vpop.f32.mrf.mxu1 }
 0x198   : > { %v2431_v54 = vadd.f32 %v2400_v44, %v2056_v6 }
 0x199   : > { %v4402_v42 = vpop.f32.mrf.mxu0 }
 0x19a   : > { %v2807_v56 = vadd.f32 %v4402_v42, %v2432_v48  ;;  %v1684_v42 = vadd.f32 %v5810_v25, %v1309_v50 }
 0x19b   : > { %v2775_v45 = vpop.f32.mrf.mxu0 }
 0x19c   : > { %v2806_v23 = vadd.f32 %v2775_v45, %v2431_v54  ;;  %v2058_v24 = vadd.f32 %v5812_v26, %v1684_v42 }
 0x1a5   : > { %v5824_v46 = vpop.f32.mrf.mxu1 }
 0x1a7   : > { %v5831_v53 = vpop.f32.mrf.mxu1 }
 0x1a9   : > { %v5829_v2 = vpop.f32.mrf.mxu0 }
 0x1ab   : > { %v5834_v41 = vpop.f32.mrf.mxu0 }
 0x1b5   : > { %v5836_v58 = vpop.f32.mrf.mxu1 }
 0x1b6   : > { %v2436_v33 = vadd.f32 %v5836_v58, %v2061_v47 }
 0x1b7   : > { %v5840_v35 = vpop.f32.mrf.mxu1 }
 0x1b9   : > { %v5838_v62 = vpop.f32.mrf.mxu0 }
 0x1bb   : > { %v5844_v0 = vpop.f32.mrf.mxu0 }
 0x1c5   : > { %v4413_v12 = vpop.f32.mrf.mxu1 }
 0x1c6   : > { %v3179_v4 = vadd.f32 %v4413_v12, %v2805_v63  ;;  %v1685_v63 = vadd.f32 %v5806_v21, %v1310_v61 }
 0x1c7   : > { %v3139_v8 = vpop.f32.mrf.mxu1 }
 0x1c8   : > { %v3178_v60 = vadd.f32 %v3139_v8, %v2804_v3  ;;  %v2059_v39 = vadd.f32 %v5808_v14, %v1685_v63 }
 0x1c9   : > { %v4427_v10 = vpop.f32.mrf.mxu0 }
 0x1ca   : > { %v3554_v16 = vadd.f32 %v4427_v10, %v3179_v4  ;;  %v2434_v57 = vadd.f32 %v5824_v46, %v2059_v39  ;;  %v2433_v4 = vadd.f32 %v5831_v53, %v2058_v24 }
 0x1cb   : > { %v3514_v43 = vpop.f32.mrf.mxu0 }
 0x1cc   : > { %v3569_v31 = vmul.f32 %v5852_v15, %v3554_v16  ;;  %v3553_v32 = vadd.f32 %v3514_v43, %v3178_v60  ;;  %v2809_v8 = vadd.f32 %v5829_v2, %v2434_v57  ;;  %v2808_v36 = vadd.f32 %v5834_v41, %v2433_v4 }
 0x1cd   : > { %v1686_v16 = vadd.f32 %v5818_v29, %v5771_v9  ;;  %v2811_v29 = vadd.f32 %v5838_v62, %v2436_v33 }
 0x1ce   : > { %v3584_v34 = vadd.f32 %v5858_v22, %v3569_v31  ;;  %v3568_v38 = vmul.f32 %v5852_v15, %v3553_v32 }
 0x1cf   : > { %v2060_v32 = vadd.f32 %v5820_v30, %v1686_v16 }
 0x1d0   : > { %v3592_v17 = vmax.f32 %v3584_v34, 0.0  ;;  %v3583_v51 = vadd.f32 %v5858_v22, %v3568_v38 }
 0x1d1   : > { %v2435_v34 = vadd.f32 %v5840_v35, %v2060_v32 }
 0x1d2   : > { %3620 = vst.msk [vmem:[%s5777_s18 + $0x10] sm:$0xff] %vm3599_vm9, %v3592_v17  ;;  %v3591_v55 = vmax.f32 %v3583_v51, 0.0 }
 0x1d3   : > { %v2810_v38 = vadd.f32 %v5844_v0, %v2435_v34 }
 0x1d4   : > { %3619 = vst.msk [vmem:[%s5777_s18] sm:$0xff] %vm3599_vm9, %v3591_v55 }
 0x1d5   : > { %v4416_v18 = vpop.f32.mrf.mxu1 }
 0x1d6   : > { %v3181_v20 = vadd.f32 %v4416_v18, %v2807_v56 }
 0x1d7   : > { %v3149_v40 = vpop.f32.mrf.mxu1 }
 0x1d8   : > { %v3180_v49 = vadd.f32 %v3149_v40, %v2806_v23 }
 0x1d9   : > { %v4430_v44 = vpop.f32.mrf.mxu0 }
 0x1da   : > { %v3556_v52 = vadd.f32 %v4430_v44, %v3181_v20 }
 0x1db   : > { %v3524_v7 = vpop.f32.mrf.mxu0 }
 0x1dc   : > { %v3571_v12 = vmul.f32 %v5852_v15, %v3556_v52  ;;  %v3555_v1 = vadd.f32 %v3524_v7, %v3180_v49 }
 0x1de   : > { %v3586_v45 = vadd.f32 %v5858_v22, %v3571_v12  ;;  %v3570_v37 = vmul.f32 %v5852_v15, %v3555_v1 }
 0x1e0   : > { %v3594_v3 = vmax.f32 %v3586_v45, 0.0  ;;  %v3585_v21 = vadd.f32 %v5858_v22, %v3570_v37 }
 0x1e2   : > { %3622 = vst.msk [vmem:[%s5777_s18 + $0x30] sm:$0xff] %vm3599_vm9, %v3594_v3  ;;  %v3593_v25 = vmax.f32 %v3585_v21, 0.0 }
 0x1e4   : > { %3621 = vst.msk [vmem:[%s5777_s18 + $0x20] sm:$0xff] %vm3599_vm9, %v3593_v25 }
 0x1e5   : > { %v4419_v14 = vpop.f32.mrf.mxu1 }
 0x1e6   : > { %v3183_v60 = vadd.f32 %v4419_v14, %v2809_v8 }
 0x1e7   : > { %v3159_v10 = vpop.f32.mrf.mxu1 }
 0x1e8   : > { %v3182_v26 = vadd.f32 %v3159_v10, %v2808_v36 }
 0x1e9   : > { %v4433_v46 = vpop.f32.mrf.mxu0 }
 0x1ea   : > { %v3558_v13 = vadd.f32 %v4433_v46, %v3183_v60 }
 0x1eb   : > { %v3534_v53 = vpop.f32.mrf.mxu0 }
 0x1ec   : > { %v3573_v2 = vmul.f32 %v5852_v15, %v3558_v13  ;;  %v3557_v43 = vadd.f32 %v3534_v53, %v3182_v26 }
 0x1ee   : > { %v3588_v41 = vadd.f32 %v5858_v22, %v3573_v2  ;;  %v3572_v31 = vmul.f32 %v5852_v15, %v3557_v43 }
 0x1f0   : > { %v3596_v5 = vmax.f32 %v3588_v41, 0.0  ;;  %v3587_v27 = vadd.f32 %v5858_v22, %v3572_v31 }
 0x1f2   : > { %3624 = vst.msk [vmem:[%s5777_s18 + $0x50] sm:$0xff] %vm3599_vm9, %v3596_v5  ;;  %v3595_v9 = vmax.f32 %v3587_v27, 0.0 }
 0x1f4   : > { %3623 = vst.msk [vmem:[%s5777_s18 + $0x40] sm:$0xff] %vm3599_vm9, %v3595_v9 }
 0x1f5   : > { %v4422_v28 = vpop.f32.mrf.mxu1 }
 0x1f6   : > { %v3185_v30 = vadd.f32 %v4422_v28, %v2811_v29 }
 0x1f7   : > { %v3169_v6 = vpop.f32.mrf.mxu1 }
 0x1f8   : > { %v3184_v58 = vadd.f32 %v3169_v6, %v2810_v38 }
 0x1f9   : > { %v4436_v48 = vpop.f32.mrf.mxu0 }
 0x1fa   : > { %v3560_v17 = vadd.f32 %v4436_v48, %v3185_v30 }
 0x1fb   : > { %v3544_v51 = vpop.f32.mrf.mxu0 }
 0x1fc   : > { %v3575_v35 = vmul.f32 %v5852_v15, %v3560_v17  ;;  %v3559_v54 = vadd.f32 %v3544_v51, %v3184_v58 }
 0x1fe   : > { %v3590_v55 = vadd.f32 %v5858_v22, %v3575_v35  ;;  %v3574_v62 = vmul.f32 %v5852_v15, %v3559_v54 }
 0x200   : > { %v3598_v19 = vmax.f32 %v3590_v55, 0.0  ;;  %v3589_v56 = vadd.f32 %v5858_v22, %v3574_v62 }
 0x202   : > { %3626 = vst.msk [vmem:[%s5777_s18 + $0x70] sm:$0xff] %vm3599_vm9, %v3598_v19  ;;  %v3597_v18 = vmax.f32 %v3589_v56, 0.0 }
 0x204   : > { %3625 = vst.msk [vmem:[%s5777_s18 + $0x60] sm:$0xff] %vm3599_vm9, %v3597_v18 }
 0x205 PF: > { %s14_s15 = sadd.s32 1, %s4456_s15  }
 0x206   : > { %p11_p4 = scmp.ge.s32.totalorder %s14_s15, 4  }
 0x208   :  { %13 = sbr.rel (!%p11_p4) target bundleno = 1 (0x1), region = 79 }

// kernel: hgstem_pallas.7
= control target key start
LH: loop header
LB: loop body
LE: loop exit
PB: predicated region body
PF: predicated region fallthrough
CT: control target
= control target key end

     0   :  { %14 = vsyncpa [#allocation3], 0  ;;  %s4738_s0 = inlined_call_operand.vmem [shape: f32[2,5,2,5,2,16], index: 0, kind: input, shape index: {}]   ;;  %s4739_s1 = inlined_call_operand.vmem [shape: f32[2,5,2,5,2,16], index: 1, kind: input, shape index: {}]   ;;  %s4740_s2 = inlined_call_operand.vmem [shape: f32[9,16,16], index: 2, kind: input, shape index: {}]   ;;  %s4741_s3 = inlined_call_operand.vmem [shape: f32[9,16,16], index: 3, kind: input, shape index: {}]   ;;  %s4742_s4 = inlined_call_operand.vmem [shape: f32[1,16], index: 4, kind: input, shape index: {}]   ;;  %s4743_s5 = inlined_call_operand.vmem [shape: f32[1,16], index: 5, kind: input, shape index: {}]   ;;  %s4744_s6 = inlined_call_operand.vmem [shape: f32[16,32], index: 6, kind: input, shape index: {}]   ;;  %s4745_s7 = inlined_call_operand.vmem [shape: f32[1,32], index: 7, kind: input, shape index: {}]   ;;  %s4746_s8 = inlined_call_operand.vmem [shape: f32[1,32], index: 8, kind: input, shape index: {}]   ;;  %s4747_s9 = inlined_call_operand.hbm [shape: f32[2,4,4,32], index: 9, kind: output, shape index: {}]  }
   0x1   :  { %16 = vsyncpa [#allocation3 + $0x1], 0  ;;  %s3854_s30 = smov 0   ;;  %s3856_s10 = smov 0  }
   0x2   :  { %s3858_s11 = smov 0   ;;  %s3860_s12 = smov 0  }
   0x3 LB: > { %s3875_s13 = sadd.s32 4294967295, %s3799_s12   ;;  %s3177_s14 = sadd.s32 4294967294, %s3799_s12   ;;  %s3799_s12 = sphi %s3860_s12, %s4753_s12   ;;  %s3795_s11 = sphi %s3858_s11, %s4752_s11   ;;  %s3791_s10 = sphi %s3856_s10, %s4751_s10   ;;  %s3787_s30 = sphi %s3854_s30, %s4750_s30  }
   0x4   : > { %s3879_s15 = sadd.s32 1, %s3799_s12   ;;  %s228_s16 = sadd.s32 1, %s3795_s11 }
   0x5   : > { %s225_s17 = ssub.s32 %s3799_s12, %s3879_s15  ;;  %p238_p0 = scmp.ne.s32.totalorder %s3795_s11, %s3791_s10 }
   0x6   : > { %p226_p1 = scmp.eq.s32.totalorder %s225_s17, 0  ;;  %p239_p2 = scmp.eq.s32.totalorder %s3875_s13, 1 }
   0x7   : > { %p244_p3 = scmp.ne.s32.totalorder %s3791_s10, %s3787_s30  ;;  %p245_p4 = scmp.eq.s32.totalorder %s3177_s14, 1 }
   0x8   : > { %s3890_s18 = scalar_select %p226_p1, %s3795_s11, %s228_s16  }
   0x9   : > { %p3892_p5 = por %p239_p2, %p238_p0  ;;  %p3896_p6 = por %p245_p4, %p244_p3 }
   0xa   : > { %p3180_p7 = scmp.ge.s32.totalorder %s3799_s12, 1  ;;  %p300_p8 = scmp.lt.s32.totalorder %s3799_s12, 3 }
   0xc   : > { %p301_p9 = pnand %p3180_p7, %p300_p8 }
   0xd   : > { %p341_p10 = scmp.lt.s32.totalorder (!%p301_p9), %s3875_s13, 1  ;;  %s338_s23 = sand.u32 (!%p301_p9), 1, %s3791_s10  }
   0xe   : > { %304 = sbr.rel (%p301_p9) target bundleno = 597 (0x255), region = 56  ;;  %s3487_s28 = sshll.u32 (!%p301_p9), %s3875_s13, 8 }
   0xf   : > { %s4694_s21 = scalar_lea.hbm (!%p301_p9), %s4747_s9, %s3487_s28  ;;  %s3801_s26 = smov (!%p301_p9), [#allocation2]  }
  0x13   : > { %v3185_v0 = vld [vmem:[%s4740_s2 + $0x18] sm:$0xff]  ;;  %v368_v1 = vld [vmem:[%s4740_s2 + $0x8] sm:$0xff]  ;;  %v3184_v2 = vld [vmem:[%s4740_s2 + $0x10] sm:$0xff]  ;;  %s3916_s29 = scalar_select %p341_p10, %s3875_s13, 1  ;;  %vm405_vm0 = vcmask 1041409   ;;  %vm408_vm1 = vcmask 1042434  }
  0x14   : > { %3564 = vmatprep.subr.mxu0 %v3185_v0  ;;  %3571 = vmatprep.subr.mxu1 %v368_v1  ;;  %v367_v3 = vld [vmem:[%s4740_s2] sm:$0xff]  ;;  %v3921_v4 = vld [vmem:[%s4740_s2 + $0x28] sm:$0xff]  ;;  %v3926_v5 = vld [vmem:[%s4740_s2 + $0x38] sm:$0xff]  ;;  %vm411_vm2 = vcmask 1043459   ;;  %vm414_vm3 = vcmask 1044484   ;;  %vm417_vm4 = vcmask 1045509  }
  0x15   : > { %3565 = vmatpush3.msra.mxu0 %v3185_v0  ;;  %3572 = vmatpush3.msra.mxu1 %v368_v1  ;;  %s3697_s22 = smul.u32 100, %s3916_s29  ;;  %vm420_vm5 = vcmask 1046534   ;;  %vm423_vm6 = vcmask 1047559   ;;  %vm439_vm7 = vcmask 130048   ;;  %vm3084_vm8 = vcmask 257024   ;;  %s4698_s13 = scalar_lea.sflag [#allocation3], %s338_s23 }
  0x16   : > { %3566 = vmatprep.subr.mxu0 %v3184_v2  ;;  %3573 = vmatprep.subr.mxu1 %v367_v3  ;;  %s3743_s29 = sshll.u32 %s3801_s26, 4  ;;  %s3744_s29 = int_to_ptr.vmem [resolvable:$false] %s3743_s29 }
  0x17   : > { %3567 = vmatpush3.msra.mxu0 %v3184_v2  ;;  %3574 = vmatpush3.msra.mxu1 %v367_v3  ;;  %s3936_s25 = scalar_lea.vmem %s4738_s0, %s3697_s22  ;;  %s4260_s27 = scalar_lea.vmem %s4739_s1, %s3697_s22 }
  0x18   : > { %3578 = vmatprep.subr.mxu0 %v3921_v4  ;;  %3585 = vmatprep.subr.mxu1 %v3926_v5  ;;  %v369_v6 = vld [vmem:[%s3936_s25 + $0x1] sm:$0x1]  ;;  %v370_v7 = vld [vmem:[%s3936_s25 + $0x3] sm:$0x1]  ;;  %v371_v8 = vld [vmem:[%s3936_s25 + $0x5] sm:$0x1] }
  0x19   : > { %v372_v9 = vld [vmem:[%s3936_s25 + $0x7] sm:$0x1]  ;;  %v373_v10 = vld [vmem:[%s3936_s25 + $0x15] sm:$0x1]  ;;  %v374_v11 = vld [vmem:[%s3936_s25 + $0x17] sm:$0x1] }
  0x1a   : > { %v375_v12 = vld [vmem:[%s3936_s25 + $0x19] sm:$0x1]  ;;  %v376_v13 = vld [vmem:[%s3936_s25 + $0x1b] sm:$0x1]  ;;  %v404_v14 = vrot.slane %v370_v7, 7  ;;  %v407_v15 = vrot.slane %v371_v8, 6 }
  0x1b   : > { %v410_v16 = vrot.slane %v372_v9, 5  ;;  %v413_v17 = vrot.slane %v373_v10, 4  ;;  %v416_v18 = vrot.slane %v374_v11, 3  ;;  %v351_v19 = vld [vmem:[%s3936_s25] sm:$0x1]  ;;  %v419_v21 = vrot.slane %v375_v12, 2 }
  0x1c   : > { %v406_v20 = vsel %vm405_vm0, %v404_v14, %v369_v6  ;;  %v422_v22 = vrot.slane %v376_v13, 1  ;;  %v352_v23 = vld [vmem:[%s3936_s25 + $0x2] sm:$0x1]  ;;  %v353_v24 = vld [vmem:[%s3936_s25 + $0x4] sm:$0x1]  ;;  %s3181_s22 = sshll.u32 %s338_s23, 4 }
  0x1d   : > { %v409_v25 = vsel %vm408_vm1, %v407_v15, %v406_v20  ;;  %v354_v26 = vld [vmem:[%s3936_s25 + $0x6] sm:$0x1]  ;;  %v355_v27 = vld [vmem:[%s3936_s25 + $0x14] sm:$0x1]  ;;  %v356_v28 = vld [vmem:[%s3936_s25 + $0x16] sm:$0x1] }
  0x1e   : > { %v412_v29 = vsel %vm411_vm2, %v410_v16, %v409_v25  ;;  %v357_v30 = vld [vmem:[%s3936_s25 + $0x18] sm:$0x1]  ;;  %v358_v31 = vld [vmem:[%s3936_s25 + $0x1a] sm:$0x1]  ;;  %v535_v32 = vrot.slane %v352_v23, 7  ;;  %v537_v33 = vrot.slane %v353_v24, 6 }
  0x1f   : > { %v415_v34 = vsel %vm414_vm3, %v413_v17, %v412_v29  ;;  %v539_v35 = vrot.slane %v354_v26, 5  ;;  %v541_v36 = vrot.slane %v355_v27, 4  ;;  %v543_v37 = vrot.slane %v356_v28, 3  ;;  %v377_v38 = vld [vmem:[%s3936_s25 + $0x29] sm:$0x1]  ;;  %v3206_v25 = vld [vmem:[%s4740_s2 + $0x20] sm:$0xff] }
  0x20   : > { %v418_v39 = vsel %vm417_vm4, %v416_v18, %v415_v34  ;;  %v536_v40 = vsel %vm405_vm0, %v535_v32, %v351_v19  ;;  %v545_v41 = vrot.slane %v357_v30, 2  ;;  %v547_v42 = vrot.slane %v358_v31, 1  ;;  %v378_v43 = vld [vmem:[%s3936_s25 + $0x2b] sm:$0x1]  ;;  %v379_v44 = vld [vmem:[%s3936_s25 + $0x2d] sm:$0x1] }
  0x21   : > { %v421_v45 = vsel %vm420_vm5, %v419_v21, %v418_v39  ;;  %v538_v46 = vsel %vm408_vm1, %v537_v33, %v536_v40  ;;  %v380_v47 = vld [vmem:[%s3936_s25 + $0x2f] sm:$0x1]  ;;  %v381_v48 = vld [vmem:[%s3936_s25 + $0x3d] sm:$0x1]  ;;  %v382_v49 = vld [vmem:[%s3936_s25 + $0x3f] sm:$0x1] }
  0x22   : > { %v424_v50 = vsel %vm423_vm6, %v422_v22, %v421_v45  ;;  %v540_v51 = vsel %vm411_vm2, %v539_v35, %v538_v46  ;;  %v383_v52 = vld [vmem:[%s3936_s25 + $0x41] sm:$0x1]  ;;  %v384_v53 = vld [vmem:[%s3936_s25 + $0x43] sm:$0x1]  ;;  %v425_v54 = vrot.slane %v378_v43, 7  ;;  %v427_v55 = vrot.slane %v379_v44, 6 }
  0x23   : > { %3568 = vmatprep.mubr.msk.f32.mxu0 %vm439_vm7, %v424_v50  ;;  %v542_v56 = vsel %vm414_vm3, %v541_v36, %v540_v51  ;;  %v429_v57 = vrot.slane %v380_v47, 5  ;;  %v431_v58 = vrot.slane %v381_v48, 4  ;;  %v433_v59 = vrot.slane %v382_v49, 3  ;;  %v359_v60 = vld [vmem:[%s3936_s25 + $0x28] sm:$0x1]  ;;  %v3226_v46 = vld [vmem:[%s4740_s2 + $0x30] sm:$0xff] }
  0x24   : > { %v544_v61 = vsel %vm417_vm4, %v543_v37, %v542_v56  ;;  %v426_v62 = vsel %vm405_vm0, %v425_v54, %v377_v38  ;;  %v435_v63 = vrot.slane %v383_v52, 2  ;;  %v437_v0 = vrot.slane %v384_v53, 1  ;;  %v360_v1 = vld [vmem:[%s3936_s25 + $0x2a] sm:$0x1]  ;;  %v361_v2 = vld [vmem:[%s3936_s25 + $0x2c] sm:$0x1] }
  0x25   : > { %v546_v3 = vsel %vm420_vm5, %v545_v41, %v544_v61  ;;  %v428_v6 = vsel %vm408_vm1, %v427_v55, %v426_v62  ;;  %v362_v7 = vld [vmem:[%s3936_s25 + $0x2e] sm:$0x1]  ;;  %v363_v8 = vld [vmem:[%s3936_s25 + $0x3c] sm:$0x1]  ;;  %v364_v9 = vld [vmem:[%s3936_s25 + $0x3e] sm:$0x1] }
  0x26   : > { %v548_v10 = vsel %vm423_vm6, %v547_v42, %v546_v3  ;;  %v430_v11 = vsel %vm411_vm2, %v429_v57, %v428_v6  ;;  %v365_v12 = vld [vmem:[%s3936_s25 + $0x40] sm:$0x1]  ;;  %v366_v13 = vld [vmem:[%s3936_s25 + $0x42] sm:$0x1]  ;;  %v549_v14 = vrot.slane %v360_v1, 7  ;;  %v551_v15 = vrot.slane %v361_v2, 6 }
  0x27   : > { %3575 = vmatprep.mubr.msk.f32.mxu1 %vm439_vm7, %v548_v10  ;;  %v432_v16 = vsel %vm414_vm3, %v431_v58, %v430_v11  ;;  %v553_v17 = vrot.slane %v362_v7, 5  ;;  %v555_v18 = vrot.slane %v363_v8, 4  ;;  %v557_v19 = vrot.slane %v364_v9, 3  ;;  %v3190_v20 = vld [vmem:[%s3936_s25 + $0x2] sm:$0x1]  ;;  %v4013_v44 = vld [vmem:[%s4740_s2 + $0x48] sm:$0xff] }
  0x28   : > { %v434_v21 = vsel %vm417_vm4, %v433_v59, %v432_v16  ;;  %v550_v22 = vsel %vm405_vm0, %v549_v14, %v359_v60  ;;  %v559_v23 = vrot.slane %v365_v12, 2  ;;  %v561_v24 = vrot.slane %v366_v13, 1  ;;  %v3191_v26 = vld [vmem:[%s3936_s25 + $0x4] sm:$0x1]  ;;  %v3192_v27 = vld [vmem:[%s3936_s25 + $0x6] sm:$0x1] }
  0x29   : > { %v436_v28 = vsel %vm420_vm5, %v435_v63, %v434_v21  ;;  %v552_v29 = vsel %vm408_vm1, %v551_v15, %v550_v22  ;;  %v3193_v30 = vld [vmem:[%s3936_s25 + $0x8] sm:$0x1]  ;;  %v3194_v31 = vld [vmem:[%s3936_s25 + $0x16] sm:$0x1]  ;;  %v3195_v32 = vld [vmem:[%s3936_s25 + $0x18] sm:$0x1] }
  0x2a   : > { %v438_v33 = vsel %vm423_vm6, %v437_v0, %v436_v28  ;;  %v554_v34 = vsel %vm411_vm2, %v553_v17, %v552_v29  ;;  %v3196_v35 = vld [vmem:[%s3936_s25 + $0x1a] sm:$0x1]  ;;  %v3197_v36 = vld [vmem:[%s3936_s25 + $0x1c] sm:$0x1]  ;;  %v678_v37 = vrot.slane %v3191_v26, 7  ;;  %v680_v38 = vrot.slane %v3192_v27, 6 }
  0x2b   : > { %3569 = vmatmul.mubr.msk.f32.vlgmr.msra.gmra.mxu0 %vm439_vm7, %v438_v33  ;;  %v556_v39 = vsel %vm414_vm3, %v555_v18, %v554_v34  ;;  %v682_v40 = vrot.slane %v3193_v30, 5  ;;  %v684_v41 = vrot.slane %v3194_v31, 4  ;;  %v686_v42 = vrot.slane %v3195_v32, 3  ;;  %v3210_v43 = vld [vmem:[%s3936_s25 + $0xa] sm:$0x1]  ;;  %v4039_v3 = vld [vmem:[%s4740_s2 + $0x58] sm:$0xff] }
  0x2c   : > { %v558_v45 = vsel %vm417_vm4, %v557_v19, %v556_v39  ;;  %3579 = vmatpush3.msra.mxu0 %v3921_v4  ;;  %v679_v47 = vsel %vm405_vm0, %v678_v37, %v3190_v20  ;;  %v688_v48 = vrot.slane %v3196_v35, 2  ;;  %v690_v49 = vrot.slane %v3197_v36, 1  ;;  %v3211_v50 = vld [vmem:[%s3936_s25 + $0xc] sm:$0x1]  ;;  %v3212_v51 = vld [vmem:[%s3936_s25 + $0xe] sm:$0x1] }
  0x2d   : > { %v560_v52 = vsel %vm420_vm5, %v559_v23, %v558_v45  ;;  %3580 = vmatprep.subr.mxu0 %v3206_v25  ;;  %v681_v53 = vsel %vm408_vm1, %v680_v38, %v679_v47  ;;  %v3213_v54 = vld [vmem:[%s3936_s25 + $0x10] sm:$0x1]  ;;  %v3214_v4 = vld [vmem:[%s3936_s25 + $0x1e] sm:$0x1]  ;;  %v3215_v55 = vld [vmem:[%s3936_s25 + $0x20] sm:$0x1] }
  0x2e   : > { %v562_v56 = vsel %vm423_vm6, %v561_v24, %v560_v52  ;;  %3581 = vmatpush3.msra.mxu0 %v3206_v25  ;;  %v683_v57 = vsel %vm411_vm2, %v682_v40, %v681_v53  ;;  %v3216_v58 = vld [vmem:[%s3936_s25 + $0x22] sm:$0x1]  ;;  %v3217_v59 = vld [vmem:[%s3936_s25 + $0x24] sm:$0x1]  ;;  %v823_v60 = vrot.slane %v3211_v50, 7  ;;  %v825_v61 = vrot.slane %v3212_v51, 6 }
  0x2f   : > { %3576 = vmatmul.mubr.msk.f32.vlgmr.msra.gmra.mxu1 %vm439_vm7, %v562_v56  ;;  %v685_v62 = vsel %vm414_vm3, %v684_v41, %v683_v57  ;;  %v827_v63 = vrot.slane %v3213_v54, 5  ;;  %v829_v0 = vrot.slane %v3214_v4, 4  ;;  %v831_v1 = vrot.slane %v3215_v55, 3  ;;  %3592 = vmatprep.subr.mxu0 %v4013_v44  ;;  %v3198_v2 = vld [vmem:[%s3936_s25 + $0x2a] sm:$0x1]  ;;  %v3246_v54 = vld [vmem:[%s4740_s2 + $0x40] sm:$0xff] }
  0x30   : > { %3586 = vmatpush3.msra.mxu1 %v3926_v5  ;;  %v687_v6 = vsel %vm417_vm4, %v686_v42, %v685_v62  ;;  %v824_v7 = vsel %vm405_vm0, %v823_v60, %v3210_v43  ;;  %v833_v8 = vrot.slane %v3216_v58, 2  ;;  %v835_v9 = vrot.slane %v3217_v59, 1  ;;  %v3199_v10 = vld [vmem:[%s3936_s25 + $0x2c] sm:$0x1]  ;;  %v3200_v11 = vld [vmem:[%s3936_s25 + $0x2e] sm:$0x1] }
  0x31   : > { %3587 = vmatprep.subr.mxu1 %v3226_v46  ;;  %v689_v12 = vsel %vm420_vm5, %v688_v48, %v687_v6  ;;  %v826_v13 = vsel %vm408_vm1, %v825_v61, %v824_v7  ;;  %v3201_v14 = vld [vmem:[%s3936_s25 + $0x30] sm:$0x1]  ;;  %v3202_v15 = vld [vmem:[%s3936_s25 + $0x3e] sm:$0x1]  ;;  %v3203_v16 = vld [vmem:[%s3936_s25 + $0x40] sm:$0x1] }
  0x32   : > { %v691_v5 = vsel %vm423_vm6, %v690_v49, %v689_v12  ;;  %3588 = vmatpush3.msra.mxu1 %v3226_v46  ;;  %v828_v17 = vsel %vm411_vm2, %v827_v63, %v826_v13  ;;  %v3204_v18 = vld [vmem:[%s3936_s25 + $0x42] sm:$0x1]  ;;  %v3205_v19 = vld [vmem:[%s3936_s25 + $0x44] sm:$0x1]  ;;  %v692_v20 = vrot.slane %v3199_v10, 7  ;;  %v694_v21 = vrot.slane %v3200_v11, 6 }
  0x33   : > { %3582 = vmatprep.mubr.msk.f32.mxu0 %vm439_vm7, %v691_v5  ;;  %v830_v22 = vsel %vm414_vm3, %v829_v0, %v828_v17  ;;  %v696_v23 = vrot.slane %v3201_v14, 5  ;;  %v698_v24 = vrot.slane %v3202_v15, 4  ;;  %v700_v25 = vrot.slane %v3203_v16, 3  ;;  %v3218_v26 = vld [vmem:[%s3936_s25 + $0x32] sm:$0x1]  ;;  %3599 = vmatprep.subr.mxu1 %v4039_v3  ;;  %v4097_v11 = vld [vmem:[%s4740_s2 + $0x68] sm:$0xff] }
  0x34   : > { %v832_v27 = vsel %vm417_vm4, %v831_v1, %v830_v22  ;;  %v693_v28 = vsel %vm405_vm0, %v692_v20, %v3198_v2  ;;  %v702_v29 = vrot.slane %v3204_v18, 2  ;;  %v704_v30 = vrot.slane %v3205_v19, 1  ;;  %v3219_v31 = vld [vmem:[%s3936_s25 + $0x34] sm:$0x1]  ;;  %v3220_v32 = vld [vmem:[%s3936_s25 + $0x36] sm:$0x1] }
  0x35   : > { %v834_v33 = vsel %vm420_vm5, %v833_v8, %v832_v27  ;;  %v695_v34 = vsel %vm408_vm1, %v694_v21, %v693_v28  ;;  %v3221_v35 = vld [vmem:[%s3936_s25 + $0x38] sm:$0x1]  ;;  %v3222_v36 = vld [vmem:[%s3936_s25 + $0x46] sm:$0x1]  ;;  %v3223_v37 = vld [vmem:[%s3936_s25 + $0x48] sm:$0x1] }
  0x36   : > { %v836_v38 = vsel %vm423_vm6, %v835_v9, %v834_v33  ;;  %v697_v39 = vsel %vm411_vm2, %v696_v23, %v695_v34  ;;  %v3224_v40 = vld [vmem:[%s3936_s25 + $0x4a] sm:$0x1]  ;;  %v3225_v41 = vld [vmem:[%s3936_s25 + $0x4c] sm:$0x1]  ;;  %v837_v42 = vrot.slane %v3219_v31, 7  ;;  %v839_v43 = vrot.slane %v3220_v32, 6 }
  0x37   : > { %3589 = vmatprep.mubr.msk.f32.mxu1 %vm439_vm7, %v836_v38  ;;  %v699_v45 = vsel %vm414_vm3, %v698_v24, %v697_v39  ;;  %v841_v46 = vrot.slane %v3221_v35, 5  ;;  %v843_v47 = vrot.slane %v3222_v36, 4  ;;  %v845_v48 = vrot.slane %v3223_v37, 3  ;;  %v3230_v49 = vld [vmem:[%s3936_s25 + $0xb] sm:$0x1]  ;;  %v3266_v13 = vld [vmem:[%s4740_s2 + $0x50] sm:$0xff] }
  0x38   : > { %v701_v50 = vsel %vm417_vm4, %v700_v25, %v699_v45  ;;  %v838_v51 = vsel %vm405_vm0, %v837_v42, %v3218_v26  ;;  %v847_v52 = vrot.slane %v3224_v40, 2  ;;  %v849_v53 = vrot.slane %v3225_v41, 1  ;;  %v3231_v4 = vld [vmem:[%s3936_s25 + $0xd] sm:$0x1]  ;;  %v3232_v55 = vld [vmem:[%s3936_s25 + $0xf] sm:$0x1] }
  0x39   : > { %v703_v56 = vsel %vm420_vm5, %v702_v29, %v701_v50  ;;  %v840_v57 = vsel %vm408_vm1, %v839_v43, %v838_v51  ;;  %v3233_v58 = vld [vmem:[%s3936_s25 + $0x11] sm:$0x1]  ;;  %v3234_v59 = vld [vmem:[%s3936_s25 + $0x1f] sm:$0x1]  ;;  %v3235_v60 = vld [vmem:[%s3936_s25 + $0x21] sm:$0x1] }
  0x3a   : > { %v705_v61 = vsel %vm423_vm6, %v704_v30, %v703_v56  ;;  %v842_v62 = vsel %vm411_vm2, %v841_v46, %v840_v57  ;;  %v3236_v63 = vld [vmem:[%s3936_s25 + $0x23] sm:$0x1]  ;;  %v3237_v0 = vld [vmem:[%s3936_s25 + $0x25] sm:$0x1]  ;;  %v967_v1 = vrot.slane %v3231_v4, 7  ;;  %v969_v2 = vrot.slane %v3232_v55, 6 }
  0x3b   : > { %3583 = vmatmul.mubr.msk.f32.vlgmr.msra.gmra.mxu0 %vm439_vm7, %v705_v61  ;;  %v844_v6 = vsel %vm414_vm3, %v843_v47, %v842_v62  ;;  %v971_v7 = vrot.slane %v3233_v58, 5  ;;  %v973_v8 = vrot.slane %v3234_v59, 4  ;;  %v975_v9 = vrot.slane %v3235_v60, 3  ;;  %v3250_v10 = vld [vmem:[%s3936_s25 + $0xc] sm:$0x1]  ;;  %v4123_v33 = vld [vmem:[%s4740_s2 + $0x78] sm:$0xff] }
  0x3c   : > { %v846_v12 = vsel %vm417_vm4, %v845_v48, %v844_v6  ;;  %3593 = vmatpush3.msra.mxu0 %v4013_v44  ;;  %v968_v14 = vsel %vm405_vm0, %v967_v1, %v3230_v49  ;;  %v977_v15 = vrot.slane %v3236_v63, 2  ;;  %v979_v16 = vrot.slane %v3237_v0, 1  ;;  %v3251_v5 = vld [vmem:[%s3936_s25 + $0xe] sm:$0x1]  ;;  %v3252_v17 = vld [vmem:[%s3936_s25 + $0x10] sm:$0x1] }
  0x3d   : > { %v848_v18 = vsel %vm420_vm5, %v847_v52, %v846_v12  ;;  %3594 = vmatprep.subr.mxu0 %v3246_v54  ;;  %v970_v19 = vsel %vm408_vm1, %v969_v2, %v968_v14  ;;  %v3253_v20 = vld [vmem:[%s3936_s25 + $0x12] sm:$0x1]  ;;  %v3254_v44 = vld [vmem:[%s3936_s25 + $0x20] sm:$0x1]  ;;  %v3255_v21 = vld [vmem:[%s3936_s25 + $0x22] sm:$0x1] }
  0x3e   : > { %v850_v22 = vsel %vm423_vm6, %v849_v53, %v848_v18  ;;  %3595 = vmatpush3.msra.mxu0 %v3246_v54  ;;  %v972_v23 = vsel %vm411_vm2, %v971_v7, %v970_v19  ;;  %v3256_v24 = vld [vmem:[%s3936_s25 + $0x24] sm:$0x1]  ;;  %v3257_v25 = vld [vmem:[%s3936_s25 + $0x26] sm:$0x1]  ;;  %v1112_v26 = vrot.slane %v3251_v5, 7  ;;  %v1114_v27 = vrot.slane %v3252_v17, 6 }
  0x3f   : > { %3590 = vmatmul.mubr.msk.f32.vlgmr.msra.gmra.mxu1 %vm439_vm7, %v850_v22  ;;  %v974_v28 = vsel %vm414_vm3, %v973_v8, %v972_v23  ;;  %v1116_v29 = vrot.slane %v3253_v20, 5  ;;  %v1118_v30 = vrot.slane %v3254_v44, 4  ;;  %v1120_v31 = vrot.slane %v3255_v21, 3  ;;  %3606 = vmatprep.subr.mxu0 %v4097_v11  ;;  %v3238_v32 = vld [vmem:[%s3936_s25 + $0x33] sm:$0x1]  ;;  %v3286_v20 = vld [vmem:[%s4740_s2 + $0x60] sm:$0xff] }
  0x40   : > { %3600 = vmatpush3.msra.mxu1 %v4039_v3  ;;  %v976_v34 = vsel %vm417_vm4, %v975_v9, %v974_v28  ;;  %v1113_v35 = vsel %vm405_vm0, %v1112_v26, %v3250_v10  ;;  %v1122_v36 = vrot.slane %v3256_v24, 2  ;;  %v1124_v37 = vrot.slane %v3257_v25, 1  ;;  %v3239_v38 = vld [vmem:[%s3936_s25 + $0x35] sm:$0x1]  ;;  %v3240_v39 = vld [vmem:[%s3936_s25 + $0x37] sm:$0x1] }
  0x41   : > { %3601 = vmatprep.subr.mxu1 %v3266_v13  ;;  %v978_v40 = vsel %vm420_vm5, %v977_v15, %v976_v34  ;;  %v1115_v41 = vsel %vm408_vm1, %v1114_v27, %v1113_v35  ;;  %v3241_v42 = vld [vmem:[%s3936_s25 + $0x39] sm:$0x1]  ;;  %v3242_v43 = vld [vmem:[%s3936_s25 + $0x47] sm:$0x1]  ;;  %v3243_v45 = vld [vmem:[%s3936_s25 + $0x49] sm:$0x1] }
  0x42   : > { %v980_v3 = vsel %vm423_vm6, %v979_v16, %v978_v40  ;;  %3602 = vmatpush3.msra.mxu1 %v3266_v13  ;;  %v1117_v46 = vsel %vm411_vm2, %v1116_v29, %v1115_v41  ;;  %v3244_v47 = vld [vmem:[%s3936_s25 + $0x4b] sm:$0x1]  ;;  %v3245_v48 = vld [vmem:[%s3936_s25 + $0x4d] sm:$0x1]  ;;  %v981_v49 = vrot.slane %v3239_v38, 7  ;;  %v983_v50 = vrot.slane %v3240_v39, 6 }
  0x43   : > { %3596 = vmatprep.mubr.msk.f32.mxu0 %vm439_vm7, %v980_v3  ;;  %v1119_v51 = vsel %vm414_vm3, %v1118_v30, %v1117_v46  ;;  %v985_v52 = vrot.slane %v3241_v42, 5  ;;  %v987_v53 = vrot.slane %v3242_v43, 4  ;;  %v989_v54 = vrot.slane %v3243_v45, 3  ;;  %v3258_v4 = vld [vmem:[%s3936_s25 + $0x34] sm:$0x1]  ;;  %3613 = vmatprep.subr.mxu1 %v4123_v33  ;;  %v4181_v39 = vld [vmem:[%s4740_s2 + $0x88] sm:$0xff] }
  0x44   : > { %v1121_v55 = vsel %vm417_vm4, %v1120_v31, %v1119_v51  ;;  %v982_v56 = vsel %vm405_vm0, %v981_v49, %v3238_v32  ;;  %v991_v57 = vrot.slane %v3244_v47, 2  ;;  %v993_v58 = vrot.slane %v3245_v48, 1  ;;  %v3259_v59 = vld [vmem:[%s3936_s25 + $0x36] sm:$0x1]  ;;  %v3260_v60 = vld [vmem:[%s3936_s25 + $0x38] sm:$0x1] }
  0x45   : > { %v1123_v61 = vsel %vm420_vm5, %v1122_v36, %v1121_v55  ;;  %v984_v62 = vsel %vm408_vm1, %v983_v50, %v982_v56  ;;  %v3261_v63 = vld [vmem:[%s3936_s25 + $0x3a] sm:$0x1]  ;;  %v3262_v0 = vld [vmem:[%s3936_s25 + $0x48] sm:$0x1]  ;;  %v3263_v1 = vld [vmem:[%s3936_s25 + $0x4a] sm:$0x1] }
  0x46   : > { %v1125_v2 = vsel %vm423_vm6, %v1124_v37, %v1123_v61  ;;  %v986_v6 = vsel %vm411_vm2, %v985_v52, %v984_v62  ;;  %v3264_v7 = vld [vmem:[%s3936_s25 + $0x4c] sm:$0x1]  ;;  %v3265_v8 = vld [vmem:[%s3936_s25 + $0x4e] sm:$0x1]  ;;  %v1126_v9 = vrot.slane %v3259_v59, 7  ;;  %v1128_v10 = vrot.slane %v3260_v60, 6 }
  0x47   : > { %3603 = vmatprep.mubr.msk.f32.mxu1 %vm439_vm7, %v1125_v2  ;;  %v988_v12 = vsel %vm414_vm3, %v987_v53, %v986_v6  ;;  %v1130_v13 = vrot.slane %v3261_v63, 5  ;;  %v1132_v14 = vrot.slane %v3262_v0, 4  ;;  %v1134_v15 = vrot.slane %v3263_v1, 3  ;;  %v3270_v16 = vld [vmem:[%s3936_s25 + $0x14] sm:$0x1]  ;;  %v4207_v61 = vld [vmem:[%s4741_s3 + $0x8] sm:$0xff] }
  0x48   : > { %v990_v5 = vsel %vm417_vm4, %v989_v54, %v988_v12  ;;  %v1127_v17 = vsel %vm405_vm0, %v1126_v9, %v3258_v4  ;;  %v1136_v18 = vrot.slane %v3264_v7, 2  ;;  %v1138_v19 = vrot.slane %v3265_v8, 1  ;;  %v3271_v44 = vld [vmem:[%s3936_s25 + $0x16] sm:$0x1]  ;;  %v3272_v21 = vld [vmem:[%s3936_s25 + $0x18] sm:$0x1] }
  0x49   : > { %v992_v22 = vsel %vm420_vm5, %v991_v57, %v990_v5  ;;  %v1129_v23 = vsel %vm408_vm1, %v1128_v10, %v1127_v17  ;;  %v3273_v24 = vld [vmem:[%s3936_s25 + $0x1a] sm:$0x1]  ;;  %v3274_v25 = vld [vmem:[%s3936_s25 + $0x28] sm:$0x1]  ;;  %v3275_v26 = vld [vmem:[%s3936_s25 + $0x2a] sm:$0x1] }
  0x4a   : > { %v994_v27 = vsel %vm423_vm6, %v993_v58, %v992_v22  ;;  %v1131_v28 = vsel %vm411_vm2, %v1130_v13, %v1129_v23  ;;  %v3276_v29 = vld [vmem:[%s3936_s25 + $0x2c] sm:$0x1]  ;;  %v3277_v30 = vld [vmem:[%s3936_s25 + $0x2e] sm:$0x1]  ;;  %v1257_v31 = vrot.slane %v3271_v44, 7  ;;  %v1259_v32 = vrot.slane %v3272_v21, 6 }
  0x4b   : > { %3597 = vmatmul.mubr.msk.f32.vlgmr.msra.gmra.mxu0 %vm439_vm7, %v994_v27  ;;  %v1133_v34 = vsel %vm414_vm3, %v1132_v14, %v1131_v28  ;;  %v1261_v35 = vrot.slane %v3273_v24, 5  ;;  %v1263_v36 = vrot.slane %v3274_v25, 4  ;;  %v1265_v37 = vrot.slane %v3275_v26, 3  ;;  %v3290_v38 = vld [vmem:[%s3936_s25 + $0x15] sm:$0x1]  ;;  %s340_s14 = scalar_lea.vmem [#allocation2], %s3181_s22 }
  0x4c   : > { %v1135_v40 = vsel %vm417_vm4, %v1134_v15, %v1133_v34  ;;  %3607 = vmatpush3.msra.mxu0 %v4097_v11  ;;  %v3306_v41 = vld [vmem:[%s4740_s2 + $0x70] sm:$0xff]  ;;  %v1258_v42 = vsel %vm405_vm0, %v1257_v31, %v3270_v16  ;;  %v1267_v43 = vrot.slane %v3276_v29, 2  ;;  %v1269_v45 = vrot.slane %v3277_v30, 1  ;;  %v3292_v46 = vld [vmem:[%s3936_s25 + $0x19] sm:$0x1]  ;;  %s3103_s16 = sshll.u32 %s340_s14, 4  ;;  %s4696_s16 = int_to_ptr.vmem [resolvable:$true] %s3103_s16 }
  0x4d   : > { %v3291_v3 = vld [vmem:[%s3936_s25 + $0x17] sm:$0x1]  ;;  %v1137_v47 = vsel %vm420_vm5, %v1136_v18, %v1135_v40  ;;  %3608 = vmatprep.subr.mxu0 %v3286_v20  ;;  %v1260_v48 = vsel %vm408_vm1, %v1259_v32, %v1258_v42  ;;  %v3293_v49 = vld [vmem:[%s3936_s25 + $0x1b] sm:$0x1]  ;;  %v3294_v11 = vld [vmem:[%s3936_s25 + $0x29] sm:$0x1]  ;;  %p3746_p0 = scmp.lt.s32.totalorder %s4696_s16, %s3744_s29 }
  0x4e   : > { %v3295_v50 = vld [vmem:[%s3936_s25 + $0x2b] sm:$0x1]  ;;  %v1139_v51 = vsel %vm423_vm6, %v1138_v19, %v1137_v47  ;;  %3609 = vmatpush3.msra.mxu0 %v3286_v20  ;;  %v1262_v52 = vsel %vm411_vm2, %v1261_v35, %v1260_v48  ;;  %v3296_v53 = vld [vmem:[%s3936_s25 + $0x2d] sm:$0x1]  ;;  %v3297_v54 = vld [vmem:[%s3936_s25 + $0x2f] sm:$0x1] }
  0x4f   : > { %v1401_v4 = vrot.slane %v3291_v3, 7  ;;  %v1403_v55 = vrot.slane %v3292_v46, 6  ;;  %3604 = vmatmul.mubr.msk.f32.vlgmr.msra.gmra.mxu1 %vm439_vm7, %v1139_v51  ;;  %v1264_v56 = vsel %vm414_vm3, %v1263_v36, %v1262_v52  ;;  %v1405_v57 = vrot.slane %v3293_v49, 5  ;;  %3620 = vmatprep.subr.mxu0 %v4181_v39  ;;  %v3278_v60 = vld [vmem:[%s3936_s25 + $0x3c] sm:$0x1]  ;;  %v3326_v49 = vld [vmem:[%s4740_s2 + $0x80] sm:$0xff] }
  0x50   : > { %v1407_v58 = vrot.slane %v3294_v11, 4  ;;  %v1409_v59 = vrot.slane %v3295_v50, 3  ;;  %3614 = vmatpush3.msra.mxu1 %v4123_v33  ;;  %v1266_v62 = vsel %vm417_vm4, %v1265_v37, %v1264_v56  ;;  %v1411_v0 = vrot.slane %v3296_v53, 2  ;;  %v3279_v2 = vld [vmem:[%s3936_s25 + $0x3e] sm:$0x1]  ;;  %s3739_s24 = scalar_lea.vmem %s4696_s16, 256 }
  0x51   : > { %v1402_v63 = vsel %vm405_vm0, %v1401_v4, %v3290_v38  ;;  %v1413_v1 = vrot.slane %v3297_v54, 1  ;;  %v3280_v6 = vld [vmem:[%s3936_s25 + $0x40] sm:$0x1]  ;;  %3615 = vmatprep.subr.mxu1 %v3306_v41  ;;  %v1268_v7 = vsel %vm420_vm5, %v1267_v43, %v1266_v62  ;;  %v3281_v9 = vld [vmem:[%s3936_s25 + $0x42] sm:$0x1]  ;;  %v1271_v16 = vrot.slane %v3279_v2, 7  ;;  %p3740_p11 = scmp.ne.s32.totalorder %s4696_s16, %s3739_s24 }
  0x52   : > { %v1404_v8 = vsel %vm408_vm1, %v1403_v55, %v1402_v63  ;;  %v3282_v10 = vld [vmem:[%s3936_s25 + $0x50] sm:$0x1]  ;;  %v3283_v12 = vld [vmem:[%s3936_s25 + $0x52] sm:$0x1]  ;;  %v1270_v33 = vsel %vm423_vm6, %v1269_v45, %v1268_v7  ;;  %3616 = vmatpush3.msra.mxu1 %v3306_v41  ;;  %v3284_v14 = vld [vmem:[%s3936_s25 + $0x54] sm:$0x1] }
  0x53   : > { %v1406_v13 = vsel %vm411_vm2, %v1405_v57, %v1404_v8  ;;  %v3285_v15 = vld [vmem:[%s3936_s25 + $0x56] sm:$0x1]  ;;  %v1273_v5 = vrot.slane %v3280_v6, 6  ;;  %3610 = vmatprep.mubr.msk.f32.mxu0 %vm439_vm7, %v1270_v33  ;;  %v1275_v18 = vrot.slane %v3281_v9, 5  ;;  %v1277_v19 = vrot.slane %v3282_v10, 4  ;;  %3627 = vmatprep.subr.mxu1 %v4207_v61  ;;  %v4272_v6 = vld [vmem:[%s4741_s3 + $0x18] sm:$0xff]  ;;  %p3741_p12 = pnand %p3740_p11, %p3892_p5 }
  0x54   : > { %v1408_v17 = vsel %vm414_vm3, %v1407_v58, %v1406_v13  ;;  %v1279_v20 = vrot.slane %v3283_v12, 3  ;;  %v3298_v44 = vld [vmem:[%s3936_s25 + $0x3d] sm:$0x1]  ;;  %v1272_v22 = vsel %vm405_vm0, %v1271_v16, %v3278_v60  ;;  %v1281_v23 = vrot.slane %v3284_v14, 2  ;;  %v3299_v25 = vld [vmem:[%s3936_s25 + $0x3f] sm:$0x1] }
  0x55   : > { %v1410_v21 = vsel %vm417_vm4, %v1409_v59, %v1408_v17  ;;  %v1283_v24 = vrot.slane %v3285_v15, 1  ;;  %v3300_v26 = vld [vmem:[%s3936_s25 + $0x41] sm:$0x1]  ;;  %v1274_v28 = vsel %vm408_vm1, %v1273_v5, %v1272_v22  ;;  %v3301_v29 = vld [vmem:[%s3936_s25 + $0x43] sm:$0x1]  ;;  %v1415_v37 = vrot.slane %v3299_v25, 7  ;;  %p3742_p13 = pneg %p3741_p12 }
  0x56   : > { %v1412_v27 = vsel %vm420_vm5, %v1411_v0, %v1410_v21  ;;  %v3302_v30 = vld [vmem:[%s3936_s25 + $0x51] sm:$0x1]  ;;  %v3303_v31 = vld [vmem:[%s3936_s25 + $0x53] sm:$0x1]  ;;  %v1276_v34 = vsel %vm411_vm2, %v1275_v18, %v1274_v28  ;;  %v3304_v35 = vld [vmem:[%s3936_s25 + $0x55] sm:$0x1] }
  0x57   : > { %v1414_v32 = vsel %vm423_vm6, %v1413_v1, %v1412_v27  ;;  %v3305_v36 = vld [vmem:[%s3936_s25 + $0x57] sm:$0x1]  ;;  %v1417_v38 = vrot.slane %v3300_v26, 6  ;;  %v1278_v40 = vsel %vm414_vm3, %v1277_v19, %v1276_v34  ;;  %v1419_v41 = vrot.slane %v3301_v29, 5  ;;  %v3310_v45 = vld [vmem:[%s3936_s25 + $0x16] sm:$0x1] }
  0x58   : > { %3617 = vmatprep.mubr.msk.f32.mxu1 %vm439_vm7, %v1414_v32  ;;  %v1421_v42 = vrot.slane %v3302_v30, 4  ;;  %v1423_v43 = vrot.slane %v3303_v31, 3  ;;  %v1280_v3 = vsel %vm417_vm4, %v1279_v20, %v1278_v40  ;;  %v1416_v46 = vsel %vm405_vm0, %v1415_v37, %v3298_v44  ;;  %v3311_v11 = vld [vmem:[%s3936_s25 + $0x18] sm:$0x1]  ;;  %v3312_v50 = vld [vmem:[%s3936_s25 + $0x1a] sm:$0x1] }
  0x59   : > { %v1425_v47 = vrot.slane %v3304_v35, 2  ;;  %v1427_v48 = vrot.slane %v3305_v36, 1  ;;  %v1282_v51 = vsel %vm420_vm5, %v1281_v23, %v1280_v3  ;;  %v1418_v52 = vsel %vm408_vm1, %v1417_v38, %v1416_v46  ;;  %v3313_v53 = vld [vmem:[%s3936_s25 + $0x1c] sm:$0x1]  ;;  %v3314_v54 = vld [vmem:[%s3936_s25 + $0x2a] sm:$0x1] }
  0x5a   : > { %v3315_v4 = vld [vmem:[%s3936_s25 + $0x2c] sm:$0x1]  ;;  %v1284_v55 = vsel %vm423_vm6, %v1283_v24, %v1282_v51  ;;  %v1420_v56 = vsel %vm411_vm2, %v1419_v41, %v1418_v52  ;;  %v3316_v57 = vld [vmem:[%s3936_s25 + $0x2e] sm:$0x1]  ;;  %v3317_v58 = vld [vmem:[%s3936_s25 + $0x30] sm:$0x1] }
  0x5b   : > { %v1546_v59 = vrot.slane %v3311_v11, 7  ;;  %v1548_v60 = vrot.slane %v3312_v50, 6  ;;  %3611 = vmatmul.mubr.msk.f32.vlgmr.msra.gmra.mxu0 %vm439_vm7, %v1284_v55  ;;  %v1422_v62 = vsel %vm414_vm3, %v1421_v42, %v1420_v56  ;;  %v1550_v63 = vrot.slane %v3313_v53, 5  ;;  %v1655_v2 = vld [vmem:[%s4260_s27] sm:$0x1]  ;;  %v4298_v27 = vld [vmem:[%s4741_s3 + $0x28] sm:$0xff] }
  0x5c   : > { %v1552_v0 = vrot.slane %v3314_v54, 4  ;;  %v1554_v1 = vrot.slane %v3315_v4, 3  ;;  %v1424_v7 = vsel %vm417_vm4, %v1423_v43, %v1422_v62  ;;  %3621 = vmatpush3.msra.mxu0 %v4181_v39  ;;  %v1671_v8 = vld [vmem:[%s4741_s3] sm:$0xff]  ;;  %v1556_v10 = vrot.slane %v3316_v57, 2  ;;  %v1659_v39 = vld [vmem:[%s4260_s27 + $0x14] sm:$0x1] }
  0x5d   : > { %v1547_v9 = vsel %vm405_vm0, %v1546_v59, %v3310_v45  ;;  %v1558_v12 = vrot.slane %v3317_v58, 1  ;;  %v1656_v33 = vld [vmem:[%s4260_s27 + $0x2] sm:$0x1]  ;;  %v1657_v13 = vld [vmem:[%s4260_s27 + $0x4] sm:$0x1]  ;;  %v1426_v14 = vsel %vm420_vm5, %v1425_v47, %v1424_v7  ;;  %3622 = vmatprep.subr.mxu0 %v3326_v49  ;;  %v1695_v24 = vrot.slane %v1659_v39, 4 }
  0x5e   : > { %v1549_v15 = vsel %vm408_vm1, %v1548_v60, %v1547_v9  ;;  %v1658_v16 = vld [vmem:[%s4260_s27 + $0x6] sm:$0x1]  ;;  %v1660_v5 = vld [vmem:[%s4260_s27 + $0x16] sm:$0x1]  ;;  %v1428_v17 = vsel %vm423_vm6, %v1427_v48, %v1426_v14  ;;  %3623 = vmatpush3.msra.mxu0 %v3326_v49  ;;  %v1661_v19 = vld [vmem:[%s4260_s27 + $0x18] sm:$0x1] }
  0x5f   : > { %v1551_v18 = vsel %vm411_vm2, %v1550_v63, %v1549_v15  ;;  %v1662_v20 = vld [vmem:[%s4260_s27 + $0x1a] sm:$0x1]  ;;  %v1689_v44 = vrot.slane %v1656_v33, 7  ;;  %v1691_v21 = vrot.slane %v1657_v13, 6  ;;  %3618 = vmatmul.mubr.msk.f32.vlgmr.msra.gmra.mxu1 %vm439_vm7, %v1428_v17  ;;  %v1693_v23 = vrot.slane %v1658_v16, 5  ;;  %3634 = vmatprep.subr.mxu0 %v4272_v6  ;;  %v3332_v16 = vld [vmem:[%s4741_s3 + $0x10] sm:$0xff] }
  0x60   : > { %v1553_v22 = vsel %vm414_vm3, %v1552_v0, %v1551_v18  ;;  %v1697_v25 = vrot.slane %v1660_v5, 3  ;;  %v3318_v26 = vld [vmem:[%s3936_s25 + $0x3e] sm:$0x1]  ;;  %3628 = vmatpush3.msra.mxu1 %v4207_v61  ;;  %v1699_v30 = vrot.slane %v1661_v19, 2  ;;  %v1701_v31 = vrot.slane %v1662_v20, 1 }
  0x61   : > { %v1555_v28 = vsel %vm417_vm4, %v1554_v1, %v1553_v22  ;;  %v1690_v29 = vsel %vm405_vm0, %v1689_v44, %v1655_v2  ;;  %v3319_v32 = vld [vmem:[%s3936_s25 + $0x40] sm:$0x1]  ;;  %v3320_v34 = vld [vmem:[%s3936_s25 + $0x42] sm:$0x1]  ;;  %3629 = vmatprep.subr.mxu1 %v1671_v8  ;;  %v3321_v37 = vld [vmem:[%s3936_s25 + $0x44] sm:$0x1] }
  0x62   : > { %v1557_v35 = vsel %vm420_vm5, %v1556_v10, %v1555_v28  ;;  %v1692_v36 = vsel %vm408_vm1, %v1691_v21, %v1690_v29  ;;  %v3322_v38 = vld [vmem:[%s3936_s25 + $0x52] sm:$0x1]  ;;  %v3323_v40 = vld [vmem:[%s3936_s25 + $0x54] sm:$0x1]  ;;  %3630 = vmatpush3.msra.mxu1 %v1671_v8  ;;  %v3324_v42 = vld [vmem:[%s3936_s25 + $0x56] sm:$0x1] }
  0x63   : > { %v1559_v61 = vsel %vm423_vm6, %v1558_v12, %v1557_v35  ;;  %v1694_v41 = vsel %vm411_vm2, %v1693_v23, %v1692_v36  ;;  %v3325_v43 = vld [vmem:[%s3936_s25 + $0x58] sm:$0x1]  ;;  %v1560_v45 = vrot.slane %v3319_v32, 7  ;;  %v1562_v3 = vrot.slane %v3320_v34, 6  ;;  %v1663_v11 = vld [vmem:[%s4260_s27 + $0x28] sm:$0x1]  ;;  %3641 = vmatprep.subr.mxu1 %v4298_v27 }
  0x64   : > { %3624 = vmatprep.mubr.msk.f32.mxu0 %vm439_vm7, %v1559_v61  ;;  %v1696_v46 = vsel %vm414_vm3, %v1695_v24, %v1694_v41  ;;  %v1564_v47 = vrot.slane %v3321_v37, 5  ;;  %v1566_v48 = vrot.slane %v3322_v38, 4  ;;  %v1568_v49 = vrot.slane %v3323_v40, 3  ;;  %v1664_v54 = vld [vmem:[%s4260_s27 + $0x2a] sm:$0x1]  ;;  %v4356_v34 = vld [vmem:[%s4741_s3 + $0x38] sm:$0xff] }
  0x65   : > { %v1698_v50 = vsel %vm417_vm4, %v1697_v25, %v1696_v46  ;;  %v1561_v51 = vsel %vm405_vm0, %v1560_v45, %v3318_v26  ;;  %v1570_v52 = vrot.slane %v3324_v42, 2  ;;  %v1572_v53 = vrot.slane %v3325_v43, 1  ;;  %v1665_v4 = vld [vmem:[%s4260_s27 + $0x2c] sm:$0x1]  ;;  %v1666_v57 = vld [vmem:[%s4260_s27 + $0x2e] sm:$0x1] }
  0x66   : > { %v1700_v55 = vsel %vm420_vm5, %v1699_v30, %v1698_v50  ;;  %v1563_v56 = vsel %vm408_vm1, %v1562_v3, %v1561_v51  ;;  %v1667_v58 = vld [vmem:[%s4260_s27 + $0x3c] sm:$0x1]  ;;  %v1668_v59 = vld [vmem:[%s4260_s27 + $0x3e] sm:$0x1]  ;;  %v1669_v63 = vld [vmem:[%s4260_s27 + $0x40] sm:$0x1] }
  0x67   : > { %v1702_v60 = vsel %vm423_vm6, %v1701_v31, %v1700_v55  ;;  %v1565_v62 = vsel %vm411_vm2, %v1564_v47, %v1563_v56  ;;  %v1670_v0 = vld [vmem:[%s4260_s27 + $0x42] sm:$0x1]  ;;  %v1703_v1 = vrot.slane %v1664_v54, 7  ;;  %v1705_v2 = vrot.slane %v1665_v4, 6  ;;  %v1798_v12 = vld [vmem:[%s4260_s27 + $0x1] sm:$0x1] }
  0x68   : > { %3631 = vmatprep.mubr.msk.f32.mxu1 %vm439_vm7, %v1702_v60  ;;  %v1567_v7 = vsel %vm414_vm3, %v1566_v48, %v1565_v62  ;;  %v1707_v8 = vrot.slane %v1666_v57, 5  ;;  %v1709_v9 = vrot.slane %v1667_v58, 4  ;;  %v1711_v10 = vrot.slane %v1668_v59, 3  ;;  %v1799_v39 = vld [vmem:[%s4260_s27 + $0x3] sm:$0x1]  ;;  %v4382_v55 = vld [vmem:[%s4741_s3 + $0x48] sm:$0xff] }
  0x69   : > { %v1569_v33 = vsel %vm417_vm4, %v1568_v49, %v1567_v7  ;;  %v1704_v13 = vsel %vm405_vm0, %v1703_v1, %v1663_v11  ;;  %v1713_v14 = vrot.slane %v1669_v63, 2  ;;  %v1715_v15 = vrot.slane %v1670_v0, 1  ;;  %v1800_v5 = vld [vmem:[%s4260_s27 + $0x5] sm:$0x1]  ;;  %v1801_v19 = vld [vmem:[%s4260_s27 + $0x7] sm:$0x1] }
  0x6a   : > { %v1571_v17 = vsel %vm420_vm5, %v1570_v52, %v1569_v33  ;;  %v1706_v18 = vsel %vm408_vm1, %v1705_v2, %v1704_v13  ;;  %v1802_v20 = vld [vmem:[%s4260_s27 + $0x15] sm:$0x1]  ;;  %v1803_v44 = vld [vmem:[%s4260_s27 + $0x17] sm:$0x1]  ;;  %v1804_v23 = vld [vmem:[%s4260_s27 + $0x19] sm:$0x1] }
  0x6b   : > { %v1573_v21 = vsel %vm423_vm6, %v1572_v53, %v1571_v17  ;;  %v1708_v22 = vsel %vm411_vm2, %v1707_v8, %v1706_v18  ;;  %v1805_v24 = vld [vmem:[%s4260_s27 + $0x1b] sm:$0x1]  ;;  %v1833_v25 = vrot.slane %v1799_v39, 7  ;;  %v1835_v26 = vrot.slane %v1800_v5, 6  ;;  %v3336_v32 = vld [vmem:[%s4260_s27 + $0x2] sm:$0x1] }
  0x6c   : > { %3625 = vmatmul.mubr.msk.f32.vlgmr.msra.gmra.mxu0 %vm439_vm7, %v1573_v21  ;;  %v1710_v28 = vsel %vm414_vm3, %v1709_v9, %v1708_v22  ;;  %v1837_v29 = vrot.slane %v1801_v19, 5  ;;  %v1839_v30 = vrot.slane %v1802_v20, 4  ;;  %v1841_v31 = vrot.slane %v1803_v44, 3  ;;  %v3352_v36 = vld [vmem:[%s4741_s3 + $0x20] sm:$0xff]  ;;  %v3339_v45 = vld [vmem:[%s4260_s27 + $0x8] sm:$0x1] }
  0x6d   : > { %v1712_v35 = vsel %vm417_vm4, %v1711_v10, %v1710_v28  ;;  %3635 = vmatpush3.msra.mxu0 %v4272_v6  ;;  %v1834_v37 = vsel %vm405_vm0, %v1833_v25, %v1798_v12  ;;  %v1843_v38 = vrot.slane %v1804_v23, 2  ;;  %v1845_v40 = vrot.slane %v1805_v24, 1  ;;  %v3337_v61 = vld [vmem:[%s4260_s27 + $0x4] sm:$0x1]  ;;  %v3338_v41 = vld [vmem:[%s4260_s27 + $0x6] sm:$0x1] }
  0x6e   : > { %v1714_v42 = vsel %vm420_vm5, %v1713_v14, %v1712_v35  ;;  %3636 = vmatprep.subr.mxu0 %v3332_v16  ;;  %v1836_v43 = vsel %vm408_vm1, %v1835_v26, %v1834_v37  ;;  %v3340_v6 = vld [vmem:[%s4260_s27 + $0x16] sm:$0x1]  ;;  %v3341_v3 = vld [vmem:[%s4260_s27 + $0x18] sm:$0x1]  ;;  %v3342_v48 = vld [vmem:[%s4260_s27 + $0x1a] sm:$0x1] }
  0x6f   : > { %v1716_v46 = vsel %vm423_vm6, %v1715_v15, %v1714_v42  ;;  %3637 = vmatpush3.msra.mxu0 %v3332_v16  ;;  %v1838_v47 = vsel %vm411_vm2, %v1837_v29, %v1836_v43  ;;  %v3343_v49 = vld [vmem:[%s4260_s27 + $0x1c] sm:$0x1]  ;;  %v1978_v11 = vrot.slane %v3337_v61, 7  ;;  %v1980_v50 = vrot.slane %v3338_v41, 6  ;;  %v1806_v4 = vld [vmem:[%s4260_s27 + $0x29] sm:$0x1] }
  0x70   : > { %3632 = vmatmul.mubr.msk.f32.vlgmr.msra.gmra.mxu1 %vm439_vm7, %v1716_v46  ;;  %v1840_v51 = vsel %vm414_vm3, %v1839_v30, %v1838_v47  ;;  %v1982_v52 = vrot.slane %v3339_v45, 5  ;;  %v1984_v53 = vrot.slane %v3340_v6, 4  ;;  %v1986_v54 = vrot.slane %v3341_v3, 3  ;;  %3648 = vmatprep.subr.mxu0 %v4356_v34  ;;  %v1807_v60 = vld [vmem:[%s4260_s27 + $0x2b] sm:$0x1]  ;;  %v3372_v45 = vld [vmem:[%s4741_s3 + $0x30] sm:$0xff] }
  0x71   : > { %3642 = vmatpush3.msra.mxu1 %v4298_v27  ;;  %v1842_v56 = vsel %vm417_vm4, %v1841_v31, %v1840_v51  ;;  %v1979_v57 = vsel %vm405_vm0, %v1978_v11, %v3336_v32  ;;  %v1988_v58 = vrot.slane %v3342_v48, 2  ;;  %v1990_v59 = vrot.slane %v3343_v49, 1  ;;  %v1808_v62 = vld [vmem:[%s4260_s27 + $0x2d] sm:$0x1]  ;;  %v1809_v1 = vld [vmem:[%s4260_s27 + $0x2f] sm:$0x1] }
  0x72   : > { %3643 = vmatprep.subr.mxu1 %v3352_v36  ;;  %v1844_v63 = vsel %vm420_vm5, %v1843_v38, %v1842_v56  ;;  %v1981_v0 = vsel %vm408_vm1, %v1980_v50, %v1979_v57  ;;  %v1810_v2 = vld [vmem:[%s4260_s27 + $0x3d] sm:$0x1]  ;;  %v1811_v7 = vld [vmem:[%s4260_s27 + $0x3f] sm:$0x1]  ;;  %v1812_v9 = vld [vmem:[%s4260_s27 + $0x41] sm:$0x1] }
  0x73   : > { %v1846_v27 = vsel %vm423_vm6, %v1845_v40, %v1844_v63  ;;  %3644 = vmatpush3.msra.mxu1 %v3352_v36  ;;  %v1983_v8 = vsel %vm411_vm2, %v1982_v52, %v1981_v0  ;;  %v1813_v10 = vld [vmem:[%s4260_s27 + $0x43] sm:$0x1]  ;;  %v1847_v12 = vrot.slane %v1807_v60, 7  ;;  %v1849_v33 = vrot.slane %v1808_v62, 6  ;;  %v3344_v39 = vld [vmem:[%s4260_s27 + $0x2a] sm:$0x1] }
  0x74   : > { %3638 = vmatprep.mubr.msk.f32.mxu0 %vm439_vm7, %v1846_v27  ;;  %v1985_v13 = vsel %vm414_vm3, %v1984_v53, %v1983_v8  ;;  %v1851_v14 = vrot.slane %v1809_v1, 5  ;;  %v1853_v15 = vrot.slane %v1810_v2, 4  ;;  %v1855_v16 = vrot.slane %v1811_v7, 3  ;;  %3655 = vmatprep.subr.mxu1 %v4382_v55  ;;  %v3345_v20 = vld [vmem:[%s4260_s27 + $0x2c] sm:$0x1]  ;;  %v4440_v62 = vld [vmem:[%s4741_s3 + $0x58] sm:$0xff] }
  0x75   : > { %v1987_v5 = vsel %vm417_vm4, %v1986_v54, %v1985_v13  ;;  %v1848_v17 = vsel %vm405_vm0, %v1847_v12, %v1806_v4  ;;  %v1857_v18 = vrot.slane %v1812_v9, 2  ;;  %v1859_v19 = vrot.slane %v1813_v10, 1  ;;  %v3346_v44 = vld [vmem:[%s4260_s27 + $0x2e] sm:$0x1]  ;;  %v3347_v23 = vld [vmem:[%s4260_s27 + $0x30] sm:$0x1] }
  0x76   : > { %v1989_v21 = vsel %vm420_vm5, %v1988_v58, %v1987_v5  ;;  %v1850_v22 = vsel %vm408_vm1, %v1849_v33, %v1848_v17  ;;  %v3348_v24 = vld [vmem:[%s4260_s27 + $0x3e] sm:$0x1]  ;;  %v3349_v25 = vld [vmem:[%s4260_s27 + $0x40] sm:$0x1]  ;;  %v3350_v29 = vld [vmem:[%s4260_s27 + $0x42] sm:$0x1] }
  0x77   : > { %v1991_v26 = vsel %vm423_vm6, %v1990_v59, %v1989_v21  ;;  %v1852_v28 = vsel %vm411_vm2, %v1851_v14, %v1850_v22  ;;  %v3351_v30 = vld [vmem:[%s4260_s27 + $0x44] sm:$0x1]  ;;  %v1992_v31 = vrot.slane %v3345_v20, 7  ;;  %v1994_v32 = vrot.slane %v3346_v44, 6  ;;  %v3356_v40 = vld [vmem:[%s4260_s27 + $0xa] sm:$0x1] }
  0x78   : > { %3645 = vmatprep.mubr.msk.f32.mxu1 %vm439_vm7, %v1991_v26  ;;  %v1854_v35 = vsel %vm414_vm3, %v1853_v15, %v1852_v28  ;;  %v1996_v36 = vrot.slane %v3347_v23, 5  ;;  %v1998_v37 = vrot.slane %v3348_v24, 4  ;;  %v2000_v38 = vrot.slane %v3349_v25, 3  ;;  %v3357_v6 = vld [vmem:[%s4260_s27 + $0xc] sm:$0x1]  ;;  %v3392_v0 = vld [vmem:[%s4741_s3 + $0x40] sm:$0xff] }
  0x79   : > { %v1856_v61 = vsel %vm417_vm4, %v1855_v16, %v1854_v35  ;;  %v1993_v41 = vsel %vm405_vm0, %v1992_v31, %v3344_v39  ;;  %v2002_v42 = vrot.slane %v3350_v29, 2  ;;  %v2004_v43 = vrot.slane %v3351_v30, 1  ;;  %v3358_v3 = vld [vmem:[%s4260_s27 + $0xe] sm:$0x1]  ;;  %v3359_v48 = vld [vmem:[%s4260_s27 + $0x10] sm:$0x1] }
  0x7a   : > { %v1858_v46 = vsel %vm420_vm5, %v1857_v18, %v1856_v61  ;;  %v1995_v47 = vsel %vm408_vm1, %v1994_v32, %v1993_v41  ;;  %v3360_v49 = vld [vmem:[%s4260_s27 + $0x1e] sm:$0x1]  ;;  %v3361_v11 = vld [vmem:[%s4260_s27 + $0x20] sm:$0x1]  ;;  %v3362_v52 = vld [vmem:[%s4260_s27 + $0x22] sm:$0x1] }
  0x7b   : > { %v1860_v50 = vsel %vm423_vm6, %v1859_v19, %v1858_v46  ;;  %v1997_v51 = vsel %vm411_vm2, %v1996_v36, %v1995_v47  ;;  %v3363_v53 = vld [vmem:[%s4260_s27 + $0x24] sm:$0x1]  ;;  %v2123_v54 = vrot.slane %v3357_v6, 7  ;;  %v2125_v4 = vrot.slane %v3358_v3, 6  ;;  %v3376_v60 = vld [vmem:[%s4260_s27 + $0xb] sm:$0x1] }
  0x7c   : > { %3639 = vmatmul.mubr.msk.f32.vlgmr.msra.gmra.mxu0 %vm439_vm7, %v1860_v50  ;;  %v1999_v56 = vsel %vm414_vm3, %v1998_v37, %v1997_v51  ;;  %v2127_v57 = vrot.slane %v3359_v48, 5  ;;  %v2129_v58 = vrot.slane %v3360_v49, 4  ;;  %v2131_v59 = vrot.slane %v3361_v11, 3  ;;  %v3377_v27 = vld [vmem:[%s4260_s27 + $0xd] sm:$0x1] }
  0x7d   : > { %v2001_v63 = vsel %vm417_vm4, %v2000_v38, %v1999_v56  ;;  %3649 = vmatpush3.msra.mxu0 %v4356_v34  ;;  %v2124_v1 = vsel %vm405_vm0, %v2123_v54, %v3356_v40  ;;  %v2133_v2 = vrot.slane %v3362_v52, 2  ;;  %v2135_v7 = vrot.slane %v3363_v53, 1  ;;  %v3378_v8 = vld [vmem:[%s4260_s27 + $0xf] sm:$0x1]  ;;  %v3379_v12 = vld [vmem:[%s4260_s27 + $0x11] sm:$0x1] }
  0x7e   : > { %v2003_v9 = vsel %vm420_vm5, %v2002_v42, %v2001_v63  ;;  %3650 = vmatprep.subr.mxu0 %v3372_v45  ;;  %v2126_v10 = vsel %vm408_vm1, %v2125_v4, %v2124_v1  ;;  %v3380_v34 = vld [vmem:[%s4260_s27 + $0x1f] sm:$0x1]  ;;  %v3381_v33 = vld [vmem:[%s4260_s27 + $0x21] sm:$0x1]  ;;  %v3382_v15 = vld [vmem:[%s4260_s27 + $0x23] sm:$0x1] }
  0x7f   : > { %v2005_v13 = vsel %vm423_vm6, %v2004_v43, %v2003_v9  ;;  %3651 = vmatpush3.msra.mxu0 %v3372_v45  ;;  %v2128_v14 = vsel %vm411_vm2, %v2127_v57, %v2126_v10  ;;  %v3383_v16 = vld [vmem:[%s4260_s27 + $0x25] sm:$0x1]  ;;  %v2267_v39 = vrot.slane %v3377_v27, 7  ;;  %v2269_v5 = vrot.slane %v3378_v8, 6  ;;  %v3364_v44 = vld [vmem:[%s4260_s27 + $0x32] sm:$0x1] }
  0x80   : > { %3646 = vmatmul.mubr.msk.f32.vlgmr.msra.gmra.mxu1 %vm439_vm7, %v2005_v13  ;;  %v2130_v17 = vsel %vm414_vm3, %v2129_v58, %v2128_v14  ;;  %v2271_v18 = vrot.slane %v3379_v12, 5  ;;  %v2273_v19 = vrot.slane %v3380_v34, 4  ;;  %v2275_v20 = vrot.slane %v3381_v33, 3  ;;  %3662 = vmatprep.subr.mxu0 %v4440_v62  ;;  %v4466_v21 = vld [vmem:[%s4741_s3 + $0x68] sm:$0xff]  ;;  %v3365_v26 = vld [vmem:[%s4260_s27 + $0x34] sm:$0x1] }
  0x81   : > { %3656 = vmatpush3.msra.mxu1 %v4382_v55  ;;  %v2132_v22 = vsel %vm417_vm4, %v2131_v59, %v2130_v17  ;;  %v2268_v23 = vsel %vm405_vm0, %v2267_v39, %v3376_v60  ;;  %v2277_v24 = vrot.slane %v3382_v15, 2  ;;  %v2279_v25 = vrot.slane %v3383_v16, 1  ;;  %v3366_v28 = vld [vmem:[%s4260_s27 + $0x36] sm:$0x1]  ;;  %v3367_v31 = vld [vmem:[%s4260_s27 + $0x38] sm:$0x1] }
  0x82   : > { %3657 = vmatprep.subr.mxu1 %v3392_v0  ;;  %v2134_v29 = vsel %vm420_vm5, %v2133_v2, %v2132_v22  ;;  %v2270_v30 = vsel %vm408_vm1, %v2269_v5, %v2268_v23  ;;  %v3368_v32 = vld [vmem:[%s4260_s27 + $0x46] sm:$0x1]  ;;  %v3369_v35 = vld [vmem:[%s4260_s27 + $0x48] sm:$0x1]  ;;  %v3370_v37 = vld [vmem:[%s4260_s27 + $0x4a] sm:$0x1] }
  0x83   : > { %v2136_v55 = vsel %vm423_vm6, %v2135_v7, %v2134_v29  ;;  %3658 = vmatpush3.msra.mxu1 %v3392_v0  ;;  %v2272_v36 = vsel %vm411_vm2, %v2271_v18, %v2270_v30  ;;  %v3371_v38 = vld [vmem:[%s4260_s27 + $0x4c] sm:$0x1]  ;;  %v2137_v40 = vrot.slane %v3365_v26, 7  ;;  %v2139_v61 = vrot.slane %v3366_v28, 6  ;;  %v3384_v6 = vld [vmem:[%s4260_s27 + $0x33] sm:$0x1] }
  0x84   : > { %3652 = vmatprep.mubr.msk.f32.mxu0 %vm439_vm7, %v2136_v55  ;;  %v2274_v41 = vsel %vm414_vm3, %v2273_v19, %v2272_v36  ;;  %v2141_v42 = vrot.slane %v3367_v31, 5  ;;  %v2143_v43 = vrot.slane %v3368_v32, 4  ;;  %v2145_v45 = vrot.slane %v3369_v35, 3  ;;  %3669 = vmatprep.subr.mxu1 %v4466_v21  ;;  %v3385_v49 = vld [vmem:[%s4260_s27 + $0x35] sm:$0x1]  ;;  %v4524_v28 = vld [vmem:[%s4741_s3 + $0x78] sm:$0xff] }
  0x85   : > { %v2276_v3 = vsel %vm417_vm4, %v2275_v20, %v2274_v41  ;;  %v2138_v46 = vsel %vm405_vm0, %v2137_v40, %v3364_v44  ;;  %v2147_v47 = vrot.slane %v3370_v37, 2  ;;  %v2149_v48 = vrot.slane %v3371_v38, 1  ;;  %v3386_v11 = vld [vmem:[%s4260_s27 + $0x37] sm:$0x1]  ;;  %v3387_v52 = vld [vmem:[%s4260_s27 + $0x39] sm:$0x1] }
  0x86   : > { %v2278_v50 = vsel %vm420_vm5, %v2277_v24, %v2276_v3  ;;  %v2140_v51 = vsel %vm408_vm1, %v2139_v61, %v2138_v46  ;;  %v3388_v53 = vld [vmem:[%s4260_s27 + $0x47] sm:$0x1]  ;;  %v3389_v54 = vld [vmem:[%s4260_s27 + $0x49] sm:$0x1]  ;;  %v3390_v57 = vld [vmem:[%s4260_s27 + $0x4b] sm:$0x1] }
  0x87   : > { %v2280_v4 = vsel %vm423_vm6, %v2279_v25, %v2278_v50  ;;  %v2142_v56 = vsel %vm411_vm2, %v2141_v42, %v2140_v51  ;;  %v3391_v58 = vld [vmem:[%s4260_s27 + $0x4d] sm:$0x1]  ;;  %v2281_v59 = vrot.slane %v3385_v49, 7  ;;  %v2283_v60 = vrot.slane %v3386_v11, 6  ;;  %v3396_v7 = vld [vmem:[%s4260_s27 + $0xc] sm:$0x1] }
  0x88   : > { %3659 = vmatprep.mubr.msk.f32.mxu1 %vm439_vm7, %v2280_v4  ;;  %v2144_v63 = vsel %vm414_vm3, %v2143_v43, %v2142_v56  ;;  %v2285_v0 = vrot.slane %v3387_v52, 5  ;;  %v2287_v1 = vrot.slane %v3388_v53, 4  ;;  %v2289_v2 = vrot.slane %v3389_v54, 3  ;;  %v3412_v12 = vld [vmem:[%s4741_s3 + $0x50] sm:$0xff]  ;;  %v3397_v34 = vld [vmem:[%s4260_s27 + $0xe] sm:$0x1] }
  0x89   : > { %v2146_v27 = vsel %vm417_vm4, %v2145_v45, %v2144_v63  ;;  %v2282_v8 = vsel %vm405_vm0, %v2281_v59, %v3384_v6  ;;  %v2291_v9 = vrot.slane %v3390_v57, 2  ;;  %v2293_v10 = vrot.slane %v3391_v58, 1  ;;  %v3398_v33 = vld [vmem:[%s4260_s27 + $0x10] sm:$0x1]  ;;  %v3399_v15 = vld [vmem:[%s4260_s27 + $0x12] sm:$0x1] }
  0x8a   : > { %v2148_v13 = vsel %vm420_vm5, %v2147_v47, %v2146_v27  ;;  %v2284_v14 = vsel %vm408_vm1, %v2283_v60, %v2282_v8  ;;  %v3400_v16 = vld [vmem:[%s4260_s27 + $0x20] sm:$0x1]  ;;  %v3401_v39 = vld [vmem:[%s4260_s27 + $0x22] sm:$0x1]  ;;  %v3402_v18 = vld [vmem:[%s4260_s27 + $0x24] sm:$0x1] }
  0x8b   : > { %v2150_v5 = vsel %vm423_vm6, %v2149_v48, %v2148_v13  ;;  %v2286_v17 = vsel %vm411_vm2, %v2285_v0, %v2284_v14  ;;  %v3403_v19 = vld [vmem:[%s4260_s27 + $0x26] sm:$0x1]  ;;  %v2412_v20 = vrot.slane %v3397_v34, 7  ;;  %v2414_v44 = vrot.slane %v3398_v33, 6  ;;  %v3416_v26 = vld [vmem:[%s4260_s27 + $0x14] sm:$0x1] }
  0x8c   : > { %3653 = vmatmul.mubr.msk.f32.vlgmr.msra.gmra.mxu0 %vm439_vm7, %v2150_v5  ;;  %v2288_v22 = vsel %vm414_vm3, %v2287_v1, %v2286_v17  ;;  %v2416_v23 = vrot.slane %v3399_v15, 5  ;;  %v2418_v24 = vrot.slane %v3400_v16, 4  ;;  %v2420_v25 = vrot.slane %v3401_v39, 3  ;;  %v3432_v30 = vld [vmem:[%s4741_s3 + $0x60] sm:$0xff]  ;;  %v3417_v55 = vld [vmem:[%s4260_s27 + $0x16] sm:$0x1] }
  0x8d   : > { %v2290_v29 = vsel %vm417_vm4, %v2289_v2, %v2288_v22  ;;  %3663 = vmatpush3.msra.mxu0 %v4440_v62  ;;  %v2413_v31 = vsel %vm405_vm0, %v2412_v20, %v3396_v7  ;;  %v2422_v32 = vrot.slane %v3402_v18, 2  ;;  %v2424_v35 = vrot.slane %v3403_v19, 1  ;;  %v3418_v36 = vld [vmem:[%s4260_s27 + $0x18] sm:$0x1]  ;;  %v3419_v40 = vld [vmem:[%s4260_s27 + $0x1a] sm:$0x1] }
  0x8e   : > { %v2292_v37 = vsel %vm420_vm5, %v2291_v9, %v2290_v29  ;;  %3664 = vmatprep.subr.mxu0 %v3412_v12  ;;  %v2415_v38 = vsel %vm408_vm1, %v2414_v44, %v2413_v31  ;;  %v3420_v62 = vld [vmem:[%s4260_s27 + $0x28] sm:$0x1]  ;;  %v3421_v61 = vld [vmem:[%s4260_s27 + $0x2a] sm:$0x1]  ;;  %v3422_v43 = vld [vmem:[%s4260_s27 + $0x2c] sm:$0x1] }
  0x8f   : > { %v2294_v41 = vsel %vm423_vm6, %v2293_v10, %v2292_v37  ;;  %3665 = vmatpush3.msra.mxu0 %v3412_v12  ;;  %v2417_v42 = vsel %vm411_vm2, %v2416_v23, %v2415_v38  ;;  %v3423_v45 = vld [vmem:[%s4260_s27 + $0x2e] sm:$0x1]  ;;  %v2557_v6 = vrot.slane %v3417_v55, 7  ;;  %v2559_v3 = vrot.slane %v3418_v36, 6  ;;  %v3404_v11 = vld [vmem:[%s4260_s27 + $0x34] sm:$0x1] }
  0x90   : > { %3660 = vmatmul.mubr.msk.f32.vlgmr.msra.gmra.mxu1 %vm439_vm7, %v2294_v41  ;;  %v2419_v46 = vsel %vm414_vm3, %v2418_v24, %v2417_v42  ;;  %v2561_v47 = vrot.slane %v3419_v40, 5  ;;  %v2563_v48 = vrot.slane %v3420_v62, 4  ;;  %v2565_v49 = vrot.slane %v3421_v61, 3  ;;  %3676 = vmatprep.subr.mxu0 %v4524_v28  ;;  %v4550_v50 = vld [vmem:[%s4741_s3 + $0x88] sm:$0xff]  ;;  %v3405_v4 = vld [vmem:[%s4260_s27 + $0x36] sm:$0x1] }
  0x91   : > { %3670 = vmatpush3.msra.mxu1 %v4466_v21  ;;  %v2421_v51 = vsel %vm417_vm4, %v2420_v25, %v2419_v46  ;;  %v2558_v52 = vsel %vm405_vm0, %v2557_v6, %v3416_v26  ;;  %v2567_v53 = vrot.slane %v3422_v43, 2  ;;  %v2569_v54 = vrot.slane %v3423_v45, 1  ;;  %v3406_v56 = vld [vmem:[%s4260_s27 + $0x38] sm:$0x1]  ;;  %v3407_v59 = vld [vmem:[%s4260_s27 + $0x3a] sm:$0x1] }
  0x92   : > { %3671 = vmatprep.subr.mxu1 %v3432_v30  ;;  %v2423_v57 = vsel %vm420_vm5, %v2422_v32, %v2421_v51  ;;  %v2560_v58 = vsel %vm408_vm1, %v2559_v3, %v2558_v52  ;;  %v3408_v60 = vld [vmem:[%s4260_s27 + $0x48] sm:$0x1]  ;;  %v3409_v63 = vld [vmem:[%s4260_s27 + $0x4a] sm:$0x1]  ;;  %v3410_v1 = vld [vmem:[%s4260_s27 + $0x4c] sm:$0x1] }
  0x93   : > { %v2425_v21 = vsel %vm423_vm6, %v2424_v35, %v2423_v57  ;;  %3672 = vmatpush3.msra.mxu1 %v3432_v30  ;;  %v2562_v0 = vsel %vm411_vm2, %v2561_v47, %v2560_v58  ;;  %v3411_v2 = vld [vmem:[%s4260_s27 + $0x4e] sm:$0x1]  ;;  %v2426_v7 = vrot.slane %v3405_v4, 7  ;;  %v2428_v27 = vrot.slane %v3406_v56, 6  ;;  %v3424_v34 = vld [vmem:[%s4260_s27 + $0x3c] sm:$0x1] }
  0x94   : > { %3666 = vmatprep.mubr.msk.f32.mxu0 %vm439_vm7, %v2425_v21  ;;  %v2564_v8 = vsel %vm414_vm3, %v2563_v48, %v2562_v0  ;;  %v2430_v9 = vrot.slane %v3407_v59, 5  ;;  %v2432_v10 = vrot.slane %v3408_v60, 4  ;;  %v2434_v12 = vrot.slane %v3409_v63, 3  ;;  %3683 = vmatprep.subr.mxu1 %v4550_v50  ;;  %v3425_v16 = vld [vmem:[%s4260_s27 + $0x3e] sm:$0x1]  ;;  %v3452_v40 = vld [vmem:[%s4741_s3 + $0x70] sm:$0xff] }
  0x95   : > { %v2566_v33 = vsel %vm417_vm4, %v2565_v49, %v2564_v8  ;;  %v2427_v13 = vsel %vm405_vm0, %v2426_v7, %v3404_v11  ;;  %v2436_v14 = vrot.slane %v3410_v1, 2  ;;  %v2438_v15 = vrot.slane %v3411_v2, 1  ;;  %v3426_v39 = vld [vmem:[%s4260_s27 + $0x40] sm:$0x1]  ;;  %v3427_v18 = vld [vmem:[%s4260_s27 + $0x42] sm:$0x1] }
  0x96   : > { %v2568_v5 = vsel %vm420_vm5, %v2567_v53, %v2566_v33  ;;  %v2429_v17 = vsel %vm408_vm1, %v2428_v27, %v2427_v13  ;;  %v3428_v19 = vld [vmem:[%s4260_s27 + $0x50] sm:$0x1]  ;;  %v3429_v20 = vld [vmem:[%s4260_s27 + $0x52] sm:$0x1]  ;;  %v3430_v23 = vld [vmem:[%s4260_s27 + $0x54] sm:$0x1] }
  0x97   : > { %v2570_v44 = vsel %vm423_vm6, %v2569_v54, %v2568_v5  ;;  %v2431_v22 = vsel %vm411_vm2, %v2430_v9, %v2429_v17  ;;  %v3431_v24 = vld [vmem:[%s4260_s27 + $0x56] sm:$0x1]  ;;  %v2571_v25 = vrot.slane %v3425_v16, 7  ;;  %v2573_v26 = vrot.slane %v3426_v39, 6  ;;  %v3436_v35 = vld [vmem:[%s4260_s27 + $0x15] sm:$0x1] }
  0x98   : > { %3673 = vmatprep.mubr.msk.f32.mxu1 %vm439_vm7, %v2570_v44  ;;  %v2433_v29 = vsel %vm414_vm3, %v2432_v10, %v2431_v22  ;;  %v2575_v30 = vrot.slane %v3427_v18, 5  ;;  %v2577_v31 = vrot.slane %v3428_v19, 4  ;;  %v2579_v32 = vrot.slane %v3429_v20, 3  ;;  %v3437_v62 = vld [vmem:[%s4260_s27 + $0x17] sm:$0x1]  ;;  %v3472_v57 = vld [vmem:[%s4741_s3 + $0x80] sm:$0xff] }
  0x99   : > { %v2435_v55 = vsel %vm417_vm4, %v2434_v12, %v2433_v29  ;;  %v2572_v36 = vsel %vm405_vm0, %v2571_v25, %v3424_v34  ;;  %v2581_v37 = vrot.slane %v3430_v23, 2  ;;  %v2583_v38 = vrot.slane %v3431_v24, 1  ;;  %v3438_v61 = vld [vmem:[%s4260_s27 + $0x19] sm:$0x1]  ;;  %v3439_v43 = vld [vmem:[%s4260_s27 + $0x1b] sm:$0x1] }
  0x9a   : > { %v2437_v41 = vsel %vm420_vm5, %v2436_v14, %v2435_v55  ;;  %v2574_v42 = vsel %vm408_vm1, %v2573_v26, %v2572_v36  ;;  %v3440_v45 = vld [vmem:[%s4260_s27 + $0x29] sm:$0x1]  ;;  %v3441_v6 = vld [vmem:[%s4260_s27 + $0x2b] sm:$0x1]  ;;  %v3442_v47 = vld [vmem:[%s4260_s27 + $0x2d] sm:$0x1] }
  0x9b   : > { %v2439_v3 = vsel %vm423_vm6, %v2438_v15, %v2437_v41  ;;  %v2576_v46 = vsel %vm411_vm2, %v2575_v30, %v2574_v42  ;;  %v3443_v48 = vld [vmem:[%s4260_s27 + $0x2f] sm:$0x1]  ;;  %v2701_v49 = vrot.slane %v3437_v62, 7  ;;  %v2703_v11 = vrot.slane %v3438_v61, 6  ;;  %v3456_v4 = vld [vmem:[%s4260_s27 + $0x16] sm:$0x1] }
  0x9c   : > { %3667 = vmatmul.mubr.msk.f32.vlgmr.msra.gmra.mxu0 %vm439_vm7, %v2439_v3  ;;  %v2578_v51 = vsel %vm414_vm3, %v2577_v31, %v2576_v46  ;;  %v2705_v52 = vrot.slane %v3439_v43, 5  ;;  %v2707_v53 = vrot.slane %v3440_v45, 4  ;;  %v2709_v54 = vrot.slane %v3441_v6, 3  ;;  %v3457_v63 = vld [vmem:[%s4260_s27 + $0x18] sm:$0x1] }
  0x9d   : > { %v2580_v56 = vsel %vm417_vm4, %v2579_v32, %v2578_v51  ;;  %3677 = vmatpush3.msra.mxu0 %v4524_v28  ;;  %v2702_v58 = vsel %vm405_vm0, %v2701_v49, %v3436_v35  ;;  %v2711_v59 = vrot.slane %v3442_v47, 2  ;;  %v2713_v60 = vrot.slane %v3443_v48, 1  ;;  %v3458_v21 = vld [vmem:[%s4260_s27 + $0x1a] sm:$0x1]  ;;  %v3459_v2 = vld [vmem:[%s4260_s27 + $0x1c] sm:$0x1] }
  0x9e   : > { %v2582_v0 = vsel %vm420_vm5, %v2581_v37, %v2580_v56  ;;  %3678 = vmatprep.subr.mxu0 %v3452_v40  ;;  %v2704_v1 = vsel %vm408_vm1, %v2703_v11, %v2702_v58  ;;  %v3460_v28 = vld [vmem:[%s4260_s27 + $0x2a] sm:$0x1]  ;;  %v3461_v7 = vld [vmem:[%s4260_s27 + $0x2c] sm:$0x1]  ;;  %v3462_v9 = vld [vmem:[%s4260_s27 + $0x2e] sm:$0x1] }
  0x9f   : > { %v2584_v27 = vsel %vm423_vm6, %v2583_v38, %v2582_v0  ;;  %3679 = vmatpush3.msra.mxu0 %v3452_v40  ;;  %v2706_v8 = vsel %vm411_vm2, %v2705_v52, %v2704_v1  ;;  %v3463_v10 = vld [vmem:[%s4260_s27 + $0x30] sm:$0x1]  ;;  %v2846_v12 = vrot.slane %v3457_v63, 7  ;;  %v2848_v34 = vrot.slane %v3458_v21, 6  ;;  %v3444_v16 = vld [vmem:[%s4260_s27 + $0x3d] sm:$0x1] }
  0xa0   : > { %3674 = vmatmul.mubr.msk.f32.vlgmr.msra.gmra.mxu1 %vm439_vm7, %v2584_v27  ;;  %v2708_v33 = vsel %vm414_vm3, %v2707_v53, %v2706_v8  ;;  %v2850_v13 = vrot.slane %v3459_v2, 5  ;;  %v2852_v14 = vrot.slane %v3460_v28, 4  ;;  %v2854_v15 = vrot.slane %v3461_v7, 3  ;;  %v3445_v19 = vld [vmem:[%s4260_s27 + $0x3f] sm:$0x1] }
  0xa1   : > { %3684 = vmatpush3.msra.mxu1 %v4550_v50  ;;  %v2710_v39 = vsel %vm417_vm4, %v2709_v54, %v2708_v33  ;;  %v2847_v5 = vsel %vm405_vm0, %v2846_v12, %v3456_v4  ;;  %v2856_v17 = vrot.slane %v3462_v9, 2  ;;  %v2858_v18 = vrot.slane %v3463_v10, 1  ;;  %v3446_v20 = vld [vmem:[%s4260_s27 + $0x41] sm:$0x1]  ;;  %v3447_v23 = vld [vmem:[%s4260_s27 + $0x43] sm:$0x1] }
  0xa2   : > { %3685 = vmatprep.subr.mxu1 %v3472_v57  ;;  %v2712_v44 = vsel %vm420_vm5, %v2711_v59, %v2710_v39  ;;  %v2849_v22 = vsel %vm408_vm1, %v2848_v34, %v2847_v5  ;;  %v3448_v24 = vld [vmem:[%s4260_s27 + $0x51] sm:$0x1]  ;;  %v3449_v25 = vld [vmem:[%s4260_s27 + $0x53] sm:$0x1]  ;;  %v3450_v29 = vld [vmem:[%s4260_s27 + $0x55] sm:$0x1] }
  0xa3   : > { %v2714_v50 = vsel %vm423_vm6, %v2713_v60, %v2712_v44  ;;  %3686 = vmatpush3.msra.mxu1 %v3472_v57  ;;  %v2851_v26 = vsel %vm411_vm2, %v2850_v13, %v2849_v22  ;;  %v3451_v30 = vld [vmem:[%s4260_s27 + $0x57] sm:$0x1]  ;;  %v2715_v31 = vrot.slane %v3445_v19, 7  ;;  %v2717_v32 = vrot.slane %v3446_v20, 6  ;;  %v3464_v38 = vld [vmem:[%s4260_s27 + $0x3e] sm:$0x1] }
  0xa4   : > { %3680 = vmatprep.mubr.msk.f32.mxu0 %vm439_vm7, %v2714_v50  ;;  %v2853_v35 = vsel %vm414_vm3, %v2852_v14, %v2851_v26  ;;  %v2719_v55 = vrot.slane %v3447_v23, 5  ;;  %v2721_v36 = vrot.slane %v3448_v24, 4  ;;  %v2723_v37 = vrot.slane %v3449_v25, 3  ;;  %v3465_v42 = vld [vmem:[%s4260_s27 + $0x40] sm:$0x1]  ;;  %v2976_v9 = vld [vmem:[%s4744_s6 + $0x8] sm:$0xff] }
  0xa5   : > { %v2855_v40 = vsel %vm417_vm4, %v2854_v15, %v2853_v35  ;;  %v2716_v62 = vsel %vm405_vm0, %v2715_v31, %v3444_v16  ;;  %v2725_v61 = vrot.slane %v3450_v29, 2  ;;  %v2727_v41 = vrot.slane %v3451_v30, 1  ;;  %v3466_v43 = vld [vmem:[%s4260_s27 + $0x42] sm:$0x1]  ;;  %v3467_v3 = vld [vmem:[%s4260_s27 + $0x44] sm:$0x1]  ;;  %3690 = vmatprep.subr.mxu0 %v2976_v9 }
  0xa6   : > { %v2857_v45 = vsel %vm420_vm5, %v2856_v17, %v2855_v40  ;;  %v2718_v6 = vsel %vm408_vm1, %v2717_v32, %v2716_v62  ;;  %v3468_v46 = vld [vmem:[%s4260_s27 + $0x52] sm:$0x1]  ;;  %v3469_v47 = vld [vmem:[%s4260_s27 + $0x54] sm:$0x1]  ;;  %v3470_v11 = vld [vmem:[%s4260_s27 + $0x56] sm:$0x1] }
  0xa7   : > { %v2859_v48 = vsel %vm423_vm6, %v2858_v18, %v2857_v45  ;;  %v2720_v49 = vsel %vm411_vm2, %v2719_v55, %v2718_v6  ;;  %v2860_v51 = vrot.slane %v3465_v42, 7  ;;  %v2862_v52 = vrot.slane %v3466_v43, 6  ;;  %v3471_v54 = vld [vmem:[%s4260_s27 + $0x58] sm:$0x1]  ;;  %v2975_v10 = vld [vmem:[%s4744_s6] sm:$0xff]  ;;  %s3745_s27 = scalar_lea.vmem %s3744_s29, 512 }
  0xa8   : > { %3687 = vmatprep.mubr.msk.f32.mxu1 %vm439_vm7, %v2859_v48  ;;  %v2722_v53 = vsel %vm414_vm3, %v2721_v36, %v2720_v49  ;;  %v2864_v4 = vrot.slane %v3467_v3, 5  ;;  %v2866_v56 = vrot.slane %v3468_v46, 4  ;;  %v2868_v59 = vrot.slane %v3469_v47, 3  ;;  %p3747_p1 = scmp.lt.s32.totalorder %s3745_s27, %s3739_s24 }
  0xa9   : > { %v2724_v57 = vsel %vm417_vm4, %v2723_v37, %v2722_v53  ;;  %v2861_v58 = vsel %vm405_vm0, %v2860_v51, %v3464_v38  ;;  %v2870_v21 = vrot.slane %v3470_v11, 2  ;;  %v2872_v2 = vrot.slane %v3471_v54, 1 }
  0xaa   : > { %v2726_v60 = vsel %vm420_vm5, %v2725_v61, %v2724_v57  ;;  %v2863_v63 = vsel %vm408_vm1, %v2862_v52, %v2861_v58  ;;  %p3748_p2 = por %p3747_p1, %p3746_p0 }
  0xab   : > { %v2728_v0 = vsel %vm423_vm6, %v2727_v41, %v2726_v60  ;;  %v2865_v1 = vsel %vm411_vm2, %v2864_v4, %v2863_v63 }
  0xac   : > { %3681 = vmatmul.mubr.msk.f32.vlgmr.msra.gmra.mxu0 %vm439_vm7, %v2728_v0  ;;  %v2867_v28 = vsel %vm414_vm3, %v2866_v56, %v2865_v1  ;;  %p3749_p3 = pnand %p3748_p2, %p3742_p13 }
  0xad   : > { %v2869_v7 = vsel %vm417_vm4, %v2868_v59, %v2867_v28  ;;  %3691 = vmatpush3.msra.mxu0 %v2976_v9 }
  0xae   : > { %v2871_v27 = vsel %vm420_vm5, %v2870_v21, %v2869_v7  ;;  %3692 = vmatprep.subr.mxu0 %v2975_v10 }
  0xaf   : > { %v2873_v8 = vsel %vm423_vm6, %v2872_v2, %v2871_v27  ;;  %3693 = vmatpush3.msra.mxu0 %v2975_v10 }
  0xb0   : > { %3688 = vmatmul.mubr.msk.f32.vlgmr.msra.gmra.mxu1 %vm439_vm7, %v2873_v8 }
  0xeb   : > { %v3570_v12 = vpop.f32.mrf.mxu0 }
  0xed   : > { %v510_v34 = vpop.f32.mrf.mxu0 }
  0xef   : > { %v3577_v33 = vpop.f32.mrf.mxu1 }
  0xf0   : > { %v639_v15 = vadd.f32 %v3577_v33, %v3570_v12 }
  0xf1   : > { %v633_v14 = vpop.f32.mrf.mxu1 }
  0xf2   : > { %v634_v39 = vadd.f32 %v633_v14, %v510_v34 }
  0xfb   : > { %v3584_v13 = vpop.f32.mrf.mxu0 }
  0xfc   : > { %v786_v5 = vadd.f32 %v3584_v13, %v639_v15  ;;  %v3476_v13 = vld [vmem:[%s4742_s4] ss:$0 sm:$0xff] }
  0xfd   : > { %v776_v16 = vpop.f32.mrf.mxu0 }
  0xfe   : > { %v785_v18 = vadd.f32 %v776_v16, %v634_v39  ;;  %v3477_v39 = vld [vmem:[%s4743_s5] ss:$0 sm:$0xff] }
  0xff   : > { %v3591_v17 = vpop.f32.mrf.mxu1 }
 0x100   : > { %v931_v20 = vadd.f32 %v3591_v17, %v786_v5 }
 0x101   : > { %v921_v44 = vpop.f32.mrf.mxu1 }
 0x102   : > { %v930_v22 = vadd.f32 %v921_v44, %v785_v18 }
 0x10b   : > { %v3598_v19 = vpop.f32.mrf.mxu0 }
 0x10c   : > { %v1075_v24 = vadd.f32 %v3598_v19, %v931_v20 }
 0x10d   : > { %v1065_v23 = vpop.f32.mrf.mxu0 }
 0x10e   : > { %v1074_v50 = vadd.f32 %v1065_v23, %v930_v22  ;;  %v3480_v22 = vld [vmem:[%s4745_s7] ss:$0 sm:$0xff] }
 0x10f   : > { %v3605_v25 = vpop.f32.mrf.mxu1 }
 0x110   : > { %v1220_v29 = vadd.f32 %v3605_v25, %v1075_v24  ;;  %v3481_v24 = vld [vmem:[%s4746_s8] ss:$0 sm:$0xff] }
 0x111   : > { %v1210_v30 = vpop.f32.mrf.mxu1 }
 0x112   : > { %v1219_v31 = vadd.f32 %v1210_v30, %v1074_v50 }
 0x11b   : > { %v3612_v26 = vpop.f32.mrf.mxu0 }
 0x11c   : > { %v1365_v35 = vadd.f32 %v3612_v26, %v1220_v29 }
 0x11d   : > { %v1355_v32 = vpop.f32.mrf.mxu0 }
 0x11e   : > { %v1364_v36 = vadd.f32 %v1355_v32, %v1219_v31 }
 0x11f   : > { %v3619_v55 = vpop.f32.mrf.mxu1 }
 0x120   : > { %v1509_v38 = vadd.f32 %v3619_v55, %v1365_v35 }
 0x121   : > { %v1499_v40 = vpop.f32.mrf.mxu1 }
 0x122   : > { %v1508_v62 = vadd.f32 %v1499_v40, %v1364_v36 }
 0x12c   : > { %v3626_v37 = vpop.f32.mrf.mxu0 }
 0x12d   : > { %v1654_v41 = vadd.f32 %v3626_v37, %v1509_v38 }
 0x12e   : > { %v1644_v61 = vpop.f32.mrf.mxu0 }
 0x12f   : > { %v1653_v43 = vadd.f32 %v1644_v61, %v1508_v62 }
 0x130   : > { %v3633_v42 = vpop.f32.mrf.mxu1 }
 0x131   : > { %v1797_v6 = vadd.f32 %v3633_v42, %v1654_v41 }
 0x132   : > { %v1787_v3 = vpop.f32.mrf.mxu1 }
 0x133   : > { %v1796_v46 = vadd.f32 %v1787_v3, %v1653_v43 }
 0x13c   : > { %v3640_v45 = vpop.f32.mrf.mxu0 }
 0x13d   : > { %v1941_v48 = vadd.f32 %v3640_v45, %v1797_v6 }
 0x13e   : > { %v1931_v47 = vpop.f32.mrf.mxu0 }
 0x13f   : > { %v1940_v11 = vadd.f32 %v1931_v47, %v1796_v46 }
 0x140   : > { %v3647_v49 = vpop.f32.mrf.mxu1 }
 0x141   : > { %v2086_v52 = vadd.f32 %v3647_v49, %v1941_v48 }
 0x142   : > { %v2076_v53 = vpop.f32.mrf.mxu1 }
 0x143   : > { %v2085_v54 = vadd.f32 %v2076_v53, %v1940_v11 }
 0x14c   : > { %v3654_v51 = vpop.f32.mrf.mxu0 }
 0x14d   : > { %v2231_v56 = vadd.f32 %v3654_v51, %v2086_v52 }
 0x14e   : > { %v2221_v4 = vpop.f32.mrf.mxu0 }
 0x14f   : > { %v2230_v58 = vadd.f32 %v2221_v4, %v2085_v54 }
 0x150   : > { %v3661_v57 = vpop.f32.mrf.mxu1 }
 0x151   : > { %v2375_v60 = vadd.f32 %v3661_v57, %v2231_v56 }
 0x152   : > { %v2365_v63 = vpop.f32.mrf.mxu1 }
 0x153   : > { %v2374_v21 = vadd.f32 %v2365_v63, %v2230_v58 }
 0x15c   : > { %v3668_v59 = vpop.f32.mrf.mxu0 }
 0x15d   : > { %v2520_v1 = vadd.f32 %v3668_v59, %v2375_v60 }
 0x15e   : > { %v2510_v0 = vpop.f32.mrf.mxu0 }
 0x15f   : > { %v2519_v28 = vadd.f32 %v2510_v0, %v2374_v21 }
 0x160   : > { %v3675_v2 = vpop.f32.mrf.mxu1 }
 0x161   : > { %v2665_v7 = vadd.f32 %v3675_v2, %v2520_v1 }
 0x162   : > { %v2655_v27 = vpop.f32.mrf.mxu1 }
 0x163   : > { %v2664_v8 = vadd.f32 %v2655_v27, %v2519_v28 }
 0x16c   : > { %v3682_v9 = vpop.f32.mrf.mxu0 }
 0x16d   : > { %v2809_v10 = vadd.f32 %v3682_v9, %v2665_v7 }
 0x16e   : > { %v2799_v12 = vpop.f32.mrf.mxu0 }
 0x16f   : > { %v2808_v34 = vadd.f32 %v2799_v12, %v2664_v8 }
 0x170   : > { %v3689_v33 = vpop.f32.mrf.mxu1 }
 0x171   : > { %v2954_v14 = vadd.f32 %v3689_v33, %v2809_v10 }
 0x172   : > { %v2944_v15 = vpop.f32.mrf.mxu1 }
 0x173   : > { %v2963_v16 = vmul.f32 %v3476_v13, %v2954_v14  ;;  %v2953_v5 = vadd.f32 %v2944_v15, %v2808_v34 }
 0x175   : > { %v2962_v17 = vmul.f32 %v3476_v13, %v2953_v5  ;;  %v2972_v18 = vadd.f32 %v3477_v39, %v2963_v16 }
 0x177   : > { %v2971_v19 = vadd.f32 %v3477_v39, %v2962_v17  ;;  %v2974_v44 = vmax.f32 %v2972_v18, 0.0 }
 0x179   : > { %v2973_v20 = vmax.f32 %v2971_v19, 0.0 }
 0x17b   : > { %3694 = vmatprep.mubr.msk.f32.mxu0 %vm439_vm7, %v2973_v20 }
 0x17c   : > { %3695 = vmatmul.mubr.msk.f32.vlgmr.msra.gmra.mxu0 %vm439_vm7, %v2974_v44 }
 0x23c   : > { %v3696_v23 = vpop.f32.mrf.mxu0 }
 0x23d   : > { %v3066_v25 = vmul.f32 %v3696_v23, %v3480_v22 }
 0x23e   : > { %v3049_v50 = vpop.f32.mrf.mxu0 }
 0x23f   : > { %v3075_v26 = vadd.f32 %v3481_v24, %v3066_v25  ;;  %v3065_v29 = vmul.f32 %v3480_v22, %v3049_v50 }
 0x241   : > { %v3077_v30 = vmax.f32 %v3075_v26, 0.0  ;;  %v3074_v31 = vadd.f32 %v3481_v24, %v3065_v29 }
 0x243   : > { %v3081_v32 = vcombine.high %v3077_v30, %v3077_v30  ;;  %3087 = vst.msk [vmem:[%s340_s14 + $0x8] sm:$0xf] %vm3084_vm8, %v3077_v30  ;;  %v3076_v35 = vmax.f32 %v3074_v31, 0.0 }
 0x245   : > { %3088 = vst.msk [vmem:[%s340_s14 + $0xc] sm:$0xf] %vm3084_vm8, %v3081_v32  ;;  %v3080_v55 = vcombine.high %v3076_v35, %v3076_v35  ;;  %3085 = vst.msk [vmem:[%s340_s14] sm:$0xf] %vm3084_vm8, %v3076_v35 }
 0x247   : > { %3086 = vst.msk [vmem:[%s340_s14 + $0x4] sm:$0xf] %vm3084_vm8, %v3080_v55 }
 0x248   : > { %3752 = shalt.err (!%p3749_p3)
}
 0x249   : > { %s3753_s23 = scalar_lea.hbm %s4694_s21, 256  ;;  %s3757_s14 = scalar_lea.hbm %s4747_s9, 512 }
 0x24a   : > { %p3754_p4 = scmp.ne.s32.totalorder %s4694_s21, %s3753_s23  ;;  %p3758_p9 = scmp.lt.s32.totalorder %s4694_s21, %s4747_s9 }
 0x24b   : > { %p3759_p10 = scmp.lt.s32.totalorder %s3757_s14, %s3753_s23 }
 0x24c   : > { %p3755_p7 = pnand %p3754_p4, %p3892_p5 }
 0x24d   : > { %p3760_p11 = por %p3759_p10, %p3758_p9 }
 0x24e   : > { %p3756_p8 = pneg %p3755_p7 }
 0x250   : > { %p3761_p12 = pnand %p3760_p11, %p3756_p8 }
 0x252   : > { %3764 = shalt.err (!%p3761_p12)
}
 0x253   : > { %s3802_s24 = smov 64   ;;  %s3803_s26 = smov 4  }
 0x254   : > { %3698 = dma.vmem_to_hbm [thread:$0]  (%p3892_p5), %s4696_s16, 256, %s4694_s21, %s4698_s13, %s3802_s24, %s3802_s24, %s3803_s26  }
 0x255 PF: > { %p3704_p13 = scmp.ge.s32.totalorder %s3799_s12, 2  ;;  %s3118_s29 = sand.u32 1, %s3787_s30  }
 0x256   : > { %s3119_s27 = scalar_lea.sflag [#allocation3], %s3118_s29 }
 0x257   : > { %p3701_p0 = pnand %p3704_p13, %p3896_p6 }
 0x259   : > { %p3702_p1 = pneg %p3701_p0 }
 0x25b   : > { %3782 = dma.done.wait (%p3702_p1), %s3119_s27, 256  }
 0x25c   : > { %3784 = vsyncadd (%p3702_p1), %s3119_s27, 4294967040  ;;  %p19_p2 = scmp.ge.s32.totalorder %s3879_s15, 4   ;;  %s4750_s30 = smov %s3791_s10 }
 0x25d   : > { %s4751_s10 = smov %s3795_s11  ;;  %s4752_s11 = smov %s3890_s18 }
 0x25e   : > { %s4753_s12 = smov %s3879_s15  ;;  %21 = sbr.rel (!%p19_p2) target bundleno = 3 (0x3), region = 120 }
 0x263   :  { %3124 = vsyncpa [#allocation3], 1 }
 0x264   :  { %3126 = vsyncpa [#allocation3 + $0x1], 1 }

</bundles_post_ra>
